<compile_context>
chip_gen: v6e
topology: v6e:2x2x1
jax: 0.10.0
libtpu: 0.0.40
codegen_flags: <defaults>
</compile_context>

<pallas_src>
import jax
import jax.numpy as jnp
import numpy as np
from jax.experimental import pallas as pl
from jax.experimental.pallas import tpu as pltpu

AUDIO_DIM = 128
IMAGE_DIM = 512   # forced by video_input.view(-1, 512)
OUT_DIM = 512     # forced by transformed_video.view(B, F, 512)
FRAMES = 75       # forced by nn.Linear(image_dim * 75, 75)
BATCH = 2
FRAMES_PER_CHUNK = 25   # 75 frames -> 3 K-chunks of 25*512 = 12800 (mult. of 128)


def fusion_kernel(audio_ref, video_ref, vflat_ref,
                  wfa_ref, bfa_ref,
                  wft_ref, bft_ref,
                  wat_ref, bat_ref,
                  wit_ref, bit_ref,
                  wca_a_ref, wca_v_ref, bca_ref,
                  out_ref, logit_acc):
    k = pl.program_id(0)

    @pl.when(k == 0)
    def _init():
        logit_acc[...] = jnp.zeros_like(logit_acc)

    # Streamed partial contraction of the frame-attention logits:
    #   logits += video_flat[:, k*TK:(k+1)*TK] @ w_fa[k*TK:(k+1)*TK, :]
    # bf16 x bf16 operands, f32 accumulation in VMEM scratch.
    logit_acc[...] += jnp.dot(vflat_ref[...], wfa_ref[...],
                              preferred_element_type=jnp.float32)

    @pl.when(k == pl.num_programs(0) - 1)
    def _epilogue():
        B = audio_ref.shape[0]
        F = video_ref.shape[1]
        eps = 1e-12

        # ---- frame attention softmax over F ----
        logits = logit_acc[...] + bfa_ref[...]                            # (B, F)
        logits = logits - jnp.max(logits, axis=1, keepdims=True)
        e = jnp.exp(logits)
        attn = e / jnp.sum(e, axis=1, keepdims=True)                      # (B, F)

        # ---- attention-weighted frame mean, folded through frame_transform ----
        #   mean_f attn[b,f]*(video[b,f]@Wft + b_ft)
        #     == ((attn[b] @ video[b]) @ Wft + b_ft) / F    (softmax sums to 1)
        # Two tiny (1,75)@(75,512) dots (B=2, unrolled) keep everything on the
        # MXU and avoid any batched-dot / relayout corner cases.
        wv = jnp.concatenate(
            [jnp.dot(attn[b:b + 1, :], video_ref[b],
                     preferred_element_type=jnp.float32) for b in range(B)],
            axis=0)                                                       # (B, D)
        video_emb = (jnp.dot(wv, wft_ref[...],
                             preferred_element_type=jnp.float32)
                     + bft_ref[...]) * (1.0 / F)                          # (B, O)

        # ---- L2 normalize (torch F.normalize: x / max(||x||_2, 1e-12)) ----
        audio = audio_ref[...]
        a_norm = audio / jnp.maximum(
            jnp.sqrt(jnp.sum(audio * audio, axis=1, keepdims=True)), eps)
        v_norm = video_emb / jnp.maximum(
            jnp.sqrt(jnp.sum(video_emb * video_emb, axis=1, keepdims=True)), eps)

        # ---- cross-modality attention on concat(audio, video) ----
        # concat folded into split weights: cat(a,v) @ Wca.T == a@Wca_a + v@Wca_v
        ca = (jnp.dot(a_norm, wca_a_ref[...], preferred_element_type=jnp.float32)
              + jnp.dot(v_norm, wca_v_ref[...], preferred_element_type=jnp.float32)
              + bca_ref[...])                                             # (B, 2)
        ca = ca - jnp.max(ca, axis=1, keepdims=True)
        ca_e = jnp.exp(ca)
        ca = ca_e / jnp.sum(ca_e, axis=1, keepdims=True)

        # ---- modality transforms + attention-weighted fusion ----
        a_emb = jnp.dot(a_norm, wat_ref[...],
                        preferred_element_type=jnp.float32) + bat_ref[...]
        f_emb = jnp.dot(v_norm, wit_ref[...],
                        preferred_element_type=jnp.float32) + bit_ref[...]
        out_ref[...] = a_emb * ca[:, 0:1] + f_emb * ca[:, 1:2]


def bignet_fusion(audio, video, params, *, frames_per_chunk=FRAMES_PER_CHUNK):
    B, A = audio.shape
    _, F, D = video.shape
    O = params["w_ft"].shape[0]
    K = F * D
    TK = frames_per_chunk * D
    assert K % TK == 0, "frames_per_chunk must divide the frame count"
    KC = K // TK

    # ---- host-side glue: reshapes / transposes / bf16 cast of the big weight ----
    video_flat = video.reshape(B, K).astype(jnp.bfloat16)    # streamed (B, F*D)
    wfa_t = params["w_fa"].T.astype(jnp.bfloat16)            # streamed (F*D, F)
    wft_t = params["w_ft"].T                                 # (D, O)
    wat_t = params["w_at"].T                                 # (A, O)
    wit_t = params["w_it"].T                                 # (D, O)
    wca_a = params["w_ca"][:, :A].T                          # (A, 2)  audio cols
    wca_v = params["w_ca"][:, A:].T                          # (D, 2)  video cols
    bfa = params["b_fa"].reshape(1, F)
    bft = params["b_ft"].reshape(1, O)
    bat = params["b_at"].reshape(1, O)
    bit = params["b_it"].reshape(1, O)
    bca = params["b_ca"].reshape(1, 2)

    in_specs = [
        pl.BlockSpec((B, A), lambda k: (0, 0)),          # audio       (resident)
        pl.BlockSpec((B, F, D), lambda k: (0, 0, 0)),    # video f32   (resident)
        pl.BlockSpec((B, TK), lambda k: (0, k)),         # video_flat  (streamed)
        pl.BlockSpec((TK, F), lambda k: (k, 0)),         # w_fa bf16   (streamed)
        pl.BlockSpec((1, F), lambda k: (0, 0)),          # b_fa
        pl.BlockSpec((D, O), lambda k: (0, 0)),          # w_ft
        pl.BlockSpec((1, O), lambda k: (0, 0)),          # b_ft
        pl.BlockSpec((A, O), lambda k: (0, 0)),          # w_at
        pl.BlockSpec((1, O), lambda k: (0, 0)),          # b_at
        pl.BlockSpec((D, O), lambda k: (0, 0)),          # w_it
        pl.BlockSpec((1, O), lambda k: (0, 0)),          # b_it
        pl.BlockSpec((A, 2), lambda k: (0, 0)),          # w_ca (audio cols)
        pl.BlockSpec((D, 2), lambda k: (0, 0)),          # w_ca (video cols)
        pl.BlockSpec((1, 2), lambda k: (0, 0)),          # b_ca
    ]

    return pl.pallas_call(
        fusion_kernel,
        out_shape=jax.ShapeDtypeStruct((B, O), jnp.float32),
        grid=(KC,),
        in_specs=in_specs,
        out_specs=pl.BlockSpec((B, O), lambda k: (0, 0)),
        scratch_shapes=[pltpu.VMEM((B, F), jnp.float32)],   # logits accumulator
        compiler_params=pltpu.CompilerParams(
            # single K-reduction axis over the w_fa contraction
            dimension_semantics=("arbitrary",),
            # safe on every generation (v7x has 64 MiB physical VMEM per TC);
            # actual footprint ~10 MB with double buffering.
            vmem_limit_bytes=32 * 1024 * 1024),
    )(audio, video, video_flat, wfa_t, bfa, wft_t, bft, wat_t, bat,
      wit_t, bit, wca_a, wca_v, bca)


def bignet_fusion_ref(audio, video, params):
    """Pure-JAX f32 reference mirroring the PyTorch forward exactly."""
    B, F, D = video.shape
    eps = 1e-12
    logits = video.reshape(B, -1) @ params["w_fa"].T + params["b_fa"]
    attn = jax.nn.softmax(logits, axis=1)[..., None]                  # (B, F, 1)
    tv = video.reshape(-1, D) @ params["w_ft"].T + params["b_ft"]
    tv = tv.reshape(B, F, -1)
    video_emb = jnp.mean(tv * attn, axis=1)                           # (B, O)
    a_norm = audio / jnp.maximum(
        jnp.linalg.norm(audio, axis=1, keepdims=True), eps)
    v_norm = video_emb / jnp.maximum(
        jnp.linalg.norm(video_emb, axis=1, keepdims=True), eps)
    ca = jax.nn.softmax(
        jnp.concatenate([a_norm, v_norm], axis=1) @ params["w_ca"].T
        + params["b_ca"], axis=1)
    a_emb = a_norm @ params["w_at"].T + params["b_at"]
    f_emb = v_norm @ params["w_it"].T + params["b_it"]
    return a_emb * ca[:, 0:1] + f_emb * ca[:, 1:2]


def init_params(key, audio_dim, image_dim, out_dim, frames):
    # Deterministic init mimicking nn.Linear default U(-1/sqrt(in), 1/sqrt(in)).
    keys = jax.random.split(key, 10)

    def linear(kw, kb, out_f, in_f):
        bound = 1.0 / float(in_f) ** 0.5
        w = jax.random.uniform(kw, (out_f, in_f), jnp.float32, -bound, bound)
        b = jax.random.uniform(kb, (out_f,), jnp.float32, -bound, bound)
        return w, b

    w_fa, b_fa = linear(keys[0], keys[1], frames, image_dim * frames)
    w_ft, b_ft = linear(keys[2], keys[3], out_dim, image_dim)
    w_at, b_at = linear(keys[4], keys[5], out_dim, audio_dim)
    w_it, b_it = linear(keys[6], keys[7], out_dim, image_dim)
    w_ca, b_ca = linear(keys[8], keys[9], 2, image_dim + audio_dim)
    return dict(w_fa=w_fa, b_fa=b_fa, w_ft=w_ft, b_ft=b_ft,
                w_at=w_at, b_at=b_at, w_it=w_it, b_it=b_it,
                w_ca=w_ca, b_ca=b_ca)


if __name__ == "__main__":
    key = jax.random.PRNGKey(0)
    kp, ka, kv = jax.random.split(key, 3)

    params = init_params(kp, AUDIO_DIM, IMAGE_DIM, OUT_DIM, FRAMES)
    audio = jax.random.normal(ka, (BATCH, AUDIO_DIM), jnp.float32)
    video = jax.random.normal(kv, (BATCH, FRAMES, IMAGE_DIM), jnp.float32)

    emb = bignet_fusion(audio, video, params)
    jax.block_until_ready(emb)
    assert emb.shape == (BATCH, OUT_DIM) and emb.dtype == jnp.float32

    # Lenient tolerance: the frame-attention contraction is streamed in bf16.
    ref = bignet_fusion_ref(audio, video, params)
    np.testing.assert_allclose(np.asarray(emb), np.asarray(ref),
                               rtol=5e-2, atol=1e-2)
    print("KERNEL_OK")
</pallas_src>

<mosaic_0001>
module attributes {stable_mosaic.version = 11 : i64} {
  func.func @fusion_kernel(%arg0: i32, %arg1: memref<2x128xf32, #tpu.memory_space<vmem>>, %arg2: memref<2x75x512xf32, #tpu.memory_space<vmem>>, %arg3: memref<2x12800xbf16, #tpu.memory_space<vmem>>, %arg4: memref<12800x75xbf16, #tpu.memory_space<vmem>>, %arg5: memref<1x75xf32, #tpu.memory_space<vmem>>, %arg6: memref<512x512xf32, #tpu.memory_space<vmem>>, %arg7: memref<1x512xf32, #tpu.memory_space<vmem>>, %arg8: memref<128x512xf32, #tpu.memory_space<vmem>>, %arg9: memref<1x512xf32, #tpu.memory_space<vmem>>, %arg10: memref<512x512xf32, #tpu.memory_space<vmem>>, %arg11: memref<1x512xf32, #tpu.memory_space<vmem>>, %arg12: memref<128x2xf32, #tpu.memory_space<vmem>>, %arg13: memref<512x2xf32, #tpu.memory_space<vmem>>, %arg14: memref<1x2xf32, #tpu.memory_space<vmem>>, %arg15: memref<2x512xf32, #tpu.memory_space<vmem>>, %arg16: memref<2x75xf32, #tpu.memory_space<vmem>>) attributes {dimension_semantics = [#tpu.dimension_semantics<arbitrary>], iteration_bounds = array<i64: 3>, scalar_prefetch = 0 : i64, scratch_operands = 1 : i64, tpu.core_type = #tpu.core_type<tc>, window_params = [{pipeline_mode = #tpu.pipeline_mode<synchronous>, transform_indices = @transform_0, window_bounds = array<i64: 2, 128>}, {pipeline_mode = #tpu.pipeline_mode<synchronous>, transform_indices = @transform_1, window_bounds = array<i64: 2, 75, 512>}, {transform_indices = @transform_2, window_bounds = array<i64: 2, 12800>}, {transform_indices = @transform_3, window_bounds = array<i64: 12800, 75>}, {pipeline_mode = #tpu.pipeline_mode<synchronous>, transform_indices = @transform_4, window_bounds = array<i64: 1, 75>}, {pipeline_mode = #tpu.pipeline_mode<synchronous>, transform_indices = @transform_5, window_bounds = array<i64: 512, 512>}, {pipeline_mode = #tpu.pipeline_mode<synchronous>, transform_indices = @transform_6, window_bounds = array<i64: 1, 512>}, {pipeline_mode = #tpu.pipeline_mode<synchronous>, transform_indices = @transform_7, window_bounds = array<i64: 128, 512>}, {pipeline_mode = #tpu.pipeline_mode<synchronous>, transform_indices = @transform_8, window_bounds = array<i64: 1, 512>}, {pipeline_mode = #tpu.pipeline_mode<synchronous>, transform_indices = @transform_9, window_bounds = array<i64: 512, 512>}, {pipeline_mode = #tpu.pipeline_mode<synchronous>, transform_indices = @transform_10, window_bounds = array<i64: 1, 512>}, {pipeline_mode = #tpu.pipeline_mode<synchronous>, transform_indices = @transform_11, window_bounds = array<i64: 128, 2>}, {pipeline_mode = #tpu.pipeline_mode<synchronous>, transform_indices = @transform_12, window_bounds = array<i64: 512, 2>}, {pipeline_mode = #tpu.pipeline_mode<synchronous>, transform_indices = @transform_13, window_bounds = array<i64: 1, 2>}, {pipeline_mode = #tpu.pipeline_mode<synchronous>, transform_indices = @transform_14, window_bounds = array<i64: 2, 512>}]} {
    %c0_i32 = arith.constant 0 : i32
    %0 = arith.cmpi eq, %arg0, %c0_i32 : i32
    %1 = arith.extui %0 : i1 to i32
    %c0_i32_0 = arith.constant 0 : i32
    %2 = arith.cmpi ne, %1, %c0_i32_0 : i32
    scf.if %2 {
      %cst_9 = arith.constant 0.000000e+00 : f32
      %12 = vector.broadcast %cst_9 : f32 to vector<2x75xf32>
      %c0_10 = arith.constant 0 : index
      %c0_11 = arith.constant 0 : index
      %13 = vector.load %arg16[%c0_10, %c0_11] : memref<2x75xf32, #tpu.memory_space<vmem>>, vector<2x75xf32>
      tpu.vector_store %arg16[%c0_10, %c0_11], %12 {strides = array<i32>} : memref<2x75xf32, #tpu.memory_space<vmem>>, vector<2x75xf32>,
    } else {
    }
    %c0 = arith.constant 0 : index
    %c0_1 = arith.constant 0 : index
    %3 = vector.load %arg16[%c0, %c0_1] : memref<2x75xf32, #tpu.memory_space<vmem>>, vector<2x75xf32>
    %c0_2 = arith.constant 0 : index
    %c0_3 = arith.constant 0 : index
    %4 = vector.load %arg3[%c0_2, %c0_3] : memref<2x12800xbf16, #tpu.memory_space<vmem>>, vector<2x12800xbf16>
    %c0_4 = arith.constant 0 : index
    %c0_5 = arith.constant 0 : index
    %5 = vector.load %arg4[%c0_4, %c0_5] : memref<12800x75xbf16, #tpu.memory_space<vmem>>, vector<12800x75xbf16>
    %cst = arith.constant dense<0.000000e+00> : vector<2x75xf32>
    %6 = tpu.matmul %4, %5, %cst {dimension_numbers = #tpu.dot_dimension_numbers<[1], [0], [0], [1], [0, 0, 1, 1], [], []>} : vector<2x12800xbf16>, vector<12800x75xbf16>, vector<2x75xf32> -> vector<2x75xf32>
    %7 = arith.addf %3, %6 : vector<2x75xf32>
    %c0_6 = arith.constant 0 : index
    %c0_7 = arith.constant 0 : index
    %8 = vector.load %arg16[%c0_6, %c0_7] : memref<2x75xf32, #tpu.memory_space<vmem>>, vector<2x75xf32>
    tpu.vector_store %arg16[%c0_6, %c0_7], %7 {strides = array<i32>} : memref<2x75xf32, #tpu.memory_space<vmem>>, vector<2x75xf32>,
    %c2_i32 = arith.constant 2 : i32
    %9 = arith.cmpi eq, %arg0, %c2_i32 : i32
    %10 = arith.extui %9 : i1 to i32
    %c0_i32_8 = arith.constant 0 : i32
    %11 = arith.cmpi ne, %10, %c0_i32_8 : i32
    scf.if %11 {
      %c0_9 = arith.constant 0 : index
      %c0_10 = arith.constant 0 : index
      %12 = vector.load %arg16[%c0_9, %c0_10] : memref<2x75xf32, #tpu.memory_space<vmem>>, vector<2x75xf32>
      %c0_11 = arith.constant 0 : index
      %c0_12 = arith.constant 0 : index
      %13 = vector.load %arg5[%c0_11, %c0_12] : memref<1x75xf32, #tpu.memory_space<vmem>>, vector<1x75xf32>
      %14 = vector.broadcast %13 : vector<1x75xf32> to vector<2x75xf32>
      %15 = arith.addf %12, %14 : vector<2x75xf32>
      %cst_13 = arith.constant dense<0xFF800000> : vector<2xf32>
      %16 = vector.multi_reduction <maximumf>, %15, %cst_13 [1] : vector<2x75xf32> to vector<2xf32>
      %17 = vector.shape_cast %16 : vector<2xf32> to vector<2x1xf32>
      %18 = vector.broadcast %17 : vector<2x1xf32> to vector<2x75xf32>
      %19 = arith.subf %15, %18 : vector<2x75xf32>
      %20 = math.exp %19 : vector<2x75xf32>
      %cst_14 = arith.constant dense<0.000000e+00> : vector<2xf32>
      %21 = vector.multi_reduction <add>, %20, %cst_14 [1] : vector<2x75xf32> to vector<2xf32>
      %22 = vector.shape_cast %21 : vector<2xf32> to vector<2x1xf32>
      %23 = vector.broadcast %22 : vector<2x1xf32> to vector<2x75xf32>
      %24 = arith.divf %20, %23 : vector<2x75xf32>
      %25 = vector.extract_strided_slice %24 {offsets = [0, 0], sizes = [1, 75], strides = [1, 1]} : vector<2x75xf32> to vector<1x75xf32>
      %c0_15 = arith.constant 0 : index
      %c0_16 = arith.constant 0 : index
      %c0_17 = arith.constant 0 : index
      %26 = vector.load %arg2[%c0_15, %c0_16, %c0_17] : memref<2x75x512xf32, #tpu.memory_space<vmem>>, vector<1x75x512xf32>
      %27 = vector.shape_cast %26 : vector<1x75x512xf32> to vector<75x512xf32>
      %cst_18 = arith.constant dense<0.000000e+00> : vector<1x512xf32>
      %28 = tpu.matmul %25, %27, %cst_18 {dimension_numbers = #tpu.dot_dimension_numbers<[1], [0], [0], [1], [0, 0, 1, 1], [], []>} : vector<1x75xf32>, vector<75x512xf32>, vector<1x512xf32> -> vector<1x512xf32>
      %29 = vector.extract_strided_slice %24 {offsets = [1, 0], sizes = [1, 75], strides = [1, 1]} : vector<2x75xf32> to vector<1x75xf32>
      %c1 = arith.constant 1 : index
      %c0_19 = arith.constant 0 : index
      %c0_20 = arith.constant 0 : index
      %30 = vector.load %arg2[%c1, %c0_19, %c0_20] : memref<2x75x512xf32, #tpu.memory_space<vmem>>, vector<1x75x512xf32>
      %31 = vector.shape_cast %30 : vector<1x75x512xf32> to vector<75x512xf32>
      %cst_21 = arith.constant dense<0.000000e+00> : vector<1x512xf32>
      %32 = tpu.matmul %29, %31, %cst_21 {dimension_numbers = #tpu.dot_dimension_numbers<[1], [0], [0], [1], [0, 0, 1, 1], [], []>} : vector<1x75xf32>, vector<75x512xf32>, vector<1x512xf32> -> vector<1x512xf32>
      %33 = tpu.concatenate %28, %32 in 0 : vector<1x512xf32>, vector<1x512xf32> -> vector<2x512xf32>
      %c0_22 = arith.constant 0 : index
      %c0_23 = arith.constant 0 : index
      %34 = vector.load %arg6[%c0_22, %c0_23] : memref<512x512xf32, #tpu.memory_space<vmem>>, vector<512x512xf32>
      %cst_24 = arith.constant dense<0.000000e+00> : vector<2x512xf32>
      %35 = tpu.matmul %33, %34, %cst_24 {dimension_numbers = #tpu.dot_dimension_numbers<[1], [0], [0], [1], [0, 0, 1, 1], [], []>} : vector<2x512xf32>, vector<512x512xf32>, vector<2x512xf32> -> vector<2x512xf32>
      %c0_25 = arith.constant 0 : index
      %c0_26 = arith.constant 0 : index
      %36 = vector.load %arg7[%c0_25, %c0_26] : memref<1x512xf32, #tpu.memory_space<vmem>>, vector<1x512xf32>
      %37 = vector.broadcast %36 : vector<1x512xf32> to vector<2x512xf32>
      %38 = arith.addf %35, %37 : vector<2x512xf32>
      %cst_27 = arith.constant 0.0133333337 : f32
      %39 = vector.broadcast %cst_27 : f32 to vector<2x512xf32>
      %40 = arith.mulf %38, %39 : vector<2x512xf32>
      %c0_28 = arith.constant 0 : index
      %c0_29 = arith.constant 0 : index
      %41 = vector.load %arg1[%c0_28, %c0_29] : memref<2x128xf32, #tpu.memory_space<vmem>>, vector<2x128xf32>
      %42 = arith.mulf %41, %41 : vector<2x128xf32>
      %cst_30 = arith.constant dense<0.000000e+00> : vector<2xf32>
      %43 = vector.multi_reduction <add>, %42, %cst_30 [1] : vector<2x128xf32> to vector<2xf32>
      %44 = vector.shape_cast %43 : vector<2xf32> to vector<2x1xf32>
      %45 = math.sqrt %44 : vector<2x1xf32>
      %cst_31 = arith.constant 9.99999996E-13 : f32
      %46 = vector.broadcast %cst_31 : f32 to vector<2x1xf32>
      %47 = arith.maximumf %45, %46 : vector<2x1xf32>
      %48 = vector.broadcast %47 : vector<2x1xf32> to vector<2x128xf32>
      %49 = arith.divf %41, %48 : vector<2x128xf32>
      %50 = arith.mulf %40, %40 : vector<2x512xf32>
      %cst_32 = arith.constant dense<0.000000e+00> : vector<2xf32>
      %51 = vector.multi_reduction <add>, %50, %cst_32 [1] : vector<2x512xf32> to vector<2xf32>
      %52 = vector.shape_cast %51 : vector<2xf32> to vector<2x1xf32>
      %53 = math.sqrt %52 : vector<2x1xf32>
      %cst_33 = arith.constant 9.99999996E-13 : f32
      %54 = vector.broadcast %cst_33 : f32 to vector<2x1xf32>
      %55 = arith.maximumf %53, %54 : vector<2x1xf32>
      %56 = vector.broadcast %55 : vector<2x1xf32> to vector<2x512xf32>
      %57 = arith.divf %40, %56 : vector<2x512xf32>
      %c0_34 = arith.constant 0 : index
      %c0_35 = arith.constant 0 : index
      %58 = vector.load %arg12[%c0_34, %c0_35] : memref<128x2xf32, #tpu.memory_space<vmem>>, vector<128x2xf32>
      %cst_36 = arith.constant dense<0.000000e+00> : vector<2x2xf32>
      %59 = tpu.matmul %49, %58, %cst_36 {dimension_numbers = #tpu.dot_dimension_numbers<[1], [0], [0], [1], [0, 0, 1, 1], [], []>} : vector<2x128xf32>, vector<128x2xf32>, vector<2x2xf32> -> vector<2x2xf32>
      %c0_37 = arith.constant 0 : index
      %c0_38 = arith.constant 0 : index
      %60 = vector.load %arg13[%c0_37, %c0_38] : memref<512x2xf32, #tpu.memory_space<vmem>>, vector<512x2xf32>
      %cst_39 = arith.constant dense<0.000000e+00> : vector<2x2xf32>
      %61 = tpu.matmul %57, %60, %cst_39 {dimension_numbers = #tpu.dot_dimension_numbers<[1], [0], [0], [1], [0, 0, 1, 1], [], []>} : vector<2x512xf32>, vector<512x2xf32>, vector<2x2xf32> -> vector<2x2xf32>
      %62 = arith.addf %59, %61 : vector<2x2xf32>
      %c0_40 = arith.constant 0 : index
      %c0_41 = arith.constant 0 : index
      %63 = vector.load %arg14[%c0_40, %c0_41] : memref<1x2xf32, #tpu.memory_space<vmem>>, vector<1x2xf32>
      %64 = vector.broadcast %63 : vector<1x2xf32> to vector<2x2xf32>
      %65 = arith.addf %62, %64 : vector<2x2xf32>
      %cst_42 = arith.constant dense<0xFF800000> : vector<2xf32>
      %66 = vector.multi_reduction <maximumf>, %65, %cst_42 [1] : vector<2x2xf32> to vector<2xf32>
      %67 = vector.shape_cast %66 : vector<2xf32> to vector<2x1xf32>
      %68 = vector.broadcast %67 : vector<2x1xf32> to vector<2x2xf32>
      %69 = arith.subf %65, %68 : vector<2x2xf32>
      %70 = math.exp %69 : vector<2x2xf32>
      %cst_43 = arith.constant dense<0.000000e+00> : vector<2xf32>
      %71 = vector.multi_reduction <add>, %70, %cst_43 [1] : vector<2x2xf32> to vector<2xf32>
      %72 = vector.shape_cast %71 : vector<2xf32> to vector<2x1xf32>
      %73 = vector.broadcast %72 : vector<2x1xf32> to vector<2x2xf32>
      %74 = arith.divf %70, %73 : vector<2x2xf32>
      %c0_44 = arith.constant 0 : index
      %c0_45 = arith.constant 0 : index
      %75 = vector.load %arg8[%c0_44, %c0_45] : memref<128x512xf32, #tpu.memory_space<vmem>>, vector<128x512xf32>
      %cst_46 = arith.constant dense<0.000000e+00> : vector<2x512xf32>
      %76 = tpu.matmul %49, %75, %cst_46 {dimension_numbers = #tpu.dot_dimension_numbers<[1], [0], [0], [1], [0, 0, 1, 1], [], []>} : vector<2x128xf32>, vector<128x512xf32>, vector<2x512xf32> -> vector<2x512xf32>
      %c0_47 = arith.constant 0 : index
      %c0_48 = arith.constant 0 : index
      %77 = vector.load %arg9[%c0_47, %c0_48] : memref<1x512xf32, #tpu.memory_space<vmem>>, vector<1x512xf32>
      %78 = vector.broadcast %77 : vector<1x512xf32> to vector<2x512xf32>
      %79 = arith.addf %76, %78 : vector<2x512xf32>
      %c0_49 = arith.constant 0 : index
      %c0_50 = arith.constant 0 : index
      %80 = vector.load %arg10[%c0_49, %c0_50] : memref<512x512xf32, #tpu.memory_space<vmem>>, vector<512x512xf32>
      %cst_51 = arith.constant dense<0.000000e+00> : vector<2x512xf32>
      %81 = tpu.matmul %57, %80, %cst_51 {dimension_numbers = #tpu.dot_dimension_numbers<[1], [0], [0], [1], [0, 0, 1, 1], [], []>} : vector<2x512xf32>, vector<512x512xf32>, vector<2x512xf32> -> vector<2x512xf32>
      %c0_52 = arith.constant 0 : index
      %c0_53 = arith.constant 0 : index
      %82 = vector.load %arg11[%c0_52, %c0_53] : memref<1x512xf32, #tpu.memory_space<vmem>>, vector<1x512xf32>
      %83 = vector.broadcast %82 : vector<1x512xf32> to vector<2x512xf32>
      %84 = arith.addf %81, %83 : vector<2x512xf32>
      %85 = vector.extract_strided_slice %74 {offsets = [0, 0], sizes = [2, 1], strides = [1, 1]} : vector<2x2xf32> to vector<2x1xf32>
      %86 = vector.broadcast %85 : vector<2x1xf32> to vector<2x512xf32>
      %87 = arith.mulf %79, %86 : vector<2x512xf32>
      %88 = vector.extract_strided_slice %74 {offsets = [0, 1], sizes = [2, 1], strides = [1, 1]} : vector<2x2xf32> to vector<2x1xf32>
      %89 = vector.broadcast %88 : vector<2x1xf32> to vector<2x512xf32>
      %90 = arith.mulf %84, %89 : vector<2x512xf32>
      %91 = arith.addf %87, %90 : vector<2x512xf32>
      %c0_54 = arith.constant 0 : index
      %c0_55 = arith.constant 0 : index
      %92 = vector.load %arg15[%c0_54, %c0_55] : memref<2x512xf32, #tpu.memory_space<vmem>>, vector<2x512xf32>
      tpu.vector_store %arg15[%c0_54, %c0_55], %91 {strides = array<i32>} : memref<2x512xf32, #tpu.memory_space<vmem>>, vector<2x512xf32>,
    } else {
    }
    return
  }
  func.func @transform_0(%arg0: i32) -> (i32, i32) {
    %c0_i32 = arith.constant 0 : i32
    %c0_i32_0 = arith.constant 0 : i32
    %c0_i32_1 = arith.constant 0 : i32
    return %c0_i32, %c0_i32_0 : i32, i32
  }
  func.func @transform_1(%arg0: i32) -> (i32, i32, i32) {
    %c0_i32 = arith.constant 0 : i32
    %c0_i32_0 = arith.constant 0 : i32
    %c0_i32_1 = arith.constant 0 : i32
    %c0_i32_2 = arith.constant 0 : i32
    return %c0_i32, %c0_i32_0, %c0_i32_1 : i32, i32, i32
  }
  func.func @transform_2(%arg0: i32) -> (i32, i32) {
    %c0_i32 = arith.constant 0 : i32
    %c0_i32_0 = arith.constant 0 : i32
    return %c0_i32, %arg0 : i32, i32
  }
  func.func @transform_3(%arg0: i32) -> (i32, i32) {
    %c0_i32 = arith.constant 0 : i32
    %c0_i32_0 = arith.constant 0 : i32
    return %arg0, %c0_i32 : i32, i32
  }
  func.func @transform_4(%arg0: i32) -> (i32, i32) {
    %c0_i32 = arith.constant 0 : i32
    %c0_i32_0 = arith.constant 0 : i32
    %c0_i32_1 = arith.constant 0 : i32
    return %c0_i32, %c0_i32_0 : i32, i32
  }
  func.func @transform_5(%arg0: i32) -> (i32, i32) {
    %c0_i32 = arith.constant 0 : i32
    %c0_i32_0 = arith.constant 0 : i32
    %c0_i32_1 = arith.constant 0 : i32
    return %c0_i32, %c0_i32_0 : i32, i32
  }
  func.func @transform_6(%arg0: i32) -> (i32, i32) {
    %c0_i32 = arith.constant 0 : i32
    %c0_i32_0 = arith.constant 0 : i32
    %c0_i32_1 = arith.constant 0 : i32
    return %c0_i32, %c0_i32_0 : i32, i32
  }
  func.func @transform_7(%arg0: i32) -> (i32, i32) {
    %c0_i32 = arith.constant 0 : i32
    %c0_i32_0 = arith.constant 0 : i32
    %c0_i32_1 = arith.constant 0 : i32
    return %c0_i32, %c0_i32_0 : i32, i32
  }
  func.func @transform_8(%arg0: i32) -> (i32, i32) {
    %c0_i32 = arith.constant 0 : i32
    %c0_i32_0 = arith.constant 0 : i32
    %c0_i32_1 = arith.constant 0 : i32
    return %c0_i32, %c0_i32_0 : i32, i32
  }
  func.func @transform_9(%arg0: i32) -> (i32, i32) {
    %c0_i32 = arith.constant 0 : i32
    %c0_i32_0 = arith.constant 0 : i32
    %c0_i32_1 = arith.constant 0 : i32
    return %c0_i32, %c0_i32_0 : i32, i32
  }
  func.func @transform_10(%arg0: i32) -> (i32, i32) {
    %c0_i32 = arith.constant 0 : i32
    %c0_i32_0 = arith.constant 0 : i32
    %c0_i32_1 = arith.constant 0 : i32
    return %c0_i32, %c0_i32_0 : i32, i32
  }
  func.func @transform_11(%arg0: i32) -> (i32, i32) {
    %c0_i32 = arith.constant 0 : i32
    %c0_i32_0 = arith.constant 0 : i32
    %c0_i32_1 = arith.constant 0 : i32
    return %c0_i32, %c0_i32_0 : i32, i32
  }
  func.func @transform_12(%arg0: i32) -> (i32, i32) {
    %c0_i32 = arith.constant 0 : i32
    %c0_i32_0 = arith.constant 0 : i32
    %c0_i32_1 = arith.constant 0 : i32
    return %c0_i32, %c0_i32_0 : i32, i32
  }
  func.func @transform_13(%arg0: i32) -> (i32, i32) {
    %c0_i32 = arith.constant 0 : i32
    %c0_i32_0 = arith.constant 0 : i32
    %c0_i32_1 = arith.constant 0 : i32
    return %c0_i32, %c0_i32_0 : i32, i32
  }
  func.func @transform_14(%arg0: i32) -> (i32, i32) {
    %c0_i32 = arith.constant 0 : i32
    %c0_i32_0 = arith.constant 0 : i32
    %c0_i32_1 = arith.constant 0 : i32
    return %c0_i32, %c0_i32_0 : i32, i32
  }
}

</mosaic_0001>

<bundles_post_ra>
// kernel: tpu_custom_call.1
= control target key start
LH: loop header
LB: loop body
LE: loop exit
PB: predicated region body
PF: predicated region fallthrough
CT: control target
= control target key end

     0   :  { %19 = vsyncpa [#allocation4], 0  ;;  %s14929_s29 = smov 0   ;;  %s18340_s0 = inlined_call_operand.vmem [shape: f32[2,128], index: 0, kind: input, shape index: {}]   ;;  %s18341_s1 = inlined_call_operand.vmem [shape: f32[2,75,512], index: 1, kind: input, shape index: {}]   ;;  %s18342_s2 = inlined_call_operand.vmem [shape: bf16[2,38400], index: 2, kind: input, shape index: {}]   ;;  %s18343_s3 = inlined_call_operand.vmem [shape: bf16[38400,75], index: 3, kind: input, shape index: {}]   ;;  %s18344_s4 = inlined_call_operand.vmem [shape: f32[1,75], index: 4, kind: input, shape index: {}]   ;;  %s18345_s5 = inlined_call_operand.vmem [shape: f32[512,512], index: 5, kind: input, shape index: {}]   ;;  %s18346_s6 = inlined_call_operand.vmem [shape: f32[1,512], index: 6, kind: input, shape index: {}]   ;;  %s18347_s7 = inlined_call_operand.vmem [shape: f32[128,512], index: 7, kind: input, shape index: {}]   ;;  %s18348_s8 = inlined_call_operand.vmem [shape: f32[1,512], index: 8, kind: input, shape index: {}]   ;;  %s18349_s9 = inlined_call_operand.vmem [shape: f32[512,512], index: 9, kind: input, shape index: {}]   ;;  %s18350_s10 = inlined_call_operand.vmem [shape: f32[1,512], index: 10, kind: input, shape index: {}]   ;;  %s18351_s11 = inlined_call_operand.vmem [shape: f32[128,2], index: 11, kind: input, shape index: {}]   ;;  %s18352_s12 = inlined_call_operand.vmem [shape: f32[512,2], index: 12, kind: input, shape index: {}]   ;;  %s18353_s13 = inlined_call_operand.vmem [shape: f32[1,2], index: 13, kind: input, shape index: {}]   ;;  %s18354_s14 = inlined_call_operand.hbm [shape: f32[2,512], index: 14, kind: output, shape index: {}]  }
   0x1 LB: > { %s14935_s30 = sadd.s32 4294967295, %s14844_s29   ;;  %p11872_p0 = scmp.ge.s32.totalorder %s14844_s29, 1  ;;  %s14844_s29 = sphi %s14929_s29, %s25_s29  }
   0x2   : > { %p419_p1 = scmp.lt.s32.totalorder %s14844_s29, 4 }
   0x4   : > { %p420_p2 = pnand %p11872_p0, %p419_p1 }
   0x5   : > { %s464_s15 = smul.u32 (!%p420_p2), 100, %s14935_s30  ;;  %p11874_p5 = scmp.ne.s32.totalorder (!%p420_p2), %s14935_s30, 0 }
   0x6   : > { %423 = sbr.rel (%p420_p2) target bundleno = 2722 (0xaa2), region = 76 }
   0x7   : > { %s469_s16 = smul.u32 (!%p420_p2), 1600, %s14935_s30  ;;  %p465_p3 = scmp.lt.s32.totalorder (!%p420_p2), %s464_s15, 299 }
   0x9   : > { %p470_p4 = scmp.lt.s32.totalorder (!%p420_p2), %s469_s16, 4799 }
   0xb   : > { %s18356_s15 = smov (!%p465_p3, %s464_s15), 299  ;;  %s18358_s16 = smov (!%p470_p4, %s469_s16), 4799 }
   0xc   : > { %s14944_s19 = scalar_lea.vmem %s18342_s2, %s18356_s15  ;;  %s11873_s20 = sshll.u32 %s18358_s16, 2 }
   0xd   : > { %s14949_s23 = scalar_lea.vmem %s18343_s3, %s11873_s20  ;;  %479 = sbr.rel (%p11874_p5) target bundleno = 20 (0x14), region = 80 }
  0x12   : > { %vm480_vm0 = vcmask 607232   ;;  %v14846_v0 = vmov 0.0  }
  0x13   : > { %481 = vst.msk [vmem:[#allocation2] sm:$0x3] %vm480_vm0, %v14846_v0 }
  0x14 PF: > { %v13979_v1 = vld [vmem:[%s14949_s23 + $0x78] sm:$0xff]   ;;  %v13983_v5 = vld [vmem:[%s14949_s23 + $0x70] sm:$0xff]   ;;  %v13987_v9 = vld [vmem:[%s14949_s23 + $0x68] sm:$0xff]   ;;  %v2113_v29 = vlaneseq  ;;  %v14847_v37 = vmov 1966171168   ;;  %vm9622_vm1 = vcmask 607232  }
  0x15   : > { %v13980_v2 = vld [vmem:[%s14949_s23 + $0xf8] sm:$0xff]   ;;  %12735 = vmatprep.subr.bf16.mxu0 %v13979_v1  ;;  %v13984_v6 = vld [vmem:[%s14949_s23 + $0xf0] sm:$0xff]   ;;  %v13988_v10 = vld [vmem:[%s14949_s23 + $0xe8] sm:$0xff]   ;;  %v2111_v38 = vunpack.c.l.s4 %v14847_v37  ;;  %p12676_p6 = scmp.ne.s32.totalorder %s14935_s30, 2 }
  0x16   : > { %v13981_v3 = vld [vmem:[%s14949_s23 + $0x38] sm:$0xff]   ;;  %12757 = vmatprep.subr.bf16.mxu1 %v13980_v2  ;;  %v13985_v7 = vld [vmem:[%s14949_s23 + $0x30] sm:$0xff]   ;;  %v13989_v11 = vld [vmem:[%s14949_s23 + $0x28] sm:$0xff]   ;;  %v14984_v34 = vshrl.u32 %v2113_v29, 7 }
  0x17   : > { %v13982_v4 = vld [vmem:[%s14949_s23 + $0xb8] sm:$0xff]   ;;  %12736 = vmatpush3.bf16.msra.mxu0 %v13981_v3  ;;  %v13986_v8 = vld [vmem:[%s14949_s23 + $0xb0] sm:$0xff]   ;;  %v13990_v12 = vld [vmem:[%s14949_s23 + $0xa8] sm:$0xff]   ;;  %v2112_v41 = vunpack.c.0.s8 %v2111_v38 }
  0x18   : > { %12758 = vmatpush3.bf16.msra.mxu1 %v13982_v4  ;;  %12737 = vmatprep.subr.bf16.mxu0 %v13983_v5  ;;  %v13991_v13 = vld [vmem:[%s14949_s23 + $0x60] sm:$0xff]   ;;  %v13995_v17 = vld [vmem:[%s14949_s23 + $0x58] sm:$0xff]   ;;  %v13999_v21 = vld [vmem:[%s14949_s23 + $0x50] sm:$0xff]  }
  0x19   : > { %12759 = vmatprep.subr.bf16.mxu1 %v13984_v6  ;;  %v13992_v14 = vld [vmem:[%s14949_s23 + $0xe0] sm:$0xff]   ;;  %v13996_v18 = vld [vmem:[%s14949_s23 + $0xd8] sm:$0xff]   ;;  %v14000_v22 = vld [vmem:[%s14949_s23 + $0xd0] sm:$0xff]   ;;  %v14990_v42 = vsub.s32 %v2112_v41, %v14984_v34 }
  0x1a   : > { %v13993_v15 = vld [vmem:[%s14949_s23 + $0x20] sm:$0xff]   ;;  %v13997_v19 = vld [vmem:[%s14949_s23 + $0x18] sm:$0xff]   ;;  %v14001_v23 = vld [vmem:[%s14949_s23 + $0x10] sm:$0xff]  }
  0x1b   : > { %12738 = vmatpush3.bf16.msra.mxu0 %v13985_v7  ;;  %v13994_v16 = vld [vmem:[%s14949_s23 + $0xa0] sm:$0xff]   ;;  %v13998_v20 = vld [vmem:[%s14949_s23 + $0x98] sm:$0xff]   ;;  %v14002_v24 = vld [vmem:[%s14949_s23 + $0x90] sm:$0xff]  }
  0x1c   : > { %12760 = vmatpush3.bf16.msra.mxu1 %v13986_v8  ;;  %12739 = vmatprep.subr.bf16.mxu0 %v13987_v9  ;;  %v14003_v25 = vld [vmem:[%s14949_s23 + $0x48] sm:$0xff]   ;;  %v14007_v30 = vld [vmem:[%s14949_s23 + $0x40] sm:$0xff]   ;;  %v14012_v36 = vld [vmem:[%s14949_s23 + $0x178] sm:$0xff]  }
  0x1d   : > { %12761 = vmatprep.subr.bf16.mxu1 %v13988_v10  ;;  %v14004_v26 = vld [vmem:[%s14949_s23 + $0xc8] sm:$0xff]   ;;  %v14008_v31 = vld [vmem:[%s14949_s23 + $0xc0] sm:$0xff]   ;;  %v14013_v39 = vld [vmem:[%s14949_s23 + $0x1f8] sm:$0xff]  }
  0x1e   : > { %v14005_v27 = vld [vmem:[%s14949_s23 + $0x8] sm:$0xff]   ;;  %v14009_v32 = vld [vmem:[%s14949_s23] sm:$0xff]   ;;  %v14014_v48 = vld [vmem:[%s14949_s23 + $0x138] sm:$0xff]  }
  0x1f   : > { %12740 = vmatpush3.bf16.msra.mxu0 %v13989_v11  ;;  %v14006_v28 = vld [vmem:[%s14949_s23 + $0x88] sm:$0xff]   ;;  %v14010_v33 = vld [vmem:[%s14949_s23 + $0x80] sm:$0xff]   ;;  %v14015_v50 = vld [vmem:[%s14949_s23 + $0x1b8] sm:$0xff]  }
  0x20   : > { %12762 = vmatpush3.bf16.msra.mxu1 %v13990_v12  ;;  %12741 = vmatprep.subr.bf16.mxu0 %v13991_v13  ;;  %v483_v35 = vld [vmem:[%s14944_s19] sm:$0xff]  ;;  %v14016_v53 = vld [vmem:[%s14949_s23 + $0x170] sm:$0xff]   ;;  %v14020_v59 = vld [vmem:[%s14949_s23 + $0x168] sm:$0xff]  }
  0x21   : > { %12763 = vmatprep.subr.bf16.mxu1 %v13992_v14  ;;  %v2109_v40 = vcombine.high %v483_v35, %v483_v35  ;;  %v2116_v43 = vrot.slane %v483_v35, %v14990_v42  ;;  %v14017_v55 = vld [vmem:[%s14949_s23 + $0x1f0] sm:$0xff]   ;;  %v14021_v60 = vld [vmem:[%s14949_s23 + $0x1e8] sm:$0xff]   ;;  %v14024_v63 = vld [vmem:[%s14949_s23 + $0x160] sm:$0xff]  }
  0x22   : > { %v14018_v56 = vld [vmem:[%s14949_s23 + $0x130] sm:$0xff]   ;;  %v14022_v61 = vld [vmem:[%s14949_s23 + $0x128] sm:$0xff]   ;;  %v14025_v0 = vld [vmem:[%s14949_s23 + $0x1e0] sm:$0xff]  }
  0x23   : > { %12742 = vmatpush3.bf16.msra.mxu0 %v13993_v15  ;;  %v14994_v44 = vrot.slane %v2109_v40, %v14990_v42  ;;  %v2124_v45 = vcombine.high %v2116_v43, %v2116_v43  ;;  %v2132_v46 = vrot.slane %v2116_v43, %v14990_v42  ;;  %v14019_v58 = vld [vmem:[%s14949_s23 + $0x1b0] sm:$0xff]   ;;  %v14023_v62 = vld [vmem:[%s14949_s23 + $0x1a8] sm:$0xff]   ;;  %v14026_v1 = vld [vmem:[%s14949_s23 + $0x120] sm:$0xff]  }
  0x24   : > { %12764 = vmatpush3.bf16.msra.mxu1 %v13994_v16  ;;  %12743 = vmatprep.subr.bf16.mxu0 %v13995_v17  ;;  %v14027_v2 = vld [vmem:[%s14949_s23 + $0x1a0] sm:$0xff]   ;;  %v14028_v3 = vld [vmem:[%s14949_s23 + $0x158] sm:$0xff]   ;;  %v14032_v7 = vld [vmem:[%s14949_s23 + $0x150] sm:$0xff]  }
  0x25   : > { %12765 = vmatprep.subr.bf16.mxu1 %v13996_v18  ;;  %v2125_v47 = vcombine.high %v14994_v44, %v14994_v44  ;;  %v2146_v49 = vrot.slane %v2124_v45, %v14990_v42  ;;  %v2154_v52 = vcombine.high %v2132_v46, %v2132_v46  ;;  %v14029_v4 = vld [vmem:[%s14949_s23 + $0x1d8] sm:$0xff]   ;;  %v14033_v8 = vld [vmem:[%s14949_s23 + $0x1d0] sm:$0xff]   ;;  %v14036_v11 = vld [vmem:[%s14949_s23 + $0x148] sm:$0xff]  }
  0x26   : > { %v14030_v5 = vld [vmem:[%s14949_s23 + $0x118] sm:$0xff]   ;;  %v14034_v9 = vld [vmem:[%s14949_s23 + $0x110] sm:$0xff]   ;;  %v14037_v12 = vld [vmem:[%s14949_s23 + $0x1c8] sm:$0xff]  }
  0x27   : > { %12744 = vmatpush3.bf16.msra.mxu0 %v13997_v19  ;;  %v2153_v51 = vrot.slane %v2125_v47, %v14990_v42  ;;  %7653 = vmatprep.mubr.bf16.mxu0 %v2146_v49  ;;  %v2156_v54 = vcombine.high %v2146_v49, %v2146_v49  ;;  %v14031_v6 = vld [vmem:[%s14949_s23 + $0x198] sm:$0xff]   ;;  %v14035_v10 = vld [vmem:[%s14949_s23 + $0x190] sm:$0xff]   ;;  %v14038_v13 = vld [vmem:[%s14949_s23 + $0x108] sm:$0xff]   ;;  %v2139_v19 = vrot.slane %v14994_v44, %v14990_v42 }
  0x28   : > { %12766 = vmatpush3.bf16.msra.mxu1 %v13998_v20  ;;  %12745 = vmatprep.subr.bf16.mxu0 %v13999_v21  ;;  %v14039_v14 = vld [vmem:[%s14949_s23 + $0x188] sm:$0xff]   ;;  %v14040_v15 = vld [vmem:[%s14949_s23 + $0x140] sm:$0xff]   ;;  %v14044_v20 = vld [vmem:[%s14949_s23 + $0x278] sm:$0xff]  }
  0x29   : > { %12767 = vmatprep.subr.bf16.mxu1 %v14000_v22  ;;  %v2157_v57 = vcombine.high %v2153_v51, %v2153_v51  ;;  %7693 = vmatprep.mubr.bf16.mxu1 %v2156_v54  ;;  %v14041_v16 = vld [vmem:[%s14949_s23 + $0x1c0] sm:$0xff]   ;;  %v14045_v21 = vld [vmem:[%s14949_s23 + $0x2f8] sm:$0xff]   ;;  %v14052_v29 = vld [vmem:[%s14949_s23 + $0x268] sm:$0xff]  }
  0x2a   : > { %v14042_v17 = vld [vmem:[%s14949_s23 + $0x100] sm:$0xff]   ;;  %v14046_v22 = vld [vmem:[%s14949_s23 + $0x238] sm:$0xff]   ;;  %v14064_v43 = vld [vmem:[%s14949_s23 + $0x250] sm:$0xff]  }
  0x2b   : > { %12746 = vmatpush3.bf16.msra.mxu0 %v14001_v23  ;;  %v14043_v18 = vld [vmem:[%s14949_s23 + $0x180] sm:$0xff]   ;;  %v14047_v23 = vld [vmem:[%s14949_s23 + $0x2b8] sm:$0xff]   ;;  %v14065_v44 = vld [vmem:[%s14949_s23 + $0x2d0] sm:$0xff]  }
  0x2c   : > { %12768 = vmatpush3.bf16.msra.mxu1 %v14002_v24  ;;  %12747 = vmatprep.subr.bf16.mxu0 %v14003_v25  ;;  %v2155_v24 = vcombine.high %v2139_v19, %v2139_v19  ;;  %v14048_v25 = vld [vmem:[%s14949_s23 + $0x270] sm:$0xff]   ;;  %v14057_v35 = vld [vmem:[%s14949_s23 + $0x2e0] sm:$0xff]   ;;  %v14060_v38 = vld [vmem:[%s14949_s23 + $0x258] sm:$0xff]  }
  0x2d   : > { %12769 = vmatprep.subr.bf16.mxu1 %v14004_v26  ;;  %v14049_v26 = vld [vmem:[%s14949_s23 + $0x2f0] sm:$0xff]   ;;  %v14059_v37 = vld [vmem:[%s14949_s23 + $0x2a0] sm:$0xff]   ;;  %v14062_v40 = vld [vmem:[%s14949_s23 + $0x218] sm:$0xff]  }
  0x2e   : > { %v14063_v41 = vld [vmem:[%s14949_s23 + $0x298] sm:$0xff]   ;;  %v14066_v45 = vld [vmem:[%s14949_s23 + $0x210] sm:$0xff]   ;;  %v14068_v47 = vld [vmem:[%s14949_s23 + $0x248] sm:$0xff]  }
  0x2f   : > { %12748 = vmatpush3.bf16.msra.mxu0 %v14005_v27  ;;  %v14050_v27 = vld [vmem:[%s14949_s23 + $0x230] sm:$0xff]   ;;  %v14069_v49 = vld [vmem:[%s14949_s23 + $0x2c8] sm:$0xff]  }
  0x30   : > { %12770 = vmatpush3.bf16.msra.mxu1 %v14006_v28  ;;  %12749 = vmatprep.subr.bf16.mxu0 %v14007_v30  ;;  %v14051_v28 = vld [vmem:[%s14949_s23 + $0x2b0] sm:$0xff]   ;;  %v14053_v30 = vld [vmem:[%s14949_s23 + $0x2e8] sm:$0xff]  }
  0x31   : > { %12771 = vmatprep.subr.bf16.mxu1 %v14008_v31  ;;  %v14054_v31 = vld [vmem:[%s14949_s23 + $0x228] sm:$0xff]  }
  0x33   : > { %12750 = vmatpush3.bf16.msra.mxu0 %v14009_v32  ;;  %v14055_v32 = vld [vmem:[%s14949_s23 + $0x2a8] sm:$0xff]  }
  0x34   : > { %12772 = vmatpush3.bf16.msra.mxu1 %v14010_v33  ;;  %12779 = vmatprep.subr.bf16.mxu0 %v14012_v36  ;;  %v14056_v33 = vld [vmem:[%s14949_s23 + $0x260] sm:$0xff]  }
  0x35   : > { %12801 = vmatprep.subr.bf16.mxu1 %v14013_v39  ;;  %v14058_v36 = vld [vmem:[%s14949_s23 + $0x220] sm:$0xff]   ;;  %v14061_v39 = vld [vmem:[%s14949_s23 + $0x2d8] sm:$0xff]  }
  0x36   : > { %7654 = vmatmul.mubr.bf16.vlgmr.msra.gmra.mxu0 %v2132_v46  ;;  %v14067_v46 = vld [vmem:[%s14949_s23 + $0x290] sm:$0xff]  }
  0x37   : > { %12780 = vmatpush3.bf16.msra.mxu0 %v14014_v48  ;;  %7694 = vmatmul.mubr.bf16.vlgmr.msra.gmra.mxu1 %v2154_v52  ;;  %v484_v48 = vld [vmem:[%s14944_s19 + $0x8] sm:$0xff] }
  0x38   : > { %12781 = vmatprep.subr.bf16.mxu0 %v14016_v53  ;;  %12802 = vmatpush3.bf16.msra.mxu1 %v14015_v50  ;;  %v2165_v50 = vrot.slane %v484_v48, %v14990_v42  ;;  %v14070_v52 = vld [vmem:[%s14949_s23 + $0x208] sm:$0xff]  }
  0x39   : > { %7733 = vmatprep.mubr.bf16.mxu0 %v2153_v51  ;;  %12803 = vmatprep.subr.bf16.mxu1 %v14017_v55  ;;  %v2158_v51 = vcombine.high %v484_v48, %v484_v48  ;;  %v14071_v53 = vld [vmem:[%s14949_s23 + $0x288] sm:$0xff]  }
  0x3a   : > { %7773 = vmatprep.mubr.bf16.mxu1 %v2157_v57  ;;  %v2173_v54 = vcombine.high %v2165_v50, %v2165_v50  ;;  %v14073_v57 = vld [vmem:[%s14949_s23 + $0x2c0] sm:$0xff]   ;;  %v14118_v48 = vld [vmem:[%s14949_s23 + $0x4e8] sm:$0xff]  }
  0x3b   : > { %12782 = vmatpush3.bf16.msra.mxu0 %v14018_v56  ;;  %v15064_v55 = vrot.slane %v2158_v51, %v14990_v42  ;;  %v14072_v56 = vld [vmem:[%s14949_s23 + $0x240] sm:$0xff]  }
  0x3c   : > { %12783 = vmatprep.subr.bf16.mxu0 %v14020_v59  ;;  %12804 = vmatpush3.bf16.msra.mxu1 %v14019_v58  ;;  %v2195_v58 = vrot.slane %v2173_v54, %v14990_v42  ;;  %v14121_v51 = vld [vmem:[%s14949_s23 + $0x460] sm:$0xff]  }
  0x3d   : > { %12805 = vmatprep.subr.bf16.mxu1 %v14021_v60  ;;  %v2174_v59 = vcombine.high %v15064_v55, %v15064_v55  ;;  %v14074_v60 = vld [vmem:[%s14949_s23 + $0x200] sm:$0xff]  }
  0x3e   : > { %v14124_v54 = vld [vmem:[%s14949_s23 + $0x4a0] sm:$0xff]  }
  0x3f   : > { %12784 = vmatpush3.bf16.msra.mxu0 %v14022_v61  ;;  %v14075_v61 = vld [vmem:[%s14949_s23 + $0x280] sm:$0xff]  }
  0x40   : > { %12785 = vmatprep.subr.bf16.mxu0 %v14024_v63  ;;  %12806 = vmatpush3.bf16.msra.mxu1 %v14023_v62  ;;  %v2205_v62 = vcombine.high %v2195_v58, %v2195_v58  ;;  %v2181_v63 = vrot.slane %v2165_v50, %v14990_v42  ;;  %v14120_v50 = vld [vmem:[%s14949_s23 + $0x4a8] sm:$0xff]  }
  0x41   : > { %12807 = vmatprep.subr.bf16.mxu1 %v14025_v0  ;;  %v14076_v0 = vld [vmem:[%s14949_s23 + $0x378] sm:$0xff]  }
  0x43   : > { %12786 = vmatpush3.bf16.msra.mxu0 %v14026_v1  ;;  %v14077_v1 = vld [vmem:[%s14949_s23 + $0x3f8] sm:$0xff]  }
  0x44   : > { %12787 = vmatprep.subr.bf16.mxu0 %v14028_v3  ;;  %12808 = vmatpush3.bf16.msra.mxu1 %v14027_v2  ;;  %v2202_v2 = vrot.slane %v2174_v59, %v14990_v42  ;;  %v14078_v3 = vld [vmem:[%s14949_s23 + $0x338] sm:$0xff]   ;;  %v14129_v59 = vld [vmem:[%s14949_s23 + $0x450] sm:$0xff]  }
  0x45   : > { %12809 = vmatprep.subr.bf16.mxu1 %v14029_v4  ;;  %v14079_v4 = vld [vmem:[%s14949_s23 + $0x3b8] sm:$0xff]  }
  0x47   : > { %12788 = vmatpush3.bf16.msra.mxu0 %v14030_v5  ;;  %v2203_v5 = vcombine.high %v2181_v63, %v2181_v63 }
  0x48   : > { %12789 = vmatprep.subr.bf16.mxu0 %v14032_v7  ;;  %12810 = vmatpush3.bf16.msra.mxu1 %v14031_v6  ;;  %v14080_v6 = vld [vmem:[%s14949_s23 + $0x370] sm:$0xff]  }
  0x49   : > { %12811 = vmatprep.subr.bf16.mxu1 %v14033_v8  ;;  %v14081_v7 = vld [vmem:[%s14949_s23 + $0x3f0] sm:$0xff]   ;;  %v2206_v8 = vcombine.high %v2202_v2, %v2202_v2 }
  0x4b   : > { %12790 = vmatpush3.bf16.msra.mxu0 %v14034_v9  ;;  %v14082_v9 = vld [vmem:[%s14949_s23 + $0x330] sm:$0xff]  }
  0x4c   : > { %12791 = vmatprep.subr.bf16.mxu0 %v14036_v11  ;;  %12812 = vmatpush3.bf16.msra.mxu1 %v14035_v10  ;;  %v14083_v10 = vld [vmem:[%s14949_s23 + $0x3b0] sm:$0xff]   ;;  %v14084_v11 = vld [vmem:[%s14949_s23 + $0x368] sm:$0xff]  }
  0x4d   : > { %12813 = vmatprep.subr.bf16.mxu1 %v14037_v12  ;;  %v14085_v12 = vld [vmem:[%s14949_s23 + $0x3e8] sm:$0xff]  }
  0x4f   : > { %12792 = vmatpush3.bf16.msra.mxu0 %v14038_v13  ;;  %v14086_v13 = vld [vmem:[%s14949_s23 + $0x328] sm:$0xff]  }
  0x50   : > { %12793 = vmatprep.subr.bf16.mxu0 %v14040_v15  ;;  %12814 = vmatpush3.bf16.msra.mxu1 %v14039_v14  ;;  %v14087_v14 = vld [vmem:[%s14949_s23 + $0x3a8] sm:$0xff]   ;;  %v14088_v15 = vld [vmem:[%s14949_s23 + $0x360] sm:$0xff]  }
  0x51   : > { %12815 = vmatprep.subr.bf16.mxu1 %v14041_v16  ;;  %v14089_v16 = vld [vmem:[%s14949_s23 + $0x3e0] sm:$0xff]  }
  0x53   : > { %12794 = vmatpush3.bf16.msra.mxu0 %v14042_v17  ;;  %v14090_v17 = vld [vmem:[%s14949_s23 + $0x320] sm:$0xff]  }
  0x54   : > { %12823 = vmatprep.subr.bf16.mxu0 %v14044_v20  ;;  %12816 = vmatpush3.bf16.msra.mxu1 %v14043_v18  ;;  %v14091_v18 = vld [vmem:[%s14949_s23 + $0x3a0] sm:$0xff]   ;;  %v14093_v20 = vld [vmem:[%s14949_s23 + $0x3d8] sm:$0xff]  }
  0x55   : > { %12845 = vmatprep.subr.bf16.mxu1 %v14045_v21  ;;  %v14094_v21 = vld [vmem:[%s14949_s23 + $0x318] sm:$0xff]  }
  0x56   : > { %7734 = vmatmul.mubr.bf16.vlgmr.msra.gmra.mxu0 %v2139_v19  ;;  %v14092_v19 = vld [vmem:[%s14949_s23 + $0x358] sm:$0xff]  }
  0x57   : > { %12824 = vmatpush3.bf16.msra.mxu0 %v14046_v22  ;;  %7774 = vmatmul.mubr.bf16.vlgmr.msra.gmra.mxu1 %v2155_v24  ;;  %v14095_v22 = vld [vmem:[%s14949_s23 + $0x398] sm:$0xff]   ;;  %v14097_v24 = vld [vmem:[%s14949_s23 + $0x3d0] sm:$0xff]  }
  0x58   : > { %12825 = vmatprep.subr.bf16.mxu0 %v14048_v25  ;;  %12846 = vmatpush3.bf16.msra.mxu1 %v14047_v23  ;;  %v14096_v23 = vld [vmem:[%s14949_s23 + $0x350] sm:$0xff]  }
  0x59   : > { %12847 = vmatprep.subr.bf16.mxu1 %v14049_v26  ;;  %7813 = vmatprep.mubr.bf16.mxu0 %v2195_v58  ;;  %v14098_v25 = vld [vmem:[%s14949_s23 + $0x310] sm:$0xff]   ;;  %v14128_v58 = vld [vmem:[%s14949_s23 + $0x498] sm:$0xff]  }
  0x5a   : > { %7853 = vmatprep.mubr.bf16.mxu1 %v2205_v62  ;;  %v14099_v26 = vld [vmem:[%s14949_s23 + $0x390] sm:$0xff]  }
  0x5b   : > { %12826 = vmatpush3.bf16.msra.mxu0 %v14050_v27  ;;  %v14100_v27 = vld [vmem:[%s14949_s23 + $0x348] sm:$0xff]   ;;  %v14132_v62 = vld [vmem:[%s14949_s23 + $0x490] sm:$0xff]  }
  0x5c   : > { %12827 = vmatprep.subr.bf16.mxu0 %v14052_v29  ;;  %12848 = vmatpush3.bf16.msra.mxu1 %v14051_v28  ;;  %v14101_v28 = vld [vmem:[%s14949_s23 + $0x3c8] sm:$0xff]  }
  0x5d   : > { %12849 = vmatprep.subr.bf16.mxu1 %v14053_v30  ;;  %v14102_v29 = vld [vmem:[%s14949_s23 + $0x308] sm:$0xff]  }
  0x5e   : > { %v14103_v30 = vld [vmem:[%s14949_s23 + $0x388] sm:$0xff]  }
  0x5f   : > { %12828 = vmatpush3.bf16.msra.mxu0 %v14054_v31  ;;  %v14104_v31 = vld [vmem:[%s14949_s23 + $0x340] sm:$0xff]  }
  0x60   : > { %12829 = vmatprep.subr.bf16.mxu0 %v14056_v33  ;;  %12850 = vmatpush3.bf16.msra.mxu1 %v14055_v32  ;;  %v14105_v32 = vld [vmem:[%s14949_s23 + $0x3c0] sm:$0xff]  }
  0x61   : > { %12851 = vmatprep.subr.bf16.mxu1 %v14057_v35  ;;  %v14106_v33 = vld [vmem:[%s14949_s23 + $0x300] sm:$0xff]  }
  0x62   : > { %v14107_v35 = vld [vmem:[%s14949_s23 + $0x380] sm:$0xff]  }
  0x63   : > { %12830 = vmatpush3.bf16.msra.mxu0 %v14058_v36  ;;  %v2188_v36 = vrot.slane %v15064_v55, %v14990_v42  ;;  %v14125_v55 = vld [vmem:[%s14949_s23 + $0x458] sm:$0xff]  }
  0x64   : > { %12831 = vmatprep.subr.bf16.mxu0 %v14060_v38  ;;  %12852 = vmatpush3.bf16.msra.mxu1 %v14059_v37  ;;  %v14109_v37 = vld [vmem:[%s14949_s23 + $0x478] sm:$0xff]  }
  0x65   : > { %12853 = vmatprep.subr.bf16.mxu1 %v14061_v39  ;;  %v14110_v38 = vld [vmem:[%s14949_s23 + $0x4f8] sm:$0xff]  }
  0x66   : > { %v14111_v39 = vld [vmem:[%s14949_s23 + $0x438] sm:$0xff]  }
  0x67   : > { %12832 = vmatpush3.bf16.msra.mxu0 %v14062_v40  ;;  %v14112_v40 = vld [vmem:[%s14949_s23 + $0x4b8] sm:$0xff]  }
  0x68   : > { %12833 = vmatprep.subr.bf16.mxu0 %v14064_v43  ;;  %12854 = vmatpush3.bf16.msra.mxu1 %v14063_v41  ;;  %v2204_v41 = vcombine.high %v2188_v36, %v2188_v36  ;;  %v14113_v43 = vld [vmem:[%s14949_s23 + $0x470] sm:$0xff]  }
  0x69   : > { %12855 = vmatprep.subr.bf16.mxu1 %v14065_v44  ;;  %v14114_v44 = vld [vmem:[%s14949_s23 + $0x4f0] sm:$0xff]  }
  0x6b   : > { %12834 = vmatpush3.bf16.msra.mxu0 %v14066_v45  ;;  %v14115_v45 = vld [vmem:[%s14949_s23 + $0x430] sm:$0xff]  }
  0x6c   : > { %12835 = vmatprep.subr.bf16.mxu0 %v14068_v47  ;;  %12856 = vmatpush3.bf16.msra.mxu1 %v14067_v46  ;;  %v14116_v46 = vld [vmem:[%s14949_s23 + $0x4b0] sm:$0xff]   ;;  %v14117_v47 = vld [vmem:[%s14949_s23 + $0x468] sm:$0xff]  }
  0x6d   : > { %12857 = vmatprep.subr.bf16.mxu1 %v14069_v49  ;;  %v14119_v49 = vld [vmem:[%s14949_s23 + $0x428] sm:$0xff]  }
  0x6f   : > { %12836 = vmatpush3.bf16.msra.mxu0 %v14070_v52  ;;  %v14122_v52 = vld [vmem:[%s14949_s23 + $0x4e0] sm:$0xff]  }
  0x70   : > { %12837 = vmatprep.subr.bf16.mxu0 %v14072_v56  ;;  %12858 = vmatpush3.bf16.msra.mxu1 %v14071_v53  ;;  %v14123_v53 = vld [vmem:[%s14949_s23 + $0x420] sm:$0xff]   ;;  %v14126_v56 = vld [vmem:[%s14949_s23 + $0x4d8] sm:$0xff]  }
  0x71   : > { %12859 = vmatprep.subr.bf16.mxu1 %v14073_v57  ;;  %v14127_v57 = vld [vmem:[%s14949_s23 + $0x418] sm:$0xff]  }
  0x73   : > { %12838 = vmatpush3.bf16.msra.mxu0 %v14074_v60  ;;  %v14130_v60 = vld [vmem:[%s14949_s23 + $0x4d0] sm:$0xff]  }
  0x74   : > { %12867 = vmatprep.subr.bf16.mxu0 %v14076_v0  ;;  %12860 = vmatpush3.bf16.msra.mxu1 %v14075_v61  ;;  %v14131_v61 = vld [vmem:[%s14949_s23 + $0x410] sm:$0xff]  }
  0x75   : > { %12889 = vmatprep.subr.bf16.mxu1 %v14077_v1  ;;  %v485_v0 = vld [vmem:[%s14944_s19 + $0x10] sm:$0xff]  ;;  %v14134_v1 = vld [vmem:[%s14949_s23 + $0x4c8] sm:$0xff]  }
  0x76   : > { %7814 = vmatmul.mubr.bf16.vlgmr.msra.gmra.mxu0 %v2181_v63  ;;  %v14133_v63 = vld [vmem:[%s14949_s23 + $0x448] sm:$0xff]  }
  0x77   : > { %12868 = vmatpush3.bf16.msra.mxu0 %v14078_v3  ;;  %7893 = vmatprep.mubr.bf16.mxu0 %v2202_v2  ;;  %v2214_v2 = vrot.slane %v485_v0, %v14990_v42  ;;  %v2207_v3 = vcombine.high %v485_v0, %v485_v0  ;;  %v14183_v0 = vld [vmem:[%s14949_s23 + $0x6e8] sm:$0xff]  }
  0x78   : > { %7854 = vmatmul.mubr.bf16.vlgmr.msra.gmra.mxu1 %v2203_v5  ;;  %12869 = vmatprep.subr.bf16.mxu0 %v14080_v6  ;;  %v14136_v5 = vld [vmem:[%s14949_s23 + $0x488] sm:$0xff]  }
  0x79   : > { %12890 = vmatpush3.bf16.msra.mxu1 %v14079_v4  ;;  %7933 = vmatprep.mubr.bf16.mxu1 %v2206_v8  ;;  %v14135_v4 = vld [vmem:[%s14949_s23 + $0x408] sm:$0xff]   ;;  %v2222_v6 = vcombine.high %v2214_v2, %v2214_v2  ;;  %v14137_v8 = vld [vmem:[%s14949_s23 + $0x440] sm:$0xff]  }
  0x7a   : > { %12891 = vmatprep.subr.bf16.mxu1 %v14081_v7  ;;  %v15140_v7 = vrot.slane %v2207_v3, %v14990_v42  ;;  %v14186_v3 = vld [vmem:[%s14949_s23 + $0x660] sm:$0xff]  }
  0x7b   : > { %12870 = vmatpush3.bf16.msra.mxu0 %v14082_v9  ;;  %v14138_v9 = vld [vmem:[%s14949_s23 + $0x4c0] sm:$0xff]  }
  0x7c   : > { %12871 = vmatprep.subr.bf16.mxu0 %v14084_v11  ;;  %v2223_v11 = vcombine.high %v15140_v7, %v15140_v7 }
  0x7d   : > { %12892 = vmatpush3.bf16.msra.mxu1 %v14083_v10  ;;  %v2244_v10 = vrot.slane %v2222_v6, %v14990_v42  ;;  %v14189_v6 = vld [vmem:[%s14949_s23 + $0x6a0] sm:$0xff]  }
  0x7e   : > { %12893 = vmatprep.subr.bf16.mxu1 %v14085_v12  ;;  %v14139_v12 = vld [vmem:[%s14949_s23 + $0x400] sm:$0xff]  }
  0x7f   : > { %12872 = vmatpush3.bf16.msra.mxu0 %v14086_v13  ;;  %v14140_v13 = vld [vmem:[%s14949_s23 + $0x480] sm:$0xff]  }
  0x80   : > { %12873 = vmatprep.subr.bf16.mxu0 %v14088_v15  ;;  %v2230_v15 = vrot.slane %v2214_v2, %v14990_v42  ;;  %v14185_v2 = vld [vmem:[%s14949_s23 + $0x6a8] sm:$0xff]  }
  0x81   : > { %12894 = vmatpush3.bf16.msra.mxu1 %v14087_v14  ;;  %v2254_v14 = vcombine.high %v2244_v10, %v2244_v10 }
  0x82   : > { %12895 = vmatprep.subr.bf16.mxu1 %v14089_v16  ;;  %v14141_v16 = vld [vmem:[%s14949_s23 + $0x578] sm:$0xff]  }
  0x83   : > { %12874 = vmatpush3.bf16.msra.mxu0 %v14090_v17  ;;  %v14142_v17 = vld [vmem:[%s14949_s23 + $0x5f8] sm:$0xff]  }
  0x84   : > { %12875 = vmatprep.subr.bf16.mxu0 %v14092_v19  ;;  %v14143_v19 = vld [vmem:[%s14949_s23 + $0x538] sm:$0xff]  }
  0x85   : > { %12896 = vmatpush3.bf16.msra.mxu1 %v14091_v18  ;;  %v2251_v18 = vrot.slane %v2223_v11, %v14990_v42  ;;  %v14194_v11 = vld [vmem:[%s14949_s23 + $0x650] sm:$0xff]  }
  0x86   : > { %12897 = vmatprep.subr.bf16.mxu1 %v14093_v20  ;;  %v14144_v20 = vld [vmem:[%s14949_s23 + $0x5b8] sm:$0xff]  }
  0x87   : > { %12876 = vmatpush3.bf16.msra.mxu0 %v14094_v21  ;;  %v2252_v21 = vcombine.high %v2230_v15, %v2230_v15 }
  0x88   : > { %12877 = vmatprep.subr.bf16.mxu0 %v14096_v23  ;;  %v14146_v23 = vld [vmem:[%s14949_s23 + $0x5f0] sm:$0xff]  }
  0x89   : > { %12898 = vmatpush3.bf16.msra.mxu1 %v14095_v22  ;;  %v14145_v22 = vld [vmem:[%s14949_s23 + $0x570] sm:$0xff]  }
  0x8a   : > { %12899 = vmatprep.subr.bf16.mxu1 %v14097_v24  ;;  %v2255_v24 = vcombine.high %v2251_v18, %v2251_v18 }
  0x8b   : > { %12878 = vmatpush3.bf16.msra.mxu0 %v14098_v25  ;;  %v14147_v25 = vld [vmem:[%s14949_s23 + $0x530] sm:$0xff]  }
  0x8c   : > { %12879 = vmatprep.subr.bf16.mxu0 %v14100_v27  ;;  %v14149_v27 = vld [vmem:[%s14949_s23 + $0x568] sm:$0xff]  }
  0x8d   : > { %12900 = vmatpush3.bf16.msra.mxu1 %v14099_v26  ;;  %v14148_v26 = vld [vmem:[%s14949_s23 + $0x5b0] sm:$0xff]  }
  0x8e   : > { %12901 = vmatprep.subr.bf16.mxu1 %v14101_v28  ;;  %v14150_v28 = vld [vmem:[%s14949_s23 + $0x5e8] sm:$0xff]  }
  0x8f   : > { %12880 = vmatpush3.bf16.msra.mxu0 %v14102_v29  ;;  %v14151_v29 = vld [vmem:[%s14949_s23 + $0x528] sm:$0xff]  }
  0x90   : > { %12881 = vmatprep.subr.bf16.mxu0 %v14104_v31  ;;  %v14153_v31 = vld [vmem:[%s14949_s23 + $0x560] sm:$0xff]  }
  0x91   : > { %12902 = vmatpush3.bf16.msra.mxu1 %v14103_v30  ;;  %v14152_v30 = vld [vmem:[%s14949_s23 + $0x5a8] sm:$0xff]  }
  0x92   : > { %12903 = vmatprep.subr.bf16.mxu1 %v14105_v32  ;;  %v14154_v32 = vld [vmem:[%s14949_s23 + $0x5e0] sm:$0xff]  }
  0x93   : > { %12882 = vmatpush3.bf16.msra.mxu0 %v14106_v33  ;;  %v14155_v33 = vld [vmem:[%s14949_s23 + $0x520] sm:$0xff]  }
  0x94   : > { %12911 = vmatprep.subr.bf16.mxu0 %v14109_v37  ;;  %v14158_v37 = vld [vmem:[%s14949_s23 + $0x5d8] sm:$0xff]  }
  0x95   : > { %12904 = vmatpush3.bf16.msra.mxu1 %v14107_v35  ;;  %v14156_v35 = vld [vmem:[%s14949_s23 + $0x5a0] sm:$0xff]  }
  0x96   : > { %7894 = vmatmul.mubr.bf16.vlgmr.msra.gmra.mxu0 %v2188_v36  ;;  %12933 = vmatprep.subr.bf16.mxu1 %v14110_v38  ;;  %v14157_v36 = vld [vmem:[%s14949_s23 + $0x558] sm:$0xff]  }
  0x97   : > { %12912 = vmatpush3.bf16.msra.mxu0 %v14111_v39  ;;  %7973 = vmatprep.mubr.bf16.mxu0 %v2244_v10  ;;  %v14159_v38 = vld [vmem:[%s14949_s23 + $0x518] sm:$0xff]  }
  0x98   : > { %7934 = vmatmul.mubr.bf16.vlgmr.msra.gmra.mxu1 %v2204_v41  ;;  %12913 = vmatprep.subr.bf16.mxu0 %v14113_v43  ;;  %v14160_v39 = vld [vmem:[%s14949_s23 + $0x598] sm:$0xff]   ;;  %v14162_v41 = vld [vmem:[%s14949_s23 + $0x5d0] sm:$0xff]  }
  0x99   : > { %12934 = vmatpush3.bf16.msra.mxu1 %v14112_v40  ;;  %8013 = vmatprep.mubr.bf16.mxu1 %v2254_v14  ;;  %v14161_v40 = vld [vmem:[%s14949_s23 + $0x550] sm:$0xff]   ;;  %v14193_v10 = vld [vmem:[%s14949_s23 + $0x698] sm:$0xff]  }
  0x9a   : > { %12935 = vmatprep.subr.bf16.mxu1 %v14114_v44  ;;  %v14163_v43 = vld [vmem:[%s14949_s23 + $0x510] sm:$0xff]  }
  0x9b   : > { %12914 = vmatpush3.bf16.msra.mxu0 %v14115_v45  ;;  %v14164_v44 = vld [vmem:[%s14949_s23 + $0x590] sm:$0xff]   ;;  %v14165_v45 = vld [vmem:[%s14949_s23 + $0x548] sm:$0xff]  }
  0x9c   : > { %12915 = vmatprep.subr.bf16.mxu0 %v14117_v47  ;;  %v14167_v47 = vld [vmem:[%s14949_s23 + $0x508] sm:$0xff]   ;;  %v14197_v14 = vld [vmem:[%s14949_s23 + $0x690] sm:$0xff]  }
  0x9d   : > { %12936 = vmatpush3.bf16.msra.mxu1 %v14116_v46  ;;  %v14166_v46 = vld [vmem:[%s14949_s23 + $0x5c8] sm:$0xff]  }
  0x9e   : > { %12937 = vmatprep.subr.bf16.mxu1 %v14118_v48  ;;  %v14168_v48 = vld [vmem:[%s14949_s23 + $0x588] sm:$0xff]  }
  0x9f   : > { %12916 = vmatpush3.bf16.msra.mxu0 %v14119_v49  ;;  %v14169_v49 = vld [vmem:[%s14949_s23 + $0x540] sm:$0xff]  }
  0xa0   : > { %12917 = vmatprep.subr.bf16.mxu0 %v14121_v51  ;;  %v14171_v51 = vld [vmem:[%s14949_s23 + $0x500] sm:$0xff]  }
  0xa1   : > { %12938 = vmatpush3.bf16.msra.mxu1 %v14120_v50  ;;  %v14170_v50 = vld [vmem:[%s14949_s23 + $0x5c0] sm:$0xff]  }
  0xa2   : > { %12939 = vmatprep.subr.bf16.mxu1 %v14122_v52  ;;  %v14172_v52 = vld [vmem:[%s14949_s23 + $0x580] sm:$0xff]  }
  0xa3   : > { %12918 = vmatpush3.bf16.msra.mxu0 %v14123_v53  ;;  %v2237_v53 = vrot.slane %v15140_v7, %v14990_v42  ;;  %v14190_v7 = vld [vmem:[%s14949_s23 + $0x658] sm:$0xff]  }
  0xa4   : > { %12919 = vmatprep.subr.bf16.mxu0 %v14125_v55  ;;  %v14175_v55 = vld [vmem:[%s14949_s23 + $0x6f8] sm:$0xff]  }
  0xa5   : > { %12940 = vmatpush3.bf16.msra.mxu1 %v14124_v54  ;;  %v14174_v54 = vld [vmem:[%s14949_s23 + $0x678] sm:$0xff]  }
  0xa6   : > { %12941 = vmatprep.subr.bf16.mxu1 %v14126_v56  ;;  %v14176_v56 = vld [vmem:[%s14949_s23 + $0x638] sm:$0xff]  }
  0xa7   : > { %12920 = vmatpush3.bf16.msra.mxu0 %v14127_v57  ;;  %v14177_v57 = vld [vmem:[%s14949_s23 + $0x6b8] sm:$0xff]  }
  0xa8   : > { %12921 = vmatprep.subr.bf16.mxu0 %v14129_v59  ;;  %v14178_v59 = vld [vmem:[%s14949_s23 + $0x670] sm:$0xff]  }
  0xa9   : > { %12942 = vmatpush3.bf16.msra.mxu1 %v14128_v58  ;;  %v2253_v58 = vcombine.high %v2237_v53, %v2237_v53 }
  0xaa   : > { %12943 = vmatprep.subr.bf16.mxu1 %v14130_v60  ;;  %v14179_v60 = vld [vmem:[%s14949_s23 + $0x6f0] sm:$0xff]  }
  0xab   : > { %12922 = vmatpush3.bf16.msra.mxu0 %v14131_v61  ;;  %v14180_v61 = vld [vmem:[%s14949_s23 + $0x630] sm:$0xff]  }
  0xac   : > { %12923 = vmatprep.subr.bf16.mxu0 %v14133_v63  ;;  %v14182_v63 = vld [vmem:[%s14949_s23 + $0x668] sm:$0xff]  }
  0xad   : > { %12944 = vmatpush3.bf16.msra.mxu1 %v14132_v62  ;;  %v14181_v62 = vld [vmem:[%s14949_s23 + $0x6b0] sm:$0xff]  }
  0xae   : > { %12945 = vmatprep.subr.bf16.mxu1 %v14134_v1  ;;  %v14184_v1 = vld [vmem:[%s14949_s23 + $0x628] sm:$0xff]  }
  0xaf   : > { %12924 = vmatpush3.bf16.msra.mxu0 %v14135_v4  ;;  %v14187_v4 = vld [vmem:[%s14949_s23 + $0x6e0] sm:$0xff]  }
  0xb0   : > { %12925 = vmatprep.subr.bf16.mxu0 %v14137_v8  ;;  %v14191_v8 = vld [vmem:[%s14949_s23 + $0x6d8] sm:$0xff]  }
  0xb1   : > { %12946 = vmatpush3.bf16.msra.mxu1 %v14136_v5  ;;  %v14188_v5 = vld [vmem:[%s14949_s23 + $0x620] sm:$0xff]  }
  0xb2   : > { %12947 = vmatprep.subr.bf16.mxu1 %v14138_v9  ;;  %v14192_v9 = vld [vmem:[%s14949_s23 + $0x618] sm:$0xff]  }
  0xb3   : > { %12926 = vmatpush3.bf16.msra.mxu0 %v14139_v12  ;;  %v14195_v12 = vld [vmem:[%s14949_s23 + $0x6d0] sm:$0xff]  }
  0xb4   : > { %12955 = vmatprep.subr.bf16.mxu0 %v14141_v16  ;;  %v14199_v16 = vld [vmem:[%s14949_s23 + $0x6c8] sm:$0xff]  }
  0xb5   : > { %12948 = vmatpush3.bf16.msra.mxu1 %v14140_v13  ;;  %v14196_v13 = vld [vmem:[%s14949_s23 + $0x610] sm:$0xff]  }
  0xb6   : > { %7974 = vmatmul.mubr.bf16.vlgmr.msra.gmra.mxu0 %v2230_v15  ;;  %12977 = vmatprep.subr.bf16.mxu1 %v14142_v17  ;;  %v14198_v15 = vld [vmem:[%s14949_s23 + $0x648] sm:$0xff]   ;;  %v486_v17 = vld [vmem:[%s14944_s19 + $0x18] sm:$0xff] }
  0xb7   : > { %12956 = vmatpush3.bf16.msra.mxu0 %v14143_v19  ;;  %8053 = vmatprep.mubr.bf16.mxu0 %v2251_v18  ;;  %v14200_v18 = vld [vmem:[%s14949_s23 + $0x608] sm:$0xff]   ;;  %v2263_v19 = vrot.slane %v486_v17, %v14990_v42 }
  0xb8   : > { %8014 = vmatmul.mubr.bf16.vlgmr.msra.gmra.mxu1 %v2252_v21  ;;  %12957 = vmatprep.subr.bf16.mxu0 %v14145_v22  ;;  %v14201_v21 = vld [vmem:[%s14949_s23 + $0x688] sm:$0xff]   ;;  %v14202_v22 = vld [vmem:[%s14949_s23 + $0x640] sm:$0xff]  }
  0xb9   : > { %12978 = vmatpush3.bf16.msra.mxu1 %v14144_v20  ;;  %8093 = vmatprep.mubr.bf16.mxu1 %v2255_v24  ;;  %v2256_v20 = vcombine.high %v486_v17, %v486_v17  ;;  %v14239_v17 = vld [vmem:[%s14949_s23 + $0x878] sm:$0xff]  }
  0xba   : > { %12979 = vmatprep.subr.bf16.mxu1 %v14146_v23  ;;  %v2271_v23 = vcombine.high %v2263_v19, %v2263_v19 }
  0xbb   : > { %12958 = vmatpush3.bf16.msra.mxu0 %v14147_v25  ;;  %v15217_v24 = vrot.slane %v2256_v20, %v14990_v42  ;;  %v14203_v25 = vld [vmem:[%s14949_s23 + $0x6c0] sm:$0xff]   ;;  %v14242_v20 = vld [vmem:[%s14949_s23 + $0x8b8] sm:$0xff]  }
  0xbc   : > { %12959 = vmatprep.subr.bf16.mxu0 %v14149_v27  ;;  %v2293_v27 = vrot.slane %v2271_v23, %v14990_v42  ;;  %v14244_v23 = vld [vmem:[%s14949_s23 + $0x8f0] sm:$0xff]  }
  0xbd   : > { %12980 = vmatpush3.bf16.msra.mxu1 %v14148_v26  ;;  %v14204_v26 = vld [vmem:[%s14949_s23 + $0x600] sm:$0xff]  }
  0xbe   : > { %12981 = vmatprep.subr.bf16.mxu1 %v14150_v28  ;;  %v2272_v28 = vcombine.high %v15217_v24, %v15217_v24 }
  0xbf   : > { %12960 = vmatpush3.bf16.msra.mxu0 %v14151_v29  ;;  %v14205_v29 = vld [vmem:[%s14949_s23 + $0x680] sm:$0xff]  }
  0xc0   : > { %12961 = vmatprep.subr.bf16.mxu0 %v14153_v31  ;;  %v2279_v31 = vrot.slane %v2263_v19, %v14990_v42  ;;  %v14241_v19 = vld [vmem:[%s14949_s23 + $0x838] sm:$0xff]  }
  0xc1   : > { %12982 = vmatpush3.bf16.msra.mxu1 %v14152_v30  ;;  %v2303_v30 = vcombine.high %v2293_v27, %v2293_v27 }
  0xc2   : > { %12983 = vmatprep.subr.bf16.mxu1 %v14154_v32  ;;  %v14206_v32 = vld [vmem:[%s14949_s23 + $0x778] sm:$0xff]  }
  0xc3   : > { %12962 = vmatpush3.bf16.msra.mxu0 %v14155_v33  ;;  %v14207_v33 = vld [vmem:[%s14949_s23 + $0x7f8] sm:$0xff]  }
  0xc4   : > { %12963 = vmatprep.subr.bf16.mxu0 %v14157_v36  ;;  %v14208_v36 = vld [vmem:[%s14949_s23 + $0x738] sm:$0xff]  }
  0xc5   : > { %12984 = vmatpush3.bf16.msra.mxu1 %v14156_v35  ;;  %v2300_v35 = vrot.slane %v2272_v28, %v14990_v42 }
  0xc6   : > { %12985 = vmatprep.subr.bf16.mxu1 %v14158_v37  ;;  %v14209_v37 = vld [vmem:[%s14949_s23 + $0x7b8] sm:$0xff]  }
  0xc7   : > { %12964 = vmatpush3.bf16.msra.mxu0 %v14159_v38  ;;  %v2301_v38 = vcombine.high %v2279_v31, %v2279_v31 }
  0xc8   : > { %12965 = vmatprep.subr.bf16.mxu0 %v14161_v40  ;;  %v14211_v40 = vld [vmem:[%s14949_s23 + $0x7f0] sm:$0xff]  }
  0xc9   : > { %12986 = vmatpush3.bf16.msra.mxu1 %v14160_v39  ;;  %v14210_v39 = vld [vmem:[%s14949_s23 + $0x770] sm:$0xff]  }
  0xca   : > { %12987 = vmatprep.subr.bf16.mxu1 %v14162_v41  ;;  %v2304_v41 = vcombine.high %v2300_v35, %v2300_v35 }
  0xcb   : > { %12966 = vmatpush3.bf16.msra.mxu0 %v14163_v43 }
  0xcc   : > { %12967 = vmatprep.subr.bf16.mxu0 %v14165_v45  ;;  %v14213_v45 = vld [vmem:[%s14949_s23 + $0x7b0] sm:$0xff]  }
  0xcd   : > { %12988 = vmatpush3.bf16.msra.mxu1 %v14164_v44  ;;  %v14212_v44 = vld [vmem:[%s14949_s23 + $0x730] sm:$0xff]  }
  0xce   : > { %12989 = vmatprep.subr.bf16.mxu1 %v14166_v46 }
  0xcf   : > { %12968 = vmatpush3.bf16.msra.mxu0 %v14167_v47 }
  0xd0   : > { %12969 = vmatprep.subr.bf16.mxu0 %v14169_v49 }
  0xd1   : > { %12990 = vmatpush3.bf16.msra.mxu1 %v14168_v48  ;;  %v14214_v48 = vld [vmem:[%s14949_s23 + $0x768] sm:$0xff]  }
  0xd2   : > { %12991 = vmatprep.subr.bf16.mxu1 %v14170_v50  ;;  %v14215_v50 = vld [vmem:[%s14949_s23 + $0x7e8] sm:$0xff]  }
  0xd3   : > { %12970 = vmatpush3.bf16.msra.mxu0 %v14171_v51 }
  0xd4   : > { %12999 = vmatprep.subr.bf16.mxu0 %v14174_v54 }
  0xd5   : > { %12992 = vmatpush3.bf16.msra.mxu1 %v14172_v52 }
  0xd6   : > { %8054 = vmatmul.mubr.bf16.vlgmr.msra.gmra.mxu0 %v2237_v53  ;;  %13021 = vmatprep.subr.bf16.mxu1 %v14175_v55  ;;  %v14216_v53 = vld [vmem:[%s14949_s23 + $0x728] sm:$0xff]  }
  0xd7   : > { %13000 = vmatpush3.bf16.msra.mxu0 %v14176_v56  ;;  %8133 = vmatprep.mubr.bf16.mxu0 %v2293_v27  ;;  %v14217_v55 = vld [vmem:[%s14949_s23 + $0x7a8] sm:$0xff]  }
  0xd8   : > { %8094 = vmatmul.mubr.bf16.vlgmr.msra.gmra.mxu1 %v2253_v58  ;;  %13001 = vmatprep.subr.bf16.mxu0 %v14178_v59  ;;  %v14218_v58 = vld [vmem:[%s14949_s23 + $0x760] sm:$0xff]  }
  0xd9   : > { %13022 = vmatpush3.bf16.msra.mxu1 %v14177_v57  ;;  %8173 = vmatprep.mubr.bf16.mxu1 %v2303_v30 }
  0xda   : > { %13023 = vmatprep.subr.bf16.mxu1 %v14179_v60  ;;  %v14219_v60 = vld [vmem:[%s14949_s23 + $0x7e0] sm:$0xff]  }
  0xdb   : > { %13002 = vmatpush3.bf16.msra.mxu0 %v14180_v61 }
  0xdc   : > { %13003 = vmatprep.subr.bf16.mxu0 %v14182_v63  ;;  %v14221_v63 = vld [vmem:[%s14949_s23 + $0x7a0] sm:$0xff]  }
  0xdd   : > { %13024 = vmatpush3.bf16.msra.mxu1 %v14181_v62  ;;  %v14220_v62 = vld [vmem:[%s14949_s23 + $0x720] sm:$0xff]  }
  0xde   : > { %13025 = vmatprep.subr.bf16.mxu1 %v14183_v0  ;;  %v14222_v0 = vld [vmem:[%s14949_s23 + $0x758] sm:$0xff]  }
  0xdf   : > { %13004 = vmatpush3.bf16.msra.mxu0 %v14184_v1  ;;  %v14223_v1 = vld [vmem:[%s14949_s23 + $0x7d8] sm:$0xff]  }
  0xe0   : > { %13005 = vmatprep.subr.bf16.mxu0 %v14186_v3  ;;  %v14225_v3 = vld [vmem:[%s14949_s23 + $0x798] sm:$0xff]  }
  0xe1   : > { %13026 = vmatpush3.bf16.msra.mxu1 %v14185_v2  ;;  %v14224_v2 = vld [vmem:[%s14949_s23 + $0x718] sm:$0xff]  }
  0xe2   : > { %13027 = vmatprep.subr.bf16.mxu1 %v14187_v4  ;;  %v14226_v4 = vld [vmem:[%s14949_s23 + $0x750] sm:$0xff]  }
  0xe3   : > { %13006 = vmatpush3.bf16.msra.mxu0 %v14188_v5  ;;  %v14227_v5 = vld [vmem:[%s14949_s23 + $0x7d0] sm:$0xff]  }
  0xe4   : > { %13007 = vmatprep.subr.bf16.mxu0 %v14190_v7  ;;  %v14229_v7 = vld [vmem:[%s14949_s23 + $0x790] sm:$0xff]  }
  0xe5   : > { %13028 = vmatpush3.bf16.msra.mxu1 %v14189_v6  ;;  %v14228_v6 = vld [vmem:[%s14949_s23 + $0x710] sm:$0xff]  }
  0xe6   : > { %13029 = vmatprep.subr.bf16.mxu1 %v14191_v8  ;;  %v14230_v8 = vld [vmem:[%s14949_s23 + $0x748] sm:$0xff]  }
  0xe7   : > { %13008 = vmatpush3.bf16.msra.mxu0 %v14192_v9  ;;  %v14231_v9 = vld [vmem:[%s14949_s23 + $0x7c8] sm:$0xff]  }
  0xe8   : > { %13009 = vmatprep.subr.bf16.mxu0 %v14194_v11  ;;  %v14233_v11 = vld [vmem:[%s14949_s23 + $0x788] sm:$0xff]  }
  0xe9   : > { %13030 = vmatpush3.bf16.msra.mxu1 %v14193_v10  ;;  %v14232_v10 = vld [vmem:[%s14949_s23 + $0x708] sm:$0xff]  }
  0xea   : > { %13031 = vmatprep.subr.bf16.mxu1 %v14195_v12  ;;  %v14234_v12 = vld [vmem:[%s14949_s23 + $0x740] sm:$0xff]  }
  0xeb   : > { %13010 = vmatpush3.bf16.msra.mxu0 %v14196_v13  ;;  %v14235_v13 = vld [vmem:[%s14949_s23 + $0x7c0] sm:$0xff]  }
  0xec   : > { %13011 = vmatprep.subr.bf16.mxu0 %v14198_v15  ;;  %v14237_v15 = vld [vmem:[%s14949_s23 + $0x780] sm:$0xff]  }
  0xed   : > { %13032 = vmatpush3.bf16.msra.mxu1 %v14197_v14  ;;  %v14236_v14 = vld [vmem:[%s14949_s23 + $0x700] sm:$0xff]  }
  0xee   : > { %13033 = vmatprep.subr.bf16.mxu1 %v14199_v16  ;;  %v2286_v16 = vrot.slane %v15217_v24, %v14990_v42  ;;  %v14245_v24 = vld [vmem:[%s14949_s23 + $0x830] sm:$0xff]  }
  0xef   : > { %13012 = vmatpush3.bf16.msra.mxu0 %v14200_v18  ;;  %v14240_v18 = vld [vmem:[%s14949_s23 + $0x8f8] sm:$0xff]  }
  0xf0   : > { %13013 = vmatprep.subr.bf16.mxu0 %v14202_v22  ;;  %v14243_v22 = vld [vmem:[%s14949_s23 + $0x870] sm:$0xff]  }
  0xf1   : > { %13034 = vmatpush3.bf16.msra.mxu1 %v14201_v21  ;;  %v2302_v21 = vcombine.high %v2286_v16, %v2286_v16 }
  0xf2   : > { %13035 = vmatprep.subr.bf16.mxu1 %v14203_v25 }
  0xf3   : > { %13014 = vmatpush3.bf16.msra.mxu0 %v14204_v26  ;;  %v14246_v26 = vld [vmem:[%s14949_s23 + $0x8b0] sm:$0xff]  }
  0xf4   : > { %13043 = vmatprep.subr.bf16.mxu0 %v14206_v32 }
  0xf5   : > { %13036 = vmatpush3.bf16.msra.mxu1 %v14205_v29  ;;  %v14247_v29 = vld [vmem:[%s14949_s23 + $0x868] sm:$0xff]  }
  0xf6   : > { %v12751_v43 = vpop.f32.mrf.mxu0  ;;  %8134 = vmatmul.mubr.bf16.vlgmr.msra.gmra.mxu0 %v2279_v31  ;;  %13065 = vmatprep.subr.bf16.mxu1 %v14207_v33  ;;  %v14248_v31 = vld [vmem:[%s14949_s23 + $0x8e8] sm:$0xff]  }
  0xf7   : > { %13044 = vmatpush3.bf16.msra.mxu0 %v14208_v36  ;;  %8213 = vmatprep.mubr.bf16.mxu0 %v2300_v35  ;;  %v12773_v46 = vpop.f32.mrf.mxu1  ;;  %v14249_v35 = vld [vmem:[%s14949_s23 + $0x828] sm:$0xff]  }
  0xf8   : > { %8174 = vmatmul.mubr.bf16.vlgmr.msra.gmra.mxu1 %v2301_v38  ;;  %v12752_v47 = vpop.f32.mrf.mxu0  ;;  %13045 = vmatprep.subr.bf16.mxu0 %v14210_v39  ;;  %v14250_v38 = vld [vmem:[%s14949_s23 + $0x8a8] sm:$0xff]  }
  0xf9   : > { %13066 = vmatpush3.bf16.msra.mxu1 %v14209_v37  ;;  %v12753_v49 = vadd.f32 %v12752_v47, %v12751_v43  ;;  %8253 = vmatprep.mubr.bf16.mxu1 %v2304_v41  ;;  %v12774_v51 = vpop.f32.mrf.mxu1  ;;  %v14251_v41 = vld [vmem:[%s14949_s23 + $0x860] sm:$0xff]  }
  0xfa   : > { %v12754_v52 = vpop.f32.mrf.mxu0  ;;  %13067 = vmatprep.subr.bf16.mxu1 %v14211_v40  ;;  %v12775_v54 = vadd.f32 %v12774_v51, %v12773_v46  ;;  %v14253_v46 = vld [vmem:[%s14949_s23 + $0x820] sm:$0xff]   ;;  %v14258_v51 = vld [vmem:[%s14949_s23 + $0x898] sm:$0xff]  }
  0xfb   : > { %13046 = vmatpush3.bf16.msra.mxu0 %v14212_v44  ;;  %v12776_v56 = vpop.f32.mrf.mxu1  ;;  %v14252_v44 = vld [vmem:[%s14949_s23 + $0x8e0] sm:$0xff]   ;;  %v14259_v52 = vld [vmem:[%s14949_s23 + $0x850] sm:$0xff]  }
  0xfc   : > { %v12755_v57 = vpop.f32.mrf.mxu0  ;;  %13047 = vmatprep.subr.bf16.mxu0 %v14214_v48  ;;  %v15240_v59 = vadd.f32 %v12775_v54, %v12753_v49  ;;  %v14254_v47 = vld [vmem:[%s14949_s23 + $0x8a0] sm:$0xff]   ;;  %v14255_v48 = vld [vmem:[%s14949_s23 + $0x858] sm:$0xff]   ;;  %v14261_v54 = vld [vmem:[%s14949_s23 + $0x810] sm:$0xff]  }
  0xfd   : > { %13068 = vmatpush3.bf16.msra.mxu1 %v14213_v45  ;;  %v12777_v61 = vpop.f32.mrf.mxu1  ;;  %v14256_v49 = vld [vmem:[%s14949_s23 + $0x8d8] sm:$0xff]   ;;  %v14263_v56 = vld [vmem:[%s14949_s23 + $0x848] sm:$0xff]  }
  0xfe   : > { %13069 = vmatprep.subr.bf16.mxu1 %v14215_v50  ;;  %v14257_v50 = vld [vmem:[%s14949_s23 + $0x818] sm:$0xff]   ;;  %v14264_v57 = vld [vmem:[%s14949_s23 + $0x8c8] sm:$0xff]  }
  0xff   : > { %13048 = vmatpush3.bf16.msra.mxu0 %v14216_v53  ;;  %v14260_v53 = vld [vmem:[%s14949_s23 + $0x8d0] sm:$0xff]  }
 0x100   : > { %13049 = vmatprep.subr.bf16.mxu0 %v14218_v58  ;;  %v487_v58 = vld [vmem:[%s14944_s19 + $0x20] sm:$0xff] }
 0x101   : > { %13070 = vmatpush3.bf16.msra.mxu1 %v14217_v55  ;;  %v14262_v55 = vld [vmem:[%s14949_s23 + $0x890] sm:$0xff]   ;;  %v2305_v61 = vcombine.high %v487_v58, %v487_v58 }
 0x102   : > { %13071 = vmatprep.subr.bf16.mxu1 %v14219_v60  ;;  %v2312_v60 = vrot.slane %v487_v58, %v14990_v42 }
 0x103   : > { %13050 = vmatpush3.bf16.msra.mxu0 %v14220_v62  ;;  %v14266_v62 = vld [vmem:[%s14949_s23 + $0x888] sm:$0xff]  }
 0x104   : > { %13051 = vmatprep.subr.bf16.mxu0 %v14222_v0  ;;  %v2320_v0 = vcombine.high %v2312_v60, %v2312_v60 }
 0x105   : > { %13072 = vmatpush3.bf16.msra.mxu1 %v14221_v63  ;;  %v14267_v63 = vld [vmem:[%s14949_s23 + $0x840] sm:$0xff]  }
 0x106   : > { %13073 = vmatprep.subr.bf16.mxu1 %v14223_v1  ;;  %v15298_v1 = vrot.slane %v2305_v61, %v14990_v42  ;;  %v14306_v61 = vld [vmem:[%s14949_s23 + $0xa38] sm:$0xff]  }
 0x107   : > { %13052 = vmatpush3.bf16.msra.mxu0 %v14224_v2  ;;  %v14268_v2 = vld [vmem:[%s14949_s23 + $0x8c0] sm:$0xff]  }
 0x108   : > { %13053 = vmatprep.subr.bf16.mxu0 %v14226_v4  ;;  %v2342_v4 = vrot.slane %v2320_v0, %v14990_v42  ;;  %v2335_v58 = vrot.slane %v15298_v1, %v14990_v42  ;;  %v14308_v0 = vld [vmem:[%s14949_s23 + $0xa70] sm:$0xff]  }
 0x109   : > { %13074 = vmatpush3.bf16.msra.mxu1 %v14225_v3  ;;  %v14269_v3 = vld [vmem:[%s14949_s23 + $0x800] sm:$0xff]  }
 0x10a   : > { %13075 = vmatprep.subr.bf16.mxu1 %v14227_v5  ;;  %v2321_v5 = vcombine.high %v15298_v1, %v15298_v1  ;;  %v14310_v1 = vld [vmem:[%s14949_s23 + $0xa30] sm:$0xff]  }
 0x10b   : > { %13054 = vmatpush3.bf16.msra.mxu0 %v14228_v6  ;;  %v14270_v6 = vld [vmem:[%s14949_s23 + $0x880] sm:$0xff]  }
 0x10c   : > { %13055 = vmatprep.subr.bf16.mxu0 %v14230_v8  ;;  %v2328_v8 = vrot.slane %v2312_v60, %v14990_v42  ;;  %v14305_v60 = vld [vmem:[%s14949_s23 + $0xaf8] sm:$0xff]  }
 0x10d   : > { %13076 = vmatpush3.bf16.msra.mxu1 %v14229_v7  ;;  %v2352_v7 = vcombine.high %v2342_v4, %v2342_v4 }
 0x10e   : > { %13077 = vmatprep.subr.bf16.mxu1 %v14231_v9  ;;  %v14271_v9 = vld [vmem:[%s14949_s23 + $0x978] sm:$0xff]  }
 0x10f   : > { %13056 = vmatpush3.bf16.msra.mxu0 %v14232_v10  ;;  %v14272_v10 = vld [vmem:[%s14949_s23 + $0x9f8] sm:$0xff]  }
 0x110   : > { %13057 = vmatprep.subr.bf16.mxu0 %v14234_v12  ;;  %v14273_v12 = vld [vmem:[%s14949_s23 + $0x938] sm:$0xff]  }
 0x111   : > { %13078 = vmatpush3.bf16.msra.mxu1 %v14233_v11  ;;  %v2349_v11 = vrot.slane %v2321_v5, %v14990_v42 }
 0x112   : > { %13079 = vmatprep.subr.bf16.mxu1 %v14235_v13  ;;  %v14274_v13 = vld [vmem:[%s14949_s23 + $0x9b8] sm:$0xff]  }
 0x113   : > { %13058 = vmatpush3.bf16.msra.mxu0 %v14236_v14  ;;  %v2350_v14 = vcombine.high %v2328_v8, %v2328_v8 }
 0x114   : > { %13087 = vmatprep.subr.bf16.mxu0 %v14239_v17  ;;  %v2353_v17 = vcombine.high %v2349_v11, %v2349_v11 }
 0x115   : > { %13080 = vmatpush3.bf16.msra.mxu1 %v14237_v15  ;;  %v14275_v15 = vld [vmem:[%s14949_s23 + $0x970] sm:$0xff]  }
 0x116   : > { %v12795_v25 = vpop.f32.mrf.mxu0  ;;  %8214 = vmatmul.mubr.bf16.vlgmr.msra.gmra.mxu0 %v2286_v16  ;;  %13109 = vmatprep.subr.bf16.mxu1 %v14240_v18  ;;  %v14276_v16 = vld [vmem:[%s14949_s23 + $0x9f0] sm:$0xff]  }
 0x117   : > { %13088 = vmatpush3.bf16.msra.mxu0 %v14241_v19  ;;  %v12817_v27 = vpop.f32.mrf.mxu1  ;;  %8293 = vmatprep.mubr.bf16.mxu0 %v2342_v4  ;;  %v14277_v19 = vld [vmem:[%s14949_s23 + $0x930] sm:$0xff]  }
 0x118   : > { %8254 = vmatmul.mubr.bf16.vlgmr.msra.gmra.mxu1 %v2302_v21  ;;  %v12796_v28 = vpop.f32.mrf.mxu0  ;;  %13089 = vmatprep.subr.bf16.mxu0 %v14243_v22  ;;  %v14311_v4 = vld [vmem:[%s14949_s23 + $0xab0] sm:$0xff]  }
 0x119   : > { %13110 = vmatpush3.bf16.msra.mxu1 %v14242_v20  ;;  %v12797_v30 = vadd.f32 %v12796_v28, %v12795_v25  ;;  %v12818_v32 = vpop.f32.mrf.mxu1  ;;  %8333 = vmatprep.mubr.bf16.mxu1 %v2352_v7  ;;  %v14278_v20 = vld [vmem:[%s14949_s23 + $0x9b0] sm:$0xff]   ;;  %v14281_v28 = vld [vmem:[%s14949_s23 + $0x928] sm:$0xff]  }
 0x11a   : > { %v12798_v33 = vpop.f32.mrf.mxu0  ;;  %13111 = vmatprep.subr.bf16.mxu1 %v14244_v23  ;;  %v12819_v37 = vadd.f32 %v12818_v32, %v12817_v27  ;;  %v14279_v23 = vld [vmem:[%s14949_s23 + $0x968] sm:$0xff]  }
 0x11b   : > { %v7736_v36 = vadd.f32 %v12797_v30, %v15240_v59  ;;  %13090 = vmatpush3.bf16.msra.mxu0 %v14245_v24  ;;  %v12820_v39 = vpop.f32.mrf.mxu1  ;;  %v14265_v59 = vld [vmem:[%s14949_s23 + $0x808] sm:$0xff]  }
 0x11c   : > { %v12799_v40 = vpop.f32.mrf.mxu0  ;;  %13091 = vmatprep.subr.bf16.mxu0 %v14247_v29  ;;  %v14280_v24 = vld [vmem:[%s14949_s23 + $0x9e8] sm:$0xff]   ;;  %v14285_v39 = vld [vmem:[%s14949_s23 + $0x920] sm:$0xff]  }
 0x11d   : > { %v15277_v43 = vadd.f32 %v12819_v37, %v7736_v36  ;;  %13112 = vmatpush3.bf16.msra.mxu1 %v14246_v26  ;;  %v12821_v45 = vpop.f32.mrf.mxu1  ;;  %v14284_v37 = vld [vmem:[%s14949_s23 + $0x9e0] sm:$0xff]   ;;  %v14312_v7 = vld [vmem:[%s14949_s23 + $0xa68] sm:$0xff]  }
 0x11e   : > { %13113 = vmatprep.subr.bf16.mxu1 %v14248_v31  ;;  %v14282_v31 = vld [vmem:[%s14949_s23 + $0x9a8] sm:$0xff]   ;;  %v14286_v40 = vld [vmem:[%s14949_s23 + $0x9a0] sm:$0xff]   ;;  %v14290_v45 = vld [vmem:[%s14949_s23 + $0x998] sm:$0xff]  }
 0x11f   : > { %13092 = vmatpush3.bf16.msra.mxu0 %v14249_v35  ;;  %v14283_v35 = vld [vmem:[%s14949_s23 + $0x960] sm:$0xff]  }
 0x120   : > { %13093 = vmatprep.subr.bf16.mxu0 %v14251_v41  ;;  %v14287_v41 = vld [vmem:[%s14949_s23 + $0x958] sm:$0xff]  }
 0x121   : > { %13114 = vmatpush3.bf16.msra.mxu1 %v14250_v38 }
 0x122   : > { %13115 = vmatprep.subr.bf16.mxu1 %v14252_v44  ;;  %v14289_v44 = vld [vmem:[%s14949_s23 + $0x918] sm:$0xff]  }
 0x123   : > { %13094 = vmatpush3.bf16.msra.mxu0 %v14253_v46  ;;  %v14291_v46 = vld [vmem:[%s14949_s23 + $0x950] sm:$0xff]  }
 0x124   : > { %13095 = vmatprep.subr.bf16.mxu0 %v14255_v48  ;;  %v14293_v48 = vld [vmem:[%s14949_s23 + $0x910] sm:$0xff]  }
 0x125   : > { %13116 = vmatpush3.bf16.msra.mxu1 %v14254_v47  ;;  %v14292_v47 = vld [vmem:[%s14949_s23 + $0x9d0] sm:$0xff]  }
 0x126   : > { %13117 = vmatprep.subr.bf16.mxu1 %v14256_v49  ;;  %v14294_v49 = vld [vmem:[%s14949_s23 + $0x990] sm:$0xff]  }
 0x127   : > { %13096 = vmatpush3.bf16.msra.mxu0 %v14257_v50  ;;  %v14295_v50 = vld [vmem:[%s14949_s23 + $0x948] sm:$0xff]  }
 0x128   : > { %13097 = vmatprep.subr.bf16.mxu0 %v14259_v52  ;;  %v14297_v52 = vld [vmem:[%s14949_s23 + $0x908] sm:$0xff]  }
 0x129   : > { %13118 = vmatpush3.bf16.msra.mxu1 %v14258_v51  ;;  %v14296_v51 = vld [vmem:[%s14949_s23 + $0x9c8] sm:$0xff]  }
 0x12a   : > { %13119 = vmatprep.subr.bf16.mxu1 %v14260_v53  ;;  %v14298_v53 = vld [vmem:[%s14949_s23 + $0x988] sm:$0xff]  }
 0x12b   : > { %13098 = vmatpush3.bf16.msra.mxu0 %v14261_v54  ;;  %v14299_v54 = vld [vmem:[%s14949_s23 + $0x940] sm:$0xff]  }
 0x12c   : > { %13099 = vmatprep.subr.bf16.mxu0 %v14263_v56  ;;  %v14301_v56 = vld [vmem:[%s14949_s23 + $0x900] sm:$0xff]  }
 0x12d   : > { %13120 = vmatpush3.bf16.msra.mxu1 %v14262_v55  ;;  %v14300_v55 = vld [vmem:[%s14949_s23 + $0x9c0] sm:$0xff]  }
 0x12e   : > { %13121 = vmatprep.subr.bf16.mxu1 %v14264_v57  ;;  %v14302_v57 = vld [vmem:[%s14949_s23 + $0x980] sm:$0xff]  }
 0x12f   : > { %13100 = vmatpush3.bf16.msra.mxu0 %v14265_v59  ;;  %v14304_v59 = vld [vmem:[%s14949_s23 + $0xa78] sm:$0xff]  }
 0x130   : > { %13101 = vmatprep.subr.bf16.mxu0 %v14267_v63  ;;  %v2351_v63 = vcombine.high %v2335_v58, %v2335_v58 }
 0x131   : > { %13122 = vmatpush3.bf16.msra.mxu1 %v14266_v62  ;;  %v14307_v62 = vld [vmem:[%s14949_s23 + $0xab8] sm:$0xff]  }
 0x132   : > { %13123 = vmatprep.subr.bf16.mxu1 %v14268_v2  ;;  %v14309_v2 = vld [vmem:[%s14949_s23 + $0xaf0] sm:$0xff]  }
 0x133   : > { %13102 = vmatpush3.bf16.msra.mxu0 %v14269_v3 }
 0x134   : > { %13131 = vmatprep.subr.bf16.mxu0 %v14271_v9  ;;  %v14313_v9 = vld [vmem:[%s14949_s23 + $0xae8] sm:$0xff]  }
 0x135   : > { %13124 = vmatpush3.bf16.msra.mxu1 %v14270_v6 }
 0x136   : > { %v12839_v18 = vpop.f32.mrf.mxu0  ;;  %8294 = vmatmul.mubr.bf16.vlgmr.msra.gmra.mxu0 %v2328_v8  ;;  %13153 = vmatprep.subr.bf16.mxu1 %v14272_v10 }
 0x137   : > { %13132 = vmatpush3.bf16.msra.mxu0 %v14273_v12  ;;  %8373 = vmatprep.mubr.bf16.mxu0 %v2349_v11  ;;  %v14314_v12 = vld [vmem:[%s14949_s23 + $0xa28] sm:$0xff]  }
 0x138   : > { %v12861_v21 = vpop.f32.mrf.mxu1  ;;  %8334 = vmatmul.mubr.bf16.vlgmr.msra.gmra.mxu1 %v2350_v14  ;;  %v12840_v22 = vpop.f32.mrf.mxu0  ;;  %13133 = vmatprep.subr.bf16.mxu0 %v14275_v15  ;;  %v14315_v15 = vld [vmem:[%s14949_s23 + $0xaa8] sm:$0xff]  }
 0x139   : > { %13154 = vmatpush3.bf16.msra.mxu1 %v14274_v13  ;;  %v12841_v25 = vadd.f32 %v12840_v22, %v12839_v18  ;;  %8413 = vmatprep.mubr.bf16.mxu1 %v2353_v17  ;;  %v14316_v18 = vld [vmem:[%s14949_s23 + $0xa60] sm:$0xff]  }
 0x13a   : > { %v12862_v26 = vpop.f32.mrf.mxu1  ;;  %v12842_v27 = vpop.f32.mrf.mxu0  ;;  %13155 = vmatprep.subr.bf16.mxu1 %v14276_v16  ;;  %v14318_v22 = vld [vmem:[%s14949_s23 + $0xa20] sm:$0xff]  }
 0x13b   : > { %v7816_v29 = vadd.f32 %v12841_v25, %v15277_v43  ;;  %v12863_v30 = vadd.f32 %v12862_v26, %v12861_v21  ;;  %13134 = vmatpush3.bf16.msra.mxu0 %v14277_v19  ;;  %v14288_v43 = vld [vmem:[%s14949_s23 + $0x9d8] sm:$0xff]  }
 0x13c   : > { %v12864_v32 = vpop.f32.mrf.mxu1  ;;  %v12843_v33 = vpop.f32.mrf.mxu0  ;;  %13135 = vmatprep.subr.bf16.mxu0 %v14279_v23  ;;  %v14319_v23 = vld [vmem:[%s14949_s23 + $0xaa0] sm:$0xff]   ;;  %v14320_v25 = vld [vmem:[%s14949_s23 + $0xa58] sm:$0xff]  }
 0x13d   : > { %v15322_v36 = vadd.f32 %v12863_v30, %v7816_v29  ;;  %13156 = vmatpush3.bf16.msra.mxu1 %v14278_v20  ;;  %v14317_v20 = vld [vmem:[%s14949_s23 + $0xae0] sm:$0xff]   ;;  %v14322_v26 = vld [vmem:[%s14949_s23 + $0xa18] sm:$0xff]   ;;  %v14325_v29 = vld [vmem:[%s14949_s23 + $0xad0] sm:$0xff]  }
 0x13e   : > { %v12865_v38 = vpop.f32.mrf.mxu1  ;;  %13157 = vmatprep.subr.bf16.mxu1 %v14280_v24  ;;  %v14321_v24 = vld [vmem:[%s14949_s23 + $0xad8] sm:$0xff]   ;;  %v14326_v30 = vld [vmem:[%s14949_s23 + $0xa10] sm:$0xff]   ;;  %v14328_v32 = vld [vmem:[%s14949_s23 + $0xa48] sm:$0xff]  }
 0x13f   : > { %13136 = vmatpush3.bf16.msra.mxu0 %v14281_v28  ;;  %v14323_v27 = vld [vmem:[%s14949_s23 + $0xa98] sm:$0xff]   ;;  %v14324_v28 = vld [vmem:[%s14949_s23 + $0xa50] sm:$0xff]   ;;  %v14329_v33 = vld [vmem:[%s14949_s23 + $0xac8] sm:$0xff]  }
 0x140   : > { %13137 = vmatprep.subr.bf16.mxu0 %v14283_v35  ;;  %v488_v35 = vld [vmem:[%s14944_s19 + $0x28] sm:$0xff] }
 0x141   : > { %13158 = vmatpush3.bf16.msra.mxu1 %v14282_v31  ;;  %v14327_v31 = vld [vmem:[%s14949_s23 + $0xa90] sm:$0xff]   ;;  %v2354_v38 = vcombine.high %v488_v35, %v488_v35 }
 0x142   : > { %13159 = vmatprep.subr.bf16.mxu1 %v14284_v37  ;;  %v2361_v37 = vrot.slane %v488_v35, %v14990_v42 }
 0x143   : > { %13138 = vmatpush3.bf16.msra.mxu0 %v14285_v39  ;;  %v14331_v39 = vld [vmem:[%s14949_s23 + $0xa88] sm:$0xff]  }
 0x144   : > { %13139 = vmatprep.subr.bf16.mxu0 %v14287_v41  ;;  %v2369_v41 = vcombine.high %v2361_v37, %v2361_v37 }
 0x145   : > { %13160 = vmatpush3.bf16.msra.mxu1 %v14286_v40  ;;  %v14332_v40 = vld [vmem:[%s14949_s23 + $0xa40] sm:$0xff]  }
 0x146   : > { %13161 = vmatprep.subr.bf16.mxu1 %v14288_v43  ;;  %v15380_v43 = vrot.slane %v2354_v38, %v14990_v42  ;;  %v14371_v38 = vld [vmem:[%s14949_s23 + $0xc38] sm:$0xff]  }
 0x147   : > { %13140 = vmatpush3.bf16.msra.mxu0 %v14289_v44  ;;  %v14333_v44 = vld [vmem:[%s14949_s23 + $0xac0] sm:$0xff]  }
 0x148   : > { %13141 = vmatprep.subr.bf16.mxu0 %v14291_v46  ;;  %v2391_v46 = vrot.slane %v2369_v41, %v14990_v42  ;;  %v2384_v35 = vrot.slane %v15380_v43, %v14990_v42  ;;  %v14373_v41 = vld [vmem:[%s14949_s23 + $0xc70] sm:$0xff]  }
 0x149   : > { %13162 = vmatpush3.bf16.msra.mxu1 %v14290_v45  ;;  %v14334_v45 = vld [vmem:[%s14949_s23 + $0xa00] sm:$0xff]  }
 0x14a   : > { %13163 = vmatprep.subr.bf16.mxu1 %v14292_v47  ;;  %v2370_v47 = vcombine.high %v15380_v43, %v15380_v43  ;;  %v14375_v43 = vld [vmem:[%s14949_s23 + $0xc30] sm:$0xff]  }
 0x14b   : > { %13142 = vmatpush3.bf16.msra.mxu0 %v14293_v48  ;;  %v14335_v48 = vld [vmem:[%s14949_s23 + $0xa80] sm:$0xff]  }
 0x14c   : > { %13143 = vmatprep.subr.bf16.mxu0 %v14295_v50  ;;  %v2377_v50 = vrot.slane %v2361_v37, %v14990_v42  ;;  %v14370_v37 = vld [vmem:[%s14949_s23 + $0xcf8] sm:$0xff]  }
 0x14d   : > { %13164 = vmatpush3.bf16.msra.mxu1 %v14294_v49  ;;  %v2401_v49 = vcombine.high %v2391_v46, %v2391_v46 }
 0x14e   : > { %13165 = vmatprep.subr.bf16.mxu1 %v14296_v51  ;;  %v14336_v51 = vld [vmem:[%s14949_s23 + $0xb78] sm:$0xff]  }
 0x14f   : > { %13144 = vmatpush3.bf16.msra.mxu0 %v14297_v52  ;;  %v14337_v52 = vld [vmem:[%s14949_s23 + $0xbf8] sm:$0xff]  }
 0x150   : > { %13145 = vmatprep.subr.bf16.mxu0 %v14299_v54  ;;  %v14338_v54 = vld [vmem:[%s14949_s23 + $0xb38] sm:$0xff]  }
 0x151   : > { %13166 = vmatpush3.bf16.msra.mxu1 %v14298_v53  ;;  %v2398_v53 = vrot.slane %v2370_v47, %v14990_v42 }
 0x152   : > { %13167 = vmatprep.subr.bf16.mxu1 %v14300_v55  ;;  %v14339_v55 = vld [vmem:[%s14949_s23 + $0xbb8] sm:$0xff]  }
 0x153   : > { %13146 = vmatpush3.bf16.msra.mxu0 %v14301_v56  ;;  %v2399_v56 = vcombine.high %v2377_v50, %v2377_v50 }
 0x154   : > { %13175 = vmatprep.subr.bf16.mxu0 %v14304_v59  ;;  %v2402_v59 = vcombine.high %v2398_v53, %v2398_v53 }
 0x155   : > { %13168 = vmatpush3.bf16.msra.mxu1 %v14302_v57  ;;  %v14340_v57 = vld [vmem:[%s14949_s23 + $0xb70] sm:$0xff]  }
 0x156   : > { %v12883_v3 = vpop.f32.mrf.mxu0  ;;  %8374 = vmatmul.mubr.bf16.vlgmr.msra.gmra.mxu0 %v2335_v58  ;;  %13197 = vmatprep.subr.bf16.mxu1 %v14305_v60  ;;  %v14341_v58 = vld [vmem:[%s14949_s23 + $0xbf0] sm:$0xff]  }
 0x157   : > { %13176 = vmatpush3.bf16.msra.mxu0 %v14306_v61  ;;  %8453 = vmatprep.mubr.bf16.mxu0 %v2391_v46  ;;  %v14342_v61 = vld [vmem:[%s14949_s23 + $0xb30] sm:$0xff]  }
 0x158   : > { %v12905_v5 = vpop.f32.mrf.mxu1  ;;  %8414 = vmatmul.mubr.bf16.vlgmr.msra.gmra.mxu1 %v2351_v63  ;;  %v12884_v6 = vpop.f32.mrf.mxu0  ;;  %13177 = vmatprep.subr.bf16.mxu0 %v14308_v0  ;;  %v14376_v46 = vld [vmem:[%s14949_s23 + $0xcb0] sm:$0xff]  }
 0x159   : > { %13198 = vmatpush3.bf16.msra.mxu1 %v14307_v62  ;;  %v12885_v8 = vadd.f32 %v12884_v6, %v12883_v3  ;;  %8493 = vmatprep.mubr.bf16.mxu1 %v2401_v49  ;;  %v14343_v62 = vld [vmem:[%s14949_s23 + $0xbb0] sm:$0xff]   ;;  %v14346_v6 = vld [vmem:[%s14949_s23 + $0xb28] sm:$0xff]  }
 0x15a   : > { %v12906_v10 = vpop.f32.mrf.mxu1  ;;  %v12886_v11 = vpop.f32.mrf.mxu0  ;;  %13199 = vmatprep.subr.bf16.mxu1 %v14309_v2  ;;  %v14344_v2 = vld [vmem:[%s14949_s23 + $0xb68] sm:$0xff]  }
 0x15b   : > { %v7896_v13 = vadd.f32 %v12885_v8, %v15322_v36  ;;  %v12907_v14 = vadd.f32 %v12906_v10, %v12905_v5  ;;  %13178 = vmatpush3.bf16.msra.mxu0 %v14310_v1  ;;  %v14330_v36 = vld [vmem:[%s14949_s23 + $0xa08] sm:$0xff]  }
 0x15c   : > { %v12908_v16 = vpop.f32.mrf.mxu1  ;;  %v12887_v17 = vpop.f32.mrf.mxu0  ;;  %13179 = vmatprep.subr.bf16.mxu0 %v14312_v7  ;;  %v14345_v1 = vld [vmem:[%s14949_s23 + $0xbe8] sm:$0xff]  }
 0x15d   : > { %v15359_v19 = vadd.f32 %v12907_v14, %v7896_v13  ;;  %13200 = vmatpush3.bf16.msra.mxu1 %v14311_v4  ;;  %v14349_v14 = vld [vmem:[%s14949_s23 + $0xbe0] sm:$0xff]   ;;  %v14377_v49 = vld [vmem:[%s14949_s23 + $0xc68] sm:$0xff]  }
 0x15e   : > { %v12909_v21 = vpop.f32.mrf.mxu1  ;;  %13201 = vmatprep.subr.bf16.mxu1 %v14313_v9  ;;  %v14347_v9 = vld [vmem:[%s14949_s23 + $0xba8] sm:$0xff]   ;;  %v14350_v16 = vld [vmem:[%s14949_s23 + $0xb20] sm:$0xff]  }
 0x15f   : > { %13180 = vmatpush3.bf16.msra.mxu0 %v14314_v12  ;;  %v14348_v12 = vld [vmem:[%s14949_s23 + $0xb60] sm:$0xff]   ;;  %v14355_v21 = vld [vmem:[%s14949_s23 + $0xb98] sm:$0xff]  }
 0x160   : > { %13181 = vmatprep.subr.bf16.mxu0 %v14316_v18  ;;  %v14351_v17 = vld [vmem:[%s14949_s23 + $0xba0] sm:$0xff]   ;;  %v14352_v18 = vld [vmem:[%s14949_s23 + $0xb58] sm:$0xff]  }
 0x161   : > { %13202 = vmatpush3.bf16.msra.mxu1 %v14315_v15 }
 0x162   : > { %13203 = vmatprep.subr.bf16.mxu1 %v14317_v20  ;;  %v14354_v20 = vld [vmem:[%s14949_s23 + $0xb18] sm:$0xff]  }
 0x163   : > { %13182 = vmatpush3.bf16.msra.mxu0 %v14318_v22  ;;  %v14356_v22 = vld [vmem:[%s14949_s23 + $0xb50] sm:$0xff]  }
 0x164   : > { %13183 = vmatprep.subr.bf16.mxu0 %v14320_v25  ;;  %v14358_v25 = vld [vmem:[%s14949_s23 + $0xb10] sm:$0xff]  }
 0x165   : > { %13204 = vmatpush3.bf16.msra.mxu1 %v14319_v23  ;;  %v14357_v23 = vld [vmem:[%s14949_s23 + $0xbd0] sm:$0xff]  }
 0x166   : > { %13205 = vmatprep.subr.bf16.mxu1 %v14321_v24  ;;  %v14359_v24 = vld [vmem:[%s14949_s23 + $0xb90] sm:$0xff]  }
 0x167   : > { %13184 = vmatpush3.bf16.msra.mxu0 %v14322_v26  ;;  %v14360_v26 = vld [vmem:[%s14949_s23 + $0xb48] sm:$0xff]  }
 0x168   : > { %13185 = vmatprep.subr.bf16.mxu0 %v14324_v28  ;;  %v14362_v28 = vld [vmem:[%s14949_s23 + $0xb08] sm:$0xff]  }
 0x169   : > { %13206 = vmatpush3.bf16.msra.mxu1 %v14323_v27  ;;  %v14361_v27 = vld [vmem:[%s14949_s23 + $0xbc8] sm:$0xff]  }
 0x16a   : > { %13207 = vmatprep.subr.bf16.mxu1 %v14325_v29  ;;  %v14363_v29 = vld [vmem:[%s14949_s23 + $0xb88] sm:$0xff]  }
 0x16b   : > { %13186 = vmatpush3.bf16.msra.mxu0 %v14326_v30  ;;  %v14364_v30 = vld [vmem:[%s14949_s23 + $0xb40] sm:$0xff]  }
 0x16c   : > { %13187 = vmatprep.subr.bf16.mxu0 %v14328_v32  ;;  %v14366_v32 = vld [vmem:[%s14949_s23 + $0xb00] sm:$0xff]  }
 0x16d   : > { %13208 = vmatpush3.bf16.msra.mxu1 %v14327_v31  ;;  %v14365_v31 = vld [vmem:[%s14949_s23 + $0xbc0] sm:$0xff]  }
 0x16e   : > { %13209 = vmatprep.subr.bf16.mxu1 %v14329_v33  ;;  %v14367_v33 = vld [vmem:[%s14949_s23 + $0xb80] sm:$0xff]  }
 0x16f   : > { %13188 = vmatpush3.bf16.msra.mxu0 %v14330_v36  ;;  %v14369_v36 = vld [vmem:[%s14949_s23 + $0xc78] sm:$0xff]  }
 0x170   : > { %13189 = vmatprep.subr.bf16.mxu0 %v14332_v40  ;;  %v2400_v40 = vcombine.high %v2384_v35, %v2384_v35 }
 0x171   : > { %13210 = vmatpush3.bf16.msra.mxu1 %v14331_v39  ;;  %v14372_v39 = vld [vmem:[%s14949_s23 + $0xcb8] sm:$0xff]  }
 0x172   : > { %13211 = vmatprep.subr.bf16.mxu1 %v14333_v44  ;;  %v14374_v44 = vld [vmem:[%s14949_s23 + $0xcf0] sm:$0xff]  }
 0x173   : > { %13190 = vmatpush3.bf16.msra.mxu0 %v14334_v45 }
 0x174   : > { %13219 = vmatprep.subr.bf16.mxu0 %v14336_v51  ;;  %v14378_v51 = vld [vmem:[%s14949_s23 + $0xce8] sm:$0xff]  }
 0x175   : > { %13212 = vmatpush3.bf16.msra.mxu1 %v14335_v48 }
 0x176   : > { %v12927_v60 = vpop.f32.mrf.mxu0  ;;  %8454 = vmatmul.mubr.bf16.vlgmr.msra.gmra.mxu0 %v2377_v50  ;;  %13241 = vmatprep.subr.bf16.mxu1 %v14337_v52 }
 0x177   : > { %13220 = vmatpush3.bf16.msra.mxu0 %v14338_v54  ;;  %8533 = vmatprep.mubr.bf16.mxu0 %v2398_v53  ;;  %v14379_v54 = vld [vmem:[%s14949_s23 + $0xc28] sm:$0xff]  }
 0x178   : > { %v12949_v63 = vpop.f32.mrf.mxu1  ;;  %8494 = vmatmul.mubr.bf16.vlgmr.msra.gmra.mxu1 %v2399_v56  ;;  %v12928_v0 = vpop.f32.mrf.mxu0  ;;  %13221 = vmatprep.subr.bf16.mxu0 %v14340_v57  ;;  %v14380_v57 = vld [vmem:[%s14949_s23 + $0xca8] sm:$0xff]  }
 0x179   : > { %13242 = vmatpush3.bf16.msra.mxu1 %v14339_v55  ;;  %v12929_v3 = vadd.f32 %v12928_v0, %v12927_v60  ;;  %8573 = vmatprep.mubr.bf16.mxu1 %v2402_v59  ;;  %v14381_v60 = vld [vmem:[%s14949_s23 + $0xc60] sm:$0xff]  }
 0x17a   : > { %v12950_v4 = vpop.f32.mrf.mxu1  ;;  %v12930_v5 = vpop.f32.mrf.mxu0  ;;  %13243 = vmatprep.subr.bf16.mxu1 %v14341_v58  ;;  %v14383_v0 = vld [vmem:[%s14949_s23 + $0xc20] sm:$0xff]  }
 0x17b   : > { %v7976_v7 = vadd.f32 %v12929_v3, %v15359_v19  ;;  %v12951_v8 = vadd.f32 %v12950_v4, %v12949_v63  ;;  %13222 = vmatpush3.bf16.msra.mxu0 %v14342_v61  ;;  %v14353_v19 = vld [vmem:[%s14949_s23 + $0xbd8] sm:$0xff]  }
 0x17c   : > { %v12952_v10 = vpop.f32.mrf.mxu1  ;;  %v12931_v11 = vpop.f32.mrf.mxu0  ;;  %13223 = vmatprep.subr.bf16.mxu0 %v14344_v2  ;;  %v14384_v2 = vld [vmem:[%s14949_s23 + $0xca0] sm:$0xff]   ;;  %v14385_v3 = vld [vmem:[%s14949_s23 + $0xc58] sm:$0xff]  }
 0x17d   : > { %v15404_v13 = vadd.f32 %v12951_v8, %v7976_v7  ;;  %13244 = vmatpush3.bf16.msra.mxu1 %v14343_v62  ;;  %v14382_v62 = vld [vmem:[%s14949_s23 + $0xce0] sm:$0xff]   ;;  %v14387_v4 = vld [vmem:[%s14949_s23 + $0xc18] sm:$0xff]   ;;  %v14390_v7 = vld [vmem:[%s14949_s23 + $0xcd0] sm:$0xff]  }
 0x17e   : > { %v12953_v15 = vpop.f32.mrf.mxu1  ;;  %13245 = vmatprep.subr.bf16.mxu1 %v14345_v1  ;;  %v14386_v1 = vld [vmem:[%s14949_s23 + $0xcd8] sm:$0xff]   ;;  %v14391_v8 = vld [vmem:[%s14949_s23 + $0xc10] sm:$0xff]   ;;  %v14393_v10 = vld [vmem:[%s14949_s23 + $0xc48] sm:$0xff]  }
 0x17f   : > { %13224 = vmatpush3.bf16.msra.mxu0 %v14346_v6  ;;  %v14388_v5 = vld [vmem:[%s14949_s23 + $0xc98] sm:$0xff]   ;;  %v14389_v6 = vld [vmem:[%s14949_s23 + $0xc50] sm:$0xff]   ;;  %v14394_v11 = vld [vmem:[%s14949_s23 + $0xcc8] sm:$0xff]  }
 0x180   : > { %13225 = vmatprep.subr.bf16.mxu0 %v14348_v12  ;;  %v14395_v12 = vld [vmem:[%s14949_s23 + $0xc08] sm:$0xff]  }
 0x181   : > { %13246 = vmatpush3.bf16.msra.mxu1 %v14347_v9  ;;  %v14392_v9 = vld [vmem:[%s14949_s23 + $0xc90] sm:$0xff]  }
 0x182   : > { %13247 = vmatprep.subr.bf16.mxu1 %v14349_v14  ;;  %v14396_v14 = vld [vmem:[%s14949_s23 + $0xc88] sm:$0xff]  }
 0x183   : > { %13226 = vmatpush3.bf16.msra.mxu0 %v14350_v16 }
 0x184   : > { %13227 = vmatprep.subr.bf16.mxu0 %v14352_v18  ;;  %v14398_v18 = vld [vmem:[%s14949_s23 + $0xcc0] sm:$0xff]  }
 0x185   : > { %13248 = vmatpush3.bf16.msra.mxu1 %v14351_v17  ;;  %v14397_v17 = vld [vmem:[%s14949_s23 + $0xc40] sm:$0xff]  }
 0x186   : > { %13249 = vmatprep.subr.bf16.mxu1 %v14353_v19 }
 0x187   : > { %13228 = vmatpush3.bf16.msra.mxu0 %v14354_v20 }
 0x188   : > { %13229 = vmatprep.subr.bf16.mxu0 %v14356_v22  ;;  %v14400_v22 = vld [vmem:[%s14949_s23 + $0xc80] sm:$0xff]  }
 0x189   : > { %13250 = vmatpush3.bf16.msra.mxu1 %v14355_v21  ;;  %v14399_v21 = vld [vmem:[%s14949_s23 + $0xc00] sm:$0xff]  }
 0x18a   : > { %13251 = vmatprep.subr.bf16.mxu1 %v14357_v23 }
 0x18b   : > { %13230 = vmatpush3.bf16.msra.mxu0 %v14358_v25 }
 0x18c   : > { %13231 = vmatprep.subr.bf16.mxu0 %v14360_v26  ;;  %v14401_v26 = vld [vmem:[%s14949_s23 + $0xd78] sm:$0xff]  }
 0x18d   : > { %13252 = vmatpush3.bf16.msra.mxu1 %v14359_v24 }
 0x18e   : > { %13253 = vmatprep.subr.bf16.mxu1 %v14361_v27 }
 0x18f   : > { %13232 = vmatpush3.bf16.msra.mxu0 %v14362_v28  ;;  %v14402_v28 = vld [vmem:[%s14949_s23 + $0xdf8] sm:$0xff]  }
 0x190   : > { %13233 = vmatprep.subr.bf16.mxu0 %v14364_v30  ;;  %v14403_v30 = vld [vmem:[%s14949_s23 + $0xd38] sm:$0xff]  }
 0x191   : > { %13254 = vmatpush3.bf16.msra.mxu1 %v14363_v29 }
 0x192   : > { %13255 = vmatprep.subr.bf16.mxu1 %v14365_v31  ;;  %v14404_v31 = vld [vmem:[%s14949_s23 + $0xdb8] sm:$0xff]  }
 0x193   : > { %13234 = vmatpush3.bf16.msra.mxu0 %v14366_v32 }
 0x194   : > { %13263 = vmatprep.subr.bf16.mxu0 %v14369_v36 }
 0x195   : > { %13256 = vmatpush3.bf16.msra.mxu1 %v14367_v33  ;;  %v14405_v33 = vld [vmem:[%s14949_s23 + $0xd70] sm:$0xff]  }
 0x196   : > { %v12971_v45 = vpop.f32.mrf.mxu0  ;;  %8534 = vmatmul.mubr.bf16.vlgmr.msra.gmra.mxu0 %v2384_v35  ;;  %13285 = vmatprep.subr.bf16.mxu1 %v14370_v37  ;;  %v14406_v35 = vld [vmem:[%s14949_s23 + $0xdf0] sm:$0xff]  }
 0x197   : > { %13264 = vmatpush3.bf16.msra.mxu0 %v14371_v38  ;;  %v14407_v38 = vld [vmem:[%s14949_s23 + $0xd30] sm:$0xff]  }
 0x198   : > { %v12993_v47 = vpop.f32.mrf.mxu1  ;;  %8574 = vmatmul.mubr.bf16.vlgmr.msra.gmra.mxu1 %v2400_v40  ;;  %v12972_v48 = vpop.f32.mrf.mxu0  ;;  %13265 = vmatprep.subr.bf16.mxu0 %v14373_v41 }
 0x199   : > { %13286 = vmatpush3.bf16.msra.mxu1 %v14372_v39  ;;  %v12973_v50 = vadd.f32 %v12972_v48, %v12971_v45  ;;  %v14408_v39 = vld [vmem:[%s14949_s23 + $0xdb0] sm:$0xff]   ;;  %v14411_v48 = vld [vmem:[%s14949_s23 + $0xd28] sm:$0xff]  }
 0x19a   : > { %v12994_v52 = vpop.f32.mrf.mxu1  ;;  %v12974_v53 = vpop.f32.mrf.mxu0  ;;  %13287 = vmatprep.subr.bf16.mxu1 %v14374_v44  ;;  %v14409_v44 = vld [vmem:[%s14949_s23 + $0xd68] sm:$0xff]  }
 0x19b   : > { %v8056_v55 = vadd.f32 %v12973_v50, %v15404_v13  ;;  %v12995_v56 = vadd.f32 %v12994_v52, %v12993_v47  ;;  %13266 = vmatpush3.bf16.msra.mxu0 %v14375_v43  ;;  %v489_v13 = vld [vmem:[%s14944_s19 + $0x30] sm:$0xff]  ;;  %v14410_v43 = vld [vmem:[%s14949_s23 + $0xde8] sm:$0xff]  }
 0x19c   : > { %v12996_v58 = vpop.f32.mrf.mxu1  ;;  %v12975_v59 = vpop.f32.mrf.mxu0  ;;  %13267 = vmatprep.subr.bf16.mxu0 %v14377_v49  ;;  %v2410_v15 = vrot.slane %v489_v13, %v14990_v42  ;;  %v2403_v16 = vcombine.high %v489_v13, %v489_v13  ;;  %v14434_v13 = vld [vmem:[%s14949_s23 + $0xe78] sm:$0xff]  }
 0x19d   : > { %v15441_v61 = vadd.f32 %v12995_v56, %v8056_v55  ;;  %13288 = vmatpush3.bf16.msra.mxu1 %v14376_v46  ;;  %v14414_v56 = vld [vmem:[%s14949_s23 + $0xde0] sm:$0xff]  }
 0x19e   : > { %v12997_v63 = vpop.f32.mrf.mxu1  ;;  %13289 = vmatprep.subr.bf16.mxu1 %v14378_v51  ;;  %v2418_v19 = vcombine.high %v2410_v15, %v2410_v15  ;;  %v15463_v20 = vrot.slane %v2403_v16, %v14990_v42  ;;  %v2426_v24 = vrot.slane %v2410_v15, %v14990_v42  ;;  %v14412_v51 = vld [vmem:[%s14949_s23 + $0xda8] sm:$0xff]   ;;  %v14415_v58 = vld [vmem:[%s14949_s23 + $0xd20] sm:$0xff]   ;;  %v14436_v15 = vld [vmem:[%s14949_s23 + $0xe38] sm:$0xff]  }
 0x19f   : > { %13268 = vmatpush3.bf16.msra.mxu0 %v14379_v54  ;;  %v14413_v54 = vld [vmem:[%s14949_s23 + $0xd60] sm:$0xff]   ;;  %v14420_v63 = vld [vmem:[%s14949_s23 + $0xd98] sm:$0xff]  }
 0x1a0   : > { %13269 = vmatprep.subr.bf16.mxu0 %v14381_v60  ;;  %v2440_v23 = vrot.slane %v2418_v19, %v14990_v42  ;;  %v2419_v25 = vcombine.high %v15463_v20, %v15463_v20  ;;  %v2448_v32 = vcombine.high %v2426_v24, %v2426_v24  ;;  %v14416_v59 = vld [vmem:[%s14949_s23 + $0xda0] sm:$0xff]   ;;  %v14417_v60 = vld [vmem:[%s14949_s23 + $0xd58] sm:$0xff]   ;;  %v14439_v19 = vld [vmem:[%s14949_s23 + $0xef0] sm:$0xff]  }
 0x1a1   : > { %13290 = vmatpush3.bf16.msra.mxu1 %v14380_v57  ;;  %v14437_v16 = vld [vmem:[%s14949_s23 + $0xeb8] sm:$0xff]  }
 0x1a2   : > { %13291 = vmatprep.subr.bf16.mxu1 %v14382_v62  ;;  %8613 = vmatprep.mubr.bf16.mxu0 %v2440_v23  ;;  %v2450_v27 = vcombine.high %v2440_v23, %v2440_v23  ;;  %v2447_v29 = vrot.slane %v2419_v25, %v14990_v42  ;;  %v14419_v62 = vld [vmem:[%s14949_s23 + $0xd18] sm:$0xff]  }
 0x1a3   : > { %13270 = vmatpush3.bf16.msra.mxu0 %v14383_v0  ;;  %v14421_v0 = vld [vmem:[%s14949_s23 + $0xd50] sm:$0xff]  }
 0x1a4   : > { %13271 = vmatprep.subr.bf16.mxu0 %v14385_v3  ;;  %8653 = vmatprep.mubr.bf16.mxu1 %v2450_v27  ;;  %v2451_v36 = vcombine.high %v2447_v29, %v2447_v29  ;;  %v14423_v3 = vld [vmem:[%s14949_s23 + $0xd10] sm:$0xff]   ;;  %v14443_v27 = vld [vmem:[%s14949_s23 + $0xee8] sm:$0xff]  }
 0x1a5   : > { %13292 = vmatpush3.bf16.msra.mxu1 %v14384_v2  ;;  %v14422_v2 = vld [vmem:[%s14949_s23 + $0xdd0] sm:$0xff]  }
 0x1a6   : > { %13293 = vmatprep.subr.bf16.mxu1 %v14386_v1  ;;  %v14424_v1 = vld [vmem:[%s14949_s23 + $0xd90] sm:$0xff]  }
 0x1a7   : > { %13272 = vmatpush3.bf16.msra.mxu0 %v14387_v4  ;;  %v14425_v4 = vld [vmem:[%s14949_s23 + $0xd48] sm:$0xff]  }
 0x1a8   : > { %13273 = vmatprep.subr.bf16.mxu0 %v14389_v6  ;;  %v14427_v6 = vld [vmem:[%s14949_s23 + $0xd08] sm:$0xff]  }
 0x1a9   : > { %13294 = vmatpush3.bf16.msra.mxu1 %v14388_v5  ;;  %v14426_v5 = vld [vmem:[%s14949_s23 + $0xdc8] sm:$0xff]  }
 0x1aa   : > { %13295 = vmatprep.subr.bf16.mxu1 %v14390_v7  ;;  %v14428_v7 = vld [vmem:[%s14949_s23 + $0xd88] sm:$0xff]  }
 0x1ab   : > { %13274 = vmatpush3.bf16.msra.mxu0 %v14391_v8  ;;  %v14429_v8 = vld [vmem:[%s14949_s23 + $0xd40] sm:$0xff]  }
 0x1ac   : > { %13275 = vmatprep.subr.bf16.mxu0 %v14393_v10  ;;  %v14431_v10 = vld [vmem:[%s14949_s23 + $0xd00] sm:$0xff]  }
 0x1ad   : > { %13296 = vmatpush3.bf16.msra.mxu1 %v14392_v9  ;;  %v14430_v9 = vld [vmem:[%s14949_s23 + $0xdc0] sm:$0xff]  }
 0x1ae   : > { %13297 = vmatprep.subr.bf16.mxu1 %v14394_v11  ;;  %v14432_v11 = vld [vmem:[%s14949_s23 + $0xd80] sm:$0xff]  }
 0x1af   : > { %13276 = vmatpush3.bf16.msra.mxu0 %v14395_v12  ;;  %v2433_v12 = vrot.slane %v15463_v20, %v14990_v42  ;;  %v14440_v20 = vld [vmem:[%s14949_s23 + $0xe30] sm:$0xff]  }
 0x1b0   : > { %13277 = vmatprep.subr.bf16.mxu0 %v14397_v17 }
 0x1b1   : > { %13298 = vmatpush3.bf16.msra.mxu1 %v14396_v14  ;;  %v14435_v14 = vld [vmem:[%s14949_s23 + $0xef8] sm:$0xff]   ;;  %v2449_v17 = vcombine.high %v2433_v12, %v2433_v12 }
 0x1b2   : > { %13299 = vmatprep.subr.bf16.mxu1 %v14398_v18  ;;  %v14438_v18 = vld [vmem:[%s14949_s23 + $0xe70] sm:$0xff]  }
 0x1b3   : > { %13278 = vmatpush3.bf16.msra.mxu0 %v14399_v21 }
 0x1b4   : > { %13307 = vmatprep.subr.bf16.mxu0 %v14401_v26 }
 0x1b5   : > { %13300 = vmatpush3.bf16.msra.mxu1 %v14400_v22  ;;  %v14441_v22 = vld [vmem:[%s14949_s23 + $0xeb0] sm:$0xff]  }
 0x1b6   : > { %v13015_v37 = vpop.f32.mrf.mxu0  ;;  %8614 = vmatmul.mubr.bf16.vlgmr.msra.gmra.mxu0 %v2426_v24  ;;  %13329 = vmatprep.subr.bf16.mxu1 %v14402_v28  ;;  %v14442_v24 = vld [vmem:[%s14949_s23 + $0xe68] sm:$0xff]  }
 0x1b7   : > { %13308 = vmatpush3.bf16.msra.mxu0 %v14403_v30  ;;  %8693 = vmatprep.mubr.bf16.mxu0 %v2447_v29  ;;  %v14444_v30 = vld [vmem:[%s14949_s23 + $0xe28] sm:$0xff]  }
 0x1b8   : > { %v13037_v40 = vpop.f32.mrf.mxu1  ;;  %8654 = vmatmul.mubr.bf16.vlgmr.msra.gmra.mxu1 %v2448_v32  ;;  %v13016_v41 = vpop.f32.mrf.mxu0  ;;  %13309 = vmatprep.subr.bf16.mxu0 %v14405_v33  ;;  %v14445_v33 = vld [vmem:[%s14949_s23 + $0xea8] sm:$0xff]  }
 0x1b9   : > { %13330 = vmatpush3.bf16.msra.mxu1 %v14404_v31  ;;  %v13017_v45 = vadd.f32 %v13016_v41, %v13015_v37  ;;  %8733 = vmatprep.mubr.bf16.mxu1 %v2451_v36  ;;  %v14446_v37 = vld [vmem:[%s14949_s23 + $0xe60] sm:$0xff]  }
 0x1ba   : > { %v13038_v46 = vpop.f32.mrf.mxu1  ;;  %v13018_v47 = vpop.f32.mrf.mxu0  ;;  %13331 = vmatprep.subr.bf16.mxu1 %v14406_v35  ;;  %v14448_v41 = vld [vmem:[%s14949_s23 + $0xe20] sm:$0xff]  }
 0x1bb   : > { %v8136_v49 = vadd.f32 %v13017_v45, %v15441_v61  ;;  %v13039_v50 = vadd.f32 %v13038_v46, %v13037_v40  ;;  %13310 = vmatpush3.bf16.msra.mxu0 %v14407_v38  ;;  %v14418_v61 = vld [vmem:[%s14949_s23 + $0xdd8] sm:$0xff]  }
 0x1bc   : > { %v13040_v52 = vpop.f32.mrf.mxu1  ;;  %v13019_v53 = vpop.f32.mrf.mxu0  ;;  %13311 = vmatprep.subr.bf16.mxu0 %v14409_v44  ;;  %v14449_v44 = vld [vmem:[%s14949_s23 + $0xea0] sm:$0xff]   ;;  %v14450_v45 = vld [vmem:[%s14949_s23 + $0xe58] sm:$0xff]  }
 0x1bd   : > { %v15486_v55 = vadd.f32 %v13039_v50, %v8136_v49  ;;  %13332 = vmatpush3.bf16.msra.mxu1 %v14408_v39  ;;  %v14447_v39 = vld [vmem:[%s14949_s23 + $0xee0] sm:$0xff]   ;;  %v14452_v46 = vld [vmem:[%s14949_s23 + $0xe18] sm:$0xff]   ;;  %v14455_v49 = vld [vmem:[%s14949_s23 + $0xed0] sm:$0xff]  }
 0x1be   : > { %v13041_v57 = vpop.f32.mrf.mxu1  ;;  %13333 = vmatprep.subr.bf16.mxu1 %v14410_v43  ;;  %v14451_v43 = vld [vmem:[%s14949_s23 + $0xed8] sm:$0xff]   ;;  %v14456_v50 = vld [vmem:[%s14949_s23 + $0xe10] sm:$0xff]   ;;  %v14458_v52 = vld [vmem:[%s14949_s23 + $0xe48] sm:$0xff]  }
 0x1bf   : > { %13312 = vmatpush3.bf16.msra.mxu0 %v14411_v48  ;;  %v14453_v47 = vld [vmem:[%s14949_s23 + $0xe98] sm:$0xff]   ;;  %v14454_v48 = vld [vmem:[%s14949_s23 + $0xe50] sm:$0xff]   ;;  %v14459_v53 = vld [vmem:[%s14949_s23 + $0xec8] sm:$0xff]  }
 0x1c0   : > { %13313 = vmatprep.subr.bf16.mxu0 %v14413_v54  ;;  %v14460_v54 = vld [vmem:[%s14949_s23 + $0xe08] sm:$0xff]  }
 0x1c1   : > { %13334 = vmatpush3.bf16.msra.mxu1 %v14412_v51  ;;  %v14457_v51 = vld [vmem:[%s14949_s23 + $0xe90] sm:$0xff]  }
 0x1c2   : > { %13335 = vmatprep.subr.bf16.mxu1 %v14414_v56  ;;  %v14461_v56 = vld [vmem:[%s14949_s23 + $0xe88] sm:$0xff]  }
 0x1c3   : > { %13314 = vmatpush3.bf16.msra.mxu0 %v14415_v58 }
 0x1c4   : > { %13315 = vmatprep.subr.bf16.mxu0 %v14417_v60  ;;  %v14463_v60 = vld [vmem:[%s14949_s23 + $0xec0] sm:$0xff]  }
 0x1c5   : > { %13336 = vmatpush3.bf16.msra.mxu1 %v14416_v59  ;;  %v14462_v59 = vld [vmem:[%s14949_s23 + $0xe40] sm:$0xff]  }
 0x1c6   : > { %13337 = vmatprep.subr.bf16.mxu1 %v14418_v61 }
 0x1c7   : > { %13316 = vmatpush3.bf16.msra.mxu0 %v14419_v62 }
 0x1c8   : > { %13317 = vmatprep.subr.bf16.mxu0 %v14421_v0  ;;  %v14465_v0 = vld [vmem:[%s14949_s23 + $0xe80] sm:$0xff]  }
 0x1c9   : > { %13338 = vmatpush3.bf16.msra.mxu1 %v14420_v63  ;;  %v14464_v63 = vld [vmem:[%s14949_s23 + $0xe00] sm:$0xff]  }
 0x1ca   : > { %13339 = vmatprep.subr.bf16.mxu1 %v14422_v2 }
 0x1cb   : > { %13318 = vmatpush3.bf16.msra.mxu0 %v14423_v3 }
 0x1cc   : > { %13319 = vmatprep.subr.bf16.mxu0 %v14425_v4  ;;  %v14466_v4 = vld [vmem:[%s14949_s23 + $0xf78] sm:$0xff]  }
 0x1cd   : > { %13340 = vmatpush3.bf16.msra.mxu1 %v14424_v1 }
 0x1ce   : > { %13341 = vmatprep.subr.bf16.mxu1 %v14426_v5 }
 0x1cf   : > { %13320 = vmatpush3.bf16.msra.mxu0 %v14427_v6  ;;  %v14467_v6 = vld [vmem:[%s14949_s23 + $0xff8] sm:$0xff]  }
 0x1d0   : > { %13321 = vmatprep.subr.bf16.mxu0 %v14429_v8  ;;  %v14468_v8 = vld [vmem:[%s14949_s23 + $0xf38] sm:$0xff]  }
 0x1d1   : > { %13342 = vmatpush3.bf16.msra.mxu1 %v14428_v7 }
 0x1d2   : > { %13343 = vmatprep.subr.bf16.mxu1 %v14430_v9  ;;  %v14469_v9 = vld [vmem:[%s14949_s23 + $0xfb8] sm:$0xff]  }
 0x1d3   : > { %13322 = vmatpush3.bf16.msra.mxu0 %v14431_v10 }
 0x1d4   : > { %13351 = vmatprep.subr.bf16.mxu0 %v14434_v13 }
 0x1d5   : > { %13344 = vmatpush3.bf16.msra.mxu1 %v14432_v11  ;;  %v14470_v11 = vld [vmem:[%s14949_s23 + $0xf70] sm:$0xff]  }
 0x1d6   : > { %v13059_v21 = vpop.f32.mrf.mxu0  ;;  %8694 = vmatmul.mubr.bf16.vlgmr.msra.gmra.mxu0 %v2433_v12  ;;  %13373 = vmatprep.subr.bf16.mxu1 %v14435_v14  ;;  %v14471_v12 = vld [vmem:[%s14949_s23 + $0xff0] sm:$0xff]  }
 0x1d7   : > { %13352 = vmatpush3.bf16.msra.mxu0 %v14436_v15  ;;  %v14472_v15 = vld [vmem:[%s14949_s23 + $0xf30] sm:$0xff]  }
 0x1d8   : > { %v13081_v23 = vpop.f32.mrf.mxu1  ;;  %8734 = vmatmul.mubr.bf16.vlgmr.msra.gmra.mxu1 %v2449_v17  ;;  %v13060_v25 = vpop.f32.mrf.mxu0  ;;  %13353 = vmatprep.subr.bf16.mxu0 %v14438_v18 }
 0x1d9   : > { %13374 = vmatpush3.bf16.msra.mxu1 %v14437_v16  ;;  %v13061_v26 = vadd.f32 %v13060_v25, %v13059_v21  ;;  %v14473_v16 = vld [vmem:[%s14949_s23 + $0xfb0] sm:$0xff]   ;;  %v14476_v25 = vld [vmem:[%s14949_s23 + $0xf28] sm:$0xff]  }
 0x1da   : > { %v13082_v28 = vpop.f32.mrf.mxu1  ;;  %v13062_v29 = vpop.f32.mrf.mxu0  ;;  %13375 = vmatprep.subr.bf16.mxu1 %v14439_v19  ;;  %v14474_v19 = vld [vmem:[%s14949_s23 + $0xf68] sm:$0xff]  }
 0x1db   : > { %v8216_v31 = vadd.f32 %v13061_v26, %v15486_v55  ;;  %v13083_v32 = vadd.f32 %v13082_v28, %v13081_v23  ;;  %13354 = vmatpush3.bf16.msra.mxu0 %v14440_v20  ;;  %v490_v55 = vld [vmem:[%s14944_s19 + $0x38] sm:$0xff]  ;;  %v14475_v20 = vld [vmem:[%s14949_s23 + $0xfe8] sm:$0xff]  }
 0x1dc   : > { %v13084_v35 = vpop.f32.mrf.mxu1  ;;  %v13063_v36 = vpop.f32.mrf.mxu0  ;;  %13355 = vmatprep.subr.bf16.mxu0 %v14442_v24  ;;  %v2459_v57 = vrot.slane %v490_v55, %v14990_v42  ;;  %v2452_v58 = vcombine.high %v490_v55, %v490_v55  ;;  %v14499_v55 = vld [vmem:[%s14949_s23 + $0x1078] sm:$0xff]  }
 0x1dd   : > { %v15523_v38 = vadd.f32 %v13083_v32, %v8216_v31  ;;  %13376 = vmatpush3.bf16.msra.mxu1 %v14441_v22  ;;  %v14479_v32 = vld [vmem:[%s14949_s23 + $0xfe0] sm:$0xff]  }
 0x1de   : > { %v13085_v40 = vpop.f32.mrf.mxu1  ;;  %13377 = vmatprep.subr.bf16.mxu1 %v14443_v27  ;;  %v2467_v61 = vcombine.high %v2459_v57, %v2459_v57  ;;  %v15545_v62 = vrot.slane %v2452_v58, %v14990_v42  ;;  %v2475_v1 = vrot.slane %v2459_v57, %v14990_v42  ;;  %v14477_v27 = vld [vmem:[%s14949_s23 + $0xfa8] sm:$0xff]   ;;  %v14480_v35 = vld [vmem:[%s14949_s23 + $0xf20] sm:$0xff]   ;;  %v14501_v57 = vld [vmem:[%s14949_s23 + $0x1038] sm:$0xff]  }
 0x1df   : > { %13356 = vmatpush3.bf16.msra.mxu0 %v14444_v30  ;;  %v14478_v30 = vld [vmem:[%s14949_s23 + $0xf60] sm:$0xff]   ;;  %v14485_v40 = vld [vmem:[%s14949_s23 + $0xf98] sm:$0xff]  }
 0x1e0   : > { %13357 = vmatprep.subr.bf16.mxu0 %v14446_v37  ;;  %v2489_v2 = vrot.slane %v2467_v61, %v14990_v42  ;;  %v2468_v3 = vcombine.high %v15545_v62, %v15545_v62  ;;  %v2497_v10 = vcombine.high %v2475_v1, %v2475_v1  ;;  %v14481_v36 = vld [vmem:[%s14949_s23 + $0xfa0] sm:$0xff]   ;;  %v14482_v37 = vld [vmem:[%s14949_s23 + $0xf58] sm:$0xff]   ;;  %v14504_v61 = vld [vmem:[%s14949_s23 + $0x10f0] sm:$0xff]  }
 0x1e1   : > { %13378 = vmatpush3.bf16.msra.mxu1 %v14445_v33  ;;  %v14502_v58 = vld [vmem:[%s14949_s23 + $0x10b8] sm:$0xff]  }
 0x1e2   : > { %13379 = vmatprep.subr.bf16.mxu1 %v14447_v39  ;;  %8773 = vmatprep.mubr.bf16.mxu0 %v2489_v2  ;;  %v2499_v5 = vcombine.high %v2489_v2, %v2489_v2  ;;  %v2496_v7 = vrot.slane %v2468_v3, %v14990_v42  ;;  %v14484_v39 = vld [vmem:[%s14949_s23 + $0xf18] sm:$0xff]  }
 0x1e3   : > { %13358 = vmatpush3.bf16.msra.mxu0 %v14448_v41  ;;  %v14486_v41 = vld [vmem:[%s14949_s23 + $0xf50] sm:$0xff]  }
 0x1e4   : > { %13359 = vmatprep.subr.bf16.mxu0 %v14450_v45  ;;  %8813 = vmatprep.mubr.bf16.mxu1 %v2499_v5  ;;  %v2500_v13 = vcombine.high %v2496_v7, %v2496_v7  ;;  %v14488_v45 = vld [vmem:[%s14949_s23 + $0xf10] sm:$0xff]   ;;  %v14508_v5 = vld [vmem:[%s14949_s23 + $0x10e8] sm:$0xff]  }
 0x1e5   : > { %13380 = vmatpush3.bf16.msra.mxu1 %v14449_v44  ;;  %v14487_v44 = vld [vmem:[%s14949_s23 + $0xfd0] sm:$0xff]  }
 0x1e6   : > { %13381 = vmatprep.subr.bf16.mxu1 %v14451_v43  ;;  %v14489_v43 = vld [vmem:[%s14949_s23 + $0xf90] sm:$0xff]  }
 0x1e7   : > { %13360 = vmatpush3.bf16.msra.mxu0 %v14452_v46  ;;  %v14490_v46 = vld [vmem:[%s14949_s23 + $0xf48] sm:$0xff]  }
 0x1e8   : > { %13361 = vmatprep.subr.bf16.mxu0 %v14454_v48  ;;  %v14492_v48 = vld [vmem:[%s14949_s23 + $0xf08] sm:$0xff]  }
 0x1e9   : > { %13382 = vmatpush3.bf16.msra.mxu1 %v14453_v47  ;;  %v14491_v47 = vld [vmem:[%s14949_s23 + $0xfc8] sm:$0xff]  }
 0x1ea   : > { %13383 = vmatprep.subr.bf16.mxu1 %v14455_v49  ;;  %v14493_v49 = vld [vmem:[%s14949_s23 + $0xf88] sm:$0xff]  }
 0x1eb   : > { %13362 = vmatpush3.bf16.msra.mxu0 %v14456_v50  ;;  %v14494_v50 = vld [vmem:[%s14949_s23 + $0xf40] sm:$0xff]  }
 0x1ec   : > { %13363 = vmatprep.subr.bf16.mxu0 %v14458_v52  ;;  %v14496_v52 = vld [vmem:[%s14949_s23 + $0xf00] sm:$0xff]  }
 0x1ed   : > { %13384 = vmatpush3.bf16.msra.mxu1 %v14457_v51  ;;  %v14495_v51 = vld [vmem:[%s14949_s23 + $0xfc0] sm:$0xff]  }
 0x1ee   : > { %13385 = vmatprep.subr.bf16.mxu1 %v14459_v53  ;;  %v14497_v53 = vld [vmem:[%s14949_s23 + $0xf80] sm:$0xff]  }
 0x1ef   : > { %13364 = vmatpush3.bf16.msra.mxu0 %v14460_v54  ;;  %v2482_v54 = vrot.slane %v15545_v62, %v14990_v42  ;;  %v14505_v62 = vld [vmem:[%s14949_s23 + $0x1030] sm:$0xff]  }
 0x1f0   : > { %13365 = vmatprep.subr.bf16.mxu0 %v14462_v59 }
 0x1f1   : > { %13386 = vmatpush3.bf16.msra.mxu1 %v14461_v56  ;;  %v14500_v56 = vld [vmem:[%s14949_s23 + $0x10f8] sm:$0xff]   ;;  %v2498_v59 = vcombine.high %v2482_v54, %v2482_v54 }
 0x1f2   : > { %13387 = vmatprep.subr.bf16.mxu1 %v14463_v60  ;;  %v14503_v60 = vld [vmem:[%s14949_s23 + $0x1070] sm:$0xff]  }
 0x1f3   : > { %13366 = vmatpush3.bf16.msra.mxu0 %v14464_v63 }
 0x1f4   : > { %13395 = vmatprep.subr.bf16.mxu0 %v14466_v4 }
 0x1f5   : > { %13388 = vmatpush3.bf16.msra.mxu1 %v14465_v0  ;;  %v14506_v0 = vld [vmem:[%s14949_s23 + $0x10b0] sm:$0xff]  }
 0x1f6   : > { %v13103_v14 = vpop.f32.mrf.mxu0  ;;  %8774 = vmatmul.mubr.bf16.vlgmr.msra.gmra.mxu0 %v2475_v1  ;;  %13417 = vmatprep.subr.bf16.mxu1 %v14467_v6  ;;  %v14507_v1 = vld [vmem:[%s14949_s23 + $0x1068] sm:$0xff]  }
 0x1f7   : > { %13396 = vmatpush3.bf16.msra.mxu0 %v14468_v8  ;;  %8853 = vmatprep.mubr.bf16.mxu0 %v2496_v7  ;;  %v14509_v8 = vld [vmem:[%s14949_s23 + $0x1028] sm:$0xff]  }
 0x1f8   : > { %v13125_v17 = vpop.f32.mrf.mxu1  ;;  %8814 = vmatmul.mubr.bf16.vlgmr.msra.gmra.mxu1 %v2497_v10  ;;  %v13104_v18 = vpop.f32.mrf.mxu0  ;;  %13397 = vmatprep.subr.bf16.mxu0 %v14470_v11  ;;  %v14510_v11 = vld [vmem:[%s14949_s23 + $0x10a8] sm:$0xff]  }
 0x1f9   : > { %13418 = vmatpush3.bf16.msra.mxu1 %v14469_v9  ;;  %v13105_v21 = vadd.f32 %v13104_v18, %v13103_v14  ;;  %8893 = vmatprep.mubr.bf16.mxu1 %v2500_v13  ;;  %v14511_v14 = vld [vmem:[%s14949_s23 + $0x1060] sm:$0xff]  }
 0x1fa   : > { %v13126_v22 = vpop.f32.mrf.mxu1  ;;  %v13106_v23 = vpop.f32.mrf.mxu0  ;;  %13419 = vmatprep.subr.bf16.mxu1 %v14471_v12  ;;  %v14513_v18 = vld [vmem:[%s14949_s23 + $0x1020] sm:$0xff]  }
 0x1fb   : > { %v8296_v24 = vadd.f32 %v13105_v21, %v15523_v38  ;;  %v13127_v26 = vadd.f32 %v13126_v22, %v13125_v17  ;;  %13398 = vmatpush3.bf16.msra.mxu0 %v14472_v15  ;;  %v14483_v38 = vld [vmem:[%s14949_s23 + $0xfd8] sm:$0xff]  }
 0x1fc   : > { %v13128_v28 = vpop.f32.mrf.mxu1  ;;  %v13107_v29 = vpop.f32.mrf.mxu0  ;;  %13399 = vmatprep.subr.bf16.mxu0 %v14474_v19  ;;  %v14514_v19 = vld [vmem:[%s14949_s23 + $0x10a0] sm:$0xff]   ;;  %v14515_v21 = vld [vmem:[%s14949_s23 + $0x1058] sm:$0xff]  }
 0x1fd   : > { %v15568_v31 = vadd.f32 %v13127_v26, %v8296_v24  ;;  %13420 = vmatpush3.bf16.msra.mxu1 %v14473_v16  ;;  %v14512_v16 = vld [vmem:[%s14949_s23 + $0x10e0] sm:$0xff]   ;;  %v14517_v22 = vld [vmem:[%s14949_s23 + $0x1018] sm:$0xff]   ;;  %v14520_v24 = vld [vmem:[%s14949_s23 + $0x10d0] sm:$0xff]  }
 0x1fe   : > { %v13129_v33 = vpop.f32.mrf.mxu1  ;;  %13421 = vmatprep.subr.bf16.mxu1 %v14475_v20  ;;  %v14516_v20 = vld [vmem:[%s14949_s23 + $0x10d8] sm:$0xff]   ;;  %v14521_v26 = vld [vmem:[%s14949_s23 + $0x1010] sm:$0xff]   ;;  %v14523_v28 = vld [vmem:[%s14949_s23 + $0x1048] sm:$0xff]  }
 0x1ff   : > { %13400 = vmatpush3.bf16.msra.mxu0 %v14476_v25  ;;  %v14518_v23 = vld [vmem:[%s14949_s23 + $0x1098] sm:$0xff]   ;;  %v14519_v25 = vld [vmem:[%s14949_s23 + $0x1050] sm:$0xff]   ;;  %v14524_v29 = vld [vmem:[%s14949_s23 + $0x10c8] sm:$0xff]  }
 0x200   : > { %13401 = vmatprep.subr.bf16.mxu0 %v14478_v30  ;;  %v14525_v30 = vld [vmem:[%s14949_s23 + $0x1008] sm:$0xff]  }
 0x201   : > { %13422 = vmatpush3.bf16.msra.mxu1 %v14477_v27  ;;  %v14522_v27 = vld [vmem:[%s14949_s23 + $0x1090] sm:$0xff]  }
 0x202   : > { %13423 = vmatprep.subr.bf16.mxu1 %v14479_v32  ;;  %v14526_v32 = vld [vmem:[%s14949_s23 + $0x1088] sm:$0xff]  }
 0x203   : > { %13402 = vmatpush3.bf16.msra.mxu0 %v14480_v35 }
 0x204   : > { %13403 = vmatprep.subr.bf16.mxu0 %v14482_v37  ;;  %v14528_v37 = vld [vmem:[%s14949_s23 + $0x10c0] sm:$0xff]  }
 0x205   : > { %13424 = vmatpush3.bf16.msra.mxu1 %v14481_v36  ;;  %v14527_v36 = vld [vmem:[%s14949_s23 + $0x1040] sm:$0xff]  }
 0x206   : > { %13425 = vmatprep.subr.bf16.mxu1 %v14483_v38 }
 0x207   : > { %13404 = vmatpush3.bf16.msra.mxu0 %v14484_v39 }
 0x208   : > { %13405 = vmatprep.subr.bf16.mxu0 %v14486_v41  ;;  %v14530_v41 = vld [vmem:[%s14949_s23 + $0x1080] sm:$0xff]  }
 0x209   : > { %13426 = vmatpush3.bf16.msra.mxu1 %v14485_v40  ;;  %v14529_v40 = vld [vmem:[%s14949_s23 + $0x1000] sm:$0xff]  }
 0x20a   : > { %13427 = vmatprep.subr.bf16.mxu1 %v14487_v44 }
 0x20b   : > { %13406 = vmatpush3.bf16.msra.mxu0 %v14488_v45 }
 0x20c   : > { %13407 = vmatprep.subr.bf16.mxu0 %v14490_v46  ;;  %v14531_v46 = vld [vmem:[%s14949_s23 + $0x1178] sm:$0xff]  }
 0x20d   : > { %13428 = vmatpush3.bf16.msra.mxu1 %v14489_v43 }
 0x20e   : > { %13429 = vmatprep.subr.bf16.mxu1 %v14491_v47 }
 0x20f   : > { %13408 = vmatpush3.bf16.msra.mxu0 %v14492_v48  ;;  %v14532_v48 = vld [vmem:[%s14949_s23 + $0x11f8] sm:$0xff]  }
 0x210   : > { %13409 = vmatprep.subr.bf16.mxu0 %v14494_v50  ;;  %v14533_v50 = vld [vmem:[%s14949_s23 + $0x1138] sm:$0xff]  }
 0x211   : > { %13430 = vmatpush3.bf16.msra.mxu1 %v14493_v49 }
 0x212   : > { %13431 = vmatprep.subr.bf16.mxu1 %v14495_v51  ;;  %v14534_v51 = vld [vmem:[%s14949_s23 + $0x11b8] sm:$0xff]  }
 0x213   : > { %13410 = vmatpush3.bf16.msra.mxu0 %v14496_v52 }
 0x214   : > { %13439 = vmatprep.subr.bf16.mxu0 %v14499_v55 }
 0x215   : > { %13432 = vmatpush3.bf16.msra.mxu1 %v14497_v53  ;;  %v14535_v53 = vld [vmem:[%s14949_s23 + $0x1170] sm:$0xff]  }
 0x216   : > { %v13147_v63 = vpop.f32.mrf.mxu0  ;;  %8854 = vmatmul.mubr.bf16.vlgmr.msra.gmra.mxu0 %v2482_v54  ;;  %13461 = vmatprep.subr.bf16.mxu1 %v14500_v56  ;;  %v14536_v54 = vld [vmem:[%s14949_s23 + $0x11f0] sm:$0xff]  }
 0x217   : > { %13440 = vmatpush3.bf16.msra.mxu0 %v14501_v57  ;;  %v14537_v57 = vld [vmem:[%s14949_s23 + $0x1130] sm:$0xff]  }
 0x218   : > { %v13169_v2 = vpop.f32.mrf.mxu1  ;;  %8894 = vmatmul.mubr.bf16.vlgmr.msra.gmra.mxu1 %v2498_v59  ;;  %v13148_v3 = vpop.f32.mrf.mxu0  ;;  %13441 = vmatprep.subr.bf16.mxu0 %v14503_v60 }
 0x219   : > { %13462 = vmatpush3.bf16.msra.mxu1 %v14502_v58  ;;  %v13149_v4 = vadd.f32 %v13148_v3, %v13147_v63  ;;  %v14538_v58 = vld [vmem:[%s14949_s23 + $0x11b0] sm:$0xff]   ;;  %v14541_v3 = vld [vmem:[%s14949_s23 + $0x1128] sm:$0xff]  }
 0x21a   : > { %v13170_v6 = vpop.f32.mrf.mxu1  ;;  %v13150_v7 = vpop.f32.mrf.mxu0  ;;  %13463 = vmatprep.subr.bf16.mxu1 %v14504_v61  ;;  %v14539_v61 = vld [vmem:[%s14949_s23 + $0x1168] sm:$0xff]  }
 0x21b   : > { %v8376_v9 = vadd.f32 %v13149_v4, %v15568_v31  ;;  %v13171_v10 = vadd.f32 %v13170_v6, %v13169_v2  ;;  %13442 = vmatpush3.bf16.msra.mxu0 %v14505_v62  ;;  %v491_v31 = vld [vmem:[%s14944_s19 + $0x40] sm:$0xff]  ;;  %v14540_v62 = vld [vmem:[%s14949_s23 + $0x11e8] sm:$0xff]  }
 0x21c   : > { %v13172_v12 = vpop.f32.mrf.mxu1  ;;  %v13151_v13 = vpop.f32.mrf.mxu0  ;;  %13443 = vmatprep.subr.bf16.mxu0 %v14507_v1  ;;  %v2508_v33 = vrot.slane %v491_v31, %v14990_v42  ;;  %v2501_v35 = vcombine.high %v491_v31, %v491_v31  ;;  %v14564_v31 = vld [vmem:[%s14949_s23 + $0x1278] sm:$0xff]  }
 0x21d   : > { %v15605_v15 = vadd.f32 %v13171_v10, %v8376_v9  ;;  %13464 = vmatpush3.bf16.msra.mxu1 %v14506_v0  ;;  %v14544_v10 = vld [vmem:[%s14949_s23 + $0x11e0] sm:$0xff]  }
 0x21e   : > { %v13173_v17 = vpop.f32.mrf.mxu1  ;;  %13465 = vmatprep.subr.bf16.mxu1 %v14508_v5  ;;  %v2516_v38 = vcombine.high %v2508_v33, %v2508_v33  ;;  %v15627_v39 = vrot.slane %v2501_v35, %v14990_v42  ;;  %v2524_v43 = vrot.slane %v2508_v33, %v14990_v42  ;;  %v14542_v5 = vld [vmem:[%s14949_s23 + $0x11a8] sm:$0xff]   ;;  %v14545_v12 = vld [vmem:[%s14949_s23 + $0x1120] sm:$0xff]   ;;  %v14566_v33 = vld [vmem:[%s14949_s23 + $0x1238] sm:$0xff]  }
 0x21f   : > { %13444 = vmatpush3.bf16.msra.mxu0 %v14509_v8  ;;  %v14543_v8 = vld [vmem:[%s14949_s23 + $0x1160] sm:$0xff]   ;;  %v14550_v17 = vld [vmem:[%s14949_s23 + $0x1198] sm:$0xff]  }
 0x220   : > { %13445 = vmatprep.subr.bf16.mxu0 %v14511_v14  ;;  %v2538_v44 = vrot.slane %v2516_v38, %v14990_v42  ;;  %v2517_v45 = vcombine.high %v15627_v39, %v15627_v39  ;;  %v2546_v52 = vcombine.high %v2524_v43, %v2524_v43  ;;  %v14546_v13 = vld [vmem:[%s14949_s23 + $0x11a0] sm:$0xff]   ;;  %v14547_v14 = vld [vmem:[%s14949_s23 + $0x1158] sm:$0xff]   ;;  %v14569_v38 = vld [vmem:[%s14949_s23 + $0x12f0] sm:$0xff]  }
 0x221   : > { %13466 = vmatpush3.bf16.msra.mxu1 %v14510_v11  ;;  %v14567_v35 = vld [vmem:[%s14949_s23 + $0x12b8] sm:$0xff]  }
 0x222   : > { %13467 = vmatprep.subr.bf16.mxu1 %v14512_v16  ;;  %8933 = vmatprep.mubr.bf16.mxu0 %v2538_v44  ;;  %v2548_v47 = vcombine.high %v2538_v44, %v2538_v44  ;;  %v2545_v49 = vrot.slane %v2517_v45, %v14990_v42  ;;  %v14549_v16 = vld [vmem:[%s14949_s23 + $0x1118] sm:$0xff]  }
 0x223   : > { %13446 = vmatpush3.bf16.msra.mxu0 %v14513_v18  ;;  %v14551_v18 = vld [vmem:[%s14949_s23 + $0x1150] sm:$0xff]  }
 0x224   : > { %13447 = vmatprep.subr.bf16.mxu0 %v14515_v21  ;;  %8973 = vmatprep.mubr.bf16.mxu1 %v2548_v47  ;;  %v2549_v55 = vcombine.high %v2545_v49, %v2545_v49  ;;  %v14553_v21 = vld [vmem:[%s14949_s23 + $0x1110] sm:$0xff]   ;;  %v14573_v47 = vld [vmem:[%s14949_s23 + $0x12e8] sm:$0xff]  }
 0x225   : > { %13468 = vmatpush3.bf16.msra.mxu1 %v14514_v19  ;;  %v14552_v19 = vld [vmem:[%s14949_s23 + $0x11d0] sm:$0xff]  }
 0x226   : > { %13469 = vmatprep.subr.bf16.mxu1 %v14516_v20  ;;  %v14554_v20 = vld [vmem:[%s14949_s23 + $0x1190] sm:$0xff]  }
 0x227   : > { %13448 = vmatpush3.bf16.msra.mxu0 %v14517_v22  ;;  %v14555_v22 = vld [vmem:[%s14949_s23 + $0x1148] sm:$0xff]  }
 0x228   : > { %13449 = vmatprep.subr.bf16.mxu0 %v14519_v25  ;;  %v14557_v25 = vld [vmem:[%s14949_s23 + $0x1108] sm:$0xff]  }
 0x229   : > { %13470 = vmatpush3.bf16.msra.mxu1 %v14518_v23  ;;  %v14556_v23 = vld [vmem:[%s14949_s23 + $0x11c8] sm:$0xff]  }
 0x22a   : > { %13471 = vmatprep.subr.bf16.mxu1 %v14520_v24  ;;  %v14558_v24 = vld [vmem:[%s14949_s23 + $0x1188] sm:$0xff]  }
 0x22b   : > { %13450 = vmatpush3.bf16.msra.mxu0 %v14521_v26  ;;  %v14559_v26 = vld [vmem:[%s14949_s23 + $0x1140] sm:$0xff]  }
 0x22c   : > { %13451 = vmatprep.subr.bf16.mxu0 %v14523_v28  ;;  %v14561_v28 = vld [vmem:[%s14949_s23 + $0x1100] sm:$0xff]  }
 0x22d   : > { %13472 = vmatpush3.bf16.msra.mxu1 %v14522_v27  ;;  %v14560_v27 = vld [vmem:[%s14949_s23 + $0x11c0] sm:$0xff]  }
 0x22e   : > { %13473 = vmatprep.subr.bf16.mxu1 %v14524_v29  ;;  %v14562_v29 = vld [vmem:[%s14949_s23 + $0x1180] sm:$0xff]  }
 0x22f   : > { %13452 = vmatpush3.bf16.msra.mxu0 %v14525_v30  ;;  %v2531_v30 = vrot.slane %v15627_v39, %v14990_v42  ;;  %v14570_v39 = vld [vmem:[%s14949_s23 + $0x1230] sm:$0xff]  }
 0x230   : > { %13453 = vmatprep.subr.bf16.mxu0 %v14527_v36 }
 0x231   : > { %13474 = vmatpush3.bf16.msra.mxu1 %v14526_v32  ;;  %v14565_v32 = vld [vmem:[%s14949_s23 + $0x12f8] sm:$0xff]   ;;  %v2547_v36 = vcombine.high %v2531_v30, %v2531_v30 }
 0x232   : > { %13475 = vmatprep.subr.bf16.mxu1 %v14528_v37  ;;  %v14568_v37 = vld [vmem:[%s14949_s23 + $0x1270] sm:$0xff]  }
 0x233   : > { %13454 = vmatpush3.bf16.msra.mxu0 %v14529_v40 }
 0x234   : > { %13483 = vmatprep.subr.bf16.mxu0 %v14531_v46 }
 0x235   : > { %13476 = vmatpush3.bf16.msra.mxu1 %v14530_v41  ;;  %v14571_v41 = vld [vmem:[%s14949_s23 + $0x12b0] sm:$0xff]  }
 0x236   : > { %v13191_v56 = vpop.f32.mrf.mxu0  ;;  %8934 = vmatmul.mubr.bf16.vlgmr.msra.gmra.mxu0 %v2524_v43  ;;  %13505 = vmatprep.subr.bf16.mxu1 %v14532_v48  ;;  %v14572_v43 = vld [vmem:[%s14949_s23 + $0x1268] sm:$0xff]  }
 0x237   : > { %13484 = vmatpush3.bf16.msra.mxu0 %v14533_v50  ;;  %9013 = vmatprep.mubr.bf16.mxu0 %v2545_v49  ;;  %v14574_v50 = vld [vmem:[%s14949_s23 + $0x1228] sm:$0xff]  }
 0x238   : > { %v13213_v59 = vpop.f32.mrf.mxu1  ;;  %8974 = vmatmul.mubr.bf16.vlgmr.msra.gmra.mxu1 %v2546_v52  ;;  %v13192_v60 = vpop.f32.mrf.mxu0  ;;  %13485 = vmatprep.subr.bf16.mxu0 %v14535_v53  ;;  %v14575_v53 = vld [vmem:[%s14949_s23 + $0x12a8] sm:$0xff]  }
 0x239   : > { %13506 = vmatpush3.bf16.msra.mxu1 %v14534_v51  ;;  %v13193_v63 = vadd.f32 %v13192_v60, %v13191_v56  ;;  %9053 = vmatprep.mubr.bf16.mxu1 %v2549_v55  ;;  %v14576_v56 = vld [vmem:[%s14949_s23 + $0x1260] sm:$0xff]  }
 0x23a   : > { %v13214_v0 = vpop.f32.mrf.mxu1  ;;  %v13194_v2 = vpop.f32.mrf.mxu0  ;;  %13507 = vmatprep.subr.bf16.mxu1 %v14536_v54  ;;  %v14578_v60 = vld [vmem:[%s14949_s23 + $0x1220] sm:$0xff]  }
 0x23b   : > { %v8456_v1 = vadd.f32 %v13193_v63, %v15605_v15  ;;  %v13215_v4 = vadd.f32 %v13214_v0, %v13213_v59  ;;  %13486 = vmatpush3.bf16.msra.mxu0 %v14537_v57  ;;  %v14548_v15 = vld [vmem:[%s14949_s23 + $0x11d8] sm:$0xff]  }
 0x23c   : > { %v13216_v6 = vpop.f32.mrf.mxu1  ;;  %v13195_v7 = vpop.f32.mrf.mxu0  ;;  %13487 = vmatprep.subr.bf16.mxu0 %v14539_v61  ;;  %v14579_v61 = vld [vmem:[%s14949_s23 + $0x12a0] sm:$0xff]   ;;  %v14580_v63 = vld [vmem:[%s14949_s23 + $0x1258] sm:$0xff]  }
 0x23d   : > { %v15650_v9 = vadd.f32 %v13215_v4, %v8456_v1  ;;  %13508 = vmatpush3.bf16.msra.mxu1 %v14538_v58  ;;  %v14577_v58 = vld [vmem:[%s14949_s23 + $0x12e0] sm:$0xff]   ;;  %v14582_v0 = vld [vmem:[%s14949_s23 + $0x1218] sm:$0xff]   ;;  %v14585_v1 = vld [vmem:[%s14949_s23 + $0x12d0] sm:$0xff]  }
 0x23e   : > { %v13217_v11 = vpop.f32.mrf.mxu1  ;;  %13509 = vmatprep.subr.bf16.mxu1 %v14540_v62  ;;  %v14581_v62 = vld [vmem:[%s14949_s23 + $0x12d8] sm:$0xff]   ;;  %v14586_v4 = vld [vmem:[%s14949_s23 + $0x1210] sm:$0xff]   ;;  %v14588_v6 = vld [vmem:[%s14949_s23 + $0x1248] sm:$0xff]  }
 0x23f   : > { %13488 = vmatpush3.bf16.msra.mxu0 %v14541_v3  ;;  %v14583_v2 = vld [vmem:[%s14949_s23 + $0x1298] sm:$0xff]   ;;  %v14584_v3 = vld [vmem:[%s14949_s23 + $0x1250] sm:$0xff]   ;;  %v14589_v7 = vld [vmem:[%s14949_s23 + $0x12c8] sm:$0xff]  }
 0x240   : > { %13489 = vmatprep.subr.bf16.mxu0 %v14543_v8  ;;  %v14590_v8 = vld [vmem:[%s14949_s23 + $0x1208] sm:$0xff]  }
 0x241   : > { %13510 = vmatpush3.bf16.msra.mxu1 %v14542_v5  ;;  %v14587_v5 = vld [vmem:[%s14949_s23 + $0x1290] sm:$0xff]  }
 0x242   : > { %13511 = vmatprep.subr.bf16.mxu1 %v14544_v10  ;;  %v14592_v10 = vld [vmem:[%s14949_s23 + $0x1240] sm:$0xff]  }
 0x243   : > { %13490 = vmatpush3.bf16.msra.mxu0 %v14545_v12 }
 0x244   : > { %13491 = vmatprep.subr.bf16.mxu0 %v14547_v14  ;;  %v14593_v14 = vld [vmem:[%s14949_s23 + $0x12c0] sm:$0xff]  }
 0x245   : > { %13512 = vmatpush3.bf16.msra.mxu1 %v14546_v13  ;;  %v14591_v13 = vld [vmem:[%s14949_s23 + $0x1288] sm:$0xff]  }
 0x246   : > { %13513 = vmatprep.subr.bf16.mxu1 %v14548_v15 }
 0x247   : > { %13492 = vmatpush3.bf16.msra.mxu0 %v14549_v16 }
 0x248   : > { %13493 = vmatprep.subr.bf16.mxu0 %v14551_v18 }
 0x249   : > { %13514 = vmatpush3.bf16.msra.mxu1 %v14550_v17  ;;  %v14594_v17 = vld [vmem:[%s14949_s23 + $0x1200] sm:$0xff]  }
 0x24a   : > { %13515 = vmatprep.subr.bf16.mxu1 %v14552_v19 }
 0x24b   : > { %13494 = vmatpush3.bf16.msra.mxu0 %v14553_v21  ;;  %v14596_v21 = vld [vmem:[%s14949_s23 + $0x1378] sm:$0xff]  }
 0x24c   : > { %13495 = vmatprep.subr.bf16.mxu0 %v14555_v22  ;;  %v14595_v22 = vld [vmem:[%s14949_s23 + $0x1280] sm:$0xff]  }
 0x24d   : > { %13516 = vmatpush3.bf16.msra.mxu1 %v14554_v20 }
 0x24e   : > { %13517 = vmatprep.subr.bf16.mxu1 %v14556_v23 }
 0x24f   : > { %13496 = vmatpush3.bf16.msra.mxu0 %v14557_v25  ;;  %v14597_v25 = vld [vmem:[%s14949_s23 + $0x13f8] sm:$0xff]  }
 0x250   : > { %13497 = vmatprep.subr.bf16.mxu0 %v14559_v26  ;;  %v14598_v26 = vld [vmem:[%s14949_s23 + $0x1338] sm:$0xff]  }
 0x251   : > { %13518 = vmatpush3.bf16.msra.mxu1 %v14558_v24 }
 0x252   : > { %13519 = vmatprep.subr.bf16.mxu1 %v14560_v27 }
 0x253   : > { %13498 = vmatpush3.bf16.msra.mxu0 %v14561_v28  ;;  %v14600_v28 = vld [vmem:[%s14949_s23 + $0x1370] sm:$0xff]  }
 0x254   : > { %13527 = vmatprep.subr.bf16.mxu0 %v14564_v31 }
 0x255   : > { %13520 = vmatpush3.bf16.msra.mxu1 %v14562_v29  ;;  %v14599_v29 = vld [vmem:[%s14949_s23 + $0x13b8] sm:$0xff]  }
 0x256   : > { %v13235_v40 = vpop.f32.mrf.mxu0  ;;  %9014 = vmatmul.mubr.bf16.vlgmr.msra.gmra.mxu0 %v2531_v30  ;;  %13549 = vmatprep.subr.bf16.mxu1 %v14565_v32  ;;  %v14601_v32 = vld [vmem:[%s14949_s23 + $0x13f0] sm:$0xff]  }
 0x257   : > { %13528 = vmatpush3.bf16.msra.mxu0 %v14566_v33  ;;  %v14602_v33 = vld [vmem:[%s14949_s23 + $0x1330] sm:$0xff]  }
 0x258   : > { %v13257_v44 = vpop.f32.mrf.mxu1  ;;  %9054 = vmatmul.mubr.bf16.vlgmr.msra.gmra.mxu1 %v2547_v36  ;;  %v13236_v45 = vpop.f32.mrf.mxu0  ;;  %13529 = vmatprep.subr.bf16.mxu0 %v14568_v37  ;;  %v14604_v37 = vld [vmem:[%s14949_s23 + $0x1368] sm:$0xff]  }
 0x259   : > { %13550 = vmatpush3.bf16.msra.mxu1 %v14567_v35  ;;  %v13237_v46 = vadd.f32 %v13236_v45, %v13235_v40  ;;  %v14603_v40 = vld [vmem:[%s14949_s23 + $0x13b0] sm:$0xff]  }
 0x25a   : > { %v13258_v48 = vpop.f32.mrf.mxu1  ;;  %v13238_v49 = vpop.f32.mrf.mxu0  ;;  %13551 = vmatprep.subr.bf16.mxu1 %v14569_v38 }
 0x25b   : > { %v8536_v51 = vadd.f32 %v13237_v46, %v15650_v9  ;;  %v13259_v52 = vadd.f32 %v13258_v48, %v13257_v44  ;;  %13530 = vmatpush3.bf16.msra.mxu0 %v14570_v39  ;;  %v492_v9 = vld [vmem:[%s14944_s19 + $0x48] sm:$0xff]  ;;  %v14608_v49 = vld [vmem:[%s14949_s23 + $0x1360] sm:$0xff]  }
 0x25c   : > { %v13260_v54 = vpop.f32.mrf.mxu1  ;;  %v13239_v55 = vpop.f32.mrf.mxu0  ;;  %13531 = vmatprep.subr.bf16.mxu0 %v14572_v43  ;;  %v2557_v11 = vrot.slane %v492_v9, %v14990_v42  ;;  %v2550_v12 = vcombine.high %v492_v9, %v492_v9  ;;  %v14605_v44 = vld [vmem:[%s14949_s23 + $0x13e8] sm:$0xff]   ;;  %v14627_v9 = vld [vmem:[%s14949_s23 + $0x1380] sm:$0xff]  }
 0x25d   : > { %v15687_v57 = vadd.f32 %v13259_v52, %v8536_v51  ;;  %13552 = vmatpush3.bf16.msra.mxu1 %v14571_v41  ;;  %v14606_v46 = vld [vmem:[%s14949_s23 + $0x1328] sm:$0xff]   ;;  %v14610_v54 = vld [vmem:[%s14949_s23 + $0x1320] sm:$0xff]   ;;  %v14612_v55 = vld [vmem:[%s14949_s23 + $0x1358] sm:$0xff]  }
 0x25e   : > { %v13261_v59 = vpop.f32.mrf.mxu1  ;;  %13553 = vmatprep.subr.bf16.mxu1 %v14573_v47  ;;  %v2565_v15 = vcombine.high %v2557_v11, %v2557_v11  ;;  %v15709_v16 = vrot.slane %v2550_v12, %v14990_v42  ;;  %v2573_v19 = vrot.slane %v2557_v11, %v14990_v42  ;;  %v14607_v51 = vld [vmem:[%s14949_s23 + $0x13a8] sm:$0xff]   ;;  %v14631_v11 = vld [vmem:[%s14949_s23 + $0x1438] sm:$0xff]  }
 0x25f   : > { %13532 = vmatpush3.bf16.msra.mxu0 %v14574_v50  ;;  %v14616_v59 = vld [vmem:[%s14949_s23 + $0x1350] sm:$0xff]  }
 0x260   : > { %13533 = vmatprep.subr.bf16.mxu0 %v14576_v56  ;;  %v2587_v18 = vrot.slane %v2565_v15, %v14990_v42  ;;  %v2566_v20 = vcombine.high %v15709_v16, %v15709_v16  ;;  %v2595_v27 = vcombine.high %v2573_v19, %v2573_v19  ;;  %v14611_v56 = vld [vmem:[%s14949_s23 + $0x13a0] sm:$0xff]  }
 0x261   : > { %13554 = vmatpush3.bf16.msra.mxu1 %v14575_v53  ;;  %v14609_v53 = vld [vmem:[%s14949_s23 + $0x13e0] sm:$0xff]  }
 0x262   : > { %13555 = vmatprep.subr.bf16.mxu1 %v14577_v58  ;;  %9093 = vmatprep.mubr.bf16.mxu0 %v2587_v18  ;;  %v2597_v23 = vcombine.high %v2587_v18, %v2587_v18  ;;  %v2594_v24 = vrot.slane %v2566_v20, %v14990_v42  ;;  %v14614_v58 = vld [vmem:[%s14949_s23 + $0x1318] sm:$0xff]  }
 0x263   : > { %13534 = vmatpush3.bf16.msra.mxu0 %v14578_v60  ;;  %v14615_v60 = vld [vmem:[%s14949_s23 + $0x1398] sm:$0xff]  }
 0x264   : > { %13535 = vmatprep.subr.bf16.mxu0 %v14580_v63  ;;  %9133 = vmatprep.mubr.bf16.mxu1 %v2597_v23  ;;  %v2598_v30 = vcombine.high %v2594_v24, %v2594_v24  ;;  %v14618_v63 = vld [vmem:[%s14949_s23 + $0x1310] sm:$0xff]  }
 0x265   : > { %13556 = vmatpush3.bf16.msra.mxu1 %v14579_v61  ;;  %v14617_v61 = vld [vmem:[%s14949_s23 + $0x13d0] sm:$0xff]  }
 0x266   : > { %13557 = vmatprep.subr.bf16.mxu1 %v14581_v62  ;;  %v14620_v62 = vld [vmem:[%s14949_s23 + $0x1348] sm:$0xff]  }
 0x267   : > { %13536 = vmatpush3.bf16.msra.mxu0 %v14582_v0  ;;  %v14619_v0 = vld [vmem:[%s14949_s23 + $0x1390] sm:$0xff]  }
 0x268   : > { %13537 = vmatprep.subr.bf16.mxu0 %v14584_v3  ;;  %v14622_v3 = vld [vmem:[%s14949_s23 + $0x1308] sm:$0xff]  }
 0x269   : > { %13558 = vmatpush3.bf16.msra.mxu1 %v14583_v2  ;;  %v14621_v2 = vld [vmem:[%s14949_s23 + $0x13c8] sm:$0xff]  }
 0x26a   : > { %13559 = vmatprep.subr.bf16.mxu1 %v14585_v1  ;;  %v14624_v1 = vld [vmem:[%s14949_s23 + $0x1340] sm:$0xff]  }
 0x26b   : > { %13538 = vmatpush3.bf16.msra.mxu0 %v14586_v4  ;;  %v14623_v4 = vld [vmem:[%s14949_s23 + $0x1388] sm:$0xff]  }
 0x26c   : > { %13539 = vmatprep.subr.bf16.mxu0 %v14588_v6  ;;  %v14626_v6 = vld [vmem:[%s14949_s23 + $0x1300] sm:$0xff]  }
 0x26d   : > { %13560 = vmatpush3.bf16.msra.mxu1 %v14587_v5  ;;  %v14625_v5 = vld [vmem:[%s14949_s23 + $0x13c0] sm:$0xff]  }
 0x26e   : > { %13561 = vmatprep.subr.bf16.mxu1 %v14589_v7  ;;  %v2580_v7 = vrot.slane %v15709_v16, %v14990_v42  ;;  %v14634_v16 = vld [vmem:[%s14949_s23 + $0x14f0] sm:$0xff]  }
 0x26f   : > { %13540 = vmatpush3.bf16.msra.mxu0 %v14590_v8  ;;  %v14629_v8 = vld [vmem:[%s14949_s23 + $0x1478] sm:$0xff]  }
 0x270   : > { %13541 = vmatprep.subr.bf16.mxu0 %v14592_v10  ;;  %v14630_v10 = vld [vmem:[%s14949_s23 + $0x14f8] sm:$0xff]   ;;  %v2596_v12 = vcombine.high %v2580_v7, %v2580_v7 }
 0x271   : > { %13562 = vmatpush3.bf16.msra.mxu1 %v14591_v13  ;;  %v14633_v13 = vld [vmem:[%s14949_s23 + $0x1470] sm:$0xff]  }
 0x272   : > { %13563 = vmatprep.subr.bf16.mxu1 %v14593_v14  ;;  %v14632_v14 = vld [vmem:[%s14949_s23 + $0x14b8] sm:$0xff]  }
 0x273   : > { %13542 = vmatpush3.bf16.msra.mxu0 %v14594_v17  ;;  %v14635_v17 = vld [vmem:[%s14949_s23 + $0x1430] sm:$0xff]  }
 0x274   : > { %13571 = vmatprep.subr.bf16.mxu0 %v14596_v21  ;;  %v14637_v21 = vld [vmem:[%s14949_s23 + $0x1468] sm:$0xff]  }
 0x275   : > { %13564 = vmatpush3.bf16.msra.mxu1 %v14595_v22  ;;  %v14636_v22 = vld [vmem:[%s14949_s23 + $0x14b0] sm:$0xff]  }
 0x276   : > { %v13279_v31 = vpop.f32.mrf.mxu0  ;;  %9094 = vmatmul.mubr.bf16.vlgmr.msra.gmra.mxu0 %v2573_v19  ;;  %13593 = vmatprep.subr.bf16.mxu1 %v14597_v25 }
 0x277   : > { %13572 = vmatpush3.bf16.msra.mxu0 %v14598_v26  ;;  %9173 = vmatprep.mubr.bf16.mxu0 %v2594_v24  ;;  %v14638_v24 = vld [vmem:[%s14949_s23 + $0x14e8] sm:$0xff]  }
 0x278   : > { %v13301_v35 = vpop.f32.mrf.mxu1  ;;  %9134 = vmatmul.mubr.bf16.vlgmr.msra.gmra.mxu1 %v2595_v27  ;;  %v13280_v36 = vpop.f32.mrf.mxu0  ;;  %13573 = vmatprep.subr.bf16.mxu0 %v14600_v28  ;;  %v14639_v28 = vld [vmem:[%s14949_s23 + $0x1428] sm:$0xff]  }
 0x279   : > { %13594 = vmatpush3.bf16.msra.mxu1 %v14599_v29  ;;  %v13281_v38 = vadd.f32 %v13280_v36, %v13279_v31  ;;  %9213 = vmatprep.mubr.bf16.mxu1 %v2598_v30  ;;  %v14641_v31 = vld [vmem:[%s14949_s23 + $0x1460] sm:$0xff]  }
 0x27a   : > { %v13302_v39 = vpop.f32.mrf.mxu1  ;;  %v13282_v41 = vpop.f32.mrf.mxu0  ;;  %13595 = vmatprep.subr.bf16.mxu1 %v14601_v32  ;;  %v14642_v36 = vld [vmem:[%s14949_s23 + $0x14e0] sm:$0xff]  }
 0x27b   : > { %v8616_v45 = vadd.f32 %v13281_v38, %v15687_v57  ;;  %v13303_v43 = vadd.f32 %v13302_v39, %v13301_v35  ;;  %13574 = vmatpush3.bf16.msra.mxu0 %v14602_v33  ;;  %v14613_v57 = vld [vmem:[%s14949_s23 + $0x13d8] sm:$0xff]   ;;  %v14640_v33 = vld [vmem:[%s14949_s23 + $0x14a8] sm:$0xff]  }
 0x27c   : > { %v13304_v47 = vpop.f32.mrf.mxu1  ;;  %v13283_v48 = vpop.f32.mrf.mxu0  ;;  %13575 = vmatprep.subr.bf16.mxu0 %v14604_v37  ;;  %v14643_v37 = vld [vmem:[%s14949_s23 + $0x1420] sm:$0xff]   ;;  %v14645_v38 = vld [vmem:[%s14949_s23 + $0x1458] sm:$0xff]  }
 0x27d   : > { %v15731_v50 = vadd.f32 %v13303_v43, %v8616_v45  ;;  %13596 = vmatpush3.bf16.msra.mxu1 %v14603_v40  ;;  %v14644_v40 = vld [vmem:[%s14949_s23 + $0x14a0] sm:$0xff]   ;;  %v14646_v39 = vld [vmem:[%s14949_s23 + $0x14d8] sm:$0xff]   ;;  %v14650_v43 = vld [vmem:[%s14949_s23 + $0x14d0] sm:$0xff]  }
 0x27e   : > { %v13305_v52 = vpop.f32.mrf.mxu1  ;;  %13597 = vmatprep.subr.bf16.mxu1 %v14605_v44  ;;  %v14647_v41 = vld [vmem:[%s14949_s23 + $0x1418] sm:$0xff]   ;;  %v14649_v44 = vld [vmem:[%s14949_s23 + $0x1450] sm:$0xff]   ;;  %v14653_v47 = vld [vmem:[%s14949_s23 + $0x1448] sm:$0xff]  }
 0x27f   : > { %13576 = vmatpush3.bf16.msra.mxu0 %v14606_v46  ;;  %v14648_v45 = vld [vmem:[%s14949_s23 + $0x1498] sm:$0xff]   ;;  %v14651_v46 = vld [vmem:[%s14949_s23 + $0x1410] sm:$0xff]   ;;  %v14657_v52 = vld [vmem:[%s14949_s23 + $0x1440] sm:$0xff]  }
 0x280   : > { %13577 = vmatprep.subr.bf16.mxu0 %v14608_v49  ;;  %v14652_v48 = vld [vmem:[%s14949_s23 + $0x1490] sm:$0xff]   ;;  %v14654_v49 = vld [vmem:[%s14949_s23 + $0x14c8] sm:$0xff]  }
 0x281   : > { %13598 = vmatpush3.bf16.msra.mxu1 %v14607_v51  ;;  %v493_v51 = vld [vmem:[%s14944_s19 + $0x50] sm:$0xff] }
 0x282   : > { %13599 = vmatprep.subr.bf16.mxu1 %v14609_v53  ;;  %v2606_v53 = vrot.slane %v493_v51, %v14990_v42 }
 0x283   : > { %13578 = vmatpush3.bf16.msra.mxu0 %v14610_v54  ;;  %v2599_v54 = vcombine.high %v493_v51, %v493_v51  ;;  %v14692_v51 = vld [vmem:[%s14949_s23 + $0x1580] sm:$0xff]  }
 0x284   : > { %13579 = vmatprep.subr.bf16.mxu0 %v14612_v55  ;;  %v14656_v55 = vld [vmem:[%s14949_s23 + $0x1488] sm:$0xff]  }
 0x285   : > { %13600 = vmatpush3.bf16.msra.mxu1 %v14611_v56  ;;  %v14658_v56 = vld [vmem:[%s14949_s23 + $0x14c0] sm:$0xff]  }
 0x286   : > { %13601 = vmatprep.subr.bf16.mxu1 %v14613_v57  ;;  %v2614_v57 = vcombine.high %v2606_v53, %v2606_v53 }
 0x287   : > { %13580 = vmatpush3.bf16.msra.mxu0 %v14614_v58  ;;  %v15791_v58 = vrot.slane %v2599_v54, %v14990_v42 }
 0x288   : > { %13581 = vmatprep.subr.bf16.mxu0 %v14616_v59  ;;  %v14659_v59 = vld [vmem:[%s14949_s23 + $0x1400] sm:$0xff]  }
 0x289   : > { %13602 = vmatpush3.bf16.msra.mxu1 %v14615_v60  ;;  %v2636_v60 = vrot.slane %v2614_v57, %v14990_v42 }
 0x28a   : > { %13603 = vmatprep.subr.bf16.mxu1 %v14617_v61  ;;  %v2622_v61 = vrot.slane %v2606_v53, %v14990_v42  ;;  %v14696_v53 = vld [vmem:[%s14949_s23 + $0x1638] sm:$0xff]  }
 0x28b   : > { %13582 = vmatpush3.bf16.msra.mxu0 %v14618_v63  ;;  %v14661_v63 = vld [vmem:[%s14949_s23 + $0x1578] sm:$0xff]  }
 0x28c   : > { %13583 = vmatprep.subr.bf16.mxu0 %v14620_v62  ;;  %v2615_v62 = vcombine.high %v15791_v58, %v15791_v58 }
 0x28d   : > { %13604 = vmatpush3.bf16.msra.mxu1 %v14619_v0  ;;  %v14660_v0 = vld [vmem:[%s14949_s23 + $0x1480] sm:$0xff]  }
 0x28e   : > { %13605 = vmatprep.subr.bf16.mxu1 %v14621_v2  ;;  %v2646_v2 = vcombine.high %v2636_v60, %v2636_v60 }
 0x28f   : > { %13584 = vmatpush3.bf16.msra.mxu0 %v14622_v3  ;;  %v14662_v3 = vld [vmem:[%s14949_s23 + $0x15f8] sm:$0xff]  }
 0x290   : > { %13585 = vmatprep.subr.bf16.mxu0 %v14624_v1  ;;  %v2643_v1 = vrot.slane %v2615_v62, %v14990_v42 }
 0x291   : > { %13606 = vmatpush3.bf16.msra.mxu1 %v14623_v4  ;;  %v14663_v4 = vld [vmem:[%s14949_s23 + $0x1538] sm:$0xff]  }
 0x292   : > { %13607 = vmatprep.subr.bf16.mxu1 %v14625_v5  ;;  %v2644_v5 = vcombine.high %v2622_v61, %v2622_v61 }
 0x293   : > { %13586 = vmatpush3.bf16.msra.mxu0 %v14626_v6  ;;  %v14665_v6 = vld [vmem:[%s14949_s23 + $0x1570] sm:$0xff]  }
 0x294   : > { %13615 = vmatprep.subr.bf16.mxu0 %v14629_v8  ;;  %v2647_v8 = vcombine.high %v2643_v1, %v2643_v1 }
 0x295   : > { %13608 = vmatpush3.bf16.msra.mxu1 %v14627_v9 }
 0x296   : > { %v13323_v15 = vpop.f32.mrf.mxu0  ;;  %9174 = vmatmul.mubr.bf16.vlgmr.msra.gmra.mxu0 %v2580_v7  ;;  %13637 = vmatprep.subr.bf16.mxu1 %v14630_v10  ;;  %v14664_v7 = vld [vmem:[%s14949_s23 + $0x15b8] sm:$0xff]   ;;  %v14666_v10 = vld [vmem:[%s14949_s23 + $0x15f0] sm:$0xff]  }
 0x297   : > { %13616 = vmatpush3.bf16.msra.mxu0 %v14631_v11  ;;  %9253 = vmatprep.mubr.bf16.mxu0 %v2636_v60  ;;  %v14667_v11 = vld [vmem:[%s14949_s23 + $0x1530] sm:$0xff]  }
 0x298   : > { %v13345_v18 = vpop.f32.mrf.mxu1  ;;  %9214 = vmatmul.mubr.bf16.vlgmr.msra.gmra.mxu1 %v2596_v12  ;;  %v13324_v19 = vpop.f32.mrf.mxu0  ;;  %13617 = vmatprep.subr.bf16.mxu0 %v14633_v13 }
 0x299   : > { %13638 = vmatpush3.bf16.msra.mxu1 %v14632_v14  ;;  %v13325_v20 = vadd.f32 %v13324_v19, %v13323_v15  ;;  %9293 = vmatprep.mubr.bf16.mxu1 %v2646_v2  ;;  %v14669_v14 = vld [vmem:[%s14949_s23 + $0x1568] sm:$0xff]  }
 0x29a   : > { %v13346_v23 = vpop.f32.mrf.mxu1  ;;  %v13326_v25 = vpop.f32.mrf.mxu0  ;;  %13639 = vmatprep.subr.bf16.mxu1 %v14634_v16  ;;  %v14668_v16 = vld [vmem:[%s14949_s23 + $0x15b0] sm:$0xff]   ;;  %v14670_v19 = vld [vmem:[%s14949_s23 + $0x15e8] sm:$0xff]  }
 0x29b   : > { %v8696_v26 = vadd.f32 %v13325_v20, %v15731_v50  ;;  %v13347_v27 = vadd.f32 %v13346_v23, %v13345_v18  ;;  %13618 = vmatpush3.bf16.msra.mxu0 %v14635_v17  ;;  %v14655_v50 = vld [vmem:[%s14949_s23 + $0x1408] sm:$0xff]  }
 0x29c   : > { %v13348_v29 = vpop.f32.mrf.mxu1  ;;  %v13327_v30 = vpop.f32.mrf.mxu0  ;;  %13619 = vmatprep.subr.bf16.mxu0 %v14637_v21 }
 0x29d   : > { %v15768_v32 = vadd.f32 %v13347_v27, %v8696_v26  ;;  %13640 = vmatpush3.bf16.msra.mxu1 %v14636_v22  ;;  %v14671_v22 = vld [vmem:[%s14949_s23 + $0x1528] sm:$0xff]   ;;  %v14674_v29 = vld [vmem:[%s14949_s23 + $0x15e0] sm:$0xff]  }
 0x29e   : > { %v13349_v35 = vpop.f32.mrf.mxu1  ;;  %13641 = vmatprep.subr.bf16.mxu1 %v14638_v24  ;;  %v14673_v24 = vld [vmem:[%s14949_s23 + $0x1560] sm:$0xff]   ;;  %v14672_v27 = vld [vmem:[%s14949_s23 + $0x15a8] sm:$0xff]  }
 0x29f   : > { %13620 = vmatpush3.bf16.msra.mxu0 %v14639_v28  ;;  %v14675_v30 = vld [vmem:[%s14949_s23 + $0x1520] sm:$0xff]   ;;  %v14679_v35 = vld [vmem:[%s14949_s23 + $0x1518] sm:$0xff]  }
 0x2a0   : > { %13621 = vmatprep.subr.bf16.mxu0 %v14641_v31  ;;  %v14677_v31 = vld [vmem:[%s14949_s23 + $0x1558] sm:$0xff]  }
 0x2a1   : > { %13642 = vmatpush3.bf16.msra.mxu1 %v14640_v33  ;;  %v14678_v33 = vld [vmem:[%s14949_s23 + $0x15d8] sm:$0xff]  }
 0x2a2   : > { %13643 = vmatprep.subr.bf16.mxu1 %v14642_v36  ;;  %v14681_v36 = vld [vmem:[%s14949_s23 + $0x1550] sm:$0xff]  }
 0x2a3   : > { %13622 = vmatpush3.bf16.msra.mxu0 %v14643_v37  ;;  %v14680_v37 = vld [vmem:[%s14949_s23 + $0x1598] sm:$0xff]  }
 0x2a4   : > { %13623 = vmatprep.subr.bf16.mxu0 %v14645_v38  ;;  %v14682_v38 = vld [vmem:[%s14949_s23 + $0x15d0] sm:$0xff]  }
 0x2a5   : > { %13644 = vmatpush3.bf16.msra.mxu1 %v14644_v40  ;;  %v14683_v40 = vld [vmem:[%s14949_s23 + $0x1510] sm:$0xff]  }
 0x2a6   : > { %13645 = vmatprep.subr.bf16.mxu1 %v14646_v39  ;;  %v14685_v39 = vld [vmem:[%s14949_s23 + $0x1548] sm:$0xff]  }
 0x2a7   : > { %13624 = vmatpush3.bf16.msra.mxu0 %v14647_v41  ;;  %v14684_v41 = vld [vmem:[%s14949_s23 + $0x1590] sm:$0xff]  }
 0x2a8   : > { %13625 = vmatprep.subr.bf16.mxu0 %v14649_v44  ;;  %v14686_v44 = vld [vmem:[%s14949_s23 + $0x15c8] sm:$0xff]  }
 0x2a9   : > { %13646 = vmatpush3.bf16.msra.mxu1 %v14648_v45  ;;  %v14687_v45 = vld [vmem:[%s14949_s23 + $0x1508] sm:$0xff]  }
 0x2aa   : > { %13647 = vmatprep.subr.bf16.mxu1 %v14650_v43  ;;  %v14689_v43 = vld [vmem:[%s14949_s23 + $0x1540] sm:$0xff]  }
 0x2ab   : > { %13626 = vmatpush3.bf16.msra.mxu0 %v14651_v46  ;;  %v14688_v46 = vld [vmem:[%s14949_s23 + $0x1588] sm:$0xff]  }
 0x2ac   : > { %13627 = vmatprep.subr.bf16.mxu0 %v14653_v47  ;;  %v14690_v47 = vld [vmem:[%s14949_s23 + $0x15c0] sm:$0xff]  }
 0x2ad   : > { %13648 = vmatpush3.bf16.msra.mxu1 %v14652_v48  ;;  %v14691_v48 = vld [vmem:[%s14949_s23 + $0x1500] sm:$0xff]  }
 0x2ae   : > { %13649 = vmatprep.subr.bf16.mxu1 %v14654_v49  ;;  %v2629_v49 = vrot.slane %v15791_v58, %v14990_v42  ;;  %v14699_v58 = vld [vmem:[%s14949_s23 + $0x16f0] sm:$0xff]  }
 0x2af   : > { %13628 = vmatpush3.bf16.msra.mxu0 %v14655_v50  ;;  %v14694_v50 = vld [vmem:[%s14949_s23 + $0x1678] sm:$0xff]  }
 0x2b0   : > { %13629 = vmatprep.subr.bf16.mxu0 %v14657_v52  ;;  %v14695_v52 = vld [vmem:[%s14949_s23 + $0x16f8] sm:$0xff]   ;;  %v2645_v54 = vcombine.high %v2629_v49, %v2629_v49 }
 0x2b1   : > { %13650 = vmatpush3.bf16.msra.mxu1 %v14656_v55  ;;  %v14698_v55 = vld [vmem:[%s14949_s23 + $0x1670] sm:$0xff]  }
 0x2b2   : > { %13651 = vmatprep.subr.bf16.mxu1 %v14658_v56  ;;  %v14697_v56 = vld [vmem:[%s14949_s23 + $0x16b8] sm:$0xff]  }
 0x2b3   : > { %13630 = vmatpush3.bf16.msra.mxu0 %v14659_v59  ;;  %v14700_v59 = vld [vmem:[%s14949_s23 + $0x1630] sm:$0xff]  }
 0x2b4   : > { %13659 = vmatprep.subr.bf16.mxu0 %v14661_v63  ;;  %v14702_v63 = vld [vmem:[%s14949_s23 + $0x1668] sm:$0xff]  }
 0x2b5   : > { %13652 = vmatpush3.bf16.msra.mxu1 %v14660_v0  ;;  %v14701_v0 = vld [vmem:[%s14949_s23 + $0x16b0] sm:$0xff]  }
 0x2b6   : > { %v13367_v9 = vpop.f32.mrf.mxu0  ;;  %9254 = vmatmul.mubr.bf16.vlgmr.msra.gmra.mxu0 %v2622_v61  ;;  %13681 = vmatprep.subr.bf16.mxu1 %v14662_v3 }
 0x2b7   : > { %13660 = vmatpush3.bf16.msra.mxu0 %v14663_v4  ;;  %9333 = vmatprep.mubr.bf16.mxu0 %v2643_v1  ;;  %v14703_v1 = vld [vmem:[%s14949_s23 + $0x16e8] sm:$0xff]  }
 0x2b8   : > { %v13389_v12 = vpop.f32.mrf.mxu1  ;;  %9294 = vmatmul.mubr.bf16.vlgmr.msra.gmra.mxu1 %v2644_v5  ;;  %v13368_v13 = vpop.f32.mrf.mxu0  ;;  %13661 = vmatprep.subr.bf16.mxu0 %v14665_v6  ;;  %v14704_v6 = vld [vmem:[%s14949_s23 + $0x1628] sm:$0xff]  }
 0x2b9   : > { %13682 = vmatpush3.bf16.msra.mxu1 %v14664_v7  ;;  %v13369_v15 = vadd.f32 %v13368_v13, %v13367_v9  ;;  %9373 = vmatprep.mubr.bf16.mxu1 %v2647_v8  ;;  %v14706_v9 = vld [vmem:[%s14949_s23 + $0x1660] sm:$0xff]  }
 0x2ba   : > { %v13390_v17 = vpop.f32.mrf.mxu1  ;;  %v13370_v18 = vpop.f32.mrf.mxu0  ;;  %13683 = vmatprep.subr.bf16.mxu1 %v14666_v10  ;;  %v14707_v13 = vld [vmem:[%s14949_s23 + $0x16e0] sm:$0xff]  }
 0x2bb   : > { %v8776_v21 = vadd.f32 %v13369_v15, %v15768_v32  ;;  %v13391_v20 = vadd.f32 %v13390_v17, %v13389_v12  ;;  %13662 = vmatpush3.bf16.msra.mxu0 %v14667_v11  ;;  %v14676_v32 = vld [vmem:[%s14949_s23 + $0x15a0] sm:$0xff]   ;;  %v14705_v11 = vld [vmem:[%s14949_s23 + $0x16a8] sm:$0xff]   ;;  %v14710_v15 = vld [vmem:[%s14949_s23 + $0x1658] sm:$0xff]  }
 0x2bc   : > { %v13392_v23 = vpop.f32.mrf.mxu1  ;;  %v13371_v25 = vpop.f32.mrf.mxu0  ;;  %13663 = vmatprep.subr.bf16.mxu0 %v14669_v14  ;;  %v14708_v14 = vld [vmem:[%s14949_s23 + $0x1620] sm:$0xff]   ;;  %v14711_v17 = vld [vmem:[%s14949_s23 + $0x16d8] sm:$0xff]  }
 0x2bd   : > { %v15813_v26 = vadd.f32 %v13391_v20, %v8776_v21  ;;  %13684 = vmatpush3.bf16.msra.mxu1 %v14668_v16  ;;  %v14709_v16 = vld [vmem:[%s14949_s23 + $0x16a0] sm:$0xff]   ;;  %v14712_v18 = vld [vmem:[%s14949_s23 + $0x1618] sm:$0xff]   ;;  %v14715_v20 = vld [vmem:[%s14949_s23 + $0x16d0] sm:$0xff]  }
 0x2be   : > { %v13393_v28 = vpop.f32.mrf.mxu1  ;;  %13685 = vmatprep.subr.bf16.mxu1 %v14670_v19  ;;  %v14714_v19 = vld [vmem:[%s14949_s23 + $0x1650] sm:$0xff]   ;;  %v14713_v21 = vld [vmem:[%s14949_s23 + $0x1698] sm:$0xff]   ;;  %v14718_v23 = vld [vmem:[%s14949_s23 + $0x1648] sm:$0xff]  }
 0x2bf   : > { %13664 = vmatpush3.bf16.msra.mxu0 %v14671_v22  ;;  %v14716_v22 = vld [vmem:[%s14949_s23 + $0x1610] sm:$0xff]   ;;  %v14722_v28 = vld [vmem:[%s14949_s23 + $0x1640] sm:$0xff]  }
 0x2c0   : > { %13665 = vmatprep.subr.bf16.mxu0 %v14673_v24  ;;  %v14717_v25 = vld [vmem:[%s14949_s23 + $0x1690] sm:$0xff]   ;;  %v14719_v24 = vld [vmem:[%s14949_s23 + $0x16c8] sm:$0xff]  }
 0x2c1   : > { %13686 = vmatpush3.bf16.msra.mxu1 %v14672_v27  ;;  %v494_v27 = vld [vmem:[%s14944_s19 + $0x58] sm:$0xff] }
 0x2c2   : > { %13687 = vmatprep.subr.bf16.mxu1 %v14674_v29  ;;  %v2655_v29 = vrot.slane %v494_v27, %v14990_v42 }
 0x2c3   : > { %13666 = vmatpush3.bf16.msra.mxu0 %v14675_v30  ;;  %v2648_v30 = vcombine.high %v494_v27, %v494_v27  ;;  %v14757_v27 = vld [vmem:[%s14949_s23 + $0x1780] sm:$0xff]  }
 0x2c4   : > { %13667 = vmatprep.subr.bf16.mxu0 %v14677_v31  ;;  %v14721_v31 = vld [vmem:[%s14949_s23 + $0x1688] sm:$0xff]  }
 0x2c5   : > { %13688 = vmatpush3.bf16.msra.mxu1 %v14676_v32  ;;  %v14723_v32 = vld [vmem:[%s14949_s23 + $0x16c0] sm:$0xff]  }
 0x2c6   : > { %13689 = vmatprep.subr.bf16.mxu1 %v14678_v33  ;;  %v2663_v33 = vcombine.high %v2655_v29, %v2655_v29 }
 0x2c7   : > { %13668 = vmatpush3.bf16.msra.mxu0 %v14679_v35  ;;  %v15873_v35 = vrot.slane %v2648_v30, %v14990_v42 }
 0x2c8   : > { %13669 = vmatprep.subr.bf16.mxu0 %v14681_v36  ;;  %v14724_v36 = vld [vmem:[%s14949_s23 + $0x1600] sm:$0xff]  }
 0x2c9   : > { %13690 = vmatpush3.bf16.msra.mxu1 %v14680_v37  ;;  %v2685_v37 = vrot.slane %v2663_v33, %v14990_v42 }
 0x2ca   : > { %13691 = vmatprep.subr.bf16.mxu1 %v14682_v38  ;;  %v2671_v38 = vrot.slane %v2655_v29, %v14990_v42  ;;  %v14761_v29 = vld [vmem:[%s14949_s23 + $0x1838] sm:$0xff]  }
 0x2cb   : > { %13670 = vmatpush3.bf16.msra.mxu0 %v14683_v40  ;;  %v14726_v40 = vld [vmem:[%s14949_s23 + $0x1778] sm:$0xff]  }
 0x2cc   : > { %13671 = vmatprep.subr.bf16.mxu0 %v14685_v39  ;;  %v2664_v39 = vcombine.high %v15873_v35, %v15873_v35 }
 0x2cd   : > { %13692 = vmatpush3.bf16.msra.mxu1 %v14684_v41  ;;  %v14725_v41 = vld [vmem:[%s14949_s23 + $0x1680] sm:$0xff]  }
 0x2ce   : > { %13693 = vmatprep.subr.bf16.mxu1 %v14686_v44  ;;  %v2695_v44 = vcombine.high %v2685_v37, %v2685_v37 }
 0x2cf   : > { %13672 = vmatpush3.bf16.msra.mxu0 %v14687_v45  ;;  %v14727_v45 = vld [vmem:[%s14949_s23 + $0x17f8] sm:$0xff]  }
 0x2d0   : > { %13673 = vmatprep.subr.bf16.mxu0 %v14689_v43  ;;  %v2692_v43 = vrot.slane %v2664_v39, %v14990_v42 }
 0x2d1   : > { %13694 = vmatpush3.bf16.msra.mxu1 %v14688_v46  ;;  %v14728_v46 = vld [vmem:[%s14949_s23 + $0x1738] sm:$0xff]  }
 0x2d2   : > { %13695 = vmatprep.subr.bf16.mxu1 %v14690_v47  ;;  %v2693_v47 = vcombine.high %v2671_v38, %v2671_v38 }
 0x2d3   : > { %13674 = vmatpush3.bf16.msra.mxu0 %v14691_v48  ;;  %v14730_v48 = vld [vmem:[%s14949_s23 + $0x1770] sm:$0xff]  }
 0x2d4   : > { %13703 = vmatprep.subr.bf16.mxu0 %v14694_v50  ;;  %v2696_v50 = vcombine.high %v2692_v43, %v2692_v43 }
 0x2d5   : > { %13696 = vmatpush3.bf16.msra.mxu1 %v14692_v51 }
 0x2d6   : > { %v13411_v57 = vpop.f32.mrf.mxu0  ;;  %9334 = vmatmul.mubr.bf16.vlgmr.msra.gmra.mxu0 %v2629_v49  ;;  %13725 = vmatprep.subr.bf16.mxu1 %v14695_v52  ;;  %v14729_v49 = vld [vmem:[%s14949_s23 + $0x17b8] sm:$0xff]   ;;  %v14731_v52 = vld [vmem:[%s14949_s23 + $0x17f0] sm:$0xff]  }
 0x2d7   : > { %13704 = vmatpush3.bf16.msra.mxu0 %v14696_v53  ;;  %9413 = vmatprep.mubr.bf16.mxu0 %v2685_v37  ;;  %v14732_v53 = vld [vmem:[%s14949_s23 + $0x1730] sm:$0xff]  }
 0x2d8   : > { %v13433_v60 = vpop.f32.mrf.mxu1  ;;  %9374 = vmatmul.mubr.bf16.vlgmr.msra.gmra.mxu1 %v2645_v54  ;;  %v13412_v61 = vpop.f32.mrf.mxu0  ;;  %13705 = vmatprep.subr.bf16.mxu0 %v14698_v55 }
 0x2d9   : > { %13726 = vmatpush3.bf16.msra.mxu1 %v14697_v56  ;;  %v13413_v62 = vadd.f32 %v13412_v61, %v13411_v57  ;;  %9453 = vmatprep.mubr.bf16.mxu1 %v2695_v44  ;;  %v14734_v56 = vld [vmem:[%s14949_s23 + $0x1768] sm:$0xff]  }
 0x2da   : > { %v13434_v2 = vpop.f32.mrf.mxu1  ;;  %v13414_v3 = vpop.f32.mrf.mxu0  ;;  %13727 = vmatprep.subr.bf16.mxu1 %v14699_v58  ;;  %v14733_v58 = vld [vmem:[%s14949_s23 + $0x17b0] sm:$0xff]   ;;  %v14735_v61 = vld [vmem:[%s14949_s23 + $0x17e8] sm:$0xff]  }
 0x2db   : > { %v8856_v4 = vadd.f32 %v13413_v62, %v15813_v26  ;;  %v13435_v5 = vadd.f32 %v13434_v2, %v13433_v60  ;;  %13706 = vmatpush3.bf16.msra.mxu0 %v14700_v59  ;;  %v14720_v26 = vld [vmem:[%s14949_s23 + $0x1608] sm:$0xff]  }
 0x2dc   : > { %v13436_v7 = vpop.f32.mrf.mxu1  ;;  %v13415_v8 = vpop.f32.mrf.mxu0  ;;  %13707 = vmatprep.subr.bf16.mxu0 %v14702_v63 }
 0x2dd   : > { %v15850_v10 = vadd.f32 %v13435_v5, %v8856_v4  ;;  %13728 = vmatpush3.bf16.msra.mxu1 %v14701_v0  ;;  %v14736_v0 = vld [vmem:[%s14949_s23 + $0x1728] sm:$0xff]   ;;  %v14739_v7 = vld [vmem:[%s14949_s23 + $0x17e0] sm:$0xff]  }
 0x2de   : > { %v13437_v12 = vpop.f32.mrf.mxu1  ;;  %13729 = vmatprep.subr.bf16.mxu1 %v14703_v1  ;;  %v14738_v1 = vld [vmem:[%s14949_s23 + $0x1760] sm:$0xff]   ;;  %v14737_v5 = vld [vmem:[%s14949_s23 + $0x17a8] sm:$0xff]  }
 0x2df   : > { %13708 = vmatpush3.bf16.msra.mxu0 %v14704_v6  ;;  %v14740_v8 = vld [vmem:[%s14949_s23 + $0x1720] sm:$0xff]   ;;  %v14744_v12 = vld [vmem:[%s14949_s23 + $0x1718] sm:$0xff]  }
 0x2e0   : > { %13709 = vmatprep.subr.bf16.mxu0 %v14706_v9  ;;  %v14742_v9 = vld [vmem:[%s14949_s23 + $0x1758] sm:$0xff]  }
 0x2e1   : > { %13730 = vmatpush3.bf16.msra.mxu1 %v14705_v11  ;;  %v14743_v11 = vld [vmem:[%s14949_s23 + $0x17d8] sm:$0xff]  }
 0x2e2   : > { %13731 = vmatprep.subr.bf16.mxu1 %v14707_v13  ;;  %v14746_v13 = vld [vmem:[%s14949_s23 + $0x1750] sm:$0xff]  }
 0x2e3   : > { %13710 = vmatpush3.bf16.msra.mxu0 %v14708_v14  ;;  %v14745_v14 = vld [vmem:[%s14949_s23 + $0x1798] sm:$0xff]  }
 0x2e4   : > { %13711 = vmatprep.subr.bf16.mxu0 %v14710_v15  ;;  %v14747_v15 = vld [vmem:[%s14949_s23 + $0x17d0] sm:$0xff]  }
 0x2e5   : > { %13732 = vmatpush3.bf16.msra.mxu1 %v14709_v16  ;;  %v14748_v16 = vld [vmem:[%s14949_s23 + $0x1710] sm:$0xff]  }
 0x2e6   : > { %13733 = vmatprep.subr.bf16.mxu1 %v14711_v17  ;;  %v14750_v17 = vld [vmem:[%s14949_s23 + $0x1748] sm:$0xff]  }
 0x2e7   : > { %13712 = vmatpush3.bf16.msra.mxu0 %v14712_v18  ;;  %v14749_v18 = vld [vmem:[%s14949_s23 + $0x1790] sm:$0xff]  }
 0x2e8   : > { %13713 = vmatprep.subr.bf16.mxu0 %v14714_v19  ;;  %v14751_v19 = vld [vmem:[%s14949_s23 + $0x17c8] sm:$0xff]  }
 0x2e9   : > { %13734 = vmatpush3.bf16.msra.mxu1 %v14713_v21  ;;  %v14752_v21 = vld [vmem:[%s14949_s23 + $0x1708] sm:$0xff]  }
 0x2ea   : > { %13735 = vmatprep.subr.bf16.mxu1 %v14715_v20  ;;  %v14754_v20 = vld [vmem:[%s14949_s23 + $0x1740] sm:$0xff]  }
 0x2eb   : > { %13714 = vmatpush3.bf16.msra.mxu0 %v14716_v22  ;;  %v14753_v22 = vld [vmem:[%s14949_s23 + $0x1788] sm:$0xff]  }
 0x2ec   : > { %13715 = vmatprep.subr.bf16.mxu0 %v14718_v23  ;;  %v14755_v23 = vld [vmem:[%s14949_s23 + $0x17c0] sm:$0xff]  }
 0x2ed   : > { %13736 = vmatpush3.bf16.msra.mxu1 %v14717_v25  ;;  %v14756_v25 = vld [vmem:[%s14949_s23 + $0x1700] sm:$0xff]  }
 0x2ee   : > { %13737 = vmatprep.subr.bf16.mxu1 %v14719_v24  ;;  %v2678_v24 = vrot.slane %v15873_v35, %v14990_v42  ;;  %v14764_v35 = vld [vmem:[%s14949_s23 + $0x18f0] sm:$0xff]  }
 0x2ef   : > { %13716 = vmatpush3.bf16.msra.mxu0 %v14720_v26  ;;  %v14759_v26 = vld [vmem:[%s14949_s23 + $0x1878] sm:$0xff]  }
 0x2f0   : > { %13717 = vmatprep.subr.bf16.mxu0 %v14722_v28  ;;  %v14760_v28 = vld [vmem:[%s14949_s23 + $0x18f8] sm:$0xff]   ;;  %v2694_v30 = vcombine.high %v2678_v24, %v2678_v24 }
 0x2f1   : > { %13738 = vmatpush3.bf16.msra.mxu1 %v14721_v31  ;;  %v14763_v31 = vld [vmem:[%s14949_s23 + $0x1870] sm:$0xff]  }
 0x2f2   : > { %13739 = vmatprep.subr.bf16.mxu1 %v14723_v32  ;;  %v14762_v32 = vld [vmem:[%s14949_s23 + $0x18b8] sm:$0xff]  }
 0x2f3   : > { %13718 = vmatpush3.bf16.msra.mxu0 %v14724_v36  ;;  %v14765_v36 = vld [vmem:[%s14949_s23 + $0x1830] sm:$0xff]  }
 0x2f4   : > { %13747 = vmatprep.subr.bf16.mxu0 %v14726_v40  ;;  %v14767_v40 = vld [vmem:[%s14949_s23 + $0x1868] sm:$0xff]  }
 0x2f5   : > { %13740 = vmatpush3.bf16.msra.mxu1 %v14725_v41  ;;  %v14766_v41 = vld [vmem:[%s14949_s23 + $0x18b0] sm:$0xff]  }
 0x2f6   : > { %v13455_v51 = vpop.f32.mrf.mxu0  ;;  %9414 = vmatmul.mubr.bf16.vlgmr.msra.gmra.mxu0 %v2671_v38  ;;  %13769 = vmatprep.subr.bf16.mxu1 %v14727_v45 }
 0x2f7   : > { %13748 = vmatpush3.bf16.msra.mxu0 %v14728_v46  ;;  %9493 = vmatprep.mubr.bf16.mxu0 %v2692_v43  ;;  %v14768_v43 = vld [vmem:[%s14949_s23 + $0x18e8] sm:$0xff]  }
 0x2f8   : > { %v13477_v54 = vpop.f32.mrf.mxu1  ;;  %9454 = vmatmul.mubr.bf16.vlgmr.msra.gmra.mxu1 %v2693_v47  ;;  %v13456_v55 = vpop.f32.mrf.mxu0  ;;  %13749 = vmatprep.subr.bf16.mxu0 %v14730_v48  ;;  %v14769_v48 = vld [vmem:[%s14949_s23 + $0x1828] sm:$0xff]  }
 0x2f9   : > { %13770 = vmatpush3.bf16.msra.mxu1 %v14729_v49  ;;  %v13457_v57 = vadd.f32 %v13456_v55, %v13455_v51  ;;  %9533 = vmatprep.mubr.bf16.mxu1 %v2696_v50  ;;  %v14771_v51 = vld [vmem:[%s14949_s23 + $0x1860] sm:$0xff]  }
 0x2fa   : > { %v13478_v59 = vpop.f32.mrf.mxu1  ;;  %v13458_v60 = vpop.f32.mrf.mxu0  ;;  %13771 = vmatprep.subr.bf16.mxu1 %v14731_v52  ;;  %v14772_v55 = vld [vmem:[%s14949_s23 + $0x18e0] sm:$0xff]  }
 0x2fb   : > { %v8936_v63 = vadd.f32 %v13457_v57, %v15850_v10  ;;  %v13479_v62 = vadd.f32 %v13478_v59, %v13477_v54  ;;  %13750 = vmatpush3.bf16.msra.mxu0 %v14732_v53  ;;  %v14741_v10 = vld [vmem:[%s14949_s23 + $0x17a0] sm:$0xff]   ;;  %v14770_v53 = vld [vmem:[%s14949_s23 + $0x18a8] sm:$0xff]   ;;  %v14775_v57 = vld [vmem:[%s14949_s23 + $0x1858] sm:$0xff]  }
 0x2fc   : > { %v13480_v2 = vpop.f32.mrf.mxu1  ;;  %v13459_v3 = vpop.f32.mrf.mxu0  ;;  %13751 = vmatprep.subr.bf16.mxu0 %v14734_v56  ;;  %v14773_v56 = vld [vmem:[%s14949_s23 + $0x1820] sm:$0xff]   ;;  %v14776_v59 = vld [vmem:[%s14949_s23 + $0x18d8] sm:$0xff]  }
 0x2fd   : > { %v15895_v4 = vadd.f32 %v13479_v62, %v8936_v63  ;;  %13772 = vmatpush3.bf16.msra.mxu1 %v14733_v58  ;;  %v14774_v58 = vld [vmem:[%s14949_s23 + $0x18a0] sm:$0xff]   ;;  %v14777_v60 = vld [vmem:[%s14949_s23 + $0x1818] sm:$0xff]   ;;  %v14780_v62 = vld [vmem:[%s14949_s23 + $0x18d0] sm:$0xff]  }
 0x2fe   : > { %v13481_v6 = vpop.f32.mrf.mxu1  ;;  %13773 = vmatprep.subr.bf16.mxu1 %v14735_v61  ;;  %v14779_v61 = vld [vmem:[%s14949_s23 + $0x1850] sm:$0xff]   ;;  %v14778_v63 = vld [vmem:[%s14949_s23 + $0x1898] sm:$0xff]   ;;  %v14783_v2 = vld [vmem:[%s14949_s23 + $0x1848] sm:$0xff]  }
 0x2ff   : > { %13752 = vmatpush3.bf16.msra.mxu0 %v14736_v0  ;;  %v14781_v0 = vld [vmem:[%s14949_s23 + $0x1810] sm:$0xff]   ;;  %v11875_v6 = vld.sshfl [vmem:[%s14944_s19 + $0x60] sm:$0x33 pattern:$0x75316420] }
 0x300   : > { %13753 = vmatprep.subr.bf16.mxu0 %v14738_v1  ;;  %v14782_v3 = vld [vmem:[%s14949_s23 + $0x1890] sm:$0xff]   ;;  %v14784_v1 = vld [vmem:[%s14949_s23 + $0x18c8] sm:$0xff]  }
 0x301   : > { %13774 = vmatpush3.bf16.msra.mxu1 %v14737_v5  ;;  %v14787_v5 = vld [vmem:[%s14949_s23 + $0x1840] sm:$0xff]  }
 0x302   : > { %13775 = vmatprep.subr.bf16.mxu1 %v14739_v7  ;;  %v14786_v7 = vld [vmem:[%s14949_s23 + $0x1888] sm:$0xff]  }
 0x303   : > { %13754 = vmatpush3.bf16.msra.mxu0 %v14740_v8  ;;  %v2704_v8 = vcombine.high %v11875_v6, %v11875_v6 }
 0x304   : > { %13755 = vmatprep.subr.bf16.mxu0 %v14742_v9  ;;  %v14788_v9 = vld [vmem:[%s14949_s23 + $0x18c0] sm:$0xff]  }
 0x305   : > { %13776 = vmatpush3.bf16.msra.mxu1 %v14741_v10  ;;  %v14789_v10 = vld [vmem:[%s14949_s23 + $0x1800] sm:$0xff]  }
 0x306   : > { %13777 = vmatprep.subr.bf16.mxu1 %v14743_v11  ;;  %v2718_v11 = vrot.slane %v2704_v8, %v14990_v42 }
 0x307   : > { %13756 = vmatpush3.bf16.msra.mxu0 %v14744_v12  ;;  %v2711_v12 = vrot.slane %v11875_v6, %v14990_v42 }
 0x308   : > { %13757 = vmatprep.subr.bf16.mxu0 %v14746_v13  ;;  %v14790_v13 = vld [vmem:[%s14949_s23 + $0x1880] sm:$0xff]  }
 0x309   : > { %13778 = vmatpush3.bf16.msra.mxu1 %v14745_v14  ;;  %v2720_v14 = vcombine.high %v2718_v11, %v2718_v11 }
 0x30a   : > { %13779 = vmatprep.subr.bf16.mxu1 %v14747_v15  ;;  %v2719_v15 = vcombine.high %v2711_v12, %v2711_v12 }
 0x30b   : > { %13758 = vmatpush3.bf16.msra.mxu0 %v14748_v16 }
 0x30c   : > { %13759 = vmatprep.subr.bf16.mxu0 %v14750_v17 }
 0x30d   : > { %13780 = vmatpush3.bf16.msra.mxu1 %v14749_v18 }
 0x30e   : > { %13781 = vmatprep.subr.bf16.mxu1 %v14751_v19 }
 0x30f   : > { %13760 = vmatpush3.bf16.msra.mxu0 %v14752_v21 }
 0x310   : > { %13761 = vmatprep.subr.bf16.mxu0 %v14754_v20 }
 0x311   : > { %13782 = vmatpush3.bf16.msra.mxu1 %v14753_v22 }
 0x312   : > { %13783 = vmatprep.subr.bf16.mxu1 %v14755_v23 }
 0x313   : > { %13762 = vmatpush3.bf16.msra.mxu0 %v14756_v25 }
 0x314   : > { %13791 = vmatprep.subr.bf16.mxu0 %v14759_v26 }
 0x315   : > { %13784 = vmatpush3.bf16.msra.mxu1 %v14757_v27 }
 0x316   : > { %v13499_v33 = vpop.f32.mrf.mxu0  ;;  %9494 = vmatmul.mubr.bf16.vlgmr.msra.gmra.mxu0 %v2678_v24  ;;  %13813 = vmatprep.subr.bf16.mxu1 %v14760_v28 }
 0x317   : > { %13792 = vmatpush3.bf16.msra.mxu0 %v14761_v29  ;;  %9573 = vmatprep.mubr.bf16.mxu0 %v2718_v11 }
 0x318   : > { %v13521_v37 = vpop.f32.mrf.mxu1  ;;  %9534 = vmatmul.mubr.bf16.vlgmr.msra.gmra.mxu1 %v2694_v30  ;;  %v13500_v38 = vpop.f32.mrf.mxu0  ;;  %13793 = vmatprep.subr.bf16.mxu0 %v14763_v31 }
 0x319   : > { %13814 = vmatpush3.bf16.msra.mxu1 %v14762_v32  ;;  %v13501_v39 = vadd.f32 %v13500_v38, %v13499_v33  ;;  %9613 = vmatprep.mubr.bf16.mxu1 %v2720_v14 }
 0x31a   : > { %v13522_v44 = vpop.f32.mrf.mxu1  ;;  %v13502_v45 = vpop.f32.mrf.mxu0  ;;  %13815 = vmatprep.subr.bf16.mxu1 %v14764_v35 }
 0x31b   : > { %v9016_v46 = vadd.f32 %v13501_v39, %v15895_v4  ;;  %v13523_v47 = vadd.f32 %v13522_v44, %v13521_v37  ;;  %13794 = vmatpush3.bf16.msra.mxu0 %v14765_v36  ;;  %v14785_v4 = vld [vmem:[%s14949_s23 + $0x1808] sm:$0xff]  }
 0x31c   : > { %v13524_v49 = vpop.f32.mrf.mxu1  ;;  %v13503_v50 = vpop.f32.mrf.mxu0  ;;  %13795 = vmatprep.subr.bf16.mxu0 %v14767_v40 }
 0x31d   : > { %v9056_v52 = vadd.f32 %v13523_v47, %v9016_v46  ;;  %13816 = vmatpush3.bf16.msra.mxu1 %v14766_v41 }
 0x31e   : > { %v13525_v54 = vpop.f32.mrf.mxu1  ;;  %13817 = vmatprep.subr.bf16.mxu1 %v14768_v43 }
 0x31f   : > { %13796 = vmatpush3.bf16.msra.mxu0 %v14769_v48 }
 0x320   : > { %13797 = vmatprep.subr.bf16.mxu0 %v14771_v51 }
 0x321   : > { %13818 = vmatpush3.bf16.msra.mxu1 %v14770_v53 }
 0x322   : > { %13819 = vmatprep.subr.bf16.mxu1 %v14772_v55 }
 0x323   : > { %13798 = vmatpush3.bf16.msra.mxu0 %v14773_v56 }
 0x324   : > { %13799 = vmatprep.subr.bf16.mxu0 %v14775_v57 }
 0x325   : > { %13820 = vmatpush3.bf16.msra.mxu1 %v14774_v58 }
 0x326   : > { %13821 = vmatprep.subr.bf16.mxu1 %v14776_v59 }
 0x327   : > { %13800 = vmatpush3.bf16.msra.mxu0 %v14777_v60 }
 0x328   : > { %13801 = vmatprep.subr.bf16.mxu0 %v14779_v61 }
 0x329   : > { %13822 = vmatpush3.bf16.msra.mxu1 %v14778_v63 }
 0x32a   : > { %13823 = vmatprep.subr.bf16.mxu1 %v14780_v62 }
 0x32b   : > { %13802 = vmatpush3.bf16.msra.mxu0 %v14781_v0 }
 0x32c   : > { %13803 = vmatprep.subr.bf16.mxu0 %v14783_v2 }
 0x32d   : > { %13824 = vmatpush3.bf16.msra.mxu1 %v14782_v3 }
 0x32e   : > { %13825 = vmatprep.subr.bf16.mxu1 %v14784_v1 }
 0x32f   : > { %13804 = vmatpush3.bf16.msra.mxu0 %v14785_v4 }
 0x330   : > { %13805 = vmatprep.subr.bf16.mxu0 %v14787_v5 }
 0x331   : > { %13826 = vmatpush3.bf16.msra.mxu1 %v14786_v7 }
 0x332   : > { %13827 = vmatprep.subr.bf16.mxu1 %v14788_v9 }
 0x333   : > { %13806 = vmatpush3.bf16.msra.mxu0 %v14789_v10 }
 0x335   : > { %13828 = vmatpush3.bf16.msra.mxu1 %v14790_v13 }
 0x336   : > { %v13543_v16 = vpop.f32.mrf.mxu0  ;;  %9574 = vmatmul.mubr.bf16.vlgmr.msra.gmra.mxu0 %v2711_v12 }
 0x338   : > { %v13565_v17 = vpop.f32.mrf.mxu1  ;;  %9614 = vmatmul.mubr.bf16.vlgmr.msra.gmra.mxu1 %v2719_v15  ;;  %v13544_v18 = vpop.f32.mrf.mxu0 }
 0x339   : > { %v13545_v19 = vadd.f32 %v13544_v18, %v13543_v16 }
 0x33a   : > { %v13566_v21 = vpop.f32.mrf.mxu1  ;;  %v13546_v20 = vpop.f32.mrf.mxu0 }
 0x33b   : > { %v9096_v22 = vadd.f32 %v13545_v19, %v9056_v52  ;;  %v13567_v23 = vadd.f32 %v13566_v21, %v13565_v17 }
 0x33c   : > { %v13568_v42 = vpop.f32.mrf.mxu1  ;;  %v13547_v25 = vpop.f32.mrf.mxu0 }
 0x33d   : > { %v9136_v24 = vadd.f32 %v13567_v23, %v9096_v22 }
 0x33e   : > { %v13569_v26 = vpop.f32.mrf.mxu1 }
 0x356   : > { %v13587_v27 = vpop.f32.mrf.mxu0 }
 0x358   : > { %v13609_v28 = vpop.f32.mrf.mxu1  ;;  %v13588_v29 = vpop.f32.mrf.mxu0 }
 0x359   : > { %v13589_v30 = vadd.f32 %v13588_v29, %v13587_v27 }
 0x35a   : > { %v13610_v31 = vpop.f32.mrf.mxu1  ;;  %v13590_v32 = vpop.f32.mrf.mxu0 }
 0x35b   : > { %v9176_v33 = vadd.f32 %v13589_v30, %v9136_v24  ;;  %v13611_v35 = vadd.f32 %v13610_v31, %v13609_v28  ;;  %v482_v32 = vld [vmem:[#allocation2] sm:$0x3] }
 0x35c   : > { %v13612_v36 = vpop.f32.mrf.mxu1  ;;  %v13591_v37 = vpop.f32.mrf.mxu0 }
 0x35d   : > { %v9216_v38 = vadd.f32 %v13611_v35, %v9176_v33 }
 0x35e   : > { %v13613_v40 = vpop.f32.mrf.mxu1 }
 0x376   : > { %v13631_v39 = vpop.f32.mrf.mxu0 }
 0x378   : > { %v13653_v41 = vpop.f32.mrf.mxu1  ;;  %v13632_v44 = vpop.f32.mrf.mxu0 }
 0x379   : > { %v13633_v45 = vadd.f32 %v13632_v44, %v13631_v39 }
 0x37a   : > { %v13654_v43 = vpop.f32.mrf.mxu1  ;;  %v13634_v46 = vpop.f32.mrf.mxu0 }
 0x37b   : > { %v9256_v47 = vadd.f32 %v13633_v45, %v9216_v38  ;;  %v13655_v48 = vadd.f32 %v13654_v43, %v13653_v41 }
 0x37c   : > { %v13656_v49 = vpop.f32.mrf.mxu1  ;;  %v13635_v50 = vpop.f32.mrf.mxu0 }
 0x37d   : > { %v9296_v51 = vadd.f32 %v13655_v48, %v9256_v47 }
 0x37e   : > { %v13657_v52 = vpop.f32.mrf.mxu1 }
 0x396   : > { %v13675_v53 = vpop.f32.mrf.mxu0 }
 0x398   : > { %v13697_v54 = vpop.f32.mrf.mxu1  ;;  %v13676_v55 = vpop.f32.mrf.mxu0 }
 0x399   : > { %v13677_v56 = vadd.f32 %v13676_v55, %v13675_v53 }
 0x39a   : > { %v13698_v57 = vpop.f32.mrf.mxu1  ;;  %v13678_v58 = vpop.f32.mrf.mxu0 }
 0x39b   : > { %v9336_v59 = vadd.f32 %v13677_v56, %v9296_v51  ;;  %v13699_v60 = vadd.f32 %v13698_v57, %v13697_v54 }
 0x39c   : > { %v13700_v61 = vpop.f32.mrf.mxu1  ;;  %v13679_v63 = vpop.f32.mrf.mxu0 }
 0x39d   : > { %v9376_v62 = vadd.f32 %v13699_v60, %v9336_v59 }
 0x39e   : > { %v13701_v0 = vpop.f32.mrf.mxu1 }
 0x3b6   : > { %v13719_v2 = vpop.f32.mrf.mxu0 }
 0x3b8   : > { %v13741_v3 = vpop.f32.mrf.mxu1  ;;  %v13720_v1 = vpop.f32.mrf.mxu0 }
 0x3b9   : > { %v13721_v17 = vadd.f32 %v13720_v1, %v13719_v2 }
 0x3ba   : > { %v13742_v4 = vpop.f32.mrf.mxu1  ;;  %v13722_v5 = vpop.f32.mrf.mxu0 }
 0x3bb   : > { %v9416_v18 = vadd.f32 %v13721_v17, %v9376_v62  ;;  %v13743_v19 = vadd.f32 %v13742_v4, %v13741_v3 }
 0x3bc   : > { %v13744_v6 = vpop.f32.mrf.mxu1  ;;  %v13723_v7 = vpop.f32.mrf.mxu0 }
 0x3bd   : > { %v9456_v20 = vadd.f32 %v13743_v19, %v9416_v18 }
 0x3be   : > { %v13745_v8 = vpop.f32.mrf.mxu1 }
 0x3d6   : > { %v13763_v9 = vpop.f32.mrf.mxu0 }
 0x3d8   : > { %v13785_v10 = vpop.f32.mrf.mxu1  ;;  %v13764_v11 = vpop.f32.mrf.mxu0 }
 0x3d9   : > { %v13765_v21 = vadd.f32 %v13764_v11, %v13763_v9 }
 0x3da   : > { %v13786_v12 = vpop.f32.mrf.mxu1  ;;  %v13766_v13 = vpop.f32.mrf.mxu0 }
 0x3db   : > { %v9496_v22 = vadd.f32 %v13765_v21, %v9456_v20  ;;  %v13787_v23 = vadd.f32 %v13786_v12, %v13785_v10 }
 0x3dc   : > { %v13788_v14 = vpop.f32.mrf.mxu1  ;;  %v13767_v15 = vpop.f32.mrf.mxu0 }
 0x3dd   : > { %v9536_v26 = vadd.f32 %v13787_v23, %v9496_v22 }
 0x3de   : > { %v13789_v16 = vpop.f32.mrf.mxu1 }
 0x3f6   : > { %v13807_v42 = vpop.f32.mrf.mxu0 }
 0x3f8   : > { %v13829_v25 = vpop.f32.mrf.mxu1  ;;  %v13808_v24 = vpop.f32.mrf.mxu0 }
 0x3f9   : > { %v13809_v27 = vadd.f32 %v13808_v24, %v13807_v42 }
 0x3fa   : > { %v13830_v28 = vpop.f32.mrf.mxu1  ;;  %v13810_v29 = vpop.f32.mrf.mxu0 }
 0x3fb   : > { %v9576_v30 = vadd.f32 %v13809_v27, %v9536_v26  ;;  %v13831_v31 = vadd.f32 %v13830_v28, %v13829_v25 }
 0x3fc   : > { %v13832_v33 = vpop.f32.mrf.mxu1  ;;  %v13811_v35 = vpop.f32.mrf.mxu0 }
 0x3fd   : > { %v9616_v36 = vadd.f32 %v13831_v31, %v9576_v30  ;;  %9627 = sbr.rel (%p12676_p6) target bundleno = 2707 (0xa93), region = 84 }
 0x3fe   : > { %v13833_v37 = vpop.f32.mrf.mxu1 }
 0x3ff   : > { %v9621_v38 = vadd.f32 %v9616_v36, %v482_v32 }
 0x401   : > { %9623 = vst.msk [vmem:[#allocation2] sm:$0x3] %vm9622_vm1, %v9621_v38 }
 0x402   : > { %v12677_v39 = vld [vmem:[%s18344_s4] ss:$0 sm:$0xff]  ;;  %v9685_v45 = vld [vmem:[%s18341_s1 + $0x128] sm:$0x7]  ;;  %vm9692_vm2 = vcmask 1042432   ;;  %v14848_v42 = vmov 0.0  }
 0x403   : > { %v9684_v43 = vld [vmem:[%s18341_s1 + $0x120] sm:$0x7]  ;;  %v9681_v46 = vld [vmem:[%s18341_s1 + $0x108] sm:$0xff]  ;;  %12678 = vmatprep.subr.msk.mxu1 %vm9692_vm2, %v9685_v45  ;;  %v9687_v22 = vld [vmem:[%s18341_s1 + $0x138] sm:$0x7]  ;;  %9769 = vmatprep.mubr.f32.mxu1 %v14848_v42  ;;  %vm9688_vm3 = vcmask 613376  }
 0x404   : > { %v9680_v47 = vld [vmem:[%s18341_s1 + $0x100] sm:$0xff]  ;;  %v12721_v48 = vld [vmem:[%s18341_s1 + $0x268] sm:$0x7]  ;;  %12679 = vmatpush1.msk.msra.mxu1 %vm9692_vm2, %v9684_v43  ;;  %9967 = vmatprep.mubr.f32.mxu0 %v14848_v42  ;;  %v9686_v30 = vld [vmem:[%s18341_s1 + $0x130] sm:$0x7]  ;;  %vm10057_vm4 = vcmask 1040384  }
 0x405   : > { %12724 = vmatprep.subr.msk.mxu0 %vm9692_vm2, %v12721_v48  ;;  %v9677_v49 = vld [vmem:[%s18341_s1 + $0xe8] sm:$0xff]  ;;  %v12720_v50 = vld [vmem:[%s18341_s1 + $0x260] sm:$0x7]  ;;  %9719 = vmatprep.subr.mxu1 %v9681_v46  ;;  %v9683_v31 = vld [vmem:[%s18341_s1 + $0x118] sm:$0xff]  ;;  %vm10630_vm5 = vcmask 1041408   ;;  %vm14849_vm10 = vmmov 0  }
 0x406   : > { %12725 = vmatpush1.msk.msra.mxu0 %vm9692_vm2, %v12720_v50  ;;  %9720 = vmatpush1.msra.mxu1 %v9680_v47  ;;  %v9676_v56 = vld [vmem:[%s18341_s1 + $0xe0] sm:$0xff]  ;;  %v12717_v57 = vld [vmem:[%s18341_s1 + $0x248] sm:$0xff]  ;;  %v9682_v32 = vld [vmem:[%s18341_s1 + $0x110] sm:$0xff]  ;;  %vm10968_vm11 = vcmask 9216  }
 0x407   : > { %9721 = vmatprep.subr.mxu1 %v9677_v49  ;;  %9917 = vmatprep.subr.mxu0 %v12717_v57  ;;  %v9673_v58 = vld [vmem:[%s18341_s1 + $0xc8] sm:$0xff]  ;;  %v12716_v59 = vld [vmem:[%s18341_s1 + $0x240] sm:$0xff]  ;;  %v9679_v36 = vld [vmem:[%s18341_s1 + $0xf8] sm:$0xff] }
 0x408   : > { %v9628_v40 = vld [vmem:[#allocation2] sm:$0x3]  ;;  %9722 = vmatpush1.msra.mxu1 %v9676_v56  ;;  %9918 = vmatpush1.msra.mxu0 %v12716_v59  ;;  %v12713_v61 = vld [vmem:[%s18341_s1 + $0x228] sm:$0xff]  ;;  %v9678_v38 = vld [vmem:[%s18341_s1 + $0xf0] sm:$0xff] }
 0x409   : > { %v9636_v41 = vadd.f32 %v12677_v39, %v9628_v40  ;;  %v9672_v60 = vld [vmem:[%s18341_s1 + $0xc0] sm:$0xff]  ;;  %9723 = vmatprep.subr.mxu1 %v9673_v58  ;;  %v9669_v63 = vld [vmem:[%s18341_s1 + $0xa8] sm:$0xff]  ;;  %9919 = vmatprep.subr.mxu0 %v12713_v61  ;;  %v9675_v39 = vld [vmem:[%s18341_s1 + $0xd8] sm:$0xff] }
 0x40a   : > { %v12712_v62 = vld [vmem:[%s18341_s1 + $0x220] sm:$0xff]  ;;  %9724 = vmatpush1.msra.mxu1 %v9672_v60  ;;  %v12709_v2 = vld [vmem:[%s18341_s1 + $0x208] sm:$0xff]  ;;  %v9671_v43 = vld [vmem:[%s18341_s1 + $0xb8] sm:$0xff] }
 0x40b   : > { %v9637_v44 = vsel %vm9622_vm1, %v9636_v41, -inf  ;;  %v9668_v0 = vld [vmem:[%s18341_s1 + $0xa0] sm:$0xff]  ;;  %v9665_v3 = vld [vmem:[%s18341_s1 + $0x88] sm:$0xff]  ;;  %9725 = vmatprep.subr.mxu1 %v9669_v63  ;;  %9920 = vmatpush1.msra.mxu0 %v12712_v62  ;;  %v9670_v47 = vld [vmem:[%s18341_s1 + $0xb0] sm:$0xff] }
 0x40c   : > { %9638 = vmax.xlane.f32.xlu0 %v9637_v44  ;;  %v12708_v1 = vld [vmem:[%s18341_s1 + $0x200] sm:$0xff]  ;;  %v12705_v5 = vld [vmem:[%s18341_s1 + $0x1e8] sm:$0xff]  ;;  %9726 = vmatpush1.msra.mxu1 %v9668_v0  ;;  %v9674_v44 = vld [vmem:[%s18341_s1 + $0xd0] sm:$0xff] }
 0x40d   : > { %v9664_v4 = vld [vmem:[%s18341_s1 + $0x80] sm:$0xff]  ;;  %9921 = vmatprep.subr.mxu0 %v12709_v2  ;;  %v9661_v6 = vld [vmem:[%s18341_s1 + $0x68] sm:$0xff]  ;;  %9727 = vmatprep.subr.mxu1 %v9665_v3  ;;  %v9667_v49 = vld [vmem:[%s18341_s1 + $0x98] sm:$0xff] }
 0x40e   : > { %v12704_v7 = vld [vmem:[%s18341_s1 + $0x1e0] sm:$0xff]  ;;  %9922 = vmatpush1.msra.mxu0 %v12708_v1  ;;  %v12701_v9 = vld [vmem:[%s18341_s1 + $0x1c8] sm:$0xff]  ;;  %9728 = vmatpush1.msra.mxu1 %v9664_v4  ;;  %v9659_v57 = vld [vmem:[%s18341_s1 + $0x58] sm:$0xff] }
 0x40f   : > { %v9660_v8 = vld [vmem:[%s18341_s1 + $0x60] sm:$0xff]  ;;  %9923 = vmatprep.subr.mxu0 %v12705_v5  ;;  %v9657_v10 = vld [vmem:[%s18341_s1 + $0x48] sm:$0xff]  ;;  %9729 = vmatprep.subr.mxu1 %v9661_v6  ;;  %v9658_v59 = vld [vmem:[%s18341_s1 + $0x50] sm:$0xff] }
 0x410   : > { %v12700_v11 = vld [vmem:[%s18341_s1 + $0x1c0] sm:$0xff]  ;;  %9924 = vmatpush1.msra.mxu0 %v12704_v7  ;;  %v12697_v13 = vld [vmem:[%s18341_s1 + $0x1a8] sm:$0xff]  ;;  %9730 = vmatpush1.msra.mxu1 %v9660_v8  ;;  %v9655_v61 = vld [vmem:[%s18341_s1 + $0x38] sm:$0xff] }
 0x411   : > { %v9656_v12 = vld [vmem:[%s18341_s1 + $0x40] sm:$0xff]  ;;  %9925 = vmatprep.subr.mxu0 %v12701_v9  ;;  %v9653_v14 = vld [vmem:[%s18341_s1 + $0x28] sm:$0xff]  ;;  %9731 = vmatprep.subr.mxu1 %v9657_v10  ;;  %v9654_v62 = vld [vmem:[%s18341_s1 + $0x30] sm:$0xff] }
 0x412   : > { %v12696_v15 = vld [vmem:[%s18341_s1 + $0x1a0] sm:$0xff]  ;;  %9926 = vmatpush1.msra.mxu0 %v12700_v11  ;;  %v12693_v17 = vld [vmem:[%s18341_s1 + $0x188] sm:$0xff]  ;;  %9732 = vmatpush1.msra.mxu1 %v9656_v12  ;;  %v9651_v2 = vld [vmem:[%s18341_s1 + $0x18] sm:$0xff] }
 0x413   : > { %v9652_v16 = vld [vmem:[%s18341_s1 + $0x20] sm:$0xff]  ;;  %9927 = vmatprep.subr.mxu0 %v12697_v13  ;;  %v9649_v18 = vld [vmem:[%s18341_s1 + $0x8] sm:$0xff]  ;;  %9733 = vmatprep.subr.mxu1 %v9653_v14  ;;  %v9650_v1 = vld [vmem:[%s18341_s1 + $0x10] sm:$0xff] }
 0x414   : > { %v12692_v19 = vld [vmem:[%s18341_s1 + $0x180] sm:$0xff]  ;;  %9928 = vmatpush1.msra.mxu0 %v12696_v15  ;;  %v12689_v20 = vld [vmem:[%s18341_s1 + $0x168] sm:$0xff]  ;;  %9734 = vmatpush1.msra.mxu1 %v9652_v16  ;;  %v12723_v5 = vld [vmem:[%s18341_s1 + $0x278] sm:$0x7] }
 0x415   : > { %v9648_v21 = vld [vmem:[%s18341_s1] sm:$0xff]  ;;  %9929 = vmatprep.subr.mxu0 %v12693_v17  ;;  %9735 = vmatprep.subr.mxu1 %v9649_v18  ;;  %v12685_v25 = vld [vmem:[%s18341_s1 + $0x148] sm:$0xff]  ;;  %v12722_v6 = vld [vmem:[%s18341_s1 + $0x270] sm:$0x7] }
 0x416   : > { %9930 = vmatpush1.msra.mxu0 %v12692_v19  ;;  %v12688_v23 = vld [vmem:[%s18341_s1 + $0x160] sm:$0xff]  ;;  %9736 = vmatpush1.msra.mxu1 %v9648_v21  ;;  %v10123_v26 = vld [vmem:[%s18345_s5 + $0x1e8] sm:$0xff]  ;;  %v12719_v7 = vld [vmem:[%s18341_s1 + $0x258] sm:$0xff] }
 0x417   : > { %9931 = vmatprep.subr.mxu0 %v12689_v20  ;;  %12681 = vmatprep.subr.msk.mxu1 %vm9692_vm2, %v9687_v22  ;;  %v12684_v24 = vld [vmem:[%s18341_s1 + $0x140] sm:$0xff]  ;;  %v10119_v37 = vld [vmem:[%s18345_s5 + $0x1c8] sm:$0xff]  ;;  %v12718_v9 = vld [vmem:[%s18341_s1 + $0x250] sm:$0xff] }
 0x418   : > { %9932 = vmatpush1.msra.mxu0 %v12688_v23  ;;  %v10122_v35 = vld [vmem:[%s18345_s5 + $0x1e0] sm:$0xff]  ;;  %v10111_v46 = vld [vmem:[%s18345_s5 + $0x188] sm:$0xff]  ;;  %v12715_v11 = vld [vmem:[%s18341_s1 + $0x238] sm:$0xff] }
 0x419   : > { %9933 = vmatprep.subr.mxu0 %v12685_v25  ;;  %v10118_v40 = vld [vmem:[%s18345_s5 + $0x1c0] sm:$0xff]  ;;  %v10107_v50 = vld [vmem:[%s18345_s5 + $0x168] sm:$0xff]  ;;  %v12714_v13 = vld [vmem:[%s18341_s1 + $0x230] sm:$0xff] }
 0x41a   : > { %9934 = vmatpush1.msra.mxu0 %v12684_v24  ;;  %v10114_v45 = vld [vmem:[%s18345_s5 + $0x1a0] sm:$0xff]  ;;  %v10099_v58 = vld [vmem:[%s18345_s5 + $0x128] sm:$0xff]  ;;  %v12711_v15 = vld [vmem:[%s18341_s1 + $0x218] sm:$0xff] }
 0x41b   : > { %10340 = vmatprep.subr.mxu0 %v10123_v26  ;;  %v10110_v48 = vld [vmem:[%s18345_s5 + $0x180] sm:$0xff]  ;;  %v10095_v63 = vld [vmem:[%s18345_s5 + $0x108] sm:$0xff]  ;;  %v12710_v17 = vld [vmem:[%s18341_s1 + $0x210] sm:$0xff] }
 0x41c   : > { %v10102_v56 = vld [vmem:[%s18345_s5 + $0x140] sm:$0xff]  ;;  %v10091_v3 = vld [vmem:[%s18345_s5 + $0xe8] sm:$0xff]  ;;  %v12707_v19 = vld [vmem:[%s18341_s1 + $0x1f8] sm:$0xff] }
 0x41d   : > { %v10098_v60 = vld [vmem:[%s18345_s5 + $0x120] sm:$0xff]  ;;  %v10087_v8 = vld [vmem:[%s18345_s5 + $0xc8] sm:$0xff]  ;;  %v12706_v20 = vld [vmem:[%s18341_s1 + $0x1f0] sm:$0xff] }
 0x41e   : > { %v10094_v0 = vld [vmem:[%s18345_s5 + $0x100] sm:$0xff]  ;;  %v10083_v12 = vld [vmem:[%s18345_s5 + $0xa8] sm:$0xff]  ;;  %v12703_v23 = vld [vmem:[%s18341_s1 + $0x1d8] sm:$0xff] }
 0x41f   : > { %v10090_v4 = vld [vmem:[%s18345_s5 + $0xe0] sm:$0xff]  ;;  %v10079_v16 = vld [vmem:[%s18345_s5 + $0x88] sm:$0xff]  ;;  %v12702_v24 = vld [vmem:[%s18341_s1 + $0x1d0] sm:$0xff] }
 0x420   : > { %v10086_v10 = vld [vmem:[%s18345_s5 + $0xc0] sm:$0xff]  ;;  %v10075_v21 = vld [vmem:[%s18345_s5 + $0x68] sm:$0xff] }
 0x421   : > { %v10082_v14 = vld [vmem:[%s18345_s5 + $0xa0] sm:$0xff]  ;;  %v10071_v25 = vld [vmem:[%s18345_s5 + $0x48] sm:$0xff] }
 0x422   : > { %v10078_v18 = vld [vmem:[%s18345_s5 + $0x80] sm:$0xff] }
 0x423   : > { %v10074_v22 = vld [vmem:[%s18345_s5 + $0x60] sm:$0xff] }
 0x424   : > { %v10070_v26 = vld [vmem:[%s18345_s5 + $0x40] sm:$0xff] }
 0x495   : > { %v9639_v51 = vpop.xlane.xlu0 %9638 }
 0x496   : > { %v9640_v52 = vsub.f32 %v9636_v41, %v9639_v51  ;;  %v10115_v41 = vld [vmem:[%s18345_s5 + $0x1a8] sm:$0xff]  ;;  %v9666_v51 = vld [vmem:[%s18341_s1 + $0x90] sm:$0xff] }
 0x498   : > { %v9641_v53 = vmul.f32 1.442695, %v9640_v52  ;;  %v10106_v52 = vld [vmem:[%s18345_s5 + $0x160] sm:$0xff] }
 0x49a   : > { %14794 = vpow2.f32 %v9641_v53  ;;  %v9663_v53 = vld [vmem:[%s18341_s1 + $0x78] sm:$0xff] }
 0x4a7   : > { %v15986_v54 = vpop.eup %14794 }
 0x4a8   : > { %v9643_v55 = vsel %vm9622_vm1, %v15986_v54, 0.0 }
 0x4a9   : > { %9644 = vadd.xlane.f32.xlu0 %v9643_v55  ;;  %v9662_v55 = vld [vmem:[%s18341_s1 + $0x70] sm:$0xff] }
 0x532   : > { %v9645_v27 = vpop.xlane.xlu0 %9644 }
 0x533   : > { %14796 = vrcp.f32 %v9645_v27  ;;  %v12699_v27 = vld [vmem:[%s18341_s1 + $0x1b8] sm:$0xff] }
 0x540   : > { %v14797_v28 = vpop.eup %14796 }
 0x541   : > { %v16099_v29 = vmul.f32 %v14797_v28, %v15986_v54  ;;  %v10103_v54 = vld [vmem:[%s18345_s5 + $0x148] sm:$0xff] }
 0x542   : > { %v10067_v28 = vld [vmem:[%s18345_s5 + $0x28] sm:$0xff] }
 0x543   : > { %12680 = vmatmul.mubr.msk.f32.vlgmr.msra.gmra.mxu1 %vm9688_vm3, %v16099_v29  ;;  %v9888_v33 = vrot.slane %v16099_v29, 1 }
 0x544   : > { %12682 = vmatpush1.msk.msra.mxu1 %vm9692_vm2, %v9686_v30  ;;  %9840 = vmatprep.mubr.f32.mxu1 %v14848_v42  ;;  %v12698_v30 = vld [vmem:[%s18341_s1 + $0x1b0] sm:$0xff] }
 0x545   : > { %9790 = vmatprep.subr.mxu1 %v9683_v31  ;;  %12726 = vmatmul.mubr.msk.f32.vlgmr.msra.gmra.mxu0 %vm9688_vm3, %v9888_v33  ;;  %v10066_v31 = vld [vmem:[%s18345_s5 + $0x20] sm:$0xff] }
 0x546   : > { %9791 = vmatpush1.msra.mxu1 %v9682_v32  ;;  %10341 = vmatpush1.msra.mxu0 %v10122_v35  ;;  %v12695_v32 = vld [vmem:[%s18341_s1 + $0x198] sm:$0xff]  ;;  %v10063_v35 = vld [vmem:[%s18345_s5 + $0x8] sm:$0xff] }
 0x547   : > { %9792 = vmatprep.subr.mxu1 %v9679_v36  ;;  %10342 = vmatprep.subr.mxu0 %v10119_v37  ;;  %v12694_v36 = vld [vmem:[%s18341_s1 + $0x190] sm:$0xff]  ;;  %v10062_v37 = vld [vmem:[%s18345_s5] sm:$0xff] }
 0x548   : > { %9793 = vmatpush1.msra.mxu1 %v9678_v38  ;;  %10343 = vmatpush1.msra.mxu0 %v10118_v40  ;;  %v12691_v38 = vld [vmem:[%s18341_s1 + $0x178] sm:$0xff]  ;;  %v10187_v40 = vld [vmem:[%s18345_s5 + $0x3e8] sm:$0xff] }
 0x549   : > { %9794 = vmatprep.subr.mxu1 %v9675_v39  ;;  %10344 = vmatprep.subr.mxu0 %v10115_v41  ;;  %v12690_v39 = vld [vmem:[%s18341_s1 + $0x170] sm:$0xff]  ;;  %v10186_v41 = vld [vmem:[%s18345_s5 + $0x3e0] sm:$0xff] }
 0x54a   : > { %9795 = vmatpush1.msra.mxu1 %v9674_v44  ;;  %10345 = vmatpush1.msra.mxu0 %v10114_v45  ;;  %v12687_v44 = vld [vmem:[%s18341_s1 + $0x158] sm:$0xff]  ;;  %v10183_v45 = vld [vmem:[%s18345_s5 + $0x3c8] sm:$0xff] }
 0x54b   : > { %9796 = vmatprep.subr.mxu1 %v9671_v43  ;;  %10346 = vmatprep.subr.mxu0 %v10111_v46  ;;  %v12686_v43 = vld [vmem:[%s18341_s1 + $0x150] sm:$0xff]  ;;  %v10182_v46 = vld [vmem:[%s18345_s5 + $0x3c0] sm:$0xff] }
 0x54c   : > { %9797 = vmatpush1.msra.mxu1 %v9670_v47  ;;  %10347 = vmatpush1.msra.mxu0 %v10110_v48  ;;  %v10179_v47 = vld [vmem:[%s18345_s5 + $0x3a8] sm:$0xff]  ;;  %v10178_v48 = vld [vmem:[%s18345_s5 + $0x3a0] sm:$0xff] }
 0x54d   : > { %9798 = vmatprep.subr.mxu1 %v9667_v49  ;;  %10348 = vmatprep.subr.mxu0 %v10107_v50  ;;  %v10251_v49 = vld [vmem:[%s18345_s5 + $0x5e8] sm:$0xff] }
 0x54e   : > { %9799 = vmatpush1.msra.mxu1 %v9666_v51  ;;  %10349 = vmatpush1.msra.mxu0 %v10106_v52  ;;  %v10175_v50 = vld [vmem:[%s18345_s5 + $0x388] sm:$0xff]  ;;  %v10250_v51 = vld [vmem:[%s18345_s5 + $0x5e0] sm:$0xff] }
 0x54f   : > { %9800 = vmatprep.subr.mxu1 %v9663_v53  ;;  %10350 = vmatprep.subr.mxu0 %v10103_v54  ;;  %v10174_v52 = vld [vmem:[%s18345_s5 + $0x380] sm:$0xff]  ;;  %v10247_v53 = vld [vmem:[%s18345_s5 + $0x5c8] sm:$0xff] }
 0x550   : > { %9801 = vmatpush1.msra.mxu1 %v9662_v55  ;;  %10351 = vmatpush1.msra.mxu0 %v10102_v56  ;;  %v10171_v54 = vld [vmem:[%s18345_s5 + $0x368] sm:$0xff] }
 0x551   : > { %9802 = vmatprep.subr.mxu1 %v9659_v57  ;;  %10352 = vmatprep.subr.mxu0 %v10099_v58  ;;  %v10243_v55 = vld [vmem:[%s18345_s5 + $0x5a8] sm:$0xff]  ;;  %v10242_v57 = vld [vmem:[%s18345_s5 + $0x5a0] sm:$0xff] }
 0x552   : > { %9803 = vmatpush1.msra.mxu1 %v9658_v59  ;;  %10353 = vmatpush1.msra.mxu0 %v10098_v60  ;;  %v10167_v56 = vld [vmem:[%s18345_s5 + $0x348] sm:$0xff]  ;;  %v10166_v58 = vld [vmem:[%s18345_s5 + $0x340] sm:$0xff] }
 0x553   : > { %9804 = vmatprep.subr.mxu1 %v9655_v61  ;;  %10354 = vmatprep.subr.mxu0 %v10095_v63  ;;  %v10239_v59 = vld [vmem:[%s18345_s5 + $0x588] sm:$0xff]  ;;  %v10238_v61 = vld [vmem:[%s18345_s5 + $0x580] sm:$0xff] }
 0x554   : > { %9805 = vmatpush1.msra.mxu1 %v9654_v62  ;;  %10355 = vmatpush1.msra.mxu0 %v10094_v0  ;;  %v10163_v60 = vld [vmem:[%s18345_s5 + $0x328] sm:$0xff]  ;;  %v10162_v63 = vld [vmem:[%s18345_s5 + $0x320] sm:$0xff] }
 0x555   : > { %9806 = vmatprep.subr.mxu1 %v9651_v2  ;;  %10356 = vmatprep.subr.mxu0 %v10091_v3  ;;  %v10235_v62 = vld [vmem:[%s18345_s5 + $0x568] sm:$0xff]  ;;  %v10234_v2 = vld [vmem:[%s18345_s5 + $0x560] sm:$0xff] }
 0x556   : > { %9807 = vmatpush1.msra.mxu1 %v9650_v1  ;;  %10357 = vmatpush1.msra.mxu0 %v10090_v4  ;;  %v10159_v0 = vld [vmem:[%s18345_s5 + $0x308] sm:$0xff]  ;;  %v10158_v3 = vld [vmem:[%s18345_s5 + $0x300] sm:$0xff] }
 0x557   : > { %12683 = vmatmul.mubr.msk.f32.vlgmr.msra.gmra.mxu1 %vm9688_vm3, %v16099_v29  ;;  %12727 = vmatprep.subr.msk.mxu1 %vm9692_vm2, %v12723_v5  ;;  %v10246_v29 = vld [vmem:[%s18345_s5 + $0x5c0] sm:$0xff]  ;;  %v10231_v1 = vld [vmem:[%s18345_s5 + $0x548] sm:$0xff] }
 0x558   : > { %12728 = vmatpush1.msk.msra.mxu1 %vm9692_vm2, %v12722_v6  ;;  %10038 = vmatprep.mubr.f32.mxu1 %v14848_v42  ;;  %v10155_v4 = vld [vmem:[%s18345_s5 + $0x2e8] sm:$0xff]  ;;  %v10230_v5 = vld [vmem:[%s18345_s5 + $0x540] sm:$0xff] }
 0x559   : > { %9988 = vmatprep.subr.mxu1 %v12719_v7  ;;  %10358 = vmatprep.subr.mxu0 %v10087_v8  ;;  %v10154_v6 = vld [vmem:[%s18345_s5 + $0x2e0] sm:$0xff]  ;;  %v10227_v7 = vld [vmem:[%s18345_s5 + $0x528] sm:$0xff] }
 0x55a   : > { %9989 = vmatpush1.msra.mxu1 %v12718_v9  ;;  %10359 = vmatpush1.msra.mxu0 %v10086_v10  ;;  %v10151_v8 = vld [vmem:[%s18345_s5 + $0x2c8] sm:$0xff]  ;;  %v10226_v9 = vld [vmem:[%s18345_s5 + $0x520] sm:$0xff] }
 0x55b   : > { %9990 = vmatprep.subr.mxu1 %v12715_v11  ;;  %10360 = vmatprep.subr.mxu0 %v10083_v12  ;;  %v10150_v10 = vld [vmem:[%s18345_s5 + $0x2c0] sm:$0xff]  ;;  %v10223_v11 = vld [vmem:[%s18345_s5 + $0x508] sm:$0xff] }
 0x55c   : > { %9991 = vmatpush1.msra.mxu1 %v12714_v13  ;;  %10361 = vmatpush1.msra.mxu0 %v10082_v14  ;;  %v10147_v12 = vld [vmem:[%s18345_s5 + $0x2a8] sm:$0xff]  ;;  %v10222_v13 = vld [vmem:[%s18345_s5 + $0x500] sm:$0xff] }
 0x55d   : > { %9992 = vmatprep.subr.mxu1 %v12711_v15  ;;  %10362 = vmatprep.subr.mxu0 %v10079_v16  ;;  %v10146_v14 = vld [vmem:[%s18345_s5 + $0x2a0] sm:$0xff]  ;;  %v10219_v15 = vld [vmem:[%s18345_s5 + $0x4e8] sm:$0xff] }
 0x55e   : > { %9993 = vmatpush1.msra.mxu1 %v12710_v17  ;;  %10363 = vmatpush1.msra.mxu0 %v10078_v18  ;;  %v10143_v16 = vld [vmem:[%s18345_s5 + $0x288] sm:$0xff]  ;;  %v10218_v17 = vld [vmem:[%s18345_s5 + $0x4e0] sm:$0xff] }
 0x55f   : > { %9994 = vmatprep.subr.mxu1 %v12707_v19  ;;  %10364 = vmatprep.subr.mxu0 %v10075_v21  ;;  %v10142_v18 = vld [vmem:[%s18345_s5 + $0x280] sm:$0xff]  ;;  %v10215_v19 = vld [vmem:[%s18345_s5 + $0x4c8] sm:$0xff] }
 0x560   : > { %9995 = vmatpush1.msra.mxu1 %v12706_v20  ;;  %10365 = vmatpush1.msra.mxu0 %v10074_v22  ;;  %v10139_v21 = vld [vmem:[%s18345_s5 + $0x268] sm:$0xff]  ;;  %v10214_v20 = vld [vmem:[%s18345_s5 + $0x4c0] sm:$0xff] }
 0x561   : > { %9996 = vmatprep.subr.mxu1 %v12703_v23  ;;  %10366 = vmatprep.subr.mxu0 %v10071_v25  ;;  %v10138_v22 = vld [vmem:[%s18345_s5 + $0x260] sm:$0xff]  ;;  %v10211_v23 = vld [vmem:[%s18345_s5 + $0x4a8] sm:$0xff] }
 0x562   : > { %9997 = vmatpush1.msra.mxu1 %v12702_v24  ;;  %10367 = vmatpush1.msra.mxu0 %v10070_v26  ;;  %v10135_v25 = vld [vmem:[%s18345_s5 + $0x248] sm:$0xff]  ;;  %v10210_v24 = vld [vmem:[%s18345_s5 + $0x4a0] sm:$0xff] }
 0x563   : > { %9998 = vmatprep.subr.mxu1 %v12699_v27  ;;  %10368 = vmatprep.subr.mxu0 %v10067_v28  ;;  %v10134_v26 = vld [vmem:[%s18345_s5 + $0x240] sm:$0xff]  ;;  %v10207_v27 = vld [vmem:[%s18345_s5 + $0x488] sm:$0xff] }
 0x564   : > { %9999 = vmatpush1.msra.mxu1 %v12698_v30  ;;  %10369 = vmatpush1.msra.mxu0 %v10066_v31  ;;  %v10131_v28 = vld [vmem:[%s18345_s5 + $0x228] sm:$0xff]  ;;  %v10206_v30 = vld [vmem:[%s18345_s5 + $0x480] sm:$0xff] }
 0x565   : > { %10000 = vmatprep.subr.mxu1 %v12695_v32  ;;  %10370 = vmatprep.subr.mxu0 %v10063_v35  ;;  %v10130_v31 = vld [vmem:[%s18345_s5 + $0x220] sm:$0xff]  ;;  %v10203_v32 = vld [vmem:[%s18345_s5 + $0x468] sm:$0xff] }
 0x566   : > { %10001 = vmatpush1.msra.mxu1 %v12694_v36  ;;  %10371 = vmatpush1.msra.mxu0 %v10062_v37  ;;  %v10127_v35 = vld [vmem:[%s18345_s5 + $0x208] sm:$0xff]  ;;  %v10202_v36 = vld [vmem:[%s18345_s5 + $0x460] sm:$0xff] }
 0x567   : > { %10002 = vmatprep.subr.mxu1 %v12691_v38  ;;  %10372 = vmatprep.subr.mxu0 %v10187_v40  ;;  %v10126_v37 = vld [vmem:[%s18345_s5 + $0x200] sm:$0xff]  ;;  %v10199_v38 = vld [vmem:[%s18345_s5 + $0x448] sm:$0xff] }
 0x568   : > { %10003 = vmatpush1.msra.mxu1 %v12690_v39  ;;  %10373 = vmatpush2.msra.mxu0 %v10186_v41  ;;  %v10198_v40 = vld [vmem:[%s18345_s5 + $0x440] sm:$0xff]  ;;  %v10125_v39 = vld [vmem:[%s18345_s5 + $0x1f8] sm:$0xff]  ;;  %v10195_v41 = vld [vmem:[%s18345_s5 + $0x428] sm:$0xff] }
 0x569   : > { %10004 = vmatprep.subr.mxu1 %v12687_v44  ;;  %10374 = vmatprep.subr.mxu0 %v10183_v45  ;;  %v10194_v44 = vld [vmem:[%s18345_s5 + $0x420] sm:$0xff]  ;;  %v10191_v45 = vld [vmem:[%s18345_s5 + $0x408] sm:$0xff] }
 0x56a   : > { %10005 = vmatpush1.msra.mxu1 %v12686_v43  ;;  %10375 = vmatpush2.msra.mxu0 %v10182_v46  ;;  %v10190_v43 = vld [vmem:[%s18345_s5 + $0x400] sm:$0xff]  ;;  %v10315_v46 = vld [vmem:[%s18345_s5 + $0x7e8] sm:$0xff] }
 0x56b   : > { %12729 = vmatmul.mubr.msk.f32.vlgmr.msra.gmra.mxu1 %vm9688_vm3, %v9888_v33  ;;  %10376 = vmatprep.subr.mxu0 %v10179_v47  ;;  %v10170_v33 = vld [vmem:[%s18345_s5 + $0x360] sm:$0xff] }
 0x56c   : > { %10377 = vmatpush2.msra.mxu0 %v10178_v48  ;;  %10411 = vmatprep.subr.mxu1 %v10251_v49  ;;  %v10314_v47 = vld [vmem:[%s18345_s5 + $0x7e0] sm:$0xff]  ;;  %v10311_v48 = vld [vmem:[%s18345_s5 + $0x7c8] sm:$0xff] }
 0x56d   : > { %10378 = vmatprep.subr.mxu0 %v10175_v50  ;;  %10412 = vmatpush1.msra.mxu1 %v10250_v51  ;;  %v10310_v49 = vld [vmem:[%s18345_s5 + $0x7c0] sm:$0xff]  ;;  %v10307_v50 = vld [vmem:[%s18345_s5 + $0x7a8] sm:$0xff] }
 0x56e   : > { %10379 = vmatpush2.msra.mxu0 %v10174_v52  ;;  %10413 = vmatprep.subr.mxu1 %v10247_v53  ;;  %v10306_v51 = vld [vmem:[%s18345_s5 + $0x7a0] sm:$0xff]  ;;  %v10303_v52 = vld [vmem:[%s18345_s5 + $0x788] sm:$0xff] }
 0x56f   : > { %10380 = vmatprep.subr.mxu0 %v10171_v54  ;;  %10414 = vmatpush1.msra.mxu1 %v10246_v29  ;;  %v10302_v53 = vld [vmem:[%s18345_s5 + $0x780] sm:$0xff]  ;;  %v10299_v54 = vld [vmem:[%s18345_s5 + $0x768] sm:$0xff] }
 0x570   : > { %10381 = vmatpush2.msra.mxu0 %v10170_v33  ;;  %10415 = vmatprep.subr.mxu1 %v10243_v55  ;;  %v10298_v29 = vld [vmem:[%s18345_s5 + $0x760] sm:$0xff]  ;;  %v10295_v33 = vld [vmem:[%s18345_s5 + $0x748] sm:$0xff] }
 0x571   : > { %10382 = vmatprep.subr.mxu0 %v10167_v56  ;;  %10416 = vmatpush1.msra.mxu1 %v10242_v57  ;;  %v10294_v55 = vld [vmem:[%s18345_s5 + $0x740] sm:$0xff]  ;;  %v10291_v56 = vld [vmem:[%s18345_s5 + $0x728] sm:$0xff] }
 0x572   : > { %10383 = vmatpush2.msra.mxu0 %v10166_v58  ;;  %10417 = vmatprep.subr.mxu1 %v10239_v59  ;;  %v10290_v57 = vld [vmem:[%s18345_s5 + $0x720] sm:$0xff]  ;;  %v10287_v58 = vld [vmem:[%s18345_s5 + $0x708] sm:$0xff] }
 0x573   : > { %10384 = vmatprep.subr.mxu0 %v10163_v60  ;;  %10418 = vmatpush1.msra.mxu1 %v10238_v61  ;;  %v10286_v59 = vld [vmem:[%s18345_s5 + $0x700] sm:$0xff]  ;;  %v10283_v60 = vld [vmem:[%s18345_s5 + $0x6e8] sm:$0xff] }
 0x574   : > { %10385 = vmatpush2.msra.mxu0 %v10162_v63  ;;  %10419 = vmatprep.subr.mxu1 %v10235_v62  ;;  %v10282_v61 = vld [vmem:[%s18345_s5 + $0x6e0] sm:$0xff]  ;;  %v10279_v63 = vld [vmem:[%s18345_s5 + $0x6c8] sm:$0xff] }
 0x575   : > { %10386 = vmatprep.subr.mxu0 %v10159_v0  ;;  %10420 = vmatpush1.msra.mxu1 %v10234_v2  ;;  %v10278_v62 = vld [vmem:[%s18345_s5 + $0x6c0] sm:$0xff]  ;;  %v10275_v0 = vld [vmem:[%s18345_s5 + $0x6a8] sm:$0xff] }
 0x576   : > { %10387 = vmatpush2.msra.mxu0 %v10158_v3  ;;  %10421 = vmatprep.subr.mxu1 %v10231_v1  ;;  %v10274_v2 = vld [vmem:[%s18345_s5 + $0x6a0] sm:$0xff]  ;;  %v10271_v3 = vld [vmem:[%s18345_s5 + $0x688] sm:$0xff] }
 0x577   : > { %10388 = vmatprep.subr.mxu0 %v10155_v4  ;;  %10422 = vmatpush1.msra.mxu1 %v10230_v5  ;;  %v10270_v1 = vld [vmem:[%s18345_s5 + $0x680] sm:$0xff]  ;;  %v10267_v4 = vld [vmem:[%s18345_s5 + $0x668] sm:$0xff] }
 0x578   : > { %10389 = vmatpush2.msra.mxu0 %v10154_v6  ;;  %10423 = vmatprep.subr.mxu1 %v10227_v7  ;;  %v10266_v5 = vld [vmem:[%s18345_s5 + $0x660] sm:$0xff]  ;;  %v10263_v6 = vld [vmem:[%s18345_s5 + $0x648] sm:$0xff] }
 0x579   : > { %10390 = vmatprep.subr.mxu0 %v10151_v8  ;;  %10424 = vmatpush1.msra.mxu1 %v10226_v9  ;;  %v10262_v7 = vld [vmem:[%s18345_s5 + $0x640] sm:$0xff]  ;;  %v10259_v8 = vld [vmem:[%s18345_s5 + $0x628] sm:$0xff] }
 0x57a   : > { %10391 = vmatpush2.msra.mxu0 %v10150_v10  ;;  %10425 = vmatprep.subr.mxu1 %v10223_v11  ;;  %v10258_v9 = vld [vmem:[%s18345_s5 + $0x620] sm:$0xff]  ;;  %v10255_v10 = vld [vmem:[%s18345_s5 + $0x608] sm:$0xff] }
 0x57b   : > { %10392 = vmatprep.subr.mxu0 %v10147_v12  ;;  %10426 = vmatpush1.msra.mxu1 %v10222_v13  ;;  %v10254_v11 = vld [vmem:[%s18345_s5 + $0x600] sm:$0xff]  ;;  %v10253_v12 = vld [vmem:[%s18345_s5 + $0x5f8] sm:$0xff] }
 0x57c   : > { %10393 = vmatpush2.msra.mxu0 %v10146_v14  ;;  %10427 = vmatprep.subr.mxu1 %v10219_v15 }
 0x57d   : > { %10394 = vmatprep.subr.mxu0 %v10143_v16  ;;  %10428 = vmatpush1.msra.mxu1 %v10218_v17 }
 0x57e   : > { %10395 = vmatpush2.msra.mxu0 %v10142_v18  ;;  %10429 = vmatprep.subr.mxu1 %v10215_v19 }
 0x57f   : > { %10396 = vmatprep.subr.mxu0 %v10139_v21  ;;  %10430 = vmatpush1.msra.mxu1 %v10214_v20  ;;  %v10124_v21 = vld [vmem:[%s18345_s5 + $0x1f0] sm:$0xff] }
 0x580   : > { %10397 = vmatpush2.msra.mxu0 %v10138_v22  ;;  %10431 = vmatprep.subr.mxu1 %v10211_v23  ;;  %v10121_v22 = vld [vmem:[%s18345_s5 + $0x1d8] sm:$0xff]  ;;  %v10120_v23 = vld [vmem:[%s18345_s5 + $0x1d0] sm:$0xff] }
 0x581   : > { %10398 = vmatprep.subr.mxu0 %v10135_v25  ;;  %10432 = vmatpush1.msra.mxu1 %v10210_v24  ;;  %v10117_v25 = vld [vmem:[%s18345_s5 + $0x1b8] sm:$0xff]  ;;  %v10116_v24 = vld [vmem:[%s18345_s5 + $0x1b0] sm:$0xff] }
 0x582   : > { %10399 = vmatpush2.msra.mxu0 %v10134_v26  ;;  %10433 = vmatprep.subr.mxu1 %v10207_v27  ;;  %v10113_v26 = vld [vmem:[%s18345_s5 + $0x198] sm:$0xff]  ;;  %v10112_v27 = vld [vmem:[%s18345_s5 + $0x190] sm:$0xff] }
 0x583   : > { %10400 = vmatprep.subr.mxu0 %v10131_v28  ;;  %10434 = vmatpush1.msra.mxu1 %v10206_v30  ;;  %v10109_v28 = vld [vmem:[%s18345_s5 + $0x178] sm:$0xff]  ;;  %v10108_v30 = vld [vmem:[%s18345_s5 + $0x170] sm:$0xff] }
 0x584   : > { %10401 = vmatpush2.msra.mxu0 %v10130_v31  ;;  %10435 = vmatprep.subr.mxu1 %v10203_v32  ;;  %v10105_v31 = vld [vmem:[%s18345_s5 + $0x158] sm:$0xff]  ;;  %v10104_v32 = vld [vmem:[%s18345_s5 + $0x150] sm:$0xff] }
 0x585   : > { %10402 = vmatprep.subr.mxu0 %v10127_v35  ;;  %10436 = vmatpush1.msra.mxu1 %v10202_v36  ;;  %v10101_v35 = vld [vmem:[%s18345_s5 + $0x138] sm:$0xff]  ;;  %v10100_v36 = vld [vmem:[%s18345_s5 + $0x130] sm:$0xff] }
 0x586   : > { %10403 = vmatpush2.msra.mxu0 %v10126_v37  ;;  %10437 = vmatprep.subr.mxu1 %v10199_v38  ;;  %v10097_v37 = vld [vmem:[%s18345_s5 + $0x118] sm:$0xff]  ;;  %v10096_v38 = vld [vmem:[%s18345_s5 + $0x110] sm:$0xff] }
 0x587   : > { %10438 = vmatpush1.msra.mxu1 %v10198_v40  ;;  %10482 = vmatprep.subr.mxu0 %v10125_v39  ;;  %v10093_v40 = vld [vmem:[%s18345_s5 + $0xf8] sm:$0xff]  ;;  %v10092_v39 = vld [vmem:[%s18345_s5 + $0xf0] sm:$0xff] }
 0x588   : > { %10439 = vmatprep.subr.mxu1 %v10195_v41  ;;  %v10089_v41 = vld [vmem:[%s18345_s5 + $0xd8] sm:$0xff] }
 0x589   : > { %10440 = vmatpush1.msra.mxu1 %v10194_v44  ;;  %v10088_v44 = vld [vmem:[%s18345_s5 + $0xd0] sm:$0xff] }
 0x58a   : > { %10441 = vmatprep.subr.mxu1 %v10191_v45  ;;  %v10085_v45 = vld [vmem:[%s18345_s5 + $0xb8] sm:$0xff] }
 0x58b   : > { %10442 = vmatpush1.msra.mxu1 %v10190_v43  ;;  %v10084_v43 = vld [vmem:[%s18345_s5 + $0xb0] sm:$0xff] }
 0x58c   : > { %10443 = vmatprep.subr.mxu1 %v10315_v46  ;;  %v10081_v46 = vld [vmem:[%s18345_s5 + $0x98] sm:$0xff] }
 0x58d   : > { %10444 = vmatpush2.msra.mxu1 %v10314_v47  ;;  %v10080_v47 = vld [vmem:[%s18345_s5 + $0x90] sm:$0xff] }
 0x58e   : > { %10445 = vmatprep.subr.mxu1 %v10311_v48  ;;  %v10077_v48 = vld [vmem:[%s18345_s5 + $0x78] sm:$0xff] }
 0x58f   : > { %10446 = vmatpush2.msra.mxu1 %v10310_v49  ;;  %v10076_v49 = vld [vmem:[%s18345_s5 + $0x70] sm:$0xff] }
 0x590   : > { %10447 = vmatprep.subr.mxu1 %v10307_v50  ;;  %v10073_v50 = vld [vmem:[%s18345_s5 + $0x58] sm:$0xff] }
 0x591   : > { %10448 = vmatpush2.msra.mxu1 %v10306_v51  ;;  %v10072_v51 = vld [vmem:[%s18345_s5 + $0x50] sm:$0xff] }
 0x592   : > { %10449 = vmatprep.subr.mxu1 %v10303_v52 }
 0x593   : > { %10450 = vmatpush2.msra.mxu1 %v10302_v53  ;;  %v10069_v53 = vld [vmem:[%s18345_s5 + $0x38] sm:$0xff] }
 0x594   : > { %10451 = vmatprep.subr.mxu1 %v10299_v54  ;;  %v10068_v54 = vld [vmem:[%s18345_s5 + $0x30] sm:$0xff] }
 0x595   : > { %10452 = vmatpush2.msra.mxu1 %v10298_v29  ;;  %v10065_v29 = vld [vmem:[%s18345_s5 + $0x18] sm:$0xff] }
 0x596   : > { %10453 = vmatprep.subr.mxu1 %v10295_v33  ;;  %v10064_v33 = vld [vmem:[%s18345_s5 + $0x10] sm:$0xff] }
 0x597   : > { %10454 = vmatpush2.msra.mxu1 %v10294_v55 }
 0x598   : > { %10455 = vmatprep.subr.mxu1 %v10291_v56  ;;  %v10189_v56 = vld [vmem:[%s18345_s5 + $0x3f8] sm:$0xff] }
 0x599   : > { %10456 = vmatpush2.msra.mxu1 %v10290_v57  ;;  %v10188_v57 = vld [vmem:[%s18345_s5 + $0x3f0] sm:$0xff] }
 0x59a   : > { %10457 = vmatprep.subr.mxu1 %v10287_v58 }
 0x59b   : > { %10458 = vmatpush2.msra.mxu1 %v10286_v59  ;;  %v10185_v59 = vld [vmem:[%s18345_s5 + $0x3d8] sm:$0xff] }
 0x59c   : > { %10459 = vmatprep.subr.mxu1 %v10283_v60  ;;  %v10184_v60 = vld [vmem:[%s18345_s5 + $0x3d0] sm:$0xff] }
 0x59d   : > { %10460 = vmatpush2.msra.mxu1 %v10282_v61 }
 0x59e   : > { %10461 = vmatprep.subr.mxu1 %v10279_v63 }
 0x59f   : > { %10462 = vmatpush2.msra.mxu1 %v10278_v62  ;;  %v10181_v62 = vld [vmem:[%s18345_s5 + $0x3b8] sm:$0xff] }
 0x5a0   : > { %10463 = vmatprep.subr.mxu1 %v10275_v0 }
 0x5a1   : > { %10464 = vmatpush2.msra.mxu1 %v10274_v2  ;;  %v10180_v2 = vld [vmem:[%s18345_s5 + $0x3b0] sm:$0xff] }
 0x5a2   : > { %10465 = vmatprep.subr.mxu1 %v10271_v3  ;;  %v10177_v3 = vld [vmem:[%s18345_s5 + $0x398] sm:$0xff] }
 0x5a3   : > { %10466 = vmatpush2.msra.mxu1 %v10270_v1 }
 0x5a4   : > { %10467 = vmatprep.subr.mxu1 %v10267_v4  ;;  %v10252_v4 = vld [vmem:[%s18345_s5 + $0x5f0] sm:$0xff] }
 0x5a5   : > { %10468 = vmatpush2.msra.mxu1 %v10266_v5  ;;  %v10176_v5 = vld [vmem:[%s18345_s5 + $0x390] sm:$0xff] }
 0x5a6   : > { %10469 = vmatprep.subr.mxu1 %v10263_v6 }
 0x5a7   : > { %10470 = vmatpush2.msra.mxu1 %v10262_v7  ;;  %v10249_v7 = vld [vmem:[%s18345_s5 + $0x5d8] sm:$0xff] }
 0x5a8   : > { %10471 = vmatprep.subr.mxu1 %v10259_v8  ;;  %v10173_v8 = vld [vmem:[%s18345_s5 + $0x378] sm:$0xff] }
 0x5a9   : > { %10472 = vmatpush2.msra.mxu1 %v10258_v9  ;;  %v10248_v9 = vld [vmem:[%s18345_s5 + $0x5d0] sm:$0xff] }
 0x5aa   : > { %10473 = vmatprep.subr.mxu1 %v10255_v10  ;;  %v10172_v10 = vld [vmem:[%s18345_s5 + $0x370] sm:$0xff] }
 0x5ab   : > { %10474 = vmatpush2.msra.mxu1 %v10254_v11  ;;  %v10245_v11 = vld [vmem:[%s18345_s5 + $0x5b8] sm:$0xff] }
 0x5ac   : > { %10553 = vmatprep.subr.mxu1 %v10253_v12  ;;  %v10169_v12 = vld [vmem:[%s18345_s5 + $0x358] sm:$0xff] }
 0x603   : > { %v9771_v13 = vpop.f32.mrf.mxu1 }
 0x605   : > { %v9969_v14 = vpop.f32.mrf.mxu0  ;;  %v9773_v18 = vpop.f32.mrf.mxu1 }
 0x606   : > { %v10049_v15 = vrot.slane %v9969_v14, 7  ;;  %v10168_v14 = vld [vmem:[%s18345_s5 + $0x350] sm:$0xff] }
 0x607   : > { %v9971_v16 = vpop.f32.mrf.mxu0 }
 0x608   : > { %v10050_v17 = vrot.slane %v9971_v16, 7  ;;  %v16626_v20 = vsel %vm10057_vm4, %v9771_v13, %v10049_v15  ;;  %v10244_v13 = vld [vmem:[%s18345_s5 + $0x5b0] sm:$0xff]  ;;  %v10241_v15 = vld [vmem:[%s18345_s5 + $0x598] sm:$0xff] }
 0x609   : > { %v10165_v16 = vld [vmem:[%s18345_s5 + $0x338] sm:$0xff] }
 0x60a   : > { %v10059_v19 = vsel %vm10057_vm4, %v9773_v18, %v10050_v17  ;;  %v10240_v17 = vld [vmem:[%s18345_s5 + $0x590] sm:$0xff] }
 0x60b   : > { %10404 = vmatprep.mubr.f32.mxu0 %v10059_v19  ;;  %v10164_v18 = vld [vmem:[%s18345_s5 + $0x330] sm:$0xff] }
 0x60c   : > { %10405 = vmatmul.mubr.f32.vlgmr.msra.gmra.mxu0 %v16626_v20 }
 0x60d   : > { %10483 = vmatpush1.msra.mxu0 %v10124_v21  ;;  %10546 = vmatprep.mubr.f32.mxu0 %v10059_v19  ;;  %v10237_v19 = vld [vmem:[%s18345_s5 + $0x578] sm:$0xff] }
 0x60e   : > { %10484 = vmatprep.subr.mxu0 %v10121_v22  ;;  %v10161_v21 = vld [vmem:[%s18345_s5 + $0x318] sm:$0xff]  ;;  %v10236_v22 = vld [vmem:[%s18345_s5 + $0x570] sm:$0xff] }
 0x60f   : > { %10485 = vmatpush1.msra.mxu0 %v10120_v23  ;;  %v10160_v23 = vld [vmem:[%s18345_s5 + $0x310] sm:$0xff] }
 0x610   : > { %10486 = vmatprep.subr.mxu0 %v10117_v25  ;;  %v10233_v25 = vld [vmem:[%s18345_s5 + $0x558] sm:$0xff] }
 0x611   : > { %10487 = vmatpush1.msra.mxu0 %v10116_v24  ;;  %v10157_v24 = vld [vmem:[%s18345_s5 + $0x2f8] sm:$0xff] }
 0x612   : > { %10488 = vmatprep.subr.mxu0 %v10113_v26  ;;  %v10232_v26 = vld [vmem:[%s18345_s5 + $0x550] sm:$0xff] }
 0x613   : > { %10489 = vmatpush1.msra.mxu0 %v10112_v27  ;;  %v10156_v27 = vld [vmem:[%s18345_s5 + $0x2f0] sm:$0xff] }
 0x614   : > { %10490 = vmatprep.subr.mxu0 %v10109_v28  ;;  %v10229_v28 = vld [vmem:[%s18345_s5 + $0x538] sm:$0xff] }
 0x615   : > { %10491 = vmatpush1.msra.mxu0 %v10108_v30  ;;  %v10153_v30 = vld [vmem:[%s18345_s5 + $0x2d8] sm:$0xff] }
 0x616   : > { %10492 = vmatprep.subr.mxu0 %v10105_v31  ;;  %v10228_v31 = vld [vmem:[%s18345_s5 + $0x530] sm:$0xff] }
 0x617   : > { %10493 = vmatpush1.msra.mxu0 %v10104_v32  ;;  %v9842_v52 = vpop.f32.mrf.mxu1  ;;  %v10152_v32 = vld [vmem:[%s18345_s5 + $0x2d0] sm:$0xff] }
 0x618   : > { %10494 = vmatprep.subr.mxu0 %v10101_v35  ;;  %v10225_v35 = vld [vmem:[%s18345_s5 + $0x518] sm:$0xff] }
 0x619   : > { %10495 = vmatpush1.msra.mxu0 %v10100_v36  ;;  %v9844_v55 = vpop.f32.mrf.mxu1  ;;  %v10149_v36 = vld [vmem:[%s18345_s5 + $0x2b8] sm:$0xff] }
 0x61a   : > { %10496 = vmatprep.subr.mxu0 %v10097_v37  ;;  %v10224_v37 = vld [vmem:[%s18345_s5 + $0x510] sm:$0xff] }
 0x61b   : > { %10497 = vmatpush1.msra.mxu0 %v10096_v38  ;;  %v10148_v38 = vld [vmem:[%s18345_s5 + $0x2b0] sm:$0xff] }
 0x61c   : > { %10498 = vmatprep.subr.mxu0 %v10093_v40  ;;  %v10221_v40 = vld [vmem:[%s18345_s5 + $0x4f8] sm:$0xff] }
 0x61d   : > { %10499 = vmatpush1.msra.mxu0 %v10092_v39  ;;  %v10145_v39 = vld [vmem:[%s18345_s5 + $0x298] sm:$0xff] }
 0x61e   : > { %10500 = vmatprep.subr.mxu0 %v10089_v41  ;;  %v10220_v41 = vld [vmem:[%s18345_s5 + $0x4f0] sm:$0xff] }
 0x61f   : > { %10501 = vmatpush1.msra.mxu0 %v10088_v44  ;;  %v10144_v44 = vld [vmem:[%s18345_s5 + $0x290] sm:$0xff] }
 0x620   : > { %10502 = vmatprep.subr.mxu0 %v10085_v45  ;;  %v10217_v45 = vld [vmem:[%s18345_s5 + $0x4d8] sm:$0xff] }
 0x621   : > { %10503 = vmatpush1.msra.mxu0 %v10084_v43  ;;  %v10141_v43 = vld [vmem:[%s18345_s5 + $0x278] sm:$0xff] }
 0x622   : > { %10504 = vmatprep.subr.mxu0 %v10081_v46  ;;  %v10216_v46 = vld [vmem:[%s18345_s5 + $0x4d0] sm:$0xff] }
 0x623   : > { %10505 = vmatpush1.msra.mxu0 %v10080_v47  ;;  %v10140_v47 = vld [vmem:[%s18345_s5 + $0x270] sm:$0xff] }
 0x624   : > { %10506 = vmatprep.subr.mxu0 %v10077_v48  ;;  %v10213_v48 = vld [vmem:[%s18345_s5 + $0x4b8] sm:$0xff] }
 0x625   : > { %10507 = vmatpush1.msra.mxu0 %v10076_v49  ;;  %v10137_v49 = vld [vmem:[%s18345_s5 + $0x258] sm:$0xff] }
 0x626   : > { %10508 = vmatprep.subr.mxu0 %v10073_v50  ;;  %v10212_v50 = vld [vmem:[%s18345_s5 + $0x4b0] sm:$0xff] }
 0x627   : > { %10509 = vmatpush1.msra.mxu0 %v10072_v51  ;;  %v10136_v51 = vld [vmem:[%s18345_s5 + $0x250] sm:$0xff] }
 0x628   : > { %10510 = vmatprep.subr.mxu0 %v10069_v53  ;;  %v10133_v53 = vld [vmem:[%s18345_s5 + $0x238] sm:$0xff] }
 0x629   : > { %10511 = vmatpush1.msra.mxu0 %v10068_v54  ;;  %v10208_v54 = vld [vmem:[%s18345_s5 + $0x490] sm:$0xff] }
 0x62a   : > { %10512 = vmatprep.subr.mxu0 %v10065_v29  ;;  %v10132_v29 = vld [vmem:[%s18345_s5 + $0x230] sm:$0xff] }
 0x62b   : > { %v10040_v58 = vpop.f32.mrf.mxu1  ;;  %10513 = vmatpush1.msra.mxu0 %v10064_v33  ;;  %v10205_v33 = vld [vmem:[%s18345_s5 + $0x478] sm:$0xff] }
 0x62c   : > { %10514 = vmatprep.subr.mxu0 %v10189_v56  ;;  %v10051_v61 = vrot.slane %v10040_v58, 7  ;;  %v10204_v56 = vld [vmem:[%s18345_s5 + $0x470] sm:$0xff]  ;;  %v10201_v58 = vld [vmem:[%s18345_s5 + $0x458] sm:$0xff] }
 0x62d   : > { %v10042_v63 = vpop.f32.mrf.mxu1  ;;  %10515 = vmatpush2.msra.mxu0 %v10188_v57  ;;  %v10128_v57 = vld [vmem:[%s18345_s5 + $0x210] sm:$0xff] }
 0x62e   : > { %v10052_v0 = vrot.slane %v10042_v63, 7  ;;  %10516 = vmatprep.subr.mxu0 %v10185_v59  ;;  %v16748_v6 = vsel %vm10057_vm4, %v9842_v52, %v10051_v61  ;;  %v10209_v52 = vld [vmem:[%s18345_s5 + $0x498] sm:$0xff]  ;;  %v10200_v59 = vld [vmem:[%s18345_s5 + $0x450] sm:$0xff] }
 0x62f   : > { %10517 = vmatpush2.msra.mxu0 %v10184_v60  ;;  %v10197_v60 = vld [vmem:[%s18345_s5 + $0x438] sm:$0xff]  ;;  %v10196_v61 = vld [vmem:[%s18345_s5 + $0x430] sm:$0xff] }
 0x630   : > { %10518 = vmatprep.subr.mxu0 %v10181_v62  ;;  %v10061_v1 = vsel %vm10057_vm4, %v9844_v55, %v10052_v0  ;;  %v10129_v55 = vld [vmem:[%s18345_s5 + $0x218] sm:$0xff]  ;;  %v10192_v62 = vld [vmem:[%s18345_s5 + $0x410] sm:$0xff] }
 0x631   : > { %10475 = vmatprep.mubr.f32.mxu1 %v10061_v1  ;;  %10519 = vmatpush2.msra.mxu0 %v10180_v2  ;;  %v10193_v63 = vld [vmem:[%s18345_s5 + $0x418] sm:$0xff] }
 0x632   : > { %10476 = vmatmul.mubr.f32.vlgmr.msra.gmra.mxu1 %v16748_v6  ;;  %10520 = vmatprep.subr.mxu0 %v10177_v3  ;;  %v10317_v0 = vld [vmem:[%s18345_s5 + $0x7f8] sm:$0xff]  ;;  %v10312_v3 = vld [vmem:[%s18345_s5 + $0x7d0] sm:$0xff] }
 0x633   : > { %10554 = vmatpush1.msra.mxu1 %v10252_v4  ;;  %10521 = vmatpush2.msra.mxu0 %v10176_v5  ;;  %v10313_v2 = vld [vmem:[%s18345_s5 + $0x7d8] sm:$0xff]  ;;  %v10308_v4 = vld [vmem:[%s18345_s5 + $0x7b0] sm:$0xff] }
 0x634   : > { %10555 = vmatprep.subr.mxu1 %v10249_v7  ;;  %10617 = vmatprep.mubr.f32.mxu1 %v10061_v1  ;;  %v10309_v1 = vld [vmem:[%s18345_s5 + $0x7b8] sm:$0xff]  ;;  %v10304_v7 = vld [vmem:[%s18345_s5 + $0x790] sm:$0xff] }
 0x635   : > { %10522 = vmatprep.subr.mxu0 %v10173_v8  ;;  %10556 = vmatpush1.msra.mxu1 %v10248_v9  ;;  %v10305_v5 = vld [vmem:[%s18345_s5 + $0x798] sm:$0xff]  ;;  %v10300_v9 = vld [vmem:[%s18345_s5 + $0x770] sm:$0xff] }
 0x636   : > { %10523 = vmatpush2.msra.mxu0 %v10172_v10  ;;  %10557 = vmatprep.subr.mxu1 %v10245_v11  ;;  %v10301_v8 = vld [vmem:[%s18345_s5 + $0x778] sm:$0xff]  ;;  %v10296_v11 = vld [vmem:[%s18345_s5 + $0x750] sm:$0xff] }
 0x637   : > { %10524 = vmatprep.subr.mxu0 %v10169_v12  ;;  %10558 = vmatpush1.msra.mxu1 %v10244_v13  ;;  %v10297_v10 = vld [vmem:[%s18345_s5 + $0x758] sm:$0xff]  ;;  %v10292_v13 = vld [vmem:[%s18345_s5 + $0x730] sm:$0xff] }
 0x638   : > { %10525 = vmatpush2.msra.mxu0 %v10168_v14  ;;  %10559 = vmatprep.subr.mxu1 %v10241_v15  ;;  %v10293_v12 = vld [vmem:[%s18345_s5 + $0x738] sm:$0xff]  ;;  %v10288_v15 = vld [vmem:[%s18345_s5 + $0x710] sm:$0xff] }
 0x639   : > { %10526 = vmatprep.subr.mxu0 %v10165_v16  ;;  %10560 = vmatpush1.msra.mxu1 %v10240_v17  ;;  %v10289_v14 = vld [vmem:[%s18345_s5 + $0x718] sm:$0xff]  ;;  %v10284_v17 = vld [vmem:[%s18345_s5 + $0x6f0] sm:$0xff] }
 0x63a   : > { %10527 = vmatpush2.msra.mxu0 %v10164_v18  ;;  %10561 = vmatprep.subr.mxu1 %v10237_v19  ;;  %v10285_v16 = vld [vmem:[%s18345_s5 + $0x6f8] sm:$0xff]  ;;  %v10280_v19 = vld [vmem:[%s18345_s5 + $0x6d0] sm:$0xff] }
 0x63b   : > { %10528 = vmatprep.subr.mxu0 %v10161_v21  ;;  %10562 = vmatpush1.msra.mxu1 %v10236_v22  ;;  %v10281_v18 = vld [vmem:[%s18345_s5 + $0x6d8] sm:$0xff]  ;;  %v10276_v22 = vld [vmem:[%s18345_s5 + $0x6b0] sm:$0xff] }
 0x63c   : > { %10529 = vmatpush2.msra.mxu0 %v10160_v23  ;;  %10563 = vmatprep.subr.mxu1 %v10233_v25  ;;  %v10277_v21 = vld [vmem:[%s18345_s5 + $0x6b8] sm:$0xff]  ;;  %v10272_v25 = vld [vmem:[%s18345_s5 + $0x690] sm:$0xff] }
 0x63d   : > { %10530 = vmatprep.subr.mxu0 %v10157_v24  ;;  %10564 = vmatpush1.msra.mxu1 %v10232_v26  ;;  %v10273_v23 = vld [vmem:[%s18345_s5 + $0x698] sm:$0xff]  ;;  %v10268_v26 = vld [vmem:[%s18345_s5 + $0x670] sm:$0xff] }
 0x63e   : > { %10531 = vmatpush2.msra.mxu0 %v10156_v27  ;;  %10565 = vmatprep.subr.mxu1 %v10229_v28  ;;  %v10269_v24 = vld [vmem:[%s18345_s5 + $0x678] sm:$0xff]  ;;  %v10264_v28 = vld [vmem:[%s18345_s5 + $0x650] sm:$0xff] }
 0x63f   : > { %10532 = vmatprep.subr.mxu0 %v10153_v30  ;;  %10566 = vmatpush1.msra.mxu1 %v10228_v31  ;;  %v10265_v27 = vld [vmem:[%s18345_s5 + $0x658] sm:$0xff]  ;;  %v10260_v31 = vld [vmem:[%s18345_s5 + $0x630] sm:$0xff] }
 0x640   : > { %10533 = vmatpush2.msra.mxu0 %v10152_v32  ;;  %10567 = vmatprep.subr.mxu1 %v10225_v35  ;;  %v10261_v30 = vld [vmem:[%s18345_s5 + $0x638] sm:$0xff]  ;;  %v10256_v35 = vld [vmem:[%s18345_s5 + $0x610] sm:$0xff] }
 0x641   : > { %10534 = vmatprep.subr.mxu0 %v10149_v36  ;;  %10568 = vmatpush1.msra.mxu1 %v10224_v37  ;;  %v10257_v32 = vld [vmem:[%s18345_s5 + $0x618] sm:$0xff]  ;;  %v17012_v36 = vsub.s32 1, %v14984_v34 }
 0x642   : > { %10535 = vmatpush2.msra.mxu0 %v10148_v38  ;;  %10569 = vmatprep.subr.mxu1 %v10221_v40  ;;  %v17015_v38 = vsub.s32 0, %v14984_v34  ;;  %v10318_v40 = vld [vmem:[%s18346_s6] sm:$0xf] }
 0x643   : > { %10536 = vmatprep.subr.mxu0 %v10145_v39  ;;  %10570 = vmatpush1.msra.mxu1 %v10220_v41  ;;  %v10327_v41 = vrot.slane %v10318_v40, %v17012_v36 }
 0x644   : > { %10537 = vmatpush2.msra.mxu0 %v10144_v44  ;;  %10571 = vmatprep.subr.mxu1 %v10217_v45  ;;  %v10323_v45 = vrot.slane %v10318_v40, %v17015_v38 }
 0x645   : > { %10538 = vmatprep.subr.mxu0 %v10141_v43  ;;  %10572 = vmatpush1.msra.mxu1 %v10216_v46 }
 0x646   : > { %10539 = vmatpush2.msra.mxu0 %v10140_v47  ;;  %10573 = vmatprep.subr.mxu1 %v10213_v48  ;;  %v17023_v48 = vsub.s32 2, %v14984_v34 }
 0x647   : > { %10540 = vmatprep.subr.mxu0 %v10137_v49  ;;  %10574 = vmatpush1.msra.mxu1 %v10212_v50  ;;  %v17026_v50 = vsub.s32 3, %v14984_v34 }
 0x648   : > { %10541 = vmatpush2.msra.mxu0 %v10136_v51  ;;  %10575 = vmatprep.subr.mxu1 %v10209_v52 }
 0x649   : > { %10542 = vmatprep.subr.mxu0 %v10133_v53  ;;  %10576 = vmatpush1.msra.mxu1 %v10208_v54  ;;  %v10331_v53 = vrot.slane %v10318_v40, %v17023_v48 }
 0x64a   : > { %10543 = vmatpush2.msra.mxu0 %v10132_v29  ;;  %10577 = vmatprep.subr.mxu1 %v10205_v33  ;;  %v10335_v29 = vrot.slane %v10318_v40, %v17026_v50  ;;  %v10712_v40 = vld [vmem:[%s18352_s12 + $0xd0] sm:$0xff] }
 0x64b   : > { %10544 = vmatprep.subr.mxu0 %v10129_v55  ;;  %10578 = vmatpush1.msra.mxu1 %v10204_v56 }
 0x64c   : > { %10545 = vmatpush2.msra.mxu0 %v10128_v57  ;;  %10579 = vmatprep.subr.mxu1 %v10201_v58 }
 0x64d   : > { %10547 = vmatmul.mubr.f32.vlgmr.msra.gmra.mxu0 %v16626_v20  ;;  %10580 = vmatpush1.msra.mxu1 %v10200_v59  ;;  %v10316_v20 = vld [vmem:[%s18345_s5 + $0x7f0] sm:$0xff] }
 0x64e   : > { %10581 = vmatprep.subr.mxu1 %v10197_v60 }
 0x64f   : > { %10582 = vmatpush1.msra.mxu1 %v10196_v61 }
 0x650   : > { %10583 = vmatprep.subr.mxu1 %v10193_v63 }
 0x651   : > { %10584 = vmatpush1.msra.mxu1 %v10192_v62 }
 0x652   : > { %10585 = vmatprep.subr.mxu1 %v10317_v0 }
 0x653   : > { %10586 = vmatpush2.msra.mxu1 %v10316_v20 }
 0x654   : > { %10587 = vmatprep.subr.mxu1 %v10313_v2 }
 0x655   : > { %10588 = vmatpush2.msra.mxu1 %v10312_v3 }
 0x656   : > { %10589 = vmatprep.subr.mxu1 %v10309_v1 }
 0x657   : > { %10590 = vmatpush2.msra.mxu1 %v10308_v4  ;;  %v17049_v4 = vld [vmem:[%s18340_s0] sm:$0x3] }
 0x658   : > { %10591 = vmatprep.subr.mxu1 %v10305_v5 }
 0x659   : > { %10592 = vmatpush2.msra.mxu1 %v10304_v7 }
 0x65a   : > { %10593 = vmatprep.subr.mxu1 %v10301_v8 }
 0x65b   : > { %10594 = vmatpush2.msra.mxu1 %v10300_v9 }
 0x65c   : > { %10595 = vmatprep.subr.mxu1 %v10297_v10  ;;  %v10629_v10 = vmul.f32 %v17049_v4, %v17049_v4 }
 0x65d   : > { %10596 = vmatpush2.msra.mxu1 %v10296_v11 }
 0x65e   : > { %10597 = vmatprep.subr.mxu1 %v10293_v12  ;;  %v10631_v12 = vsel %vm10630_vm5, %v10629_v10, 0.0  ;;  %v10689_v10 = vld [vmem:[%s18352_s12 + $0x18] sm:$0xff] }
 0x65f   : > { %10598 = vmatpush2.msra.mxu1 %v10292_v13  ;;  %v10717_v13 = vld [vmem:[%s18352_s12 + $0xf8] sm:$0xff] }
 0x660   : > { %10599 = vmatprep.subr.mxu1 %v10289_v14  ;;  %v10749_v14 = vld [vmem:[%s18352_s12 + $0x1f8] sm:$0xff]  ;;  %13835 = vmatprep.subr.mxu0 %v10717_v13  ;;  %v10736_v13 = vld [vmem:[%s18352_s12 + $0x190] sm:$0xff] }
 0x661   : > { %10600 = vmatpush2.msra.mxu1 %v10288_v15  ;;  %v10701_v15 = vld [vmem:[%s18352_s12 + $0x78] sm:$0xff] }
 0x662   : > { %10601 = vmatprep.subr.mxu1 %v10285_v16  ;;  %v10733_v16 = vld [vmem:[%s18352_s12 + $0x178] sm:$0xff]  ;;  %13836 = vmatpush3.msra.mxu0 %v10701_v15  ;;  %v10720_v15 = vld [vmem:[%s18352_s12 + $0x110] sm:$0xff] }
 0x663   : > { %10602 = vmatpush2.msra.mxu1 %v10284_v17  ;;  %v10716_v17 = vld [vmem:[%s18352_s12 + $0xf0] sm:$0xff] }
 0x664   : > { %10603 = vmatprep.subr.mxu1 %v10281_v18  ;;  %v10748_v18 = vld [vmem:[%s18352_s12 + $0x1f0] sm:$0xff]  ;;  %13837 = vmatprep.subr.mxu0 %v10716_v17  ;;  %v10735_v17 = vld [vmem:[%s18352_s12 + $0x188] sm:$0xff] }
 0x665   : > { %10604 = vmatpush2.msra.mxu1 %v10280_v19  ;;  %v10700_v19 = vld [vmem:[%s18352_s12 + $0x70] sm:$0xff] }
 0x666   : > { %10605 = vmatprep.subr.mxu1 %v10277_v21  ;;  %v10732_v21 = vld [vmem:[%s18352_s12 + $0x170] sm:$0xff]  ;;  %13838 = vmatpush3.msra.mxu0 %v10700_v19  ;;  %v10719_v19 = vld [vmem:[%s18352_s12 + $0x108] sm:$0xff] }
 0x667   : > { %10606 = vmatpush2.msra.mxu1 %v10276_v22  ;;  %v10715_v22 = vld [vmem:[%s18352_s12 + $0xe8] sm:$0xff] }
 0x668   : > { %10607 = vmatprep.subr.mxu1 %v10273_v23  ;;  %v10747_v23 = vld [vmem:[%s18352_s12 + $0x1e8] sm:$0xff]  ;;  %13839 = vmatprep.subr.mxu0 %v10715_v22  ;;  %v10734_v22 = vld [vmem:[%s18352_s12 + $0x180] sm:$0xff] }
 0x669   : > { %10608 = vmatpush2.msra.mxu1 %v10272_v25  ;;  %v10699_v25 = vld [vmem:[%s18352_s12 + $0x68] sm:$0xff] }
 0x66a   : > { %10609 = vmatprep.subr.mxu1 %v10269_v24  ;;  %v10731_v24 = vld [vmem:[%s18352_s12 + $0x168] sm:$0xff]  ;;  %13840 = vmatpush3.msra.mxu0 %v10699_v25  ;;  %v10718_v25 = vld [vmem:[%s18352_s12 + $0x100] sm:$0xff] }
 0x66b   : > { %10610 = vmatpush2.msra.mxu1 %v10268_v26  ;;  %v10714_v26 = vld [vmem:[%s18352_s12 + $0xe0] sm:$0xff] }
 0x66c   : > { %10611 = vmatprep.subr.mxu1 %v10265_v27  ;;  %v10746_v27 = vld [vmem:[%s18352_s12 + $0x1e0] sm:$0xff]  ;;  %13841 = vmatprep.subr.mxu0 %v10714_v26 }
 0x66d   : > { %10612 = vmatpush2.msra.mxu1 %v10264_v28  ;;  %v10698_v28 = vld [vmem:[%s18352_s12 + $0x60] sm:$0xff] }
 0x66e   : > { %10613 = vmatprep.subr.mxu1 %v10261_v30  ;;  %v10730_v30 = vld [vmem:[%s18352_s12 + $0x160] sm:$0xff]  ;;  %13842 = vmatpush3.msra.mxu0 %v10698_v28 }
 0x66f   : > { %10614 = vmatpush2.msra.mxu1 %v10260_v31  ;;  %v10713_v31 = vld [vmem:[%s18352_s12 + $0xd8] sm:$0xff] }
 0x670   : > { %10615 = vmatprep.subr.mxu1 %v10257_v32  ;;  %v10745_v32 = vld [vmem:[%s18352_s12 + $0x1d8] sm:$0xff]  ;;  %13843 = vmatprep.subr.mxu0 %v10713_v31 }
 0x671   : > { %10616 = vmatpush2.msra.mxu1 %v10256_v35  ;;  %v10697_v35 = vld [vmem:[%s18352_s12 + $0x58] sm:$0xff] }
 0x672   : > { %10618 = vmatmul.mubr.f32.vlgmr.msra.gmra.mxu1 %v16748_v6  ;;  %13870 = vmatprep.subr.mxu1 %v10749_v14  ;;  %v10688_v14 = vld [vmem:[%s18352_s12 + $0x10] sm:$0xff] }
 0x673   : > { %13871 = vmatpush3.msra.mxu1 %v10733_v16  ;;  %13844 = vmatpush3.msra.mxu0 %v10697_v35  ;;  %v10703_v16 = vld [vmem:[%s18352_s12 + $0x88] sm:$0xff] }
 0x674   : > { %13872 = vmatprep.subr.mxu1 %v10748_v18  ;;  %13845 = vmatprep.subr.mxu0 %v10712_v40  ;;  %v10687_v18 = vld [vmem:[%s18352_s12 + $0x8] sm:$0xff] }
 0x675   : > { %13873 = vmatpush3.msra.mxu1 %v10732_v21  ;;  %v10702_v21 = vld [vmem:[%s18352_s12 + $0x80] sm:$0xff] }
 0x676   : > { %13874 = vmatprep.subr.mxu1 %v10747_v23  ;;  %v10686_v23 = vld [vmem:[%s18352_s12] sm:$0xff] }
 0x677   : > { %13875 = vmatpush3.msra.mxu1 %v10731_v24  ;;  %v11041_v24 = vld [vmem:[%s18347_s7 + $0x1e8] sm:$0xff] }
 0x678   : > { %13876 = vmatprep.subr.mxu1 %v10746_v27 }
 0x679   : > { %13877 = vmatpush3.msra.mxu1 %v10730_v30 }
 0x67a   : > { %13878 = vmatprep.subr.mxu1 %v10745_v32 }
 0x6cc   : > { %v10406_v37 = vpop.f32.mrf.mxu0 }
 0x6cd   : > { %v10407_v6 = vadd.f32 %v10406_v37, %v10323_v45  ;;  %v10729_v37 = vld [vmem:[%s18352_s12 + $0x158] sm:$0xff]  ;;  %v10711_v45 = vld [vmem:[%s18352_s12 + $0xc8] sm:$0xff] }
 0x6ce   : > { %v10408_v44 = vpop.f32.mrf.mxu0  ;;  %13879 = vmatpush3.msra.mxu1 %v10729_v37 }
 0x6cf   : > { %v10409_v46 = vadd.f32 %v10408_v44, %v10327_v41  ;;  %v10696_v41 = vld [vmem:[%s18352_s12 + $0x50] sm:$0xff] }
 0x6d0   : > { %v10728_v44 = vld [vmem:[%s18352_s12 + $0x150] sm:$0xff]  ;;  %13846 = vmatpush3.msra.mxu0 %v10696_v41 }
 0x6d1   : > { %13847 = vmatprep.subr.mxu0 %v10711_v45 }
 0x6f2   : > { %v10477_v39 = vpop.f32.mrf.mxu1 }
 0x6f3   : > { %v10478_v49 = vadd.f32 %v10477_v39, %v10407_v6  ;;  %v10744_v39 = vld [vmem:[%s18352_s12 + $0x1d0] sm:$0xff]  ;;  %v10727_v6 = vld [vmem:[%s18352_s12 + $0x148] sm:$0xff] }
 0x6f4   : > { %v10479_v43 = vpop.f32.mrf.mxu1  ;;  %13880 = vmatprep.subr.mxu1 %v10744_v39 }
 0x6f5   : > { %v10480_v47 = vadd.f32 %v10479_v43, %v10409_v46  ;;  %v17031_v54 = vmul.f32 0.013333334, %v10478_v49  ;;  %13881 = vmatpush3.msra.mxu1 %v10728_v44  ;;  %v10743_v43 = vld [vmem:[%s18352_s12 + $0x1c8] sm:$0xff]  ;;  %v10742_v49 = vld [vmem:[%s18352_s12 + $0x1c0] sm:$0xff] }
 0x6f6   : > { %13882 = vmatprep.subr.mxu1 %v10743_v43  ;;  %v10695_v46 = vld [vmem:[%s18352_s12 + $0x48] sm:$0xff] }
 0x6f7   : > { %v17028_v52 = vmul.f32 0.013333334, %v10480_v47  ;;  %v10644_v58 = vmul.f32 %v17031_v54, %v17031_v54  ;;  %13848 = vmatpush3.msra.mxu0 %v10695_v46  ;;  %13883 = vmatpush3.msra.mxu1 %v10727_v6  ;;  %v10710_v47 = vld [vmem:[%s18352_s12 + $0xc0] sm:$0xff]  ;;  %v10685_v46 = vld [vmem:[%s18351_s11 + $0x78] sm:$0xff] }
 0x6f8   : > { %13849 = vmatprep.subr.mxu0 %v10710_v47  ;;  %13884 = vmatprep.subr.mxu1 %v10742_v49  ;;  %v11040_v6 = vld [vmem:[%s18347_s7 + $0x1e0] sm:$0xff]  ;;  %v11033_v47 = vld [vmem:[%s18347_s7 + $0x1a8] sm:$0xff] }
 0x6f9   : > { %v10645_v55 = vmul.f32 %v17028_v52, %v17028_v52  ;;  %v10648_v3 = vsel %vm10630_vm5, %v10644_v58, 0.0  ;;  %v10740_v58 = vld [vmem:[%s18352_s12 + $0x1b0] sm:$0xff]  ;;  %v10683_v49 = vld [vmem:[%s18351_s11 + $0x68] sm:$0xff] }
 0x6fb   : > { %v10649_v0 = vsel %vm10630_vm5, %v10645_v55, 0.0  ;;  %v10693_v55 = vld [vmem:[%s18352_s12 + $0x38] sm:$0xff] }
 0x6fc   : > { %v10650_v1 = vadd.f32 %v10649_v0, %v10648_v3  ;;  %v10691_v0 = vld [vmem:[%s18352_s12 + $0x28] sm:$0xff]  ;;  %v10706_v3 = vld [vmem:[%s18352_s12 + $0xa0] sm:$0xff] }
 0x70d   : > { %v10548_v51 = vpop.f32.mrf.mxu0 }
 0x70e   : > { %v10549_v56 = vadd.f32 %v10548_v51, %v10331_v53  ;;  %v10694_v51 = vld [vmem:[%s18352_s12 + $0x40] sm:$0xff] }
 0x70f   : > { %v10550_v33 = vpop.f32.mrf.mxu0  ;;  %v10726_v53 = vld [vmem:[%s18352_s12 + $0x140] sm:$0xff]  ;;  %13850 = vmatpush3.msra.mxu0 %v10694_v51 }
 0x710   : > { %v10551_v59 = vadd.f32 %v10550_v33, %v10335_v29  ;;  %13885 = vmatpush3.msra.mxu1 %v10726_v53  ;;  %v10709_v29 = vld [vmem:[%s18352_s12 + $0xb8] sm:$0xff]  ;;  %v11032_v51 = vld [vmem:[%s18347_s7 + $0x1a0] sm:$0xff]  ;;  %v11029_v53 = vld [vmem:[%s18347_s7 + $0x188] sm:$0xff] }
 0x711   : > { %v10741_v33 = vld [vmem:[%s18352_s12 + $0x1b8] sm:$0xff]  ;;  %13851 = vmatprep.subr.mxu0 %v10709_v29 }
 0x712   : > { %13886 = vmatprep.subr.mxu1 %v10741_v33  ;;  %13852 = vmatpush3.msra.mxu0 %v10693_v55  ;;  %v10682_v33 = vld [vmem:[%s18351_s11 + $0x60] sm:$0xff] }
 0x713   : > { %v11028_v55 = vld [vmem:[%s18347_s7 + $0x180] sm:$0xff] }
 0x732   : > { %v10619_v57 = vpop.f32.mrf.mxu1 }
 0x733   : > { %v10620_v60 = vadd.f32 %v10619_v57, %v10549_v56  ;;  %v10725_v56 = vld [vmem:[%s18352_s12 + $0x138] sm:$0xff]  ;;  %v10708_v57 = vld [vmem:[%s18352_s12 + $0xb0] sm:$0xff] }
 0x734   : > { %v10621_v61 = vpop.f32.mrf.mxu1  ;;  %13887 = vmatpush3.msra.mxu1 %v10725_v56  ;;  %13853 = vmatprep.subr.mxu0 %v10708_v57  ;;  %v11025_v57 = vld [vmem:[%s18347_s7 + $0x168] sm:$0xff] }
 0x735   : > { %v17038_v63 = vmul.f32 0.013333334, %v10620_v60  ;;  %v10622_v62 = vadd.f32 %v10621_v61, %v10551_v59  ;;  %13888 = vmatprep.subr.mxu1 %v10740_v58  ;;  %v10692_v59 = vld [vmem:[%s18352_s12 + $0x30] sm:$0xff]  ;;  %v10707_v61 = vld [vmem:[%s18352_s12 + $0xa8] sm:$0xff]  ;;  %v10681_v58 = vld [vmem:[%s18351_s11 + $0x58] sm:$0xff] }
 0x736   : > { %v10724_v60 = vld [vmem:[%s18352_s12 + $0x130] sm:$0xff]  ;;  %13854 = vmatpush3.msra.mxu0 %v10692_v59  ;;  %v11024_v59 = vld [vmem:[%s18347_s7 + $0x160] sm:$0xff] }
 0x737   : > { %v10646_v20 = vmul.f32 %v17038_v63, %v17038_v63  ;;  %v17043_v2 = vmul.f32 0.013333334, %v10622_v62  ;;  %13889 = vmatpush3.msra.mxu1 %v10724_v60  ;;  %v10739_v62 = vld [vmem:[%s18352_s12 + $0x1a8] sm:$0xff]  ;;  %13855 = vmatprep.subr.mxu0 %v10707_v61 }
 0x738   : > { %13890 = vmatprep.subr.mxu1 %v10739_v62  ;;  %13856 = vmatpush3.msra.mxu0 %v10691_v0  ;;  %v11021_v60 = vld [vmem:[%s18347_s7 + $0x148] sm:$0xff]  ;;  %v10680_v62 = vld [vmem:[%s18351_s11 + $0x50] sm:$0xff]  ;;  %v11020_v0 = vld [vmem:[%s18347_s7 + $0x140] sm:$0xff] }
 0x739   : > { %v10647_v5 = vmul.f32 %v17043_v2, %v17043_v2  ;;  %v10651_v7 = vsel %vm10630_vm5, %v10646_v20, 0.0  ;;  %v10723_v20 = vld [vmem:[%s18352_s12 + $0x128] sm:$0xff]  ;;  %13857 = vmatprep.subr.mxu0 %v10706_v3 }
 0x73a   : > { %v10652_v8 = vadd.f32 %v10651_v7, %v10650_v1  ;;  %13891 = vmatpush3.msra.mxu1 %v10723_v20  ;;  %v10738_v1 = vld [vmem:[%s18352_s12 + $0x1a0] sm:$0xff]  ;;  %v11017_v20 = vld [vmem:[%s18347_s7 + $0x128] sm:$0xff] }
 0x73b   : > { %v10653_v9 = vsel %vm10630_vm5, %v10647_v5, 0.0  ;;  %v10690_v5 = vld [vmem:[%s18352_s12 + $0x20] sm:$0xff]  ;;  %13892 = vmatprep.subr.mxu1 %v10738_v1  ;;  %v10679_v3 = vld [vmem:[%s18351_s11 + $0x48] sm:$0xff] }
 0x73c   : > { %v10654_v11 = vadd.f32 %v10653_v9, %v10652_v8  ;;  %v10722_v7 = vld [vmem:[%s18352_s12 + $0x120] sm:$0xff]  ;;  %v10705_v8 = vld [vmem:[%s18352_s12 + $0x98] sm:$0xff]  ;;  %13858 = vmatpush3.msra.mxu0 %v10690_v5 }
 0x73d   : > { %v10737_v9 = vld [vmem:[%s18352_s12 + $0x198] sm:$0xff]  ;;  %13893 = vmatpush3.msra.mxu1 %v10722_v7  ;;  %13859 = vmatprep.subr.mxu0 %v10705_v8  ;;  %v11016_v1 = vld [vmem:[%s18347_s7 + $0x120] sm:$0xff]  ;;  %v11013_v7 = vld [vmem:[%s18347_s7 + $0x108] sm:$0xff] }
 0x73e   : > { %10655 = vadd.xlane.f32.xlu1 %v10654_v11  ;;  %v10721_v11 = vld [vmem:[%s18352_s12 + $0x118] sm:$0xff]  ;;  %13894 = vmatprep.subr.mxu1 %v10737_v9  ;;  %v10678_v8 = vld [vmem:[%s18351_s11 + $0x40] sm:$0xff] }
 0x73f   : > { %13860 = vmatpush3.msra.mxu0 %v10689_v10  ;;  %13895 = vmatpush3.msra.mxu1 %v10721_v11  ;;  %v11012_v9 = vld [vmem:[%s18347_s7 + $0x100] sm:$0xff]  ;;  %v11009_v10 = vld [vmem:[%s18347_s7 + $0xe8] sm:$0xff]  ;;  %v10677_v11 = vld [vmem:[%s18351_s11 + $0x38] sm:$0xff] }
 0x740   : > { %13896 = vmatprep.subr.mxu1 %v10736_v13  ;;  %v11005_v13 = vld [vmem:[%s18347_s7 + $0xc8] sm:$0xff] }
 0x741   : > { %13897 = vmatpush3.msra.mxu1 %v10720_v15  ;;  %v11004_v15 = vld [vmem:[%s18347_s7 + $0xc0] sm:$0xff] }
 0x742   : > { %10632 = vadd.xlane.f32.xlu1 %v10631_v12  ;;  %v10704_v12 = vld [vmem:[%s18352_s12 + $0x90] sm:$0xff]  ;;  %13898 = vmatprep.subr.mxu1 %v10735_v17  ;;  %v10675_v17 = vld [vmem:[%s18351_s11 + $0x28] sm:$0xff] }
 0x743   : > { %13861 = vmatprep.subr.mxu0 %v10704_v12  ;;  %13899 = vmatpush3.msra.mxu1 %v10719_v19  ;;  %v11008_v12 = vld [vmem:[%s18347_s7 + $0xe0] sm:$0xff]  ;;  %v10997_v19 = vld [vmem:[%s18347_s7 + $0x88] sm:$0xff] }
 0x744   : > { %13862 = vmatpush3.msra.mxu0 %v10688_v14  ;;  %13900 = vmatprep.subr.mxu1 %v10734_v22  ;;  %v10676_v14 = vld [vmem:[%s18351_s11 + $0x30] sm:$0xff]  ;;  %v10996_v22 = vld [vmem:[%s18347_s7 + $0x80] sm:$0xff] }
 0x745   : > { %13863 = vmatprep.subr.mxu0 %v10703_v16  ;;  %13901 = vmatpush3.msra.mxu1 %v10718_v25  ;;  %v11001_v16 = vld [vmem:[%s18347_s7 + $0xa8] sm:$0xff]  ;;  %v10673_v25 = vld [vmem:[%s18351_s11 + $0x18] sm:$0xff] }
 0x746   : > { %13864 = vmatpush3.msra.mxu0 %v10687_v18  ;;  %11066 = vmatprep.subr.mxu1 %v11041_v24  ;;  %v11000_v18 = vld [vmem:[%s18347_s7 + $0xa0] sm:$0xff] }
 0x747   : > { %13865 = vmatprep.subr.mxu0 %v10702_v21  ;;  %v10674_v21 = vld [vmem:[%s18351_s11 + $0x20] sm:$0xff] }
 0x748   : > { %13866 = vmatpush3.msra.mxu0 %v10686_v23  ;;  %v10993_v23 = vld [vmem:[%s18347_s7 + $0x68] sm:$0xff]  ;;  %v10992_v24 = vld [vmem:[%s18347_s7 + $0x60] sm:$0xff] }
 0x749   : > { %13922 = vmatprep.subr.mxu0 %v14848_v42 }
 0x7c7   : > { %v10656_v26 = vpop.xlane.xlu1 %10655 }
 0x7c8   : > { %14798 = vrsqrt.f32 %v10656_v26  ;;  %vm10659_vm6 = vcmp.eq.f32.partialorder %v10656_v26, inf  ;;  %v10662_v30 = vand.u32 2147483648, %v10656_v26  ;;  %vm10661_vm7 = vcmp.eq.f32.partialorder %v10656_v26, 0.0 }
 0x7cb   : > { %v10633_v37 = vpop.xlane.xlu1 %10632 }
 0x7cc   : > { %vm10636_vm8 = vcmp.eq.f32.partialorder %v10633_v37, inf  ;;  %v10639_v29 = vand.u32 2147483648, %v10633_v37  ;;  %vm10638_vm9 = vcmp.eq.f32.partialorder %v10633_v37, 0.0 }
 0x7d5   : > { %v14799_v27 = vpop.eup %14798 }
 0x7d6   : > { %v10658_v28 = vmul.f32 %v14799_v27, %v10656_v26  ;;  %v10672_v27 = vld [vmem:[%s18351_s11 + $0x10] sm:$0xff] }
 0x7d8   : > { %v10660_v31 = vsel %vm10659_vm6, %v10656_v26, %v10658_v28  ;;  %v10989_v26 = vld [vmem:[%s18347_s7 + $0x48] sm:$0xff]  ;;  %v10988_v28 = vld [vmem:[%s18347_s7 + $0x40] sm:$0xff] }
 0x7d9   : > { %v10663_v32 = vsel %vm10661_vm7, %v10662_v30, %v10660_v31  ;;  %v10985_v30 = vld [vmem:[%s18347_s7 + $0x28] sm:$0xff] }
 0x7da   : > { %v10664_v35 = vmax.f32 %v10663_v32, 1e-12  ;;  %v10671_v31 = vld [vmem:[%s18351_s11 + $0x8] sm:$0xff]  ;;  %v10984_v32 = vld [vmem:[%s18347_s7 + $0x20] sm:$0xff] }
 0x7dc   : > { %14800 = vrcp.f32 %v10664_v35  ;;  %v10981_v35 = vld [vmem:[%s18347_s7 + $0x8] sm:$0xff] }
 0x7dd   : > { %14802 = vrsqrt.f32 %v10633_v37 }
 0x7e9   : > { %v14801_v40 = vpop.eup %14800 }
 0x7ea   : > { %v17255_v39 = vmul.f32 %v14801_v40, %v17028_v52  ;;  %v17258_v41 = vmul.f32 %v14801_v40, %v17043_v2  ;;  %v17261_v44 = vmul.f32 %v14801_v40, %v17031_v54  ;;  %v17264_v45 = vmul.f32 %v14801_v40, %v17038_v63  ;;  %v14803_v43 = vpop.eup %14802  ;;  %v11037_v52 = vld [vmem:[%s18347_s7 + $0x1c8] sm:$0xff]  ;;  %v10684_v54 = vld [vmem:[%s18351_s11 + $0x70] sm:$0xff]  ;;  %v11036_v63 = vld [vmem:[%s18347_s7 + $0x1c0] sm:$0xff] }
 0x7eb   : > { %v10635_v2 = vmul.f32 %v14803_v43, %v10633_v37  ;;  %v10670_v40 = vld [vmem:[%s18351_s11] sm:$0xff] }
 0x7ec   : > { %10814 = vmatprep.mubr.f32.mxu0 %v17255_v39  ;;  %10884 = vmatprep.mubr.f32.mxu1 %v17258_v41  ;;  %v10980_v43 = vld [vmem:[%s18347_s7] sm:$0xff] }
 0x7ed   : > { %10815 = vmatmul.mubr.f32.vlgmr.msra.gmra.mxu0 %v17261_v44  ;;  %10885 = vmatmul.mubr.f32.vlgmr.msra.gmra.mxu1 %v17264_v45  ;;  %v10637_v56 = vsel %vm10636_vm8, %v10633_v37, %v10635_v2  ;;  %v11265_v2 = vld [vmem:[%s18349_s9 + $0x1c8] sm:$0xff] }
 0x7ee   : > { %13923 = vmatpush3.msra.mxu0 %v10685_v46  ;;  %11067 = vmatpush1.msra.mxu1 %v11040_v6  ;;  %v10640_v61 = vsel %vm10638_vm9, %v10639_v29, %v10637_v56  ;;  %v11043_v6 = vld [vmem:[%s18347_s7 + $0x1f8] sm:$0xff]  ;;  %v11034_v29 = vld [vmem:[%s18347_s7 + $0x1b0] sm:$0xff]  ;;  %v11257_v56 = vld [vmem:[%s18349_s9 + $0x188] sm:$0xff] }
 0x7ef   : > { %13924 = vmatprep.subr.mxu0 %v14848_v42  ;;  %11068 = vmatprep.subr.mxu1 %v11037_v52  ;;  %v10641_v5 = vmax.f32 %v10640_v61, 1e-12  ;;  %v11269_v52 = vld [vmem:[%s18349_s9 + $0x1e8] sm:$0xff]  ;;  %v11026_v61 = vld [vmem:[%s18347_s7 + $0x170] sm:$0xff] }
 0x7f0   : > { %13925 = vmatpush3.msra.mxu0 %v10684_v54  ;;  %11069 = vmatpush1.msra.mxu1 %v11036_v63  ;;  %v11042_v54 = vld [vmem:[%s18347_s7 + $0x1f0] sm:$0xff]  ;;  %v11039_v63 = vld [vmem:[%s18347_s7 + $0x1d8] sm:$0xff] }
 0x7f1   : > { %13926 = vmatprep.subr.mxu0 %v14848_v42  ;;  %11070 = vmatprep.subr.mxu1 %v11033_v47  ;;  %14804 = vrcp.f32 %v10641_v5  ;;  %v11038_v47 = vld [vmem:[%s18347_s7 + $0x1d0] sm:$0xff]  ;;  %v11019_v5 = vld [vmem:[%s18347_s7 + $0x138] sm:$0xff] }
 0x7f2   : > { %13927 = vmatpush3.msra.mxu0 %v10683_v49  ;;  %11071 = vmatpush1.msra.mxu1 %v11032_v51  ;;  %v11264_v49 = vld [vmem:[%s18349_s9 + $0x1c0] sm:$0xff]  ;;  %v11035_v51 = vld [vmem:[%s18347_s7 + $0x1b8] sm:$0xff] }
 0x7f3   : > { %13928 = vmatprep.subr.mxu0 %v14848_v42  ;;  %11072 = vmatprep.subr.mxu1 %v11029_v53  ;;  %v11261_v53 = vld [vmem:[%s18349_s9 + $0x1a8] sm:$0xff] }
 0x7f4   : > { %13929 = vmatpush3.msra.mxu0 %v10682_v33  ;;  %11073 = vmatpush1.msra.mxu1 %v11028_v55  ;;  %v11260_v33 = vld [vmem:[%s18349_s9 + $0x1a0] sm:$0xff]  ;;  %v11031_v55 = vld [vmem:[%s18347_s7 + $0x198] sm:$0xff] }
 0x7f5   : > { %13930 = vmatprep.subr.mxu0 %v14848_v42  ;;  %11074 = vmatprep.subr.mxu1 %v11025_v57  ;;  %v11030_v57 = vld [vmem:[%s18347_s7 + $0x190] sm:$0xff] }
 0x7f6   : > { %13931 = vmatpush3.msra.mxu0 %v10681_v58  ;;  %11075 = vmatpush1.msra.mxu1 %v11024_v59  ;;  %v11256_v58 = vld [vmem:[%s18349_s9 + $0x180] sm:$0xff]  ;;  %v11027_v59 = vld [vmem:[%s18347_s7 + $0x178] sm:$0xff] }
 0x7f7   : > { %13932 = vmatprep.subr.mxu0 %v14848_v42  ;;  %11076 = vmatprep.subr.mxu1 %v11021_v60  ;;  %v11253_v60 = vld [vmem:[%s18349_s9 + $0x168] sm:$0xff] }
 0x7f8   : > { %13933 = vmatpush3.msra.mxu0 %v10680_v62  ;;  %11077 = vmatpush1.msra.mxu1 %v11020_v0  ;;  %v11252_v62 = vld [vmem:[%s18349_s9 + $0x160] sm:$0xff]  ;;  %v11023_v0 = vld [vmem:[%s18347_s7 + $0x158] sm:$0xff] }
 0x7f9   : > { %13934 = vmatprep.subr.mxu0 %v14848_v42  ;;  %11078 = vmatprep.subr.mxu1 %v11017_v20  ;;  %v11249_v20 = vld [vmem:[%s18349_s9 + $0x148] sm:$0xff] }
 0x7fa   : > { %13935 = vmatpush3.msra.mxu0 %v10679_v3  ;;  %11079 = vmatpush1.msra.mxu1 %v11016_v1  ;;  %v11022_v3 = vld [vmem:[%s18347_s7 + $0x150] sm:$0xff]  ;;  %v11248_v1 = vld [vmem:[%s18349_s9 + $0x140] sm:$0xff] }
 0x7fb   : > { %13936 = vmatprep.subr.mxu0 %v14848_v42  ;;  %11080 = vmatprep.subr.mxu1 %v11013_v7  ;;  %v11245_v7 = vld [vmem:[%s18349_s9 + $0x128] sm:$0xff] }
 0x7fc   : > { %13937 = vmatpush3.msra.mxu0 %v10678_v8  ;;  %11081 = vmatpush1.msra.mxu1 %v11012_v9  ;;  %v11018_v8 = vld [vmem:[%s18347_s7 + $0x130] sm:$0xff]  ;;  %v11244_v9 = vld [vmem:[%s18349_s9 + $0x120] sm:$0xff] }
 0x7fd   : > { %13938 = vmatprep.subr.mxu0 %v14848_v42  ;;  %11082 = vmatprep.subr.mxu1 %v11009_v10  ;;  %v11015_v10 = vld [vmem:[%s18347_s7 + $0x118] sm:$0xff] }
 0x7fe   : > { %13939 = vmatpush3.msra.mxu0 %v10677_v11  ;;  %11083 = vmatpush1.msra.mxu1 %v11008_v12  ;;  %v14805_v37 = vpop.eup %14804  ;;  %v11241_v11 = vld [vmem:[%s18349_s9 + $0x108] sm:$0xff]  ;;  %v11014_v12 = vld [vmem:[%s18347_s7 + $0x110] sm:$0xff] }
 0x7ff   : > { %13940 = vmatprep.subr.mxu0 %v14848_v42  ;;  %11084 = vmatprep.subr.mxu1 %v11005_v13  ;;  %v17428_v46 = vmul.f32 %v14805_v37, %v17049_v4  ;;  %v11268_v4 = vld [vmem:[%s18349_s9 + $0x1e0] sm:$0xff]  ;;  %v10994_v37 = vld [vmem:[%s18347_s7 + $0x70] sm:$0xff] }
 0x800   : > { %13941 = vmatpush3.msra.mxu0 %v10676_v14  ;;  %11085 = vmatpush1.msra.mxu1 %v11004_v15  ;;  %v11240_v13 = vld [vmem:[%s18349_s9 + $0x100] sm:$0xff]  ;;  %v11011_v14 = vld [vmem:[%s18347_s7 + $0xf8] sm:$0xff]  ;;  %v11237_v15 = vld [vmem:[%s18349_s9 + $0xe8] sm:$0xff] }
 0x801   : > { %13942 = vmatprep.subr.mxu0 %v14848_v42  ;;  %11086 = vmatprep.subr.mxu1 %v11001_v16  ;;  %v11010_v16 = vld [vmem:[%s18347_s7 + $0xf0] sm:$0xff] }
 0x802   : > { %13943 = vmatpush3.msra.mxu0 %v10675_v17  ;;  %11087 = vmatpush1.msra.mxu1 %v11000_v18  ;;  %v11236_v17 = vld [vmem:[%s18349_s9 + $0xe0] sm:$0xff]  ;;  %v11007_v18 = vld [vmem:[%s18347_s7 + $0xd8] sm:$0xff] }
 0x803   : > { %13944 = vmatprep.subr.mxu0 %v14848_v42  ;;  %11088 = vmatprep.subr.mxu1 %v10997_v19  ;;  %v11233_v19 = vld [vmem:[%s18349_s9 + $0xc8] sm:$0xff] }
 0x804   : > { %13945 = vmatpush3.msra.mxu0 %v10674_v21  ;;  %11089 = vmatpush1.msra.mxu1 %v10996_v22  ;;  %v11006_v21 = vld [vmem:[%s18347_s7 + $0xd0] sm:$0xff]  ;;  %v11232_v22 = vld [vmem:[%s18349_s9 + $0xc0] sm:$0xff] }
 0x805   : > { %13946 = vmatprep.subr.mxu0 %v14848_v42  ;;  %11090 = vmatprep.subr.mxu1 %v10993_v23  ;;  %v11003_v23 = vld [vmem:[%s18347_s7 + $0xb8] sm:$0xff] }
 0x806   : > { %13947 = vmatpush3.msra.mxu0 %v10673_v25  ;;  %11091 = vmatpush1.msra.mxu1 %v10992_v24  ;;  %v11229_v25 = vld [vmem:[%s18349_s9 + $0xa8] sm:$0xff]  ;;  %v11002_v24 = vld [vmem:[%s18347_s7 + $0xb0] sm:$0xff] }
 0x807   : > { %13948 = vmatprep.subr.mxu0 %v14848_v42  ;;  %11092 = vmatprep.subr.mxu1 %v10989_v26  ;;  %v11228_v26 = vld [vmem:[%s18349_s9 + $0xa0] sm:$0xff] }
 0x808   : > { %13949 = vmatpush3.msra.mxu0 %v10672_v27  ;;  %11093 = vmatpush1.msra.mxu1 %v10988_v28  ;;  %v10999_v27 = vld [vmem:[%s18347_s7 + $0x98] sm:$0xff]  ;;  %v11225_v28 = vld [vmem:[%s18349_s9 + $0x88] sm:$0xff] }
 0x809   : > { %13950 = vmatprep.subr.mxu0 %v14848_v42  ;;  %11094 = vmatprep.subr.mxu1 %v10985_v30  ;;  %v10998_v30 = vld [vmem:[%s18347_s7 + $0x90] sm:$0xff] }
 0x80a   : > { %13951 = vmatpush3.msra.mxu0 %v10671_v31  ;;  %11095 = vmatpush1.msra.mxu1 %v10984_v32  ;;  %v11224_v31 = vld [vmem:[%s18349_s9 + $0x80] sm:$0xff]  ;;  %v10995_v32 = vld [vmem:[%s18347_s7 + $0x78] sm:$0xff] }
 0x80b   : > { %13952 = vmatprep.subr.mxu0 %v14848_v42  ;;  %11096 = vmatprep.subr.mxu1 %v10981_v35  ;;  %v11221_v35 = vld [vmem:[%s18349_s9 + $0x68] sm:$0xff] }
 0x80c   : > { %13953 = vmatpush3.msra.mxu0 %v10670_v40  ;;  %13954 = vmatprep.mubr.msk.f32.mxu0 %vm14849_vm10, %v14848_v42  ;;  %v11220_v40 = vld [vmem:[%s18349_s9 + $0x60] sm:$0xff] }
 0x80d   : > { %11097 = vmatpush1.msra.mxu1 %v10980_v43  ;;  %11130 = vmatprep.mubr.f32.mxu1 %v14848_v42  ;;  %v10991_v43 = vld [vmem:[%s18347_s7 + $0x58] sm:$0xff] }
 0x80e   : > { %13955 = vmatmul.mubr.f32.vlgmr.msra.gmra.mxu0 %v17428_v46  ;;  %11131 = vmatmul.mubr.f32.vlgmr.msra.gmra.mxu1 %v17428_v46 }
 0x80f   : > { %11137 = vmatprep.subr.mxu0 %v11043_v6  ;;  %11486 = vmatprep.subr.mxu1 %v11269_v52  ;;  %v11217_v6 = vld [vmem:[%s18349_s9 + $0x48] sm:$0xff]  ;;  %v10990_v52 = vld [vmem:[%s18347_s7 + $0x50] sm:$0xff] }
 0x810   : > { %11138 = vmatpush1.msra.mxu0 %v11042_v54  ;;  %11487 = vmatpush1.msra.mxu1 %v11268_v4  ;;  %v11216_v54 = vld [vmem:[%s18349_s9 + $0x40] sm:$0xff]  ;;  %v10987_v4 = vld [vmem:[%s18347_s7 + $0x38] sm:$0xff] }
 0x811   : > { %11550 = vmatprep.mubr.f32.mxu1 %v17255_v39  ;;  %11139 = vmatprep.subr.mxu0 %v11039_v63  ;;  %v11213_v63 = vld [vmem:[%s18349_s9 + $0x28] sm:$0xff] }
 0x812   : > { %11488 = vmatprep.subr.mxu1 %v11265_v2  ;;  %11140 = vmatpush1.msra.mxu0 %v11038_v47  ;;  %v10986_v2 = vld [vmem:[%s18347_s7 + $0x30] sm:$0xff]  ;;  %v11212_v47 = vld [vmem:[%s18349_s9 + $0x20] sm:$0xff] }
 0x813   : > { %11489 = vmatpush1.msra.mxu1 %v11264_v49  ;;  %11141 = vmatprep.subr.mxu0 %v11035_v51  ;;  %v10983_v49 = vld [vmem:[%s18347_s7 + $0x18] sm:$0xff]  ;;  %v11209_v51 = vld [vmem:[%s18349_s9 + $0x8] sm:$0xff] }
 0x814   : > { %11490 = vmatprep.subr.mxu1 %v11261_v53  ;;  %11142 = vmatpush1.msra.mxu0 %v11034_v29  ;;  %v10982_v53 = vld [vmem:[%s18347_s7 + $0x10] sm:$0xff]  ;;  %v11208_v29 = vld [vmem:[%s18349_s9] sm:$0xff] }
 0x815   : > { %11491 = vmatpush1.msra.mxu1 %v11260_v33  ;;  %11143 = vmatprep.subr.mxu0 %v11031_v55  ;;  %v11333_v33 = vld [vmem:[%s18349_s9 + $0x3e8] sm:$0xff] }
 0x816   : > { %11492 = vmatprep.subr.mxu1 %v11257_v56  ;;  %11144 = vmatpush1.msra.mxu0 %v11030_v57  ;;  %v11397_v55 = vld [vmem:[%s18349_s9 + $0x5e8] sm:$0xff]  ;;  %v11332_v56 = vld [vmem:[%s18349_s9 + $0x3e0] sm:$0xff] }
 0x817   : > { %11493 = vmatpush1.msra.mxu1 %v11256_v58  ;;  %11145 = vmatprep.subr.mxu0 %v11027_v59  ;;  %v11396_v57 = vld [vmem:[%s18349_s9 + $0x5e0] sm:$0xff]  ;;  %v11329_v58 = vld [vmem:[%s18349_s9 + $0x3c8] sm:$0xff] }
 0x818   : > { %11494 = vmatprep.subr.mxu1 %v11253_v60  ;;  %11146 = vmatpush1.msra.mxu0 %v11026_v61  ;;  %v11393_v59 = vld [vmem:[%s18349_s9 + $0x5c8] sm:$0xff]  ;;  %v11392_v60 = vld [vmem:[%s18349_s9 + $0x5c0] sm:$0xff] }
 0x819   : > { %11495 = vmatpush1.msra.mxu1 %v11252_v62  ;;  %11147 = vmatprep.subr.mxu0 %v11023_v0  ;;  %v11389_v61 = vld [vmem:[%s18349_s9 + $0x5a8] sm:$0xff]  ;;  %v11324_v62 = vld [vmem:[%s18349_s9 + $0x3a0] sm:$0xff] }
 0x81a   : > { %11496 = vmatprep.subr.mxu1 %v11249_v20  ;;  %11148 = vmatpush1.msra.mxu0 %v11022_v3  ;;  %v11388_v0 = vld [vmem:[%s18349_s9 + $0x5a0] sm:$0xff]  ;;  %v11321_v20 = vld [vmem:[%s18349_s9 + $0x388] sm:$0xff] }
 0x81b   : > { %11497 = vmatpush1.msra.mxu1 %v11248_v1  ;;  %11149 = vmatprep.subr.mxu0 %v11019_v5  ;;  %v11385_v3 = vld [vmem:[%s18349_s9 + $0x588] sm:$0xff]  ;;  %v11320_v1 = vld [vmem:[%s18349_s9 + $0x380] sm:$0xff] }
 0x81c   : > { %11498 = vmatprep.subr.mxu1 %v11245_v7  ;;  %11150 = vmatpush1.msra.mxu0 %v11018_v8  ;;  %v11384_v5 = vld [vmem:[%s18349_s9 + $0x580] sm:$0xff]  ;;  %v11317_v7 = vld [vmem:[%s18349_s9 + $0x368] sm:$0xff] }
 0x81d   : > { %11499 = vmatpush1.msra.mxu1 %v11244_v9  ;;  %11151 = vmatprep.subr.mxu0 %v11015_v10  ;;  %v11381_v8 = vld [vmem:[%s18349_s9 + $0x568] sm:$0xff]  ;;  %v11316_v9 = vld [vmem:[%s18349_s9 + $0x360] sm:$0xff] }
 0x81e   : > { %11500 = vmatprep.subr.mxu1 %v11241_v11  ;;  %11152 = vmatpush1.msra.mxu0 %v11014_v12  ;;  %v11380_v10 = vld [vmem:[%s18349_s9 + $0x560] sm:$0xff]  ;;  %v11313_v11 = vld [vmem:[%s18349_s9 + $0x348] sm:$0xff] }
 0x81f   : > { %11501 = vmatpush1.msra.mxu1 %v11240_v13  ;;  %11153 = vmatprep.subr.mxu0 %v11011_v14  ;;  %v11377_v12 = vld [vmem:[%s18349_s9 + $0x548] sm:$0xff]  ;;  %v11312_v13 = vld [vmem:[%s18349_s9 + $0x340] sm:$0xff] }
 0x820   : > { %11502 = vmatprep.subr.mxu1 %v11237_v15  ;;  %11154 = vmatpush1.msra.mxu0 %v11010_v16  ;;  %v11376_v14 = vld [vmem:[%s18349_s9 + $0x540] sm:$0xff]  ;;  %v11309_v15 = vld [vmem:[%s18349_s9 + $0x328] sm:$0xff] }
 0x821   : > { %11503 = vmatpush1.msra.mxu1 %v11236_v17  ;;  %11155 = vmatprep.subr.mxu0 %v11007_v18  ;;  %v11373_v16 = vld [vmem:[%s18349_s9 + $0x528] sm:$0xff]  ;;  %v11308_v17 = vld [vmem:[%s18349_s9 + $0x320] sm:$0xff] }
 0x822   : > { %11504 = vmatprep.subr.mxu1 %v11233_v19  ;;  %11156 = vmatpush1.msra.mxu0 %v11006_v21  ;;  %v11372_v18 = vld [vmem:[%s18349_s9 + $0x520] sm:$0xff]  ;;  %v11305_v19 = vld [vmem:[%s18349_s9 + $0x308] sm:$0xff] }
 0x823   : > { %11505 = vmatpush1.msra.mxu1 %v11232_v22  ;;  %11157 = vmatprep.subr.mxu0 %v11003_v23  ;;  %v11369_v21 = vld [vmem:[%s18349_s9 + $0x508] sm:$0xff]  ;;  %v11304_v22 = vld [vmem:[%s18349_s9 + $0x300] sm:$0xff] }
 0x824   : > { %11506 = vmatprep.subr.mxu1 %v11229_v25  ;;  %11158 = vmatpush1.msra.mxu0 %v11002_v24  ;;  %v11368_v23 = vld [vmem:[%s18349_s9 + $0x500] sm:$0xff]  ;;  %v11301_v25 = vld [vmem:[%s18349_s9 + $0x2e8] sm:$0xff] }
 0x825   : > { %11507 = vmatpush1.msra.mxu1 %v11228_v26  ;;  %11159 = vmatprep.subr.mxu0 %v10999_v27  ;;  %v11365_v24 = vld [vmem:[%s18349_s9 + $0x4e8] sm:$0xff]  ;;  %v11300_v26 = vld [vmem:[%s18349_s9 + $0x2e0] sm:$0xff] }
 0x826   : > { %11508 = vmatprep.subr.mxu1 %v11225_v28  ;;  %11160 = vmatpush1.msra.mxu0 %v10998_v30  ;;  %v11364_v27 = vld [vmem:[%s18349_s9 + $0x4e0] sm:$0xff]  ;;  %v11297_v28 = vld [vmem:[%s18349_s9 + $0x2c8] sm:$0xff] }
 0x827   : > { %11509 = vmatpush1.msra.mxu1 %v11224_v31  ;;  %11161 = vmatprep.subr.mxu0 %v10995_v32  ;;  %v11361_v30 = vld [vmem:[%s18349_s9 + $0x4c8] sm:$0xff]  ;;  %v11296_v31 = vld [vmem:[%s18349_s9 + $0x2c0] sm:$0xff] }
 0x828   : > { %11510 = vmatprep.subr.mxu1 %v11221_v35  ;;  %11162 = vmatpush1.msra.mxu0 %v10994_v37  ;;  %v11360_v32 = vld [vmem:[%s18349_s9 + $0x4c0] sm:$0xff]  ;;  %v11293_v35 = vld [vmem:[%s18349_s9 + $0x2a8] sm:$0xff] }
 0x829   : > { %11511 = vmatpush1.msra.mxu1 %v11220_v40  ;;  %11163 = vmatprep.subr.mxu0 %v10991_v43  ;;  %v11357_v37 = vld [vmem:[%s18349_s9 + $0x4a8] sm:$0xff]  ;;  %v11292_v40 = vld [vmem:[%s18349_s9 + $0x2a0] sm:$0xff] }
 0x82a   : > { %11512 = vmatprep.subr.mxu1 %v11217_v6  ;;  %11164 = vmatpush1.msra.mxu0 %v10990_v52  ;;  %v11356_v43 = vld [vmem:[%s18349_s9 + $0x4a0] sm:$0xff]  ;;  %v11289_v6 = vld [vmem:[%s18349_s9 + $0x288] sm:$0xff] }
 0x82b   : > { %11513 = vmatpush1.msra.mxu1 %v11216_v54  ;;  %11165 = vmatprep.subr.mxu0 %v10987_v4  ;;  %v11353_v52 = vld [vmem:[%s18349_s9 + $0x488] sm:$0xff]  ;;  %v11288_v54 = vld [vmem:[%s18349_s9 + $0x280] sm:$0xff] }
 0x82c   : > { %11514 = vmatprep.subr.mxu1 %v11213_v63  ;;  %11166 = vmatpush1.msra.mxu0 %v10986_v2  ;;  %v11352_v4 = vld [vmem:[%s18349_s9 + $0x480] sm:$0xff]  ;;  %v11285_v63 = vld [vmem:[%s18349_s9 + $0x268] sm:$0xff] }
 0x82d   : > { %11515 = vmatpush1.msra.mxu1 %v11212_v47  ;;  %11167 = vmatprep.subr.mxu0 %v10983_v49  ;;  %v11349_v2 = vld [vmem:[%s18349_s9 + $0x468] sm:$0xff]  ;;  %v11284_v47 = vld [vmem:[%s18349_s9 + $0x260] sm:$0xff] }
 0x82e   : > { %11516 = vmatprep.subr.mxu1 %v11209_v51  ;;  %11168 = vmatpush1.msra.mxu0 %v10982_v53  ;;  %v11348_v49 = vld [vmem:[%s18349_s9 + $0x460] sm:$0xff]  ;;  %v11281_v51 = vld [vmem:[%s18349_s9 + $0x248] sm:$0xff] }
 0x82f   : > { %11201 = vmatprep.mubr.f32.mxu0 %v14848_v42  ;;  %11517 = vmatpush1.msra.mxu1 %v11208_v29  ;;  %v11328_v42 = vld [vmem:[%s18349_s9 + $0x3c0] sm:$0xff]  ;;  %v11345_v53 = vld [vmem:[%s18349_s9 + $0x448] sm:$0xff] }
 0x830   : > { %11202 = vmatmul.mubr.f32.vlgmr.msra.gmra.mxu0 %v17428_v46  ;;  %11518 = vmatprep.subr.mxu1 %v11333_v33  ;;  %v11325_v46 = vld [vmem:[%s18349_s9 + $0x3a8] sm:$0xff]  ;;  %v11280_v29 = vld [vmem:[%s18349_s9 + $0x240] sm:$0xff] }
 0x831   : > { %11557 = vmatprep.subr.mxu0 %v11397_v55  ;;  %11519 = vmatpush2.msra.mxu1 %v11332_v56  ;;  %v11344_v33 = vld [vmem:[%s18349_s9 + $0x440] sm:$0xff]  ;;  %v11277_v55 = vld [vmem:[%s18349_s9 + $0x228] sm:$0xff] }
 0x832   : > { %11558 = vmatpush1.msra.mxu0 %v11396_v57  ;;  %11621 = vmatprep.mubr.f32.mxu0 %v17258_v41  ;;  %v11341_v56 = vld [vmem:[%s18349_s9 + $0x428] sm:$0xff]  ;;  %v11276_v57 = vld [vmem:[%s18349_s9 + $0x220] sm:$0xff] }
 0x833   : > { %11520 = vmatprep.subr.mxu1 %v11329_v58  ;;  %11559 = vmatprep.subr.mxu0 %v11393_v59  ;;  %v11340_v58 = vld [vmem:[%s18349_s9 + $0x420] sm:$0xff]  ;;  %v11273_v59 = vld [vmem:[%s18349_s9 + $0x208] sm:$0xff] }
 0x834   : > { %11521 = vmatpush2.msra.mxu1 %v11328_v42  ;;  %11560 = vmatpush1.msra.mxu0 %v11392_v60  ;;  %v11337_v42 = vld [vmem:[%s18349_s9 + $0x408] sm:$0xff]  ;;  %v11272_v60 = vld [vmem:[%s18349_s9 + $0x200] sm:$0xff] }
 0x835   : > { %11522 = vmatprep.subr.mxu1 %v11325_v46  ;;  %11561 = vmatprep.subr.mxu0 %v11389_v61  ;;  %v11336_v46 = vld [vmem:[%s18349_s9 + $0x400] sm:$0xff]  ;;  %v11461_v61 = vld [vmem:[%s18349_s9 + $0x7e8] sm:$0xff] }
 0x836   : > { %11523 = vmatpush2.msra.mxu1 %v11324_v62  ;;  %11562 = vmatpush1.msra.mxu0 %v11388_v0  ;;  %v11271_v62 = vld [vmem:[%s18349_s9 + $0x1f8] sm:$0xff]  ;;  %v11460_v0 = vld [vmem:[%s18349_s9 + $0x7e0] sm:$0xff] }
 0x837   : > { %11524 = vmatprep.subr.mxu1 %v11321_v20  ;;  %11563 = vmatprep.subr.mxu0 %v11385_v3  ;;  %v11270_v20 = vld [vmem:[%s18349_s9 + $0x1f0] sm:$0xff]  ;;  %v11457_v3 = vld [vmem:[%s18349_s9 + $0x7c8] sm:$0xff] }
 0x838   : > { %11525 = vmatpush2.msra.mxu1 %v11320_v1  ;;  %11564 = vmatpush1.msra.mxu0 %v11384_v5  ;;  %v11267_v1 = vld [vmem:[%s18349_s9 + $0x1d8] sm:$0xff]  ;;  %v11456_v5 = vld [vmem:[%s18349_s9 + $0x7c0] sm:$0xff] }
 0x839   : > { %11526 = vmatprep.subr.mxu1 %v11317_v7  ;;  %11565 = vmatprep.subr.mxu0 %v11381_v8  ;;  %v11266_v7 = vld [vmem:[%s18349_s9 + $0x1d0] sm:$0xff]  ;;  %v11453_v8 = vld [vmem:[%s18349_s9 + $0x7a8] sm:$0xff] }
 0x83a   : > { %11527 = vmatpush2.msra.mxu1 %v11316_v9  ;;  %11566 = vmatpush1.msra.mxu0 %v11380_v10  ;;  %v11263_v9 = vld [vmem:[%s18349_s9 + $0x1b8] sm:$0xff]  ;;  %v11452_v10 = vld [vmem:[%s18349_s9 + $0x7a0] sm:$0xff] }
 0x83b   : > { %11528 = vmatprep.subr.mxu1 %v11313_v11  ;;  %11567 = vmatprep.subr.mxu0 %v11377_v12  ;;  %v11262_v11 = vld [vmem:[%s18349_s9 + $0x1b0] sm:$0xff]  ;;  %v11259_v12 = vld [vmem:[%s18349_s9 + $0x198] sm:$0xff] }
 0x83c   : > { %11529 = vmatpush2.msra.mxu1 %v11312_v13  ;;  %11568 = vmatpush1.msra.mxu0 %v11376_v14  ;;  %v11448_v13 = vld [vmem:[%s18349_s9 + $0x780] sm:$0xff]  ;;  %v11258_v14 = vld [vmem:[%s18349_s9 + $0x190] sm:$0xff] }
 0x83d   : > { %11530 = vmatprep.subr.mxu1 %v11309_v15  ;;  %11569 = vmatprep.subr.mxu0 %v11373_v16  ;;  %v11445_v15 = vld [vmem:[%s18349_s9 + $0x768] sm:$0xff]  ;;  %v11255_v16 = vld [vmem:[%s18349_s9 + $0x178] sm:$0xff] }
 0x83e   : > { %11531 = vmatpush2.msra.mxu1 %v11308_v17  ;;  %11570 = vmatpush1.msra.mxu0 %v11372_v18  ;;  %v11444_v17 = vld [vmem:[%s18349_s9 + $0x760] sm:$0xff]  ;;  %v11254_v18 = vld [vmem:[%s18349_s9 + $0x170] sm:$0xff] }
 0x83f   : > { %11532 = vmatprep.subr.mxu1 %v11305_v19  ;;  %11571 = vmatprep.subr.mxu0 %v11369_v21  ;;  %v11441_v19 = vld [vmem:[%s18349_s9 + $0x748] sm:$0xff]  ;;  %v11251_v21 = vld [vmem:[%s18349_s9 + $0x158] sm:$0xff] }
 0x840   : > { %11533 = vmatpush2.msra.mxu1 %v11304_v22  ;;  %11572 = vmatpush1.msra.mxu0 %v11368_v23  ;;  %v11440_v22 = vld [vmem:[%s18349_s9 + $0x740] sm:$0xff]  ;;  %v11250_v23 = vld [vmem:[%s18349_s9 + $0x150] sm:$0xff] }
 0x841   : > { %11534 = vmatprep.subr.mxu1 %v11301_v25  ;;  %11573 = vmatprep.subr.mxu0 %v11365_v24  ;;  %v11437_v25 = vld [vmem:[%s18349_s9 + $0x728] sm:$0xff]  ;;  %v11247_v24 = vld [vmem:[%s18349_s9 + $0x138] sm:$0xff] }
 0x842   : > { %11535 = vmatpush2.msra.mxu1 %v11300_v26  ;;  %11574 = vmatpush1.msra.mxu0 %v11364_v27  ;;  %v11436_v26 = vld [vmem:[%s18349_s9 + $0x720] sm:$0xff]  ;;  %v11246_v27 = vld [vmem:[%s18349_s9 + $0x130] sm:$0xff] }
 0x843   : > { %11536 = vmatprep.subr.mxu1 %v11297_v28  ;;  %11575 = vmatprep.subr.mxu0 %v11361_v30  ;;  %v11433_v28 = vld [vmem:[%s18349_s9 + $0x708] sm:$0xff]  ;;  %v11243_v30 = vld [vmem:[%s18349_s9 + $0x118] sm:$0xff] }
 0x844   : > { %11537 = vmatpush2.msra.mxu1 %v11296_v31  ;;  %11576 = vmatpush1.msra.mxu0 %v11360_v32  ;;  %v11432_v31 = vld [vmem:[%s18349_s9 + $0x700] sm:$0xff]  ;;  %v11242_v32 = vld [vmem:[%s18349_s9 + $0x110] sm:$0xff] }
 0x845   : > { %11538 = vmatprep.subr.mxu1 %v11293_v35  ;;  %11577 = vmatprep.subr.mxu0 %v11357_v37  ;;  %v11429_v35 = vld [vmem:[%s18349_s9 + $0x6e8] sm:$0xff]  ;;  %v11239_v37 = vld [vmem:[%s18349_s9 + $0xf8] sm:$0xff] }
 0x846   : > { %11539 = vmatpush2.msra.mxu1 %v11292_v40  ;;  %11578 = vmatpush1.msra.mxu0 %v11356_v43  ;;  %v11428_v40 = vld [vmem:[%s18349_s9 + $0x6e0] sm:$0xff]  ;;  %v11238_v43 = vld [vmem:[%s18349_s9 + $0xf0] sm:$0xff] }
 0x847   : > { %11540 = vmatprep.subr.mxu1 %v11289_v6  ;;  %11579 = vmatprep.subr.mxu0 %v11353_v52  ;;  %v11425_v6 = vld [vmem:[%s18349_s9 + $0x6c8] sm:$0xff]  ;;  %v11235_v52 = vld [vmem:[%s18349_s9 + $0xd8] sm:$0xff] }
 0x848   : > { %11541 = vmatpush2.msra.mxu1 %v11288_v54  ;;  %11580 = vmatpush1.msra.mxu0 %v11352_v4  ;;  %v11424_v54 = vld [vmem:[%s18349_s9 + $0x6c0] sm:$0xff]  ;;  %v11234_v4 = vld [vmem:[%s18349_s9 + $0xd0] sm:$0xff] }
 0x849   : > { %11542 = vmatprep.subr.mxu1 %v11285_v63  ;;  %11581 = vmatprep.subr.mxu0 %v11349_v2  ;;  %v11421_v63 = vld [vmem:[%s18349_s9 + $0x6a8] sm:$0xff]  ;;  %v11231_v2 = vld [vmem:[%s18349_s9 + $0xb8] sm:$0xff] }
 0x84a   : > { %11543 = vmatpush2.msra.mxu1 %v11284_v47  ;;  %11582 = vmatpush1.msra.mxu0 %v11348_v49  ;;  %v11420_v47 = vld [vmem:[%s18349_s9 + $0x6a0] sm:$0xff]  ;;  %v11230_v49 = vld [vmem:[%s18349_s9 + $0xb0] sm:$0xff] }
 0x84b   : > { %11544 = vmatprep.subr.mxu1 %v11281_v51  ;;  %11583 = vmatprep.subr.mxu0 %v11345_v53  ;;  %v11417_v51 = vld [vmem:[%s18349_s9 + $0x688] sm:$0xff]  ;;  %v11227_v53 = vld [vmem:[%s18349_s9 + $0x98] sm:$0xff] }
 0x84c   : > { %11545 = vmatpush2.msra.mxu1 %v11280_v29  ;;  %11584 = vmatpush1.msra.mxu0 %v11344_v33  ;;  %v11416_v29 = vld [vmem:[%s18349_s9 + $0x680] sm:$0xff]  ;;  %v11226_v33 = vld [vmem:[%s18349_s9 + $0x90] sm:$0xff] }
 0x84d   : > { %11546 = vmatprep.subr.mxu1 %v11277_v55  ;;  %11585 = vmatprep.subr.mxu0 %v11341_v56  ;;  %v11413_v55 = vld [vmem:[%s18349_s9 + $0x668] sm:$0xff]  ;;  %v11223_v56 = vld [vmem:[%s18349_s9 + $0x78] sm:$0xff] }
 0x84e   : > { %11547 = vmatpush2.msra.mxu1 %v11276_v57  ;;  %11586 = vmatpush1.msra.mxu0 %v11340_v58  ;;  %v11412_v57 = vld [vmem:[%s18349_s9 + $0x660] sm:$0xff]  ;;  %v11222_v58 = vld [vmem:[%s18349_s9 + $0x70] sm:$0xff] }
 0x84f   : > { %11548 = vmatprep.subr.mxu1 %v11273_v59  ;;  %11587 = vmatprep.subr.mxu0 %v11337_v42  ;;  %v11409_v59 = vld [vmem:[%s18349_s9 + $0x648] sm:$0xff]  ;;  %v11219_v42 = vld [vmem:[%s18349_s9 + $0x58] sm:$0xff] }
 0x850   : > { %11549 = vmatpush2.msra.mxu1 %v11272_v60  ;;  %11588 = vmatpush1.msra.mxu0 %v11336_v46  ;;  %v11408_v60 = vld [vmem:[%s18349_s9 + $0x640] sm:$0xff]  ;;  %v11218_v46 = vld [vmem:[%s18349_s9 + $0x50] sm:$0xff] }
 0x851   : > { %11551 = vmatmul.mubr.f32.vlgmr.msra.gmra.mxu1 %v17261_v44  ;;  %11589 = vmatprep.subr.mxu0 %v11461_v61  ;;  %v11405_v61 = vld [vmem:[%s18349_s9 + $0x628] sm:$0xff] }
 0x852   : > { %11628 = vmatprep.subr.mxu1 %v11271_v62  ;;  %11590 = vmatpush2.msra.mxu0 %v11460_v0  ;;  %v11215_v62 = vld [vmem:[%s18349_s9 + $0x38] sm:$0xff]  ;;  %v11404_v0 = vld [vmem:[%s18349_s9 + $0x620] sm:$0xff] }
 0x853   : > { %11629 = vmatpush1.msra.mxu1 %v11270_v20  ;;  %11692 = vmatprep.mubr.f32.mxu1 %v17255_v39  ;;  %v11449_v39 = vld [vmem:[%s18349_s9 + $0x788] sm:$0xff]  ;;  %v11214_v20 = vld [vmem:[%s18349_s9 + $0x30] sm:$0xff] }
 0x854   : > { %11591 = vmatprep.subr.mxu0 %v11457_v3  ;;  %11630 = vmatprep.subr.mxu1 %v11267_v1  ;;  %v11401_v3 = vld [vmem:[%s18349_s9 + $0x608] sm:$0xff]  ;;  %v11211_v1 = vld [vmem:[%s18349_s9 + $0x18] sm:$0xff] }
 0x855   : > { %11592 = vmatpush2.msra.mxu0 %v11456_v5  ;;  %11631 = vmatpush1.msra.mxu1 %v11266_v7  ;;  %v11400_v5 = vld [vmem:[%s18349_s9 + $0x600] sm:$0xff]  ;;  %v11210_v7 = vld [vmem:[%s18349_s9 + $0x10] sm:$0xff] }
 0x856   : > { %11593 = vmatprep.subr.mxu0 %v11453_v8  ;;  %11632 = vmatprep.subr.mxu1 %v11263_v9  ;;  %v11335_v8 = vld [vmem:[%s18349_s9 + $0x3f8] sm:$0xff] }
 0x857   : > { %11594 = vmatpush2.msra.mxu0 %v11452_v10  ;;  %11633 = vmatpush1.msra.mxu1 %v11262_v11  ;;  %v11399_v9 = vld [vmem:[%s18349_s9 + $0x5f8] sm:$0xff]  ;;  %v11334_v10 = vld [vmem:[%s18349_s9 + $0x3f0] sm:$0xff] }
 0x858   : > { %11595 = vmatprep.subr.mxu0 %v11449_v39  ;;  %11634 = vmatprep.subr.mxu1 %v11259_v12  ;;  %v11398_v11 = vld [vmem:[%s18349_s9 + $0x5f0] sm:$0xff]  ;;  %v11331_v39 = vld [vmem:[%s18349_s9 + $0x3d8] sm:$0xff] }
 0x859   : > { %11596 = vmatpush2.msra.mxu0 %v11448_v13  ;;  %11635 = vmatpush1.msra.mxu1 %v11258_v14  ;;  %v11395_v12 = vld [vmem:[%s18349_s9 + $0x5d8] sm:$0xff]  ;;  %v11330_v13 = vld [vmem:[%s18349_s9 + $0x3d0] sm:$0xff] }
 0x85a   : > { %11597 = vmatprep.subr.mxu0 %v11445_v15  ;;  %11636 = vmatprep.subr.mxu1 %v11255_v16  ;;  %v11394_v14 = vld [vmem:[%s18349_s9 + $0x5d0] sm:$0xff]  ;;  %v11327_v15 = vld [vmem:[%s18349_s9 + $0x3b8] sm:$0xff] }
 0x85b   : > { %11598 = vmatpush2.msra.mxu0 %v11444_v17  ;;  %11637 = vmatpush1.msra.mxu1 %v11254_v18  ;;  %v11391_v16 = vld [vmem:[%s18349_s9 + $0x5b8] sm:$0xff]  ;;  %v11326_v17 = vld [vmem:[%s18349_s9 + $0x3b0] sm:$0xff] }
 0x85c   : > { %11599 = vmatprep.subr.mxu0 %v11441_v19  ;;  %11638 = vmatprep.subr.mxu1 %v11251_v21  ;;  %v11390_v18 = vld [vmem:[%s18349_s9 + $0x5b0] sm:$0xff]  ;;  %v11387_v19 = vld [vmem:[%s18349_s9 + $0x598] sm:$0xff] }
 0x85d   : > { %11600 = vmatpush2.msra.mxu0 %v11440_v22  ;;  %11639 = vmatpush1.msra.mxu1 %v11250_v23  ;;  %v11322_v21 = vld [vmem:[%s18349_s9 + $0x390] sm:$0xff]  ;;  %v11319_v23 = vld [vmem:[%s18349_s9 + $0x378] sm:$0xff] }
 0x85e   : > { %11601 = vmatprep.subr.mxu0 %v11437_v25  ;;  %11640 = vmatprep.subr.mxu1 %v11247_v24  ;;  %v11386_v22 = vld [vmem:[%s18349_s9 + $0x590] sm:$0xff]  ;;  %v11383_v25 = vld [vmem:[%s18349_s9 + $0x578] sm:$0xff] }
 0x85f   : > { %11602 = vmatpush2.msra.mxu0 %v11436_v26  ;;  %11641 = vmatpush1.msra.mxu1 %v11246_v27  ;;  %v11318_v24 = vld [vmem:[%s18349_s9 + $0x370] sm:$0xff]  ;;  %v11315_v27 = vld [vmem:[%s18349_s9 + $0x358] sm:$0xff] }
 0x860   : > { %11603 = vmatprep.subr.mxu0 %v11433_v28  ;;  %11642 = vmatprep.subr.mxu1 %v11243_v30  ;;  %v11382_v26 = vld [vmem:[%s18349_s9 + $0x570] sm:$0xff]  ;;  %v11379_v28 = vld [vmem:[%s18349_s9 + $0x558] sm:$0xff] }
 0x861   : > { %11604 = vmatpush2.msra.mxu0 %v11432_v31  ;;  %11643 = vmatpush1.msra.mxu1 %v11242_v32  ;;  %v11314_v30 = vld [vmem:[%s18349_s9 + $0x350] sm:$0xff]  ;;  %v11311_v32 = vld [vmem:[%s18349_s9 + $0x338] sm:$0xff] }
 0x862   : > { %11605 = vmatprep.subr.mxu0 %v11429_v35  ;;  %11644 = vmatprep.subr.mxu1 %v11239_v37  ;;  %v11378_v31 = vld [vmem:[%s18349_s9 + $0x550] sm:$0xff]  ;;  %v11375_v35 = vld [vmem:[%s18349_s9 + $0x538] sm:$0xff] }
 0x863   : > { %11606 = vmatpush2.msra.mxu0 %v11428_v40  ;;  %11645 = vmatpush1.msra.mxu1 %v11238_v43  ;;  %v11310_v37 = vld [vmem:[%s18349_s9 + $0x330] sm:$0xff]  ;;  %v11307_v43 = vld [vmem:[%s18349_s9 + $0x318] sm:$0xff] }
 0x864   : > { %11607 = vmatprep.subr.mxu0 %v11425_v6  ;;  %11646 = vmatprep.subr.mxu1 %v11235_v52  ;;  %v11374_v40 = vld [vmem:[%s18349_s9 + $0x530] sm:$0xff]  ;;  %v11371_v6 = vld [vmem:[%s18349_s9 + $0x518] sm:$0xff] }
 0x865   : > { %11608 = vmatpush2.msra.mxu0 %v11424_v54  ;;  %11647 = vmatpush1.msra.mxu1 %v11234_v4  ;;  %v11306_v52 = vld [vmem:[%s18349_s9 + $0x310] sm:$0xff]  ;;  %v11303_v4 = vld [vmem:[%s18349_s9 + $0x2f8] sm:$0xff] }
 0x866   : > { %11609 = vmatprep.subr.mxu0 %v11421_v63  ;;  %11648 = vmatprep.subr.mxu1 %v11231_v2  ;;  %v11370_v54 = vld [vmem:[%s18349_s9 + $0x510] sm:$0xff]  ;;  %v11367_v63 = vld [vmem:[%s18349_s9 + $0x4f8] sm:$0xff] }
 0x867   : > { %11610 = vmatpush2.msra.mxu0 %v11420_v47  ;;  %11649 = vmatpush1.msra.mxu1 %v11230_v49  ;;  %v11302_v2 = vld [vmem:[%s18349_s9 + $0x2f0] sm:$0xff]  ;;  %v11299_v49 = vld [vmem:[%s18349_s9 + $0x2d8] sm:$0xff] }
 0x868   : > { %11611 = vmatprep.subr.mxu0 %v11417_v51  ;;  %11650 = vmatprep.subr.mxu1 %v11227_v53  ;;  %v11366_v47 = vld [vmem:[%s18349_s9 + $0x4f0] sm:$0xff]  ;;  %v11363_v51 = vld [vmem:[%s18349_s9 + $0x4d8] sm:$0xff] }
 0x869   : > { %11612 = vmatpush2.msra.mxu0 %v11416_v29  ;;  %11651 = vmatpush1.msra.mxu1 %v11226_v33  ;;  %v11298_v53 = vld [vmem:[%s18349_s9 + $0x2d0] sm:$0xff]  ;;  %v11295_v33 = vld [vmem:[%s18349_s9 + $0x2b8] sm:$0xff] }
 0x86a   : > { %11613 = vmatprep.subr.mxu0 %v11413_v55  ;;  %11652 = vmatprep.subr.mxu1 %v11223_v56  ;;  %v11362_v29 = vld [vmem:[%s18349_s9 + $0x4d0] sm:$0xff]  ;;  %v11359_v55 = vld [vmem:[%s18349_s9 + $0x4b8] sm:$0xff] }
 0x86b   : > { %11614 = vmatpush2.msra.mxu0 %v11412_v57  ;;  %11653 = vmatpush1.msra.mxu1 %v11222_v58  ;;  %v11294_v56 = vld [vmem:[%s18349_s9 + $0x2b0] sm:$0xff]  ;;  %v11291_v58 = vld [vmem:[%s18349_s9 + $0x298] sm:$0xff] }
 0x86c   : > { %11615 = vmatprep.subr.mxu0 %v11409_v59  ;;  %11654 = vmatprep.subr.mxu1 %v11219_v42  ;;  %v11358_v57 = vld [vmem:[%s18349_s9 + $0x4b0] sm:$0xff]  ;;  %v11355_v59 = vld [vmem:[%s18349_s9 + $0x498] sm:$0xff] }
 0x86d   : > { %11616 = vmatpush2.msra.mxu0 %v11408_v60  ;;  %11655 = vmatpush1.msra.mxu1 %v11218_v46  ;;  %v11290_v42 = vld [vmem:[%s18349_s9 + $0x290] sm:$0xff]  ;;  %v11287_v46 = vld [vmem:[%s18349_s9 + $0x278] sm:$0xff] }
 0x86e   : > { %11617 = vmatprep.subr.mxu0 %v11405_v61  ;;  %11656 = vmatprep.subr.mxu1 %v11215_v62  ;;  %v11354_v60 = vld [vmem:[%s18349_s9 + $0x490] sm:$0xff]  ;;  %v11351_v61 = vld [vmem:[%s18349_s9 + $0x478] sm:$0xff] }
 0x86f   : > { %11618 = vmatpush2.msra.mxu0 %v11404_v0  ;;  %11657 = vmatpush1.msra.mxu1 %v11214_v20  ;;  %v11286_v62 = vld [vmem:[%s18349_s9 + $0x270] sm:$0xff]  ;;  %v11283_v20 = vld [vmem:[%s18349_s9 + $0x258] sm:$0xff] }
 0x870   : > { %11619 = vmatprep.subr.mxu0 %v11401_v3  ;;  %11658 = vmatprep.subr.mxu1 %v11211_v1  ;;  %v11350_v0 = vld [vmem:[%s18349_s9 + $0x470] sm:$0xff]  ;;  %v11347_v3 = vld [vmem:[%s18349_s9 + $0x458] sm:$0xff] }
 0x871   : > { %11620 = vmatpush2.msra.mxu0 %v11400_v5  ;;  %11659 = vmatpush1.msra.mxu1 %v11210_v7  ;;  %v11282_v1 = vld [vmem:[%s18349_s9 + $0x250] sm:$0xff]  ;;  %v11279_v7 = vld [vmem:[%s18349_s9 + $0x238] sm:$0xff] }
 0x872   : > { %11622 = vmatmul.mubr.f32.vlgmr.msra.gmra.mxu0 %v17264_v45  ;;  %11660 = vmatprep.subr.mxu1 %v11335_v8  ;;  %v11346_v5 = vld [vmem:[%s18349_s9 + $0x450] sm:$0xff]  ;;  %v11343_v8 = vld [vmem:[%s18349_s9 + $0x438] sm:$0xff] }
 0x873   : > { %11699 = vmatprep.subr.mxu0 %v11399_v9  ;;  %11661 = vmatpush2.msra.mxu1 %v11334_v10  ;;  %v11278_v9 = vld [vmem:[%s18349_s9 + $0x230] sm:$0xff] }
 0x874   : > { %11700 = vmatpush1.msra.mxu0 %v11398_v11  ;;  %11763 = vmatprep.mubr.f32.mxu0 %v17258_v41  ;;  %v11323_v41 = vld [vmem:[%s18349_s9 + $0x398] sm:$0xff]  ;;  %v11342_v10 = vld [vmem:[%s18349_s9 + $0x430] sm:$0xff] }
 0x875   : > { %11662 = vmatprep.subr.mxu1 %v11331_v39  ;;  %11701 = vmatprep.subr.mxu0 %v11395_v12  ;;  %v11275_v11 = vld [vmem:[%s18349_s9 + $0x218] sm:$0xff]  ;;  %v11274_v12 = vld [vmem:[%s18349_s9 + $0x210] sm:$0xff] }
 0x876   : > { %11663 = vmatpush2.msra.mxu1 %v11330_v13  ;;  %11702 = vmatpush1.msra.mxu0 %v11394_v14  ;;  %v11339_v39 = vld [vmem:[%s18349_s9 + $0x418] sm:$0xff]  ;;  %v11338_v13 = vld [vmem:[%s18349_s9 + $0x410] sm:$0xff] }
 0x877   : > { %11664 = vmatprep.subr.mxu1 %v11327_v15  ;;  %11703 = vmatprep.subr.mxu0 %v11391_v16  ;;  %v11463_v14 = vld [vmem:[%s18349_s9 + $0x7f8] sm:$0xff]  ;;  %v11462_v15 = vld [vmem:[%s18349_s9 + $0x7f0] sm:$0xff] }
 0x878   : > { %11665 = vmatpush2.msra.mxu1 %v11326_v17  ;;  %11704 = vmatpush1.msra.mxu0 %v11390_v18  ;;  %v11459_v16 = vld [vmem:[%s18349_s9 + $0x7d8] sm:$0xff]  ;;  %v11458_v17 = vld [vmem:[%s18349_s9 + $0x7d0] sm:$0xff] }
 0x879   : > { %11666 = vmatprep.subr.mxu1 %v11323_v41  ;;  %11705 = vmatprep.subr.mxu0 %v11387_v19  ;;  %v11455_v18 = vld [vmem:[%s18349_s9 + $0x7b8] sm:$0xff]  ;;  %v11454_v41 = vld [vmem:[%s18349_s9 + $0x7b0] sm:$0xff] }
 0x87a   : > { %11667 = vmatpush2.msra.mxu1 %v11322_v21  ;;  %11706 = vmatpush1.msra.mxu0 %v11386_v22  ;;  %v11450_v19 = vld [vmem:[%s18349_s9 + $0x790] sm:$0xff]  ;;  %v11447_v21 = vld [vmem:[%s18349_s9 + $0x778] sm:$0xff] }
 0x87b   : > { %11668 = vmatprep.subr.mxu1 %v11319_v23  ;;  %11707 = vmatprep.subr.mxu0 %v11383_v25  ;;  %v11446_v22 = vld [vmem:[%s18349_s9 + $0x770] sm:$0xff]  ;;  %v11443_v23 = vld [vmem:[%s18349_s9 + $0x758] sm:$0xff] }
 0x87c   : > { %11669 = vmatpush2.msra.mxu1 %v11318_v24  ;;  %11708 = vmatpush1.msra.mxu0 %v11382_v26  ;;  %v11442_v25 = vld [vmem:[%s18349_s9 + $0x750] sm:$0xff]  ;;  %v11439_v24 = vld [vmem:[%s18349_s9 + $0x738] sm:$0xff] }
 0x87d   : > { %11670 = vmatprep.subr.mxu1 %v11315_v27  ;;  %11709 = vmatprep.subr.mxu0 %v11379_v28  ;;  %v11438_v26 = vld [vmem:[%s18349_s9 + $0x730] sm:$0xff]  ;;  %v11435_v27 = vld [vmem:[%s18349_s9 + $0x718] sm:$0xff] }
 0x87e   : > { %11671 = vmatpush2.msra.mxu1 %v11314_v30  ;;  %11710 = vmatpush1.msra.mxu0 %v11378_v31  ;;  %v11434_v28 = vld [vmem:[%s18349_s9 + $0x710] sm:$0xff]  ;;  %v11431_v30 = vld [vmem:[%s18349_s9 + $0x6f8] sm:$0xff] }
 0x87f   : > { %11672 = vmatprep.subr.mxu1 %v11311_v32  ;;  %11711 = vmatprep.subr.mxu0 %v11375_v35  ;;  %v11430_v31 = vld [vmem:[%s18349_s9 + $0x6f0] sm:$0xff]  ;;  %v11427_v32 = vld [vmem:[%s18349_s9 + $0x6d8] sm:$0xff] }
 0x880   : > { %11673 = vmatpush2.msra.mxu1 %v11310_v37  ;;  %11712 = vmatpush1.msra.mxu0 %v11374_v40  ;;  %v11426_v35 = vld [vmem:[%s18349_s9 + $0x6d0] sm:$0xff]  ;;  %v11423_v37 = vld [vmem:[%s18349_s9 + $0x6b8] sm:$0xff] }
 0x881   : > { %11674 = vmatprep.subr.mxu1 %v11307_v43  ;;  %11713 = vmatprep.subr.mxu0 %v11371_v6  ;;  %v11422_v40 = vld [vmem:[%s18349_s9 + $0x6b0] sm:$0xff]  ;;  %v11419_v43 = vld [vmem:[%s18349_s9 + $0x698] sm:$0xff] }
 0x882   : > { %11675 = vmatpush2.msra.mxu1 %v11306_v52  ;;  %11714 = vmatpush1.msra.mxu0 %v11370_v54  ;;  %v11418_v6 = vld [vmem:[%s18349_s9 + $0x690] sm:$0xff]  ;;  %v11415_v52 = vld [vmem:[%s18349_s9 + $0x678] sm:$0xff] }
 0x883   : > { %11676 = vmatprep.subr.mxu1 %v11303_v4  ;;  %11715 = vmatprep.subr.mxu0 %v11367_v63  ;;  %v11414_v54 = vld [vmem:[%s18349_s9 + $0x670] sm:$0xff]  ;;  %v11411_v4 = vld [vmem:[%s18349_s9 + $0x658] sm:$0xff] }
 0x884   : > { %11677 = vmatpush2.msra.mxu1 %v11302_v2  ;;  %11716 = vmatpush1.msra.mxu0 %v11366_v47  ;;  %v11410_v63 = vld [vmem:[%s18349_s9 + $0x650] sm:$0xff]  ;;  %v11407_v2 = vld [vmem:[%s18349_s9 + $0x638] sm:$0xff] }
 0x885   : > { %11678 = vmatprep.subr.mxu1 %v11299_v49  ;;  %11717 = vmatprep.subr.mxu0 %v11363_v51  ;;  %v11406_v47 = vld [vmem:[%s18349_s9 + $0x630] sm:$0xff]  ;;  %v11403_v49 = vld [vmem:[%s18349_s9 + $0x618] sm:$0xff] }
 0x886   : > { %11679 = vmatpush2.msra.mxu1 %v11298_v53  ;;  %11718 = vmatpush1.msra.mxu0 %v11362_v29  ;;  %v11402_v51 = vld [vmem:[%s18349_s9 + $0x610] sm:$0xff] }
 0x887   : > { %11680 = vmatprep.subr.mxu1 %v11295_v33  ;;  %11719 = vmatprep.subr.mxu0 %v11359_v55 }
 0x888   : > { %11681 = vmatpush2.msra.mxu1 %v11294_v56  ;;  %11720 = vmatpush1.msra.mxu0 %v11358_v57 }
 0x889   : > { %11682 = vmatprep.subr.mxu1 %v11291_v58  ;;  %11721 = vmatprep.subr.mxu0 %v11355_v59 }
 0x88a   : > { %11683 = vmatpush2.msra.mxu1 %v11290_v42  ;;  %11722 = vmatpush1.msra.mxu0 %v11354_v60  ;;  %v12730_v42 = vld [vmem:[%s18353_s13] ss:$0 sm:$0xff] }
 0x88b   : > { %11684 = vmatprep.subr.mxu1 %v11287_v46  ;;  %11723 = vmatprep.subr.mxu0 %v11351_v61 }
 0x88c   : > { %11685 = vmatpush2.msra.mxu1 %v11286_v62  ;;  %11724 = vmatpush1.msra.mxu0 %v11350_v0 }
 0x88d   : > { %11686 = vmatprep.subr.mxu1 %v11283_v20  ;;  %11725 = vmatprep.subr.mxu0 %v11347_v3 }
 0x88e   : > { %11687 = vmatpush2.msra.mxu1 %v11282_v1  ;;  %11726 = vmatpush1.msra.mxu0 %v11346_v5  ;;  %v14850_v5 = vmov 1  }
 0x88f   : > { %11688 = vmatprep.subr.mxu1 %v11279_v7  ;;  %11727 = vmatprep.subr.mxu0 %v11343_v8  ;;  %v14851_v7 = vmov 0  }
 0x890   : > { %11689 = vmatpush2.msra.mxu1 %v11278_v9  ;;  %11728 = vmatpush1.msra.mxu0 %v11342_v10 }
 0x891   : > { %11690 = vmatprep.subr.mxu1 %v11275_v11  ;;  %11729 = vmatprep.subr.mxu0 %v11339_v39 }
 0x892   : > { %11691 = vmatpush2.msra.mxu1 %v11274_v12  ;;  %11730 = vmatpush1.msra.mxu0 %v11338_v13 }
 0x893   : > { %11693 = vmatmul.mubr.f32.vlgmr.msra.gmra.mxu1 %v17261_v44  ;;  %11731 = vmatprep.subr.mxu0 %v11463_v14  ;;  %v11451_v44 = vld [vmem:[%s18349_s9 + $0x798] sm:$0xff] }
 0x894   : > { %11732 = vmatpush2.msra.mxu0 %v11462_v15  ;;  %14792 = vset.pattern.permute.xlu1 %v14850_v5 }
 0x895   : > { %11733 = vmatprep.subr.mxu0 %v11459_v16  ;;  %14791 = vset.pattern.permute.xlu0 %v14851_v7 }
 0x896   : > { %11734 = vmatpush2.msra.mxu0 %v11458_v17  ;;  %v11464_v17 = vld [vmem:[%s18350_s10] sm:$0xf] }
 0x897   : > { %11735 = vmatprep.subr.mxu0 %v11455_v18 }
 0x898   : > { %11736 = vmatpush2.msra.mxu0 %v11454_v41 }
 0x899   : > { %11737 = vmatprep.subr.mxu0 %v11451_v44  ;;  %v11044_v44 = vld [vmem:[%s18348_s8] sm:$0xf] }
 0x89a   : > { %11738 = vmatpush2.msra.mxu0 %v11450_v19  ;;  %v11469_v19 = vrot.slane %v11464_v17, %v17015_v38 }
 0x89b   : > { %11739 = vmatprep.subr.mxu0 %v11447_v21 }
 0x89c   : > { %11740 = vmatpush2.msra.mxu0 %v11446_v22  ;;  %v11473_v22 = vrot.slane %v11464_v17, %v17012_v36 }
 0x89d   : > { %11741 = vmatprep.subr.mxu0 %v11443_v23  ;;  %v11477_v23 = vrot.slane %v11464_v17, %v17023_v48 }
 0x89e   : > { %11742 = vmatpush2.msra.mxu0 %v11442_v25  ;;  %v11481_v25 = vrot.slane %v11464_v17, %v17026_v50 }
 0x89f   : > { %11743 = vmatprep.subr.mxu0 %v11439_v24 }
 0x8a0   : > { %11744 = vmatpush2.msra.mxu0 %v11438_v26  ;;  %v11049_v26 = vrot.slane %v11044_v44, %v17015_v38 }
 0x8a1   : > { %11745 = vmatprep.subr.mxu0 %v11435_v27  ;;  %v14852_v27 = vmov 1983009808  }
 0x8a2   : > { %11746 = vmatpush2.msra.mxu0 %v11434_v28  ;;  %v11798_v28 = vunpack.c.l.s4 %v14852_v27 }
 0x8a3   : > { %11747 = vmatprep.subr.mxu0 %v11431_v30  ;;  %v11053_v30 = vrot.slane %v11044_v44, %v17012_v36 }
 0x8a4   : > { %11748 = vmatpush2.msra.mxu0 %v11430_v31  ;;  %v11057_v31 = vrot.slane %v11044_v44, %v17023_v48 }
 0x8a5   : > { %11749 = vmatprep.subr.mxu0 %v11427_v32  ;;  %v11061_v32 = vrot.slane %v11044_v44, %v17026_v50 }
 0x8a6   : > { %11750 = vmatpush2.msra.mxu0 %v11426_v35 }
 0x8a7   : > { %11751 = vmatprep.subr.mxu0 %v11423_v37 }
 0x8a8   : > { %11752 = vmatpush2.msra.mxu0 %v11422_v40 }
 0x8a9   : > { %11753 = vmatprep.subr.mxu0 %v11419_v43 }
 0x8aa   : > { %11754 = vmatpush2.msra.mxu0 %v11418_v6 }
 0x8ab   : > { %11755 = vmatprep.subr.mxu0 %v11415_v52 }
 0x8ac   : > { %11756 = vmatpush2.msra.mxu0 %v11414_v54 }
 0x8ad   : > { %11757 = vmatprep.subr.mxu0 %v11411_v4  ;;  %v13867_v53 = vpop.f32.mrf.mxu0  ;;  %v13902_v29 = vpop.f32.mrf.mxu1 }
 0x8ae   : > { %11758 = vmatpush2.msra.mxu0 %v11410_v63 }
 0x8af   : > { %11759 = vmatprep.subr.mxu0 %v11407_v2  ;;  %v13868_v33 = vpop.f32.mrf.mxu0  ;;  %v13903_v55 = vpop.f32.mrf.mxu1  ;;  %v11799_v2 = vunpack.c.0.s8 %v11798_v28 }
 0x8b0   : > { %11760 = vmatpush2.msra.mxu0 %v11406_v47  ;;  %v13869_v56 = vadd.f32 %v13868_v33, %v13867_v53  ;;  %v13904_v57 = vadd.f32 %v13903_v55, %v13902_v29 }
 0x8b1   : > { %11761 = vmatprep.subr.mxu0 %v11403_v49 }
 0x8b2   : > { %11762 = vmatpush2.msra.mxu0 %v11402_v51  ;;  %v10887_v58 = vadd.f32 %v13904_v57, %v13869_v56 }
 0x8b3   : > { %11764 = vmatmul.mubr.f32.vlgmr.msra.gmra.mxu0 %v17264_v45 }
 0x8ce   : > { %v10956_v59 = vpop.f32.mrf.mxu0  ;;  %v11132_v11 = vpop.f32.mrf.mxu1 }
 0x8cf   : > { %v10957_v60 = vadd.f32 %v10956_v59, %v10887_v58  ;;  %v11133_v47 = vadd.f32 %v11132_v11, %v11049_v26  ;;  %v11802_v59 = vsub.s32 %v11799_v2, %v14984_v34 }
 0x8d0   : > { %v13956_v46 = vpop.f32.mrf.mxu0  ;;  %v11134_v12 = vpop.f32.mrf.mxu1 }
 0x8d1   : > { %v10967_v61 = vadd.f32 %v12730_v42, %v10957_v60  ;;  %v11135_v38 = vadd.f32 %v11134_v12, %v11053_v30 }
 0x8d3   : > { %v10969_v62 = vsel %vm10968_vm11, %v10967_v61, -inf }
 0x8d4   : > { %10970 = vmax.xlane.f32.xlu0 %v10969_v62 }
 0x8f0   : > { %v11203_v39 = vpop.f32.mrf.mxu0 }
 0x8f1   : > { %v11204_v49 = vadd.f32 %v11203_v39, %v11057_v31 }
 0x8f2   : > { %v11205_v13 = vpop.f32.mrf.mxu0 }
 0x8f3   : > { %v11206_v51 = vadd.f32 %v11205_v13, %v11061_v32 }
 0x911   : > { %v11552_v14 = vpop.f32.mrf.mxu1 }
 0x912   : > { %v11553_v35 = vadd.f32 %v11552_v14, %v11469_v19 }
 0x913   : > { %v11554_v16 = vpop.f32.mrf.mxu1 }
 0x914   : > { %v11555_v40 = vadd.f32 %v11554_v16, %v11473_v22 }
 0x932   : > { %v11623_v15 = vpop.f32.mrf.mxu0 }
 0x933   : > { %v11624_v52 = vadd.f32 %v11623_v15, %v11553_v35 }
 0x934   : > { %v11625_v18 = vpop.f32.mrf.mxu0 }
 0x935   : > { %v11626_v54 = vadd.f32 %v11625_v18, %v11555_v40 }
 0x953   : > { %v11694_v41 = vpop.f32.mrf.mxu1 }
 0x954   : > { %v11695_v43 = vadd.f32 %v11694_v41, %v11477_v23 }
 0x955   : > { %v11696_v24 = vpop.f32.mrf.mxu1 }
 0x956   : > { %v11697_v6 = vadd.f32 %v11696_v24, %v11481_v25 }
 0x95d   : > { %v10971_v0 = vpop.xlane.xlu0 %10970 }
 0x95e   : > { %v10972_v45 = vsub.f32 %v10967_v61, %v10971_v0 }
 0x960   : > { %v10973_v20 = vmul.f32 1.442695, %v10972_v45 }
 0x962   : > { %14806 = vpow2.f32 %v10973_v20 }
 0x96f   : > { %v14807_v3 = vpop.eup %14806 }
 0x970   : > { %v10975_v1 = vsel %vm10968_vm11, %v14807_v3, 0.0 }
 0x971   : > { %10976 = vadd.xlane.f32.xlu1 %v10975_v1 }
 0x973   : > { %v11765_v21 = vpop.f32.mrf.mxu0 }
 0x974   : > { %v11766_v4 = vadd.f32 %v11765_v21, %v11695_v43 }
 0x975   : > { %v11767_v37 = vpop.f32.mrf.mxu0 }
 0x976   : > { %v11768_v63 = vadd.f32 %v11767_v37, %v11697_v6 }
 0x9fa   : > { %v10977_v8 = vpop.xlane.xlu1 %10976 }
 0x9fb   : > { %14808 = vrcp.f32 %v10977_v8 }
 0xa08   : > { %v14809_v9 = vpop.eup %14808 }
 0xa09   : > { %v10979_v10 = vmul.f32 %v14809_v9, %v14807_v3 }
 0xa0b   : > { %11780 = vperm.xlu1 %14792, %v10979_v10   ;;  %11772 = vperm.xlu0 %14791, %v10979_v10  }
 0xa0f   : > { %14793 = vset.pattern.permute.xlu0 %v14850_v5 }
 0xa86   : > { %v11781_v53 = vpop.permute.xlu1 %11780  ;;  %v11773_v36 = vpop.permute.xlu0 %11772 }
 0xa87   : > { %v11783_v29 = vmul.f32 %v11781_v53, %v11624_v52  ;;  %v11784_v48 = vmul.f32 %v11781_v53, %v11626_v54  ;;  %v11785_v33 = vmul.f32 %v11781_v53, %v11766_v4  ;;  %v11786_v50 = vmul.f32 %v11781_v53, %v11768_v63 }
 0xa88   : > { %v11775_v55 = vmul.f32 %v11773_v36, %v11133_v47  ;;  %v11776_v56 = vmul.f32 %v11773_v36, %v11135_v38  ;;  %v11777_v57 = vmul.f32 %v11773_v36, %v11204_v49  ;;  %v11778_v58 = vmul.f32 %v11773_v36, %v11206_v51 }
 0xa8a   : > { %v11787_v42 = vadd.f32 %v11783_v29, %v11775_v55  ;;  %v11788_v60 = vadd.f32 %v11784_v48, %v11776_v56  ;;  %v11789_v46 = vadd.f32 %v11785_v33, %v11777_v57  ;;  %v11790_v61 = vadd.f32 %v11786_v50, %v11778_v58 }
 0xa8c   : > { %v11795_v62 = vcombine.low %v11787_v42, %v11788_v60  ;;  %v11796_v0 = vcombine.low %v11789_v46, %v11790_v61 }
 0xa8e   : > { %v11803_v45 = vrot.slane %v11795_v62, %v11802_v59  ;;  %v11810_v20 = vrot.slane %v11796_v0, %v11802_v59 }
 0xa90   : > { %v11811_v3 = vcombine.low %v11803_v45, %v11810_v20 }
 0xa92   : > { %11813 = vst [vmem:[#allocation3] sm:$0xff] %v11811_v3 }
 0xa93 PF: > { %p13961_p7 = scmp.eq.s32.totalorder %s14935_s30, 2  ;;  %s14853_s24 = smov [#allocation3]  }
 0xa94   : > { %s11821_s25 = sshll.u32 %s14853_s24, 4  ;;  %s11822_s25 = int_to_ptr.vmem [resolvable:$true] %s11821_s25 }
 0xa95   : > { %s14810_s26 = scalar_lea.vmem %s11822_s25, 128  ;;  %p14817_p11 = scmp.lt.s32.totalorder %s11822_s25, %s11822_s25 }
 0xa96   : > { %p14811_p8 = scmp.ne.s32.totalorder %s11822_s25, %s14810_s26  ;;  %p14818_p12 = scmp.lt.s32.totalorder %s14810_s26, %s14810_s26 }
 0xa98   : > { %p14812_p9 = pnand %p14811_p8, %p13961_p7  ;;  %p14819_p13 = por %p14818_p12, %p14817_p11 }
 0xa9a   : > { %p14813_p10 = pneg %p14812_p9 }
 0xa9c   : > { %p14820_p0 = pnand %p14819_p13, %p14813_p10 }
 0xa9e   : > { %14823 = shalt.err (!%p14820_p0)
}
 0xa9f   : > { %13958 = dma.vmem_to_hbm [thread:$0]  (%p13961_p7), %s11822_s25, 128, %s18354_s14, [#allocation4]  }
 0xaa0   : > { %14839 = dma.done.wait (%p13961_p7), [#allocation4], 128  }
 0xaa1   : > { %14841 = vsyncadd (%p13961_p7), [#allocation4], 4294967168 }
 0xaa2 PF: > { %s25_s29 = sadd.s32 1, %s14844_s29  }
 0xaa3   : > { %p22_p1 = scmp.ge.s32.totalorder %s25_s29, 5  }
 0xaa5   :  { %24 = sbr.rel (!%p22_p1) target bundleno = 1 (0x1), region = 115 }
 0xaaa   :  { %11834 = vsyncpa [#allocation4], 1 }
 0xaab   :  { %11836 = vsyncpa [#allocation4 + $0x1], 1 }

</bundles_post_ra>
